<compile_context>
chip_gen: v7x
topology: tpu7x:2x2x1
jax: 0.10.0
libtpu: 0.0.40
codegen_flags: <defaults>
</compile_context>

<pallas_src>
import functools

import jax
import jax.numpy as jnp
from jax.experimental import pallas as pl
from jax.experimental.pallas import tpu as pltpu


# ----------------------------------------------------------------------------
# Architecture-aware scoped-VMEM limit (v7x: 64 MiB/TC, v5e/v6e: 128 MiB).
# ----------------------------------------------------------------------------
def _vmem_limit_bytes():
    try:
        cap = int(pltpu.get_tpu_info().vmem_capacity_bytes)
    except Exception:
        cap = 64 << 20  # conservative: v7x per-TensorCore VMEM
    return min((cap * 3) // 4, 96 << 20)


_VMEM_LIMIT = _vmem_limit_bytes()


# ----------------------------------------------------------------------------
# Kernels (bf16 MXU matmuls, f32 stats/epilogue)
# ----------------------------------------------------------------------------
def _mm_lrelu_kernel(x_ref, w_ref, o_ref, *, slope):
    acc = jnp.dot(x_ref[...], w_ref[...], preferred_element_type=jnp.float32)
    acc = jnp.where(acc >= 0.0, acc, slope * acc)
    o_ref[...] = acc.astype(o_ref.dtype)


def _mm_bn_lrelu_kernel(x_ref, w_ref, g_ref, b_ref, o_ref, *, eps, slope, inv_m):
    # Matmul + BatchNorm (training-mode batch stats, biased var) + LeakyReLU.
    # Stats are per output channel (column); the grid runs over N only, so
    # every invocation sees ALL M rows and the one-pass stats are exact.
    acc = jnp.dot(x_ref[...], w_ref[...], preferred_element_type=jnp.float32)
    mean = jnp.sum(acc, axis=0, keepdims=True) * inv_m
    mean_sq = jnp.sum(acc * acc, axis=0, keepdims=True) * inv_m
    var = jnp.maximum(mean_sq - mean * mean, 0.0)          # clamp: no NaN rsqrt
    scale = g_ref[...] * jax.lax.rsqrt(var + eps)           # fold BN: 1 mul ...
    shift = b_ref[...] - mean * scale                       # ... + 1 fma pass
    acc = acc * scale + shift
    acc = jnp.where(acc >= 0.0, acc, slope * acc)
    o_ref[...] = acc.astype(o_ref.dtype)


def _fc_sigmoid_kernel(x_ref, wt_ref, b_ref, o_ref):
    # N=1 output: multiply + cross-lane reduce beats a degenerate MXU matmul
    # and keeps the weight lane-compact as (1, K).
    prod = x_ref[...].astype(jnp.float32) * wt_ref[...].astype(jnp.float32)
    acc = jnp.sum(prod, axis=1, keepdims=True) + b_ref[...]
    o_ref[...] = 1.0 / (1.0 + jnp.exp(-acc))


# ----------------------------------------------------------------------------
# Wrappers
# ----------------------------------------------------------------------------
def _pick_m_tile(M):
    for t in (2048, 1024, 512, 256):
        if M % t == 0:
            return t
    return M


def matmul_lrelu(x, w, *, slope=0.2):
    """(M,K)@(K,N) + LeakyReLU, M-parallel grid, bf16 in/out, K unpadded."""
    x = x.astype(jnp.bfloat16)
    w = w.astype(jnp.bfloat16)
    M, K = x.shape
    _, N = w.shape
    tm = _pick_m_tile(M)
    return pl.pallas_call(
        functools.partial(_mm_lrelu_kernel, slope=slope),
        out_shape=jax.ShapeDtypeStruct((M, N), jnp.bfloat16),
        grid_spec=pltpu.PrefetchScalarGridSpec(
            num_scalar_prefetch=0,
            grid=(M // tm,),
            in_specs=[pl.BlockSpec((tm, K), lambda i: (i, 0)),
                      pl.BlockSpec((K, N), lambda i: (0, 0))],
            out_specs=pl.BlockSpec((tm, N), lambda i: (i, 0))),
        compiler_params=pltpu.CompilerParams(
            dimension_semantics=("parallel",),
            vmem_limit_bytes=_VMEM_LIMIT),
    )(x, w)


def matmul_bn_lrelu(x, w, gamma, beta, *, eps=1e-5, slope=0.2, tn=128):
    """(M,K)@(K,N) + BatchNorm(batch stats) + LeakyReLU, N-parallel grid.

    The (M,K) activation block is identical for every grid step, so it is
    single-buffered (pl.Buffered(1)) — it is the dominant VMEM consumer.
    """
    x = x.astype(jnp.bfloat16)
    w = w.astype(jnp.bfloat16)
    M, K = x.shape
    _, N = w.shape
    tn = min(tn, N)
    gamma = gamma.reshape(1, N).astype(jnp.float32)
    beta = beta.reshape(1, N).astype(jnp.float32)
    kernel = functools.partial(_mm_bn_lrelu_kernel, eps=eps, slope=slope,
                               inv_m=1.0 / M)
    return pl.pallas_call(
        kernel,
        out_shape=jax.ShapeDtypeStruct((M, N), jnp.bfloat16),
        grid_spec=pltpu.PrefetchScalarGridSpec(
            num_scalar_prefetch=0,
            grid=(N // tn,),
            in_specs=[pl.BlockSpec((M, K), lambda j: (0, 0),
                                   pipeline_mode=pl.Buffered(1)),
                      pl.BlockSpec((K, tn), lambda j: (0, j)),
                      pl.BlockSpec((1, tn), lambda j: (0, j)),
                      pl.BlockSpec((1, tn), lambda j: (0, j))],
            out_specs=pl.BlockSpec((M, tn), lambda j: (0, j))),
        compiler_params=pltpu.CompilerParams(
            dimension_semantics=("parallel",),
            vmem_limit_bytes=_VMEM_LIMIT),
    )(x, w, gamma, beta)


def fc_sigmoid(x, w_t, bias):
    """Final Linear(8192->1) + Sigmoid; weight kept lane-compact as (1, K)."""
    x = x.astype(jnp.bfloat16)
    w_t = w_t.astype(jnp.bfloat16)
    M, K = x.shape
    bias = bias.reshape(1, 1).astype(jnp.float32)
    vmem = pl.BlockSpec(memory_space=pltpu.MemorySpace.VMEM)
    return pl.pallas_call(
        _fc_sigmoid_kernel,
        out_shape=jax.ShapeDtypeStruct((M, 1), jnp.float32),
        in_specs=[vmem, vmem, vmem],
        out_specs=vmem,
        compiler_params=pltpu.CompilerParams(vmem_limit_bytes=_VMEM_LIMIT),
    )(x, w_t, bias)


# ----------------------------------------------------------------------------
# NHWC im2col glue for Conv2d(k=4, s=2, p=1).
# Column index = (i*k + j)*Cin + c  (weights are pre-permuted to match).
# ----------------------------------------------------------------------------
def im2col_nhwc(x, k=4, s=2, p=1):
    B, H, W, C = x.shape
    xp = jnp.pad(x, ((0, 0), (p, p), (p, p), (0, 0)))
    Ho = (H + 2 * p - k) // s + 1
    Wo = (W + 2 * p - k) // s + 1
    cols = [xp[:, i:i + s * Ho:s, j:j + s * Wo:s, :]
            for i in range(k) for j in range(k)]          # each (B, Ho, Wo, C)
    patches = jnp.stack(cols, axis=3)                     # (B, Ho, Wo, k*k, C)
    return patches.reshape(B * Ho * Wo, k * k * C), Ho, Wo


# ----------------------------------------------------------------------------
# Parameters
# ----------------------------------------------------------------------------
def init_raw_params(key):
    ks = jax.random.split(key, 6)
    return {
        "emb":   jax.random.normal(ks[0], (10, 10), jnp.float32),
        "w_lab": jax.random.normal(ks[1], (10, 1024), jnp.float32) * 0.05,
        "b_lab": jnp.zeros((1024,), jnp.float32),
        "w1":    jax.random.normal(ks[2], (128, 2, 4, 4), jnp.float32) * 0.05,
        "w2":    jax.random.normal(ks[3], (256, 128, 4, 4), jnp.float32) * 0.02,
        "w3":    jax.random.normal(ks[4], (512, 256, 4, 4), jnp.float32) * 0.02,
        "g2":    jnp.ones((256,), jnp.float32),
        "be2":   jnp.zeros((256,), jnp.float32),
        "g3":    jnp.ones((512,), jnp.float32),
        "be3":   jnp.zeros((512,), jnp.float32),
        "w_fc":  jax.random.normal(ks[5], (8192, 1), jnp.float32) * 0.01,
        "b_fc":  jnp.zeros((1,), jnp.float32),
    }


def prepare_params(raw):
    def conv_w(w_oihw):
        # OIHW -> (kh, kw, Cin, Cout) -> (kh*kw*Cin, Cout): matches im2col_nhwc
        cout, cin, kh, kw = w_oihw.shape
        return jnp.transpose(w_oihw, (2, 3, 1, 0)).reshape(
            kh * kw * cin, cout).astype(jnp.bfloat16)

    # FC weight rows are in PyTorch's NCHW flatten order (c*16 + h*4 + w);
    # permute to our NHWC flatten order ((h*4 + w)*512 + c), store transposed
    # and lane-compact as (1, 8192) bf16 (no 128-column padding).
    w_fc = raw["w_fc"].reshape(512, 4, 4, 1).transpose(1, 2, 0, 3)
    w_fc_t = w_fc.reshape(1, 512 * 16).astype(jnp.bfloat16)

    # Label branch is data-independent of x: precompute Embedding @ Linear.
    label_table = (raw["emb"].astype(jnp.float32) @ raw["w_lab"].astype(jnp.float32)
                   + raw["b_lab"])                          # (10, 1024)

    return {
        "label_table": label_table,
        "w1": conv_w(raw["w1"]),                            # (32, 128), unpadded
        "w2": conv_w(raw["w2"]),                            # (2048, 256)
        "w3": conv_w(raw["w3"]),                            # (4096, 512)
        "g2": raw["g2"], "be2": raw["be2"],
        "g3": raw["g3"], "be3": raw["be3"],
        "w_fc_t": w_fc_t, "b_fc": raw["b_fc"].astype(jnp.float32),
    }


# ----------------------------------------------------------------------------
# Full Discriminator forward (NHWC internally; NCHW only at the boundary).
# ----------------------------------------------------------------------------
def discriminator_forward(params, x, c):
    B = x.shape[0]
    x = jnp.transpose(x, (0, 2, 3, 1))                       # NCHW -> NHWC
    y = jnp.take(params["label_table"], c, axis=0)           # (B, 1024)
    y = y.reshape(B, 32, 32, 1)                              # label map
    h = jnp.concatenate([x, y], axis=-1).astype(jnp.bfloat16)  # (B,32,32,2) bf16

    # conv1: 2 -> 128, LeakyReLU (no bias, no BN); K = 32, unpadded.
    p, ho, wo = im2col_nhwc(h)                               # (B*256, 32)
    h = matmul_lrelu(p, params["w1"]).reshape(B, ho, wo, 128)

    # conv2: 128 -> 256, BN + LeakyReLU
    p, ho, wo = im2col_nhwc(h)                               # (B*64, 2048)
    h = matmul_bn_lrelu(p, params["w2"], params["g2"], params["be2"], tn=128)
    h = h.reshape(B, ho, wo, 256)

    # conv3: 256 -> 512, BN + LeakyReLU (tn=256 matches 256-wide MXUs)
    p, ho, wo = im2col_nhwc(h)                               # (B*16, 4096)
    h = matmul_bn_lrelu(p, params["w3"], params["g3"], params["be3"], tn=256)
    h = h.reshape(B, ho, wo, 512)

    # FC + Sigmoid (weight pre-permuted to NHWC flatten order, stored (1,8192)).
    h = h.reshape(B, ho * wo * 512)                          # (B, 8192)
    return fc_sigmoid(h, params["w_fc_t"], params["b_fc"])   # (B, 1) f32


if __name__ == "__main__":
    key = jax.random.PRNGKey(0)
    kp, kx = jax.random.split(key)
    params = prepare_params(init_raw_params(kp))

    # x: single-channel 32x32 images (conv1 expects 2 ch = image + label map)
    x = jax.random.normal(kx, (2, 1, 32, 32), jnp.float32)
    c = jnp.array([3, 7], jnp.int32)

    fwd = jax.jit(discriminator_forward)
    out = fwd(params, x, c)
    jax.block_until_ready(out)

    assert out.shape == (2, 1) and out.dtype == jnp.float32
    assert bool(jnp.all((out >= 0.0) & (out <= 1.0)))
    print("KERNEL_OK")
</pallas_src>

<mosaic_0001>
module attributes {stable_mosaic.version = 11 : i64} {
  func.func @_mm_lrelu_kernel(%arg0: i32, %arg1: memref<512x32xbf16, #tpu.memory_space<vmem>>, %arg2: memref<32x128xbf16, #tpu.memory_space<vmem>>, %arg3: memref<512x128xbf16, #tpu.memory_space<vmem>>) attributes {dimension_semantics = [#tpu.dimension_semantics<parallel>], iteration_bounds = array<i64: 1>, scalar_prefetch = 0 : i64, scratch_operands = 0 : i64, tpu.core_type = #tpu.core_type<tc>, window_params = [{transform_indices = @transform_0, window_bounds = array<i64: 512, 32>}, {pipeline_mode = #tpu.pipeline_mode<synchronous>, transform_indices = @transform_1, window_bounds = array<i64: 32, 128>}, {transform_indices = @transform_2, window_bounds = array<i64: 512, 128>}]} {
    %c0 = arith.constant 0 : index
    %c0_0 = arith.constant 0 : index
    %0 = vector.load %arg1[%c0, %c0_0] : memref<512x32xbf16, #tpu.memory_space<vmem>>, vector<512x32xbf16>
    %c0_1 = arith.constant 0 : index
    %c0_2 = arith.constant 0 : index
    %1 = vector.load %arg2[%c0_1, %c0_2] : memref<32x128xbf16, #tpu.memory_space<vmem>>, vector<32x128xbf16>
    %cst = arith.constant dense<0.000000e+00> : vector<512x128xf32>
    %2 = tpu.matmul %0, %1, %cst {dimension_numbers = #tpu.dot_dimension_numbers<[1], [0], [0], [1], [0, 0, 1, 1], [], []>} : vector<512x32xbf16>, vector<32x128xbf16>, vector<512x128xf32> -> vector<512x128xf32>
    %cst_3 = arith.constant 0.000000e+00 : f32
    %3 = vector.broadcast %cst_3 : f32 to vector<512x128xf32>
    %4 = arith.cmpf oge, %2, %3 : vector<512x128xf32>
    %cst_4 = arith.constant 2.000000e-01 : f32
    %5 = vector.broadcast %cst_4 : f32 to vector<512x128xf32>
    %6 = arith.mulf %5, %2 : vector<512x128xf32>
    %7 = arith.select %4, %2, %6 : vector<512x128xi1>, vector<512x128xf32>
    %8 = arith.truncf %7 : vector<512x128xf32> to vector<512x128xbf16>
    %c0_5 = arith.constant 0 : index
    %c0_6 = arith.constant 0 : index
    %9 = vector.load %arg3[%c0_5, %c0_6] : memref<512x128xbf16, #tpu.memory_space<vmem>>, vector<512x128xbf16>
    tpu.vector_store %arg3[%c0_5, %c0_6], %8 {strides = array<i32>} : memref<512x128xbf16, #tpu.memory_space<vmem>>, vector<512x128xbf16>,
    return
  }
  func.func @transform_0(%arg0: i32) -> (i32, i32) {
    %c0_i32 = arith.constant 0 : i32
    %c0_i32_0 = arith.constant 0 : i32
    return %arg0, %c0_i32 : i32, i32
  }
  func.func @transform_1(%arg0: i32) -> (i32, i32) {
    %c0_i32 = arith.constant 0 : i32
    %c0_i32_0 = arith.constant 0 : i32
    %c0_i32_1 = arith.constant 0 : i32
    return %c0_i32, %c0_i32_0 : i32, i32
  }
  func.func @transform_2(%arg0: i32) -> (i32, i32) {
    %c0_i32 = arith.constant 0 : i32
    %c0_i32_0 = arith.constant 0 : i32
    return %arg0, %c0_i32 : i32, i32
  }
}

module attributes {stable_mosaic.version = 11 : i64} {
  func.func @_mm_bn_lrelu_kernel(%arg0: i32, %arg1: memref<128x2048xbf16, #tpu.memory_space<vmem>>, %arg2: memref<2048x128xbf16, #tpu.memory_space<vmem>>, %arg3: memref<1x128xf32, #tpu.memory_space<vmem>>, %arg4: memref<1x128xf32, #tpu.memory_space<vmem>>, %arg5: memref<128x128xbf16, #tpu.memory_space<vmem>>) attributes {dimension_semantics = [#tpu.dimension_semantics<parallel>], iteration_bounds = array<i64: 2>, scalar_prefetch = 0 : i64, scratch_operands = 0 : i64, tpu.core_type = #tpu.core_type<tc>, window_params = [{pipeline_mode = #tpu.pipeline_mode<synchronous>, transform_indices = @transform_0, window_bounds = array<i64: 128, 2048>}, {transform_indices = @transform_1, window_bounds = array<i64: 2048, 128>}, {transform_indices = @transform_2, window_bounds = array<i64: 1, 128>}, {transform_indices = @transform_3, window_bounds = array<i64: 1, 128>}, {transform_indices = @transform_4, window_bounds = array<i64: 128, 128>}]} {
    %c0 = arith.constant 0 : index
    %c0_0 = arith.constant 0 : index
    %0 = vector.load %arg1[%c0, %c0_0] : memref<128x2048xbf16, #tpu.memory_space<vmem>>, vector<128x2048xbf16>
    %c0_1 = arith.constant 0 : index
    %c0_2 = arith.constant 0 : index
    %1 = vector.load %arg2[%c0_1, %c0_2] : memref<2048x128xbf16, #tpu.memory_space<vmem>>, vector<2048x128xbf16>
    %cst = arith.constant dense<0.000000e+00> : vector<128x128xf32>
    %2 = tpu.matmul %0, %1, %cst {dimension_numbers = #tpu.dot_dimension_numbers<[1], [0], [0], [1], [0, 0, 1, 1], [], []>} : vector<128x2048xbf16>, vector<2048x128xbf16>, vector<128x128xf32> -> vector<128x128xf32>
    %cst_3 = arith.constant dense<0.000000e+00> : vector<128xf32>
    %3 = vector.multi_reduction <add>, %2, %cst_3 [0] : vector<128x128xf32> to vector<128xf32>
    %4 = vector.shape_cast %3 : vector<128xf32> to vector<1x128xf32>
    %cst_4 = arith.constant 7.812500e-03 : f32
    %5 = vector.broadcast %cst_4 : f32 to vector<1x128xf32>
    %6 = arith.mulf %4, %5 : vector<1x128xf32>
    %7 = arith.mulf %2, %2 : vector<128x128xf32>
    %cst_5 = arith.constant dense<0.000000e+00> : vector<128xf32>
    %8 = vector.multi_reduction <add>, %7, %cst_5 [0] : vector<128x128xf32> to vector<128xf32>
    %9 = vector.shape_cast %8 : vector<128xf32> to vector<1x128xf32>
    %cst_6 = arith.constant 7.812500e-03 : f32
    %10 = vector.broadcast %cst_6 : f32 to vector<1x128xf32>
    %11 = arith.mulf %9, %10 : vector<1x128xf32>
    %12 = arith.mulf %6, %6 : vector<1x128xf32>
    %13 = arith.subf %11, %12 : vector<1x128xf32>
    %cst_7 = arith.constant 0.000000e+00 : f32
    %14 = vector.broadcast %cst_7 : f32 to vector<1x128xf32>
    %15 = arith.maximumf %13, %14 : vector<1x128xf32>
    %c0_8 = arith.constant 0 : index
    %c0_9 = arith.constant 0 : index
    %16 = vector.load %arg3[%c0_8, %c0_9] : memref<1x128xf32, #tpu.memory_space<vmem>>, vector<1x128xf32>
    %cst_10 = arith.constant 9.99999974E-6 : f32
    %17 = vector.broadcast %cst_10 : f32 to vector<1x128xf32>
    %18 = arith.addf %15, %17 : vector<1x128xf32>
    %19 = math.rsqrt %18 : vector<1x128xf32>
    %20 = arith.mulf %16, %19 : vector<1x128xf32>
    %c0_11 = arith.constant 0 : index
    %c0_12 = arith.constant 0 : index
    %21 = vector.load %arg4[%c0_11, %c0_12] : memref<1x128xf32, #tpu.memory_space<vmem>>, vector<1x128xf32>
    %22 = arith.mulf %6, %20 : vector<1x128xf32>
    %23 = arith.subf %21, %22 : vector<1x128xf32>
    %24 = vector.broadcast %20 : vector<1x128xf32> to vector<128x128xf32>
    %25 = arith.mulf %2, %24 : vector<128x128xf32>
    %26 = vector.broadcast %23 : vector<1x128xf32> to vector<128x128xf32>
    %27 = arith.addf %25, %26 : vector<128x128xf32>
    %cst_13 = arith.constant 0.000000e+00 : f32
    %28 = vector.broadcast %cst_13 : f32 to vector<128x128xf32>
    %29 = arith.cmpf oge, %27, %28 : vector<128x128xf32>
    %cst_14 = arith.constant 2.000000e-01 : f32
    %30 = vector.broadcast %cst_14 : f32 to vector<128x128xf32>
    %31 = arith.mulf %30, %27 : vector<128x128xf32>
    %32 = arith.select %29, %27, %31 : vector<128x128xi1>, vector<128x128xf32>
    %33 = arith.truncf %32 : vector<128x128xf32> to vector<128x128xbf16>
    %c0_15 = arith.constant 0 : index
    %c0_16 = arith.constant 0 : index
    %34 = vector.load %arg5[%c0_15, %c0_16] : memref<128x128xbf16, #tpu.memory_space<vmem>>, vector<128x128xbf16>
    tpu.vector_store %arg5[%c0_15, %c0_16], %33 {strides = array<i32>} : memref<128x128xbf16, #tpu.memory_space<vmem>>, vector<128x128xbf16>,
    return
  }
  func.func @transform_0(%arg0: i32) -> (i32, i32) {
    %c0_i32 = arith.constant 0 : i32
    %c0_i32_0 = arith.constant 0 : i32
    %c0_i32_1 = arith.constant 0 : i32
    return %c0_i32, %c0_i32_0 : i32, i32
  }
  func.func @transform_1(%arg0: i32) -> (i32, i32) {
    %c0_i32 = arith.constant 0 : i32
    %c0_i32_0 = arith.constant 0 : i32
    return %c0_i32, %arg0 : i32, i32
  }
  func.func @transform_2(%arg0: i32) -> (i32, i32) {
    %c0_i32 = arith.constant 0 : i32
    %c0_i32_0 = arith.constant 0 : i32
    return %c0_i32, %arg0 : i32, i32
  }
  func.func @transform_3(%arg0: i32) -> (i32, i32) {
    %c0_i32 = arith.constant 0 : i32
    %c0_i32_0 = arith.constant 0 : i32
    return %c0_i32, %arg0 : i32, i32
  }
  func.func @transform_4(%arg0: i32) -> (i32, i32) {
    %c0_i32 = arith.constant 0 : i32
    %c0_i32_0 = arith.constant 0 : i32
    return %c0_i32, %arg0 : i32, i32
  }
}

module attributes {stable_mosaic.version = 11 : i64} {
  func.func @_mm_bn_lrelu_kernel(%arg0: i32, %arg1: memref<32x4096xbf16, #tpu.memory_space<vmem>>, %arg2: memref<4096x256xbf16, #tpu.memory_space<vmem>>, %arg3: memref<1x256xf32, #tpu.memory_space<vmem>>, %arg4: memref<1x256xf32, #tpu.memory_space<vmem>>, %arg5: memref<32x256xbf16, #tpu.memory_space<vmem>>) attributes {dimension_semantics = [#tpu.dimension_semantics<parallel>], iteration_bounds = array<i64: 2>, scalar_prefetch = 0 : i64, scratch_operands = 0 : i64, tpu.core_type = #tpu.core_type<tc>, window_params = [{pipeline_mode = #tpu.pipeline_mode<synchronous>, transform_indices = @transform_0, window_bounds = array<i64: 32, 4096>}, {transform_indices = @transform_1, window_bounds = array<i64: 4096, 256>}, {transform_indices = @transform_2, window_bounds = array<i64: 1, 256>}, {transform_indices = @transform_3, window_bounds = array<i64: 1, 256>}, {transform_indices = @transform_4, window_bounds = array<i64: 32, 256>}]} {
    %c0 = arith.constant 0 : index
    %c0_0 = arith.constant 0 : index
    %0 = vector.load %arg1[%c0, %c0_0] : memref<32x4096xbf16, #tpu.memory_space<vmem>>, vector<32x4096xbf16>
    %c0_1 = arith.constant 0 : index
    %c0_2 = arith.constant 0 : index
    %1 = vector.load %arg2[%c0_1, %c0_2] : memref<4096x256xbf16, #tpu.memory_space<vmem>>, vector<4096x256xbf16>
    %cst = arith.constant dense<0.000000e+00> : vector<32x256xf32>
    %2 = tpu.matmul %0, %1, %cst {dimension_numbers = #tpu.dot_dimension_numbers<[1], [0], [0], [1], [0, 0, 1, 1], [], []>} : vector<32x4096xbf16>, vector<4096x256xbf16>, vector<32x256xf32> -> vector<32x256xf32>
    %cst_3 = arith.constant dense<0.000000e+00> : vector<256xf32>
    %3 = vector.multi_reduction <add>, %2, %cst_3 [0] : vector<32x256xf32> to vector<256xf32>
    %4 = vector.shape_cast %3 : vector<256xf32> to vector<1x256xf32>
    %cst_4 = arith.constant 3.125000e-02 : f32
    %5 = vector.broadcast %cst_4 : f32 to vector<1x256xf32>
    %6 = arith.mulf %4, %5 : vector<1x256xf32>
    %7 = arith.mulf %2, %2 : vector<32x256xf32>
    %cst_5 = arith.constant dense<0.000000e+00> : vector<256xf32>
    %8 = vector.multi_reduction <add>, %7, %cst_5 [0] : vector<32x256xf32> to vector<256xf32>
    %9 = vector.shape_cast %8 : vector<256xf32> to vector<1x256xf32>
    %cst_6 = arith.constant 3.125000e-02 : f32
    %10 = vector.broadcast %cst_6 : f32 to vector<1x256xf32>
    %11 = arith.mulf %9, %10 : vector<1x256xf32>
    %12 = arith.mulf %6, %6 : vector<1x256xf32>
    %13 = arith.subf %11, %12 : vector<1x256xf32>
    %cst_7 = arith.constant 0.000000e+00 : f32
    %14 = vector.broadcast %cst_7 : f32 to vector<1x256xf32>
    %15 = arith.maximumf %13, %14 : vector<1x256xf32>
    %c0_8 = arith.constant 0 : index
    %c0_9 = arith.constant 0 : index
    %16 = vector.load %arg3[%c0_8, %c0_9] : memref<1x256xf32, #tpu.memory_space<vmem>>, vector<1x256xf32>
    %cst_10 = arith.constant 9.99999974E-6 : f32
    %17 = vector.broadcast %cst_10 : f32 to vector<1x256xf32>
    %18 = arith.addf %15, %17 : vector<1x256xf32>
    %19 = math.rsqrt %18 : vector<1x256xf32>
    %20 = arith.mulf %16, %19 : vector<1x256xf32>
    %c0_11 = arith.constant 0 : index
    %c0_12 = arith.constant 0 : index
    %21 = vector.load %arg4[%c0_11, %c0_12] : memref<1x256xf32, #tpu.memory_space<vmem>>, vector<1x256xf32>
    %22 = arith.mulf %6, %20 : vector<1x256xf32>
    %23 = arith.subf %21, %22 : vector<1x256xf32>
    %24 = vector.broadcast %20 : vector<1x256xf32> to vector<32x256xf32>
    %25 = arith.mulf %2, %24 : vector<32x256xf32>
    %26 = vector.broadcast %23 : vector<1x256xf32> to vector<32x256xf32>
    %27 = arith.addf %25, %26 : vector<32x256xf32>
    %cst_13 = arith.constant 0.000000e+00 : f32
    %28 = vector.broadcast %cst_13 : f32 to vector<32x256xf32>
    %29 = arith.cmpf oge, %27, %28 : vector<32x256xf32>
    %cst_14 = arith.constant 2.000000e-01 : f32
    %30 = vector.broadcast %cst_14 : f32 to vector<32x256xf32>
    %31 = arith.mulf %30, %27 : vector<32x256xf32>
    %32 = arith.select %29, %27, %31 : vector<32x256xi1>, vector<32x256xf32>
    %33 = arith.truncf %32 : vector<32x256xf32> to vector<32x256xbf16>
    %c0_15 = arith.constant 0 : index
    %c0_16 = arith.constant 0 : index
    %34 = vector.load %arg5[%c0_15, %c0_16] : memref<32x256xbf16, #tpu.memory_space<vmem>>, vector<32x256xbf16>
    tpu.vector_store %arg5[%c0_15, %c0_16], %33 {strides = array<i32>} : memref<32x256xbf16, #tpu.memory_space<vmem>>, vector<32x256xbf16>,
    return
  }
  func.func @transform_0(%arg0: i32) -> (i32, i32) {
    %c0_i32 = arith.constant 0 : i32
    %c0_i32_0 = arith.constant 0 : i32
    %c0_i32_1 = arith.constant 0 : i32
    return %c0_i32, %c0_i32_0 : i32, i32
  }
  func.func @transform_1(%arg0: i32) -> (i32, i32) {
    %c0_i32 = arith.constant 0 : i32
    %c0_i32_0 = arith.constant 0 : i32
    return %c0_i32, %arg0 : i32, i32
  }
  func.func @transform_2(%arg0: i32) -> (i32, i32) {
    %c0_i32 = arith.constant 0 : i32
    %c0_i32_0 = arith.constant 0 : i32
    return %c0_i32, %arg0 : i32, i32
  }
  func.func @transform_3(%arg0: i32) -> (i32, i32) {
    %c0_i32 = arith.constant 0 : i32
    %c0_i32_0 = arith.constant 0 : i32
    return %c0_i32, %arg0 : i32, i32
  }
  func.func @transform_4(%arg0: i32) -> (i32, i32) {
    %c0_i32 = arith.constant 0 : i32
    %c0_i32_0 = arith.constant 0 : i32
    return %c0_i32, %arg0 : i32, i32
  }
}

module attributes {stable_mosaic.version = 11 : i64} {
  func.func @_fc_sigmoid_kernel(%arg0: memref<2x8192xbf16, #tpu.memory_space<vmem>>, %arg1: memref<1x8192xbf16, #tpu.memory_space<vmem>>, %arg2: memref<1x1xf32, #tpu.memory_space<vmem>>, %arg3: memref<2x1xf32, #tpu.memory_space<vmem>>) attributes {dimension_semantics = [], scalar_prefetch = 0 : i64, scratch_operands = 0 : i64, tpu.core_type = #tpu.core_type<tc>} {
    %c0 = arith.constant 0 : index
    %c0_0 = arith.constant 0 : index
    %0 = vector.load %arg0[%c0, %c0_0] : memref<2x8192xbf16, #tpu.memory_space<vmem>>, vector<2x8192xbf16>
    %1 = arith.extf %0 : vector<2x8192xbf16> to vector<2x8192xf32>
    %c0_1 = arith.constant 0 : index
    %c0_2 = arith.constant 0 : index
    %2 = vector.load %arg1[%c0_1, %c0_2] : memref<1x8192xbf16, #tpu.memory_space<vmem>>, vector<1x8192xbf16>
    %3 = arith.extf %2 : vector<1x8192xbf16> to vector<1x8192xf32>
    %4 = vector.broadcast %3 : vector<1x8192xf32> to vector<2x8192xf32>
    %5 = arith.mulf %1, %4 : vector<2x8192xf32>
    %cst = arith.constant dense<0.000000e+00> : vector<2xf32>
    %6 = vector.multi_reduction <add>, %5, %cst [1] : vector<2x8192xf32> to vector<2xf32>
    %7 = vector.shape_cast %6 : vector<2xf32> to vector<2x1xf32>
    %c0_3 = arith.constant 0 : index
    %c0_4 = arith.constant 0 : index
    %8 = vector.load %arg2[%c0_3, %c0_4] : memref<1x1xf32, #tpu.memory_space<vmem>>, vector<1x1xf32>
    %9 = vector.broadcast %8 : vector<1x1xf32> to vector<2x1xf32>
    %10 = arith.addf %7, %9 : vector<2x1xf32>
    %cst_5 = arith.constant 0.000000e+00 : f32
    %11 = vector.broadcast %cst_5 : f32 to vector<2x1xf32>
    %12 = arith.subf %11, %10 : vector<2x1xf32>
    %13 = math.exp %12 : vector<2x1xf32>
    %cst_6 = arith.constant 1.000000e+00 : f32
    %14 = vector.broadcast %cst_6 : f32 to vector<2x1xf32>
    %15 = arith.addf %14, %13 : vector<2x1xf32>
    %cst_7 = arith.constant 1.000000e+00 : f32
    %16 = vector.broadcast %cst_7 : f32 to vector<2x1xf32>
    %17 = arith.divf %16, %15 : vector<2x1xf32>
    %c0_8 = arith.constant 0 : index
    %c0_9 = arith.constant 0 : index
    %18 = vector.load %arg3[%c0_8, %c0_9] : memref<2x1xf32, #tpu.memory_space<vmem>>, vector<2x1xf32>
    tpu.vector_store %arg3[%c0_8, %c0_9], %17 {strides = array<i32>} : memref<2x1xf32, #tpu.memory_space<vmem>>, vector<2x1xf32>,
    return
  }
}

</mosaic_0001>

<bundles_post_ra>
// kernel: discriminator_forward.4
= control target key start
LH: loop header
LB: loop body
LE: loop exit
PB: predicated region body
PF: predicated region fallthrough
CT: control target
= control target key end

     0   :  { %7 = vsyncpa [#allocation3], 0  ;;  %s1721_s9 = smov [#allocation2]   ;;  %s1982_s0 = inlined_call_operand.vmem [shape: bf16[512,32], index: 0, kind: input, shape index: {}]   ;;  %s1983_s1 = inlined_call_operand.hbm [shape: bf16[32,128], index: 1, kind: input, shape index: {}]   ;;  %s1984_s2 = inlined_call_operand.vmem [shape: bf16[512,128], index: 2, kind: output, shape index: {}]  }
   0x1   :  { %s15_s10 = sshll.u32 %s1721_s9, 4  ;;  %s1697_s13 = scalar_lea.hbm %s1983_s1, 256  ;;  %s16_s10 = int_to_ptr.vmem [resolvable:$true] %s15_s10 }
   0x2   :  { %p1698_p0 = scmp.ne.s32.totalorder %s1983_s1, %s1697_s13  ;;  %p1701_p1 = scmp.lt.u32.totalorder %s1697_s13, %s1983_s1 }
   0x4   :  { %p1703_p2 = pnand %p1701_p1, %p1698_p0 }
   0x6   :  { %1706 = shalt.err (!%p1703_p2)
}
   0x7   :  { %s1707_s18 = scalar_lea.vmem %s16_s10, 256  ;;  %p1712_p4 = scmp.lt.s32.totalorder %s16_s10, %s16_s10 }
   0x8   :  { %p1708_p3 = scmp.ne.s32.totalorder %s16_s10, %s1707_s18  ;;  %p1713_p5 = scmp.lt.s32.totalorder %s1707_s18, %s1707_s18 }
   0xa   :  { %p1714_p6 = por %p1713_p5, %p1712_p4 }
   0xc   :  { %p1715_p7 = pnand %p1714_p6, %p1708_p3 }
   0xe   :  { %1718 = shalt.err (!%p1715_p7)
}
   0xf   :  { %s1722_s19 = smov 64   ;;  %s1723_s20 = smov 4  }
  0x10   :  { %21 = dma.hbm_to_vmem [thread:$0]  %s1983_s1, 256, %s16_s10, [#allocation3], %s1722_s19, %s1722_s19, %s1723_s20  }
  0x11   :  { %1719 = dma.done.wait [#allocation3], 256  }
  0x12   :  { %1720 = vsyncadd [#allocation3], 4294967040  ;;  %v1663_v0 = vld [vmem:[#allocation2] sm:$0xff]   ;;  %v1664_v1 = vld [vmem:[#allocation2 + $0x8] sm:$0xff]   ;;  %vm266_vm0 = vcmask 261120  }
  0x13   :  { %1588 = vmatprep.subr.bf16.mxu0 %v1663_v0  ;;  %1656 = vmatprep.subr.bf16.mxu1 %v1663_v0  ;;  %v1665_v2 = vld [vmem:[%s1982_s0] sm:$0xff]   ;;  %v1667_v4 = vld [vmem:[%s1982_s0 + $0x8] sm:$0xff]   ;;  %v1669_v6 = vld [vmem:[%s1982_s0 + $0x10] sm:$0xff]  }
  0x14   :  { %1589 = vmatpush3.bf16.msra.mxu0 %v1663_v0  ;;  %1658 = vmatpush3.bf16.msra.mxu1 %v1663_v0  ;;  %v1666_v3 = vld [vmem:[%s1982_s0 + $0x80] sm:$0xff]   ;;  %v1668_v5 = vld [vmem:[%s1982_s0 + $0x88] sm:$0xff]   ;;  %v1670_v7 = vld [vmem:[%s1982_s0 + $0x90] sm:$0xff]  }
  0x15   :  { %1590 = vmatprep.subr.bf16.mxu0 %v1664_v1  ;;  %1657 = vmatprep.subr.bf16.mxu1 %v1664_v1  ;;  %v1671_v8 = vld [vmem:[%s1982_s0 + $0x18] sm:$0xff]   ;;  %v1673_v10 = vld [vmem:[%s1982_s0 + $0x20] sm:$0xff]   ;;  %v1675_v12 = vld [vmem:[%s1982_s0 + $0x28] sm:$0xff]  }
  0x16   :  { %1592 = vmatprep.mubr.msk.bf16.mxu0 %vm266_vm0, %v1665_v2  ;;  %1624 = vmatprep.mubr.msk.bf16.mxu1 %vm266_vm0, %v1666_v3  ;;  %v1672_v9 = vld [vmem:[%s1982_s0 + $0x98] sm:$0xff]   ;;  %v1674_v11 = vld [vmem:[%s1982_s0 + $0xa0] sm:$0xff]   ;;  %v1676_v13 = vld [vmem:[%s1982_s0 + $0xa8] sm:$0xff]  }
  0x17   :  { %v1677_v14 = vld [vmem:[%s1982_s0 + $0x30] sm:$0xff]   ;;  %v1679_v16 = vld [vmem:[%s1982_s0 + $0x38] sm:$0xff]   ;;  %v1681_v18 = vld [vmem:[%s1982_s0 + $0x40] sm:$0xff]  }
  0x18   :  { %1591 = vmatpush3.bf16.msra.mxu0 %v1664_v1  ;;  %1659 = vmatpush3.bf16.msra.mxu1 %v1664_v1  ;;  %v1678_v15 = vld [vmem:[%s1982_s0 + $0xb0] sm:$0xff]   ;;  %v1680_v17 = vld [vmem:[%s1982_s0 + $0xb8] sm:$0xff]   ;;  %v1682_v19 = vld [vmem:[%s1982_s0 + $0xc0] sm:$0xff]  }
  0x19   :  { %v1683_v20 = vld [vmem:[%s1982_s0 + $0x48] sm:$0xff]   ;;  %v1685_v22 = vld [vmem:[%s1982_s0 + $0x50] sm:$0xff]   ;;  %v1687_v24 = vld [vmem:[%s1982_s0 + $0x58] sm:$0xff]  }
  0x1a   :  { %v1684_v21 = vld [vmem:[%s1982_s0 + $0xc8] sm:$0xff]   ;;  %v1686_v23 = vld [vmem:[%s1982_s0 + $0xd0] sm:$0xff]   ;;  %v1688_v25 = vld [vmem:[%s1982_s0 + $0xd8] sm:$0xff]  }
  0x1b   :  { %1593 = vmatmul.mubr.msk.bf16.vlgmr.msra.gmra.mrb[0].mxu0 %vm266_vm0, %v1667_v4  ;;  %1625 = vmatmul.mubr.msk.bf16.vlgmr.msra.gmra.mrb[0].mxu1 %vm266_vm0, %v1668_v5  ;;  %v1689_v26 = vld [vmem:[%s1982_s0 + $0x60] sm:$0xff]   ;;  %v1691_v28 = vld [vmem:[%s1982_s0 + $0x68] sm:$0xff]   ;;  %v1693_v30 = vld [vmem:[%s1982_s0 + $0x70] sm:$0xff]  }
  0x1c   :  { %1596 = vmatprep.mubr.msk.bf16.mxu0 %vm266_vm0, %v1669_v6  ;;  %1628 = vmatprep.mubr.msk.bf16.mxu1 %vm266_vm0, %v1670_v7  ;;  %v1690_v27 = vld [vmem:[%s1982_s0 + $0xe0] sm:$0xff]   ;;  %v1692_v29 = vld [vmem:[%s1982_s0 + $0xe8] sm:$0xff]   ;;  %v1694_v31 = vld [vmem:[%s1982_s0 + $0xf0] sm:$0xff]  }
  0x1d   :  { %v1695_v32 = vld [vmem:[%s1982_s0 + $0x78] sm:$0xff]  }
  0x1e   :  { %v1696_v33 = vld [vmem:[%s1982_s0 + $0xf8] sm:$0xff]  }
  0x23   :  { %1597 = vmatmul.mubr.msk.bf16.gmra.mrb[4].mxu0 %vm266_vm0, %v1671_v8  ;;  %1629 = vmatmul.mubr.msk.bf16.gmra.mrb[4].mxu1 %vm266_vm0, %v1672_v9 }
  0x24   :  { %1600 = vmatprep.mubr.msk.bf16.mxu0 %vm266_vm0, %v1673_v10  ;;  %1632 = vmatprep.mubr.msk.bf16.mxu1 %vm266_vm0, %v1674_v11 }
  0x2b   :  { %1601 = vmatmul.mubr.msk.bf16.gmra.mrb[8].mxu0 %vm266_vm0, %v1675_v12  ;;  %1633 = vmatmul.mubr.msk.bf16.gmra.mrb[8].mxu1 %vm266_vm0, %v1676_v13 }
  0x2c   :  { %1604 = vmatprep.mubr.msk.bf16.mxu0 %vm266_vm0, %v1677_v14  ;;  %1636 = vmatprep.mubr.msk.bf16.mxu1 %vm266_vm0, %v1678_v15 }
  0x33   :  { %1605 = vmatmul.mubr.msk.bf16.gmra.mrb[12].mxu0 %vm266_vm0, %v1679_v16  ;;  %1637 = vmatmul.mubr.msk.bf16.gmra.mrb[12].mxu1 %vm266_vm0, %v1680_v17 }
  0x34   :  { %1608 = vmatprep.mubr.msk.bf16.mxu0 %vm266_vm0, %v1681_v18  ;;  %1640 = vmatprep.mubr.msk.bf16.mxu1 %vm266_vm0, %v1682_v19 }
  0x3b   :  { %1609 = vmatmul.mubr.msk.bf16.gmra.mrb[16].mxu0 %vm266_vm0, %v1683_v20  ;;  %1641 = vmatmul.mubr.msk.bf16.gmra.mrb[16].mxu1 %vm266_vm0, %v1684_v21 }
  0x3c   :  { %1612 = vmatprep.mubr.msk.bf16.mxu0 %vm266_vm0, %v1685_v22  ;;  %1644 = vmatprep.mubr.msk.bf16.mxu1 %vm266_vm0, %v1686_v23 }
  0x43   :  { %1613 = vmatmul.mubr.msk.bf16.gmra.mrb[20].mxu0 %vm266_vm0, %v1687_v24  ;;  %1645 = vmatmul.mubr.msk.bf16.gmra.mrb[20].mxu1 %vm266_vm0, %v1688_v25 }
  0x44   :  { %1616 = vmatprep.mubr.msk.bf16.mxu0 %vm266_vm0, %v1689_v26  ;;  %1648 = vmatprep.mubr.msk.bf16.mxu1 %vm266_vm0, %v1690_v27 }
  0x4b   :  { %1617 = vmatmul.mubr.msk.bf16.gmra.mrb[24].mxu0 %vm266_vm0, %v1691_v28  ;;  %1649 = vmatmul.mubr.msk.bf16.gmra.mrb[24].mxu1 %vm266_vm0, %v1692_v29 }
  0x4c   :  { %1620 = vmatprep.mubr.msk.bf16.mxu0 %vm266_vm0, %v1693_v30  ;;  %1652 = vmatprep.mubr.msk.bf16.mxu1 %vm266_vm0, %v1694_v31 }
  0x53   :  { %1621 = vmatmul.mubr.msk.bf16.gmra.mrb[28].mxu0 %vm266_vm0, %v1695_v32  ;;  %1653 = vmatmul.mubr.msk.bf16.gmra.mrb[28].mxu1 %vm266_vm0, %v1696_v33 }
  0xee   :  { %v1594_v34 = vpop.f32.mrb[0].mxu0  ;;  %v1626_v35 = vpop.f32.mrb[0].mxu1 }
  0xef   :  { %vm654_vm1 = vcmp.ge.f32.partialorder %v1594_v34, 0.0  ;;  %v718_v36 = vmul.f32 0.2, %v1594_v34  ;;  %v750_v37 = vmul.f32 0.2, %v1626_v35  ;;  %vm686_vm2 = vcmp.ge.f32.partialorder %v1626_v35, 0.0 }
  0xf0   :  { %v397_v38 = vpop.f32.mrb[1].mxu0  ;;  %v525_v39 = vpop.f32.mrb[1].mxu1 }
  0xf1   :  { %v716_v40 = vmul.f32 0.2, %v397_v38  ;;  %v1595_v41 = vpop.f32.mrb[2].mxu0  ;;  %v1627_v42 = vpop.f32.mrb[2].mxu1  ;;  %v782_v43 = vsel %vm654_vm1, %v1594_v34, %v718_v36  ;;  %v748_v44 = vmul.f32 0.2, %v525_v39  ;;  %v814_v46 = vsel %vm686_vm2, %v1626_v35, %v750_v37 }
  0xf2   :  { %vm655_vm3 = vcmp.ge.f32.partialorder %v1595_v41, 0.0  ;;  %v719_v45 = vmul.f32 0.2, %v1595_v41  ;;  %vm652_vm4 = vcmp.ge.f32.partialorder %v397_v38, 0.0  ;;  %vm687_vm5 = vcmp.ge.f32.partialorder %v1627_v42, 0.0  ;;  %v400_v48 = vpop.f32.mrb[3].mxu0 }
  0xf3   :  { %v751_v47 = vmul.f32 0.2, %v1627_v42  ;;  %v528_v49 = vpop.f32.mrb[3].mxu1  ;;  %vm684_vm6 = vcmp.ge.f32.partialorder %v525_v39, 0.0  ;;  %vm653_vm7 = vcmp.ge.f32.partialorder %v400_v48, 0.0  ;;  %v780_v55 = vsel %vm652_vm4, %v397_v38, %v716_v40 }
  0xf4   :  { %v783_v50 = vsel %vm655_vm3, %v1595_v41, %v719_v45  ;;  %v717_v51 = vmul.f32 0.2, %v400_v48  ;;  %vm685_vm8 = vcmp.ge.f32.partialorder %v528_v49, 0.0  ;;  %v749_v54 = vmul.f32 0.2, %v528_v49 }
  0xf5   :  { %v1371_v52 = vpack.c.bf16 %v783_v50, %v782_v43  ;;  %v815_v53 = vsel %vm687_vm5, %v1627_v42, %v751_v47  ;;  %v812_v60 = vsel %vm684_vm6, %v525_v39, %v748_v44 }
  0xf6   :  { %v1451_v56 = vpack.c.bf16 %v815_v53, %v814_v46  ;;  %v781_v57 = vsel %vm653_vm7, %v400_v48, %v717_v51  ;;  %v1598_v58 = vpop.f32.mrb[4].mxu0  ;;  %v1630_v59 = vpop.f32.mrb[4].mxu1  ;;  %v813_v62 = vsel %vm685_vm8, %v528_v49, %v749_v54 }
  0xf7   :  { %1523 = vst [vmem:[%s1984_s2 + $0x8] sm:$0xff] %v1371_v52   ;;  %v1366_v61 = vpack.c.bf16 %v781_v57, %v780_v55  ;;  %v722_v63 = vmul.f32 0.2, %v1598_v58  ;;  %v413_v0 = vpop.f32.mrb[5].mxu0  ;;  %v541_v1 = vpop.f32.mrb[5].mxu1  ;;  %v1446_v2 = vpack.c.bf16 %v813_v62, %v812_v60  ;;  %vm658_vm9 = vcmp.ge.f32.partialorder %v1598_v58, 0.0 }
  0xf8   :  { %1539 = vst [vmem:[%s1984_s2 + $0x88] sm:$0xff] %v1451_v56   ;;  %v754_v3 = vmul.f32 0.2, %v1630_v59  ;;  %v1599_v4 = vpop.f32.mrb[6].mxu0  ;;  %v1631_v5 = vpop.f32.mrb[6].mxu1  ;;  %vm690_vm10 = vcmp.ge.f32.partialorder %v1630_v59, 0.0 }
  0xf9   :  { %1367 = vst [vmem:[%s1984_s2] sm:$0xff] %v1366_v61   ;;  %v720_v6 = vmul.f32 0.2, %v413_v0  ;;  %v752_v7 = vmul.f32 0.2, %v541_v1  ;;  %v416_v8 = vpop.f32.mrb[7].mxu0  ;;  %1538 = vst [vmem:[%s1984_s2 + $0x80] sm:$0xff] %v1446_v2   ;;  %v786_v11 = vsel %vm658_vm9, %v1598_v58, %v722_v63 }
  0xfa   :  { %vm656_vm11 = vcmp.ge.f32.partialorder %v413_v0, 0.0  ;;  %vm659_vm12 = vcmp.ge.f32.partialorder %v1599_v4, 0.0  ;;  %v723_v9 = vmul.f32 0.2, %v1599_v4  ;;  %vm691_vm13 = vcmp.ge.f32.partialorder %v1631_v5, 0.0  ;;  %v544_v10 = vpop.f32.mrb[7].mxu1 }
  0xfb   :  { %vm688_vm14 = vcmp.ge.f32.partialorder %v541_v1, 0.0  ;;  %v755_v12 = vmul.f32 0.2, %v1631_v5  ;;  %vm657_vm15 = vcmp.ge.f32.partialorder %v416_v8, 0.0  ;;  %v721_v14 = vmul.f32 0.2, %v416_v8 }
  0xfc   :  { %v787_v13 = vsel %vm659_vm12, %v1599_v4, %v723_v9  ;;  %vm689_vm0 = vcmp.ge.f32.partialorder %v544_v10, 0.0  ;;  %v753_v15 = vmul.f32 0.2, %v544_v10  ;;  %v818_v16 = vsel %vm690_vm10, %v1630_v59, %v754_v3 }
  0xfd   :  { %v784_v17 = vsel %vm656_vm11, %v413_v0, %v720_v6  ;;  %v1381_v18 = vpack.c.bf16 %v787_v13, %v786_v11  ;;  %v819_v19 = vsel %vm691_vm13, %v1631_v5, %v755_v12  ;;  %v816_v20 = vsel %vm688_vm14, %v541_v1, %v752_v7 }
  0xfe   :  { %v1461_v21 = vpack.c.bf16 %v819_v19, %v818_v16  ;;  %v785_v22 = vsel %vm657_vm15, %v416_v8, %v721_v14  ;;  %v817_v23 = vsel %vm689_vm0, %v544_v10, %v753_v15  ;;  %v1602_v24 = vpop.f32.mrb[8].mxu0  ;;  %v1634_v25 = vpop.f32.mrb[8].mxu1 }
  0xff   :  { %1525 = vst [vmem:[%s1984_s2 + $0x18] sm:$0xff] %v1381_v18   ;;  %v1376_v26 = vpack.c.bf16 %v785_v22, %v784_v17  ;;  %v1456_v27 = vpack.c.bf16 %v817_v23, %v816_v20  ;;  %vm662_vm1 = vcmp.ge.f32.partialorder %v1602_v24, 0.0  ;;  %v726_v28 = vmul.f32 0.2, %v1602_v24  ;;  %v429_v29 = vpop.f32.mrb[9].mxu0  ;;  %v557_v30 = vpop.f32.mrb[9].mxu1 }
 0x100   :  { %1541 = vst [vmem:[%s1984_s2 + $0x98] sm:$0xff] %v1461_v21   ;;  %vm694_vm2 = vcmp.ge.f32.partialorder %v1634_v25, 0.0  ;;  %v758_v31 = vmul.f32 0.2, %v1634_v25  ;;  %v724_v32 = vmul.f32 0.2, %v429_v29 }
 0x101   :  { %1524 = vst [vmem:[%s1984_s2 + $0x10] sm:$0xff] %v1376_v26   ;;  %1540 = vst [vmem:[%s1984_s2 + $0x90] sm:$0xff] %v1456_v27   ;;  %v756_v33 = vmul.f32 0.2, %v557_v30  ;;  %v1603_v34 = vpop.f32.mrb[10].mxu0  ;;  %v1635_v35 = vpop.f32.mrb[10].mxu1  ;;  %v790_v36 = vsel %vm662_vm1, %v1602_v24, %v726_v28 }
 0x102   :  { %vm660_vm3 = vcmp.ge.f32.partialorder %v429_v29, 0.0  ;;  %vm663_vm4 = vcmp.ge.f32.partialorder %v1603_v34, 0.0  ;;  %v727_v37 = vmul.f32 0.2, %v1603_v34  ;;  %v432_v38 = vpop.f32.mrb[11].mxu0  ;;  %v560_v39 = vpop.f32.mrb[11].mxu1  ;;  %v822_v44 = vsel %vm694_vm2, %v1634_v25, %v758_v31 }
 0x103   :  { %vm692_vm5 = vcmp.ge.f32.partialorder %v557_v30, 0.0  ;;  %vm695_vm6 = vcmp.ge.f32.partialorder %v1635_v35, 0.0  ;;  %v759_v40 = vmul.f32 0.2, %v1635_v35  ;;  %vm661_vm7 = vcmp.ge.f32.partialorder %v432_v38, 0.0 }
 0x104   :  { %v791_v41 = vsel %vm663_vm4, %v1603_v34, %v727_v37  ;;  %v725_v42 = vmul.f32 0.2, %v432_v38  ;;  %vm693_vm8 = vcmp.ge.f32.partialorder %v560_v39, 0.0  ;;  %v757_v43 = vmul.f32 0.2, %v560_v39 }
 0x105   :  { %v788_v45 = vsel %vm660_vm3, %v429_v29, %v724_v32  ;;  %v1391_v46 = vpack.c.bf16 %v791_v41, %v790_v36  ;;  %v823_v47 = vsel %vm695_vm6, %v1635_v35, %v759_v40  ;;  %v820_v48 = vsel %vm692_vm5, %v557_v30, %v756_v33 }
 0x106   :  { %v1471_v49 = vpack.c.bf16 %v823_v47, %v822_v44  ;;  %v789_v50 = vsel %vm661_vm7, %v432_v38, %v725_v42  ;;  %v821_v51 = vsel %vm693_vm8, %v560_v39, %v757_v43  ;;  %v1606_v52 = vpop.f32.mrb[12].mxu0  ;;  %v1638_v53 = vpop.f32.mrb[12].mxu1 }
 0x107   :  { %1527 = vst [vmem:[%s1984_s2 + $0x28] sm:$0xff] %v1391_v46   ;;  %v1386_v54 = vpack.c.bf16 %v789_v50, %v788_v45  ;;  %v1466_v55 = vpack.c.bf16 %v821_v51, %v820_v48  ;;  %vm666_vm9 = vcmp.ge.f32.partialorder %v1606_v52, 0.0  ;;  %v730_v56 = vmul.f32 0.2, %v1606_v52  ;;  %v445_v57 = vpop.f32.mrb[13].mxu0  ;;  %v573_v58 = vpop.f32.mrb[13].mxu1 }
 0x108   :  { %1543 = vst [vmem:[%s1984_s2 + $0xa8] sm:$0xff] %v1471_v49   ;;  %vm698_vm10 = vcmp.ge.f32.partialorder %v1638_v53, 0.0  ;;  %v762_v59 = vmul.f32 0.2, %v1638_v53  ;;  %v728_v60 = vmul.f32 0.2, %v445_v57 }
 0x109   :  { %1526 = vst [vmem:[%s1984_s2 + $0x20] sm:$0xff] %v1386_v54   ;;  %1542 = vst [vmem:[%s1984_s2 + $0xa0] sm:$0xff] %v1466_v55   ;;  %v760_v61 = vmul.f32 0.2, %v573_v58  ;;  %v1607_v62 = vpop.f32.mrb[14].mxu0  ;;  %v1639_v63 = vpop.f32.mrb[14].mxu1  ;;  %v794_v0 = vsel %vm666_vm9, %v1606_v52, %v730_v56 }
 0x10a   :  { %vm664_vm11 = vcmp.ge.f32.partialorder %v445_v57, 0.0  ;;  %vm667_vm12 = vcmp.ge.f32.partialorder %v1607_v62, 0.0  ;;  %v731_v1 = vmul.f32 0.2, %v1607_v62  ;;  %v448_v2 = vpop.f32.mrb[15].mxu0  ;;  %v576_v3 = vpop.f32.mrb[15].mxu1  ;;  %v826_v8 = vsel %vm698_vm10, %v1638_v53, %v762_v59 }
 0x10b   :  { %vm696_vm13 = vcmp.ge.f32.partialorder %v573_v58, 0.0  ;;  %vm699_vm14 = vcmp.ge.f32.partialorder %v1639_v63, 0.0  ;;  %v763_v4 = vmul.f32 0.2, %v1639_v63  ;;  %vm665_vm15 = vcmp.ge.f32.partialorder %v448_v2, 0.0 }
 0x10c   :  { %v795_v5 = vsel %vm667_vm12, %v1607_v62, %v731_v1  ;;  %v729_v6 = vmul.f32 0.2, %v448_v2  ;;  %vm697_vm0 = vcmp.ge.f32.partialorder %v576_v3, 0.0  ;;  %v761_v7 = vmul.f32 0.2, %v576_v3 }
 0x10d   :  { %v792_v9 = vsel %vm664_vm11, %v445_v57, %v728_v60  ;;  %v1401_v10 = vpack.c.bf16 %v795_v5, %v794_v0  ;;  %v827_v11 = vsel %vm699_vm14, %v1639_v63, %v763_v4  ;;  %v824_v12 = vsel %vm696_vm13, %v573_v58, %v760_v61 }
 0x10e   :  { %v1481_v13 = vpack.c.bf16 %v827_v11, %v826_v8  ;;  %v793_v14 = vsel %vm665_vm15, %v448_v2, %v729_v6  ;;  %v825_v15 = vsel %vm697_vm0, %v576_v3, %v761_v7  ;;  %v1610_v16 = vpop.f32.mrb[16].mxu0  ;;  %v1642_v17 = vpop.f32.mrb[16].mxu1 }
 0x10f   :  { %1529 = vst [vmem:[%s1984_s2 + $0x38] sm:$0xff] %v1401_v10   ;;  %v1396_v18 = vpack.c.bf16 %v793_v14, %v792_v9  ;;  %v1476_v19 = vpack.c.bf16 %v825_v15, %v824_v12  ;;  %vm670_vm1 = vcmp.ge.f32.partialorder %v1610_v16, 0.0  ;;  %v734_v20 = vmul.f32 0.2, %v1610_v16  ;;  %v461_v21 = vpop.f32.mrb[17].mxu0  ;;  %v589_v22 = vpop.f32.mrb[17].mxu1 }
 0x110   :  { %1545 = vst [vmem:[%s1984_s2 + $0xb8] sm:$0xff] %v1481_v13   ;;  %vm702_vm2 = vcmp.ge.f32.partialorder %v1642_v17, 0.0  ;;  %v766_v23 = vmul.f32 0.2, %v1642_v17  ;;  %v732_v24 = vmul.f32 0.2, %v461_v21 }
 0x111   :  { %1528 = vst [vmem:[%s1984_s2 + $0x30] sm:$0xff] %v1396_v18   ;;  %1544 = vst [vmem:[%s1984_s2 + $0xb0] sm:$0xff] %v1476_v19   ;;  %v764_v25 = vmul.f32 0.2, %v589_v22  ;;  %v1611_v26 = vpop.f32.mrb[18].mxu0  ;;  %v1643_v27 = vpop.f32.mrb[18].mxu1  ;;  %v798_v28 = vsel %vm670_vm1, %v1610_v16, %v734_v20 }
 0x112   :  { %vm668_vm3 = vcmp.ge.f32.partialorder %v461_v21, 0.0  ;;  %vm671_vm4 = vcmp.ge.f32.partialorder %v1611_v26, 0.0  ;;  %v735_v29 = vmul.f32 0.2, %v1611_v26  ;;  %v464_v30 = vpop.f32.mrb[19].mxu0  ;;  %v592_v31 = vpop.f32.mrb[19].mxu1  ;;  %v830_v36 = vsel %vm702_vm2, %v1642_v17, %v766_v23 }
 0x113   :  { %vm700_vm5 = vcmp.ge.f32.partialorder %v589_v22, 0.0  ;;  %vm703_vm6 = vcmp.ge.f32.partialorder %v1643_v27, 0.0  ;;  %v767_v32 = vmul.f32 0.2, %v1643_v27  ;;  %vm669_vm7 = vcmp.ge.f32.partialorder %v464_v30, 0.0 }
 0x114   :  { %v799_v33 = vsel %vm671_vm4, %v1611_v26, %v735_v29  ;;  %v733_v34 = vmul.f32 0.2, %v464_v30  ;;  %vm701_vm8 = vcmp.ge.f32.partialorder %v592_v31, 0.0  ;;  %v765_v35 = vmul.f32 0.2, %v592_v31 }
 0x115   :  { %v796_v37 = vsel %vm668_vm3, %v461_v21, %v732_v24  ;;  %v1411_v38 = vpack.c.bf16 %v799_v33, %v798_v28  ;;  %v831_v39 = vsel %vm703_vm6, %v1643_v27, %v767_v32  ;;  %v828_v40 = vsel %vm700_vm5, %v589_v22, %v764_v25 }
 0x116   :  { %v1491_v41 = vpack.c.bf16 %v831_v39, %v830_v36  ;;  %v797_v42 = vsel %vm669_vm7, %v464_v30, %v733_v34  ;;  %v829_v43 = vsel %vm701_vm8, %v592_v31, %v765_v35  ;;  %v1614_v44 = vpop.f32.mrb[20].mxu0  ;;  %v1646_v45 = vpop.f32.mrb[20].mxu1 }
 0x117   :  { %1531 = vst [vmem:[%s1984_s2 + $0x48] sm:$0xff] %v1411_v38   ;;  %v1406_v46 = vpack.c.bf16 %v797_v42, %v796_v37  ;;  %v1486_v47 = vpack.c.bf16 %v829_v43, %v828_v40  ;;  %vm674_vm9 = vcmp.ge.f32.partialorder %v1614_v44, 0.0  ;;  %v738_v48 = vmul.f32 0.2, %v1614_v44  ;;  %v477_v49 = vpop.f32.mrb[21].mxu0  ;;  %v605_v50 = vpop.f32.mrb[21].mxu1 }
 0x118   :  { %1547 = vst [vmem:[%s1984_s2 + $0xc8] sm:$0xff] %v1491_v41   ;;  %vm706_vm10 = vcmp.ge.f32.partialorder %v1646_v45, 0.0  ;;  %v770_v51 = vmul.f32 0.2, %v1646_v45  ;;  %v736_v52 = vmul.f32 0.2, %v477_v49 }
 0x119   :  { %1530 = vst [vmem:[%s1984_s2 + $0x40] sm:$0xff] %v1406_v46   ;;  %1546 = vst [vmem:[%s1984_s2 + $0xc0] sm:$0xff] %v1486_v47   ;;  %v768_v53 = vmul.f32 0.2, %v605_v50  ;;  %v1615_v54 = vpop.f32.mrb[22].mxu0  ;;  %v1647_v55 = vpop.f32.mrb[22].mxu1  ;;  %v802_v56 = vsel %vm674_vm9, %v1614_v44, %v738_v48 }
 0x11a   :  { %vm672_vm11 = vcmp.ge.f32.partialorder %v477_v49, 0.0  ;;  %vm675_vm12 = vcmp.ge.f32.partialorder %v1615_v54, 0.0  ;;  %v739_v57 = vmul.f32 0.2, %v1615_v54  ;;  %v480_v58 = vpop.f32.mrb[23].mxu0  ;;  %v608_v59 = vpop.f32.mrb[23].mxu1  ;;  %v834_v0 = vsel %vm706_vm10, %v1646_v45, %v770_v51 }
 0x11b   :  { %vm704_vm13 = vcmp.ge.f32.partialorder %v605_v50, 0.0  ;;  %vm707_vm14 = vcmp.ge.f32.partialorder %v1647_v55, 0.0  ;;  %v771_v60 = vmul.f32 0.2, %v1647_v55  ;;  %vm673_vm15 = vcmp.ge.f32.partialorder %v480_v58, 0.0 }
 0x11c   :  { %v803_v61 = vsel %vm675_vm12, %v1615_v54, %v739_v57  ;;  %v737_v62 = vmul.f32 0.2, %v480_v58  ;;  %vm705_vm0 = vcmp.ge.f32.partialorder %v608_v59, 0.0  ;;  %v769_v63 = vmul.f32 0.2, %v608_v59 }
 0x11d   :  { %v800_v1 = vsel %vm672_vm11, %v477_v49, %v736_v52  ;;  %v1421_v2 = vpack.c.bf16 %v803_v61, %v802_v56  ;;  %v835_v3 = vsel %vm707_vm14, %v1647_v55, %v771_v60  ;;  %v832_v4 = vsel %vm704_vm13, %v605_v50, %v768_v53 }
 0x11e   :  { %v1501_v5 = vpack.c.bf16 %v835_v3, %v834_v0  ;;  %v801_v6 = vsel %vm673_vm15, %v480_v58, %v737_v62  ;;  %v833_v7 = vsel %vm705_vm0, %v608_v59, %v769_v63  ;;  %v1618_v8 = vpop.f32.mrb[24].mxu0  ;;  %v1650_v9 = vpop.f32.mrb[24].mxu1 }
 0x11f   :  { %1533 = vst [vmem:[%s1984_s2 + $0x58] sm:$0xff] %v1421_v2   ;;  %v1416_v10 = vpack.c.bf16 %v801_v6, %v800_v1  ;;  %v1496_v11 = vpack.c.bf16 %v833_v7, %v832_v4  ;;  %vm678_vm1 = vcmp.ge.f32.partialorder %v1618_v8, 0.0  ;;  %v742_v12 = vmul.f32 0.2, %v1618_v8  ;;  %v493_v13 = vpop.f32.mrb[25].mxu0  ;;  %v621_v14 = vpop.f32.mrb[25].mxu1 }
 0x120   :  { %1549 = vst [vmem:[%s1984_s2 + $0xd8] sm:$0xff] %v1501_v5   ;;  %vm710_vm2 = vcmp.ge.f32.partialorder %v1650_v9, 0.0  ;;  %v774_v15 = vmul.f32 0.2, %v1650_v9  ;;  %v740_v16 = vmul.f32 0.2, %v493_v13 }
 0x121   :  { %1532 = vst [vmem:[%s1984_s2 + $0x50] sm:$0xff] %v1416_v10   ;;  %1548 = vst [vmem:[%s1984_s2 + $0xd0] sm:$0xff] %v1496_v11   ;;  %v772_v17 = vmul.f32 0.2, %v621_v14  ;;  %v1619_v18 = vpop.f32.mrb[26].mxu0  ;;  %v1651_v19 = vpop.f32.mrb[26].mxu1  ;;  %v806_v20 = vsel %vm678_vm1, %v1618_v8, %v742_v12 }
 0x122   :  { %vm676_vm3 = vcmp.ge.f32.partialorder %v493_v13, 0.0  ;;  %vm679_vm4 = vcmp.ge.f32.partialorder %v1619_v18, 0.0  ;;  %v743_v21 = vmul.f32 0.2, %v1619_v18  ;;  %v496_v22 = vpop.f32.mrb[27].mxu0  ;;  %v624_v23 = vpop.f32.mrb[27].mxu1  ;;  %v838_v28 = vsel %vm710_vm2, %v1650_v9, %v774_v15 }
 0x123   :  { %vm708_vm5 = vcmp.ge.f32.partialorder %v621_v14, 0.0  ;;  %vm711_vm6 = vcmp.ge.f32.partialorder %v1651_v19, 0.0  ;;  %v775_v24 = vmul.f32 0.2, %v1651_v19  ;;  %vm677_vm7 = vcmp.ge.f32.partialorder %v496_v22, 0.0 }
 0x124   :  { %v807_v25 = vsel %vm679_vm4, %v1619_v18, %v743_v21  ;;  %v741_v26 = vmul.f32 0.2, %v496_v22  ;;  %vm709_vm8 = vcmp.ge.f32.partialorder %v624_v23, 0.0  ;;  %v773_v27 = vmul.f32 0.2, %v624_v23 }
 0x125   :  { %v804_v29 = vsel %vm676_vm3, %v493_v13, %v740_v16  ;;  %v1431_v30 = vpack.c.bf16 %v807_v25, %v806_v20  ;;  %v839_v31 = vsel %vm711_vm6, %v1651_v19, %v775_v24  ;;  %v836_v32 = vsel %vm708_vm5, %v621_v14, %v772_v17 }
 0x126   :  { %v1511_v33 = vpack.c.bf16 %v839_v31, %v838_v28  ;;  %v805_v34 = vsel %vm677_vm7, %v496_v22, %v741_v26  ;;  %v837_v35 = vsel %vm709_vm8, %v624_v23, %v773_v27  ;;  %v1622_v36 = vpop.f32.mrb[28].mxu0  ;;  %v1654_v37 = vpop.f32.mrb[28].mxu1 }
 0x127   :  { %1535 = vst [vmem:[%s1984_s2 + $0x68] sm:$0xff] %v1431_v30   ;;  %v1426_v38 = vpack.c.bf16 %v805_v34, %v804_v29  ;;  %v1506_v39 = vpack.c.bf16 %v837_v35, %v836_v32  ;;  %vm682_vm9 = vcmp.ge.f32.partialorder %v1622_v36, 0.0  ;;  %v746_v40 = vmul.f32 0.2, %v1622_v36  ;;  %v509_v41 = vpop.f32.mrb[29].mxu0  ;;  %v637_v42 = vpop.f32.mrb[29].mxu1 }
 0x128   :  { %1551 = vst [vmem:[%s1984_s2 + $0xe8] sm:$0xff] %v1511_v33   ;;  %vm714_vm10 = vcmp.ge.f32.partialorder %v1654_v37, 0.0  ;;  %v778_v43 = vmul.f32 0.2, %v1654_v37  ;;  %v744_v44 = vmul.f32 0.2, %v509_v41 }
 0x129   :  { %1534 = vst [vmem:[%s1984_s2 + $0x60] sm:$0xff] %v1426_v38   ;;  %1550 = vst [vmem:[%s1984_s2 + $0xe0] sm:$0xff] %v1506_v39   ;;  %v776_v45 = vmul.f32 0.2, %v637_v42  ;;  %v1623_v46 = vpop.f32.mrb[30].mxu0  ;;  %v1655_v47 = vpop.f32.mrb[30].mxu1  ;;  %v810_v48 = vsel %vm682_vm9, %v1622_v36, %v746_v40 }
 0x12a   :  { %vm680_vm11 = vcmp.ge.f32.partialorder %v509_v41, 0.0  ;;  %vm683_vm12 = vcmp.ge.f32.partialorder %v1623_v46, 0.0  ;;  %v747_v49 = vmul.f32 0.2, %v1623_v46  ;;  %v512_v50 = vpop.f32.mrb[31].mxu0  ;;  %v640_v51 = vpop.f32.mrb[31].mxu1  ;;  %v842_v56 = vsel %vm714_vm10, %v1654_v37, %v778_v43 }
 0x12b   :  { %vm712_vm13 = vcmp.ge.f32.partialorder %v637_v42, 0.0  ;;  %vm715_vm14 = vcmp.ge.f32.partialorder %v1655_v47, 0.0  ;;  %v779_v52 = vmul.f32 0.2, %v1655_v47  ;;  %vm681_vm15 = vcmp.ge.f32.partialorder %v512_v50, 0.0 }
 0x12c   :  { %v811_v53 = vsel %vm683_vm12, %v1623_v46, %v747_v49  ;;  %v745_v54 = vmul.f32 0.2, %v512_v50  ;;  %vm713_vm0 = vcmp.ge.f32.partialorder %v640_v51, 0.0  ;;  %v777_v55 = vmul.f32 0.2, %v640_v51 }
 0x12d   :  { %v808_v57 = vsel %vm680_vm11, %v509_v41, %v744_v44  ;;  %v1441_v58 = vpack.c.bf16 %v811_v53, %v810_v48  ;;  %v843_v59 = vsel %vm715_vm14, %v1655_v47, %v779_v52  ;;  %v840_v60 = vsel %vm712_vm13, %v637_v42, %v776_v45 }
 0x12e   :  { %v1521_v61 = vpack.c.bf16 %v843_v59, %v842_v56  ;;  %v809_v62 = vsel %vm681_vm15, %v512_v50, %v745_v54  ;;  %v841_v63 = vsel %vm713_vm0, %v640_v51, %v777_v55 }
 0x12f   :  { %1537 = vst [vmem:[%s1984_s2 + $0x78] sm:$0xff] %v1441_v58   ;;  %v1436_v0 = vpack.c.bf16 %v809_v62, %v808_v57  ;;  %v1516_v1 = vpack.c.bf16 %v841_v63, %v840_v60 }
 0x130   :  { %1553 = vst [vmem:[%s1984_s2 + $0xf8] sm:$0xff] %v1521_v61  }
 0x131   :  { %1536 = vst [vmem:[%s1984_s2 + $0x70] sm:$0xff] %v1436_v0   ;;  %1552 = vst [vmem:[%s1984_s2 + $0xf0] sm:$0xff] %v1516_v1  }
 0x132   :  { %1168 = vsyncpa [#allocation3], 1 }

// kernel: discriminator_forward.5
= control target key start
LH: loop header
LB: loop body
LE: loop exit
PB: predicated region body
PF: predicated region fallthrough
CT: control target
= control target key end

     0   :  { %s5337_s15 = smov 0   ;;  %s5339_s16 = smov 0   ;;  %s6728_s0 = inlined_call_operand.vmem [shape: bf16[128,2048], index: 0, kind: input, shape index: {}]   ;;  %s6729_s1 = inlined_call_operand.vmem [shape: bf16[2048,256], index: 1, kind: input, shape index: {}]   ;;  %s6730_s2 = inlined_call_operand.vmem [shape: f32[1,256], index: 2, kind: input, shape index: {}]   ;;  %s6731_s3 = inlined_call_operand.vmem [shape: f32[1,256], index: 3, kind: input, shape index: {}]   ;;  %s6732_s4 = inlined_call_operand.vmem [shape: bf16[128,256], index: 4, kind: output, shape index: {}]  }
   0x1   :  { %s5341_s17 = smov 0  }
   0x2 LB: > { %s5353_s18 = sadd.s32 4294967295, %s5310_s17   ;;  %s5356_s19 = sadd.s32 1, %s5310_s17   ;;  %s5310_s17 = sphi %s5341_s17, %s6736_s17   ;;  %s5306_s16 = sphi %s5339_s16, %s6735_s16   ;;  %s5302_s15 = sphi %s5337_s15, %s6734_s15  }
   0x3   : > { %s39_s20 = ssub.s32 %s5310_s17, %s5356_s19  ;;  %s42_s21 = sadd.s32 1, %s5306_s16 }
   0x4   : > { %p40_p0 = scmp.eq.s32.totalorder %s39_s20, 0  ;;  %p49_p1 = scmp.ne.s32.totalorder %s5306_s16, %s5302_s15 }
   0x5   : > { %p50_p2 = scmp.eq.s32.totalorder %s5310_s17, 0  ;;  %p131_p3 = scmp.eq.s32.totalorder %s5353_s18, 1 }
   0x6   : > { %s5366_s22 = scalar_select %p40_p0, %s5306_s16, %s42_s21  }
   0x7   : > { %p51_p4 = por %p50_p2, %p49_p1  ;;  %p5368_p5 = por %p131_p3, %p49_p1 }
   0x8   : > { %p4277_p6 = scmp.ge.s32.totalorder %s5310_s17, 2 }
   0xa   : > { %156 = sbr.rel (%p4277_p6) target bundleno = 191 (0xbf), region = 20 }
  0x11   : > { %159 = sbr.rel (!%p51_p4) target bundleno = 191 (0xbf), region = 24  ;;  %s161_s24 = sand.u32 (%p51_p4), 1, %s5306_s16  }
  0x12   : > { %s4279_s25 = sshll.u32 (%p51_p4), %s5310_s17, 2  ;;  %s4278_s26 = sshll.u32 (%p51_p4), %s161_s24, 10 }
  0x13   : > { %s5378_s29 = scalar_lea.vmem (%p51_p4), %s6729_s1, %s4279_s25  ;;  %s5382_s30 = scalar_lea.vmem (%p51_p4), [#allocation2], %s4278_s26 }
  0x14   : > { %v181_v0 = vld [vmem:[%s5378_s29] sm:$0xf] (%p51_p4)  ;;  %v183_v1 = vld [vmem:[%s5378_s29 + $0x8] sm:$0xf] (%p51_p4)  ;;  %v185_v2 = vld [vmem:[%s5378_s29 + $0x10] sm:$0xf] (%p51_p4) }
  0x15   : > { %182 = vst [vmem:[%s5382_s30] sm:$0xf] (%p51_p4), %v181_v0  ;;  %184 = vst [vmem:[%s5382_s30 + $0x4] sm:$0xf] (%p51_p4), %v183_v1  ;;  %v187_v3 = vld [vmem:[%s5378_s29 + $0x18] sm:$0xf] (%p51_p4) }
  0x16   : > { %v189_v4 = vld [vmem:[%s5378_s29 + $0x20] sm:$0xf] (%p51_p4)  ;;  %186 = vst [vmem:[%s5382_s30 + $0x8] sm:$0xf] (%p51_p4), %v185_v2  ;;  %188 = vst [vmem:[%s5382_s30 + $0xc] sm:$0xf] (%p51_p4), %v187_v3 }
  0x17   : > { %190 = vst [vmem:[%s5382_s30 + $0x10] sm:$0xf] (%p51_p4), %v189_v4  ;;  %v191_v5 = vld [vmem:[%s5378_s29 + $0x28] sm:$0xf] (%p51_p4)  ;;  %v193_v6 = vld [vmem:[%s5378_s29 + $0x30] sm:$0xf] (%p51_p4) }
  0x18   : > { %v195_v7 = vld [vmem:[%s5378_s29 + $0x38] sm:$0xf]  ;;  %192 = vst [vmem:[%s5382_s30 + $0x14] sm:$0xf] %v191_v5  ;;  %194 = vst [vmem:[%s5382_s30 + $0x18] sm:$0xf] %v193_v6 }
  0x19   : > { %196 = vst [vmem:[%s5382_s30 + $0x1c] sm:$0xf] %v195_v7  ;;  %v197_v8 = vld [vmem:[%s5378_s29 + $0x40] sm:$0xf]  ;;  %v199_v9 = vld [vmem:[%s5378_s29 + $0x48] sm:$0xf] }
  0x1a   : > { %v201_v10 = vld [vmem:[%s5378_s29 + $0x50] sm:$0xf]  ;;  %198 = vst [vmem:[%s5382_s30 + $0x20] sm:$0xf] %v197_v8  ;;  %200 = vst [vmem:[%s5382_s30 + $0x24] sm:$0xf] %v199_v9 }
  0x1b   : > { %202 = vst [vmem:[%s5382_s30 + $0x28] sm:$0xf] %v201_v10  ;;  %v203_v11 = vld [vmem:[%s5378_s29 + $0x58] sm:$0xf]  ;;  %v205_v12 = vld [vmem:[%s5378_s29 + $0x60] sm:$0xf] }
  0x1c   : > { %v207_v13 = vld [vmem:[%s5378_s29 + $0x68] sm:$0xf]  ;;  %204 = vst [vmem:[%s5382_s30 + $0x2c] sm:$0xf] %v203_v11  ;;  %206 = vst [vmem:[%s5382_s30 + $0x30] sm:$0xf] %v205_v12 }
  0x1d   : > { %208 = vst [vmem:[%s5382_s30 + $0x34] sm:$0xf] %v207_v13  ;;  %v209_v14 = vld [vmem:[%s5378_s29 + $0x70] sm:$0xf]  ;;  %v211_v15 = vld [vmem:[%s5378_s29 + $0x78] sm:$0xf] }
  0x1e   : > { %v213_v16 = vld [vmem:[%s5378_s29 + $0x80] sm:$0xf]  ;;  %210 = vst [vmem:[%s5382_s30 + $0x38] sm:$0xf] %v209_v14  ;;  %212 = vst [vmem:[%s5382_s30 + $0x3c] sm:$0xf] %v211_v15 }
  0x1f   : > { %214 = vst [vmem:[%s5382_s30 + $0x40] sm:$0xf] %v213_v16  ;;  %v215_v17 = vld [vmem:[%s5378_s29 + $0x88] sm:$0xf]  ;;  %v217_v18 = vld [vmem:[%s5378_s29 + $0x90] sm:$0xf] }
  0x20   : > { %v219_v19 = vld [vmem:[%s5378_s29 + $0x98] sm:$0xf]  ;;  %216 = vst [vmem:[%s5382_s30 + $0x44] sm:$0xf] %v215_v17  ;;  %218 = vst [vmem:[%s5382_s30 + $0x48] sm:$0xf] %v217_v18 }
  0x21   : > { %220 = vst [vmem:[%s5382_s30 + $0x4c] sm:$0xf] %v219_v19  ;;  %v221_v20 = vld [vmem:[%s5378_s29 + $0xa0] sm:$0xf]  ;;  %v223_v21 = vld [vmem:[%s5378_s29 + $0xa8] sm:$0xf] }
  0x22   : > { %v225_v22 = vld [vmem:[%s5378_s29 + $0xb0] sm:$0xf]  ;;  %222 = vst [vmem:[%s5382_s30 + $0x50] sm:$0xf] %v221_v20  ;;  %224 = vst [vmem:[%s5382_s30 + $0x54] sm:$0xf] %v223_v21 }
  0x23   : > { %226 = vst [vmem:[%s5382_s30 + $0x58] sm:$0xf] %v225_v22  ;;  %v227_v23 = vld [vmem:[%s5378_s29 + $0xb8] sm:$0xf]  ;;  %v229_v24 = vld [vmem:[%s5378_s29 + $0xc0] sm:$0xf] }
  0x24   : > { %v231_v25 = vld [vmem:[%s5378_s29 + $0xc8] sm:$0xf]  ;;  %228 = vst [vmem:[%s5382_s30 + $0x5c] sm:$0xf] %v227_v23  ;;  %230 = vst [vmem:[%s5382_s30 + $0x60] sm:$0xf] %v229_v24 }
  0x25   : > { %232 = vst [vmem:[%s5382_s30 + $0x64] sm:$0xf] %v231_v25  ;;  %v233_v26 = vld [vmem:[%s5378_s29 + $0xd0] sm:$0xf]  ;;  %v235_v27 = vld [vmem:[%s5378_s29 + $0xd8] sm:$0xf] }
  0x26   : > { %v237_v28 = vld [vmem:[%s5378_s29 + $0xe0] sm:$0xf]  ;;  %234 = vst [vmem:[%s5382_s30 + $0x68] sm:$0xf] %v233_v26  ;;  %236 = vst [vmem:[%s5382_s30 + $0x6c] sm:$0xf] %v235_v27 }
  0x27   : > { %238 = vst [vmem:[%s5382_s30 + $0x70] sm:$0xf] %v237_v28  ;;  %v239_v29 = vld [vmem:[%s5378_s29 + $0xe8] sm:$0xf]  ;;  %v241_v30 = vld [vmem:[%s5378_s29 + $0xf0] sm:$0xf] }
  0x28   : > { %v243_v31 = vld [vmem:[%s5378_s29 + $0xf8] sm:$0xf]  ;;  %240 = vst [vmem:[%s5382_s30 + $0x74] sm:$0xf] %v239_v29  ;;  %242 = vst [vmem:[%s5382_s30 + $0x78] sm:$0xf] %v241_v30 }
  0x29   : > { %244 = vst [vmem:[%s5382_s30 + $0x7c] sm:$0xf] %v243_v31  ;;  %v245_v32 = vld [vmem:[%s5378_s29 + $0x100] sm:$0xf]  ;;  %v247_v33 = vld [vmem:[%s5378_s29 + $0x108] sm:$0xf] }
  0x2a   : > { %v249_v34 = vld [vmem:[%s5378_s29 + $0x110] sm:$0xf]  ;;  %246 = vst [vmem:[%s5382_s30 + $0x80] sm:$0xf] %v245_v32  ;;  %248 = vst [vmem:[%s5382_s30 + $0x84] sm:$0xf] %v247_v33 }
  0x2b   : > { %250 = vst [vmem:[%s5382_s30 + $0x88] sm:$0xf] %v249_v34  ;;  %v251_v35 = vld [vmem:[%s5378_s29 + $0x118] sm:$0xf]  ;;  %v253_v36 = vld [vmem:[%s5378_s29 + $0x120] sm:$0xf] }
  0x2c   : > { %v255_v37 = vld [vmem:[%s5378_s29 + $0x128] sm:$0xf]  ;;  %252 = vst [vmem:[%s5382_s30 + $0x8c] sm:$0xf] %v251_v35  ;;  %254 = vst [vmem:[%s5382_s30 + $0x90] sm:$0xf] %v253_v36 }
  0x2d   : > { %256 = vst [vmem:[%s5382_s30 + $0x94] sm:$0xf] %v255_v37  ;;  %v257_v38 = vld [vmem:[%s5378_s29 + $0x130] sm:$0xf]  ;;  %v259_v39 = vld [vmem:[%s5378_s29 + $0x138] sm:$0xf] }
  0x2e   : > { %v261_v40 = vld [vmem:[%s5378_s29 + $0x140] sm:$0xf]  ;;  %258 = vst [vmem:[%s5382_s30 + $0x98] sm:$0xf] %v257_v38  ;;  %260 = vst [vmem:[%s5382_s30 + $0x9c] sm:$0xf] %v259_v39 }
  0x2f   : > { %262 = vst [vmem:[%s5382_s30 + $0xa0] sm:$0xf] %v261_v40  ;;  %v263_v41 = vld [vmem:[%s5378_s29 + $0x148] sm:$0xf]  ;;  %v265_v42 = vld [vmem:[%s5378_s29 + $0x150] sm:$0xf] }
  0x30   : > { %v267_v43 = vld [vmem:[%s5378_s29 + $0x158] sm:$0xf]  ;;  %264 = vst [vmem:[%s5382_s30 + $0xa4] sm:$0xf] %v263_v41  ;;  %266 = vst [vmem:[%s5382_s30 + $0xa8] sm:$0xf] %v265_v42 }
  0x31   : > { %268 = vst [vmem:[%s5382_s30 + $0xac] sm:$0xf] %v267_v43  ;;  %v269_v44 = vld [vmem:[%s5378_s29 + $0x160] sm:$0xf]  ;;  %v271_v45 = vld [vmem:[%s5378_s29 + $0x168] sm:$0xf] }
  0x32   : > { %v273_v46 = vld [vmem:[%s5378_s29 + $0x170] sm:$0xf]  ;;  %270 = vst [vmem:[%s5382_s30 + $0xb0] sm:$0xf] %v269_v44  ;;  %272 = vst [vmem:[%s5382_s30 + $0xb4] sm:$0xf] %v271_v45 }
  0x33   : > { %274 = vst [vmem:[%s5382_s30 + $0xb8] sm:$0xf] %v273_v46  ;;  %v275_v47 = vld [vmem:[%s5378_s29 + $0x178] sm:$0xf]  ;;  %v277_v48 = vld [vmem:[%s5378_s29 + $0x180] sm:$0xf] }
  0x34   : > { %v279_v49 = vld [vmem:[%s5378_s29 + $0x188] sm:$0xf]  ;;  %276 = vst [vmem:[%s5382_s30 + $0xbc] sm:$0xf] %v275_v47  ;;  %278 = vst [vmem:[%s5382_s30 + $0xc0] sm:$0xf] %v277_v48 }
  0x35   : > { %280 = vst [vmem:[%s5382_s30 + $0xc4] sm:$0xf] %v279_v49  ;;  %v281_v50 = vld [vmem:[%s5378_s29 + $0x190] sm:$0xf]  ;;  %v283_v51 = vld [vmem:[%s5378_s29 + $0x198] sm:$0xf] }
  0x36   : > { %v285_v52 = vld [vmem:[%s5378_s29 + $0x1a0] sm:$0xf]  ;;  %282 = vst [vmem:[%s5382_s30 + $0xc8] sm:$0xf] %v281_v50  ;;  %284 = vst [vmem:[%s5382_s30 + $0xcc] sm:$0xf] %v283_v51 }
  0x37   : > { %286 = vst [vmem:[%s5382_s30 + $0xd0] sm:$0xf] %v285_v52  ;;  %v287_v53 = vld [vmem:[%s5378_s29 + $0x1a8] sm:$0xf]  ;;  %v289_v54 = vld [vmem:[%s5378_s29 + $0x1b0] sm:$0xf] }
  0x38   : > { %v291_v55 = vld [vmem:[%s5378_s29 + $0x1b8] sm:$0xf]  ;;  %288 = vst [vmem:[%s5382_s30 + $0xd4] sm:$0xf] %v287_v53  ;;  %290 = vst [vmem:[%s5382_s30 + $0xd8] sm:$0xf] %v289_v54 }
  0x39   : > { %292 = vst [vmem:[%s5382_s30 + $0xdc] sm:$0xf] %v291_v55  ;;  %v293_v56 = vld [vmem:[%s5378_s29 + $0x1c0] sm:$0xf]  ;;  %v295_v57 = vld [vmem:[%s5378_s29 + $0x1c8] sm:$0xf] }
  0x3a   : > { %v297_v58 = vld [vmem:[%s5378_s29 + $0x1d0] sm:$0xf]  ;;  %294 = vst [vmem:[%s5382_s30 + $0xe0] sm:$0xf] %v293_v56  ;;  %296 = vst [vmem:[%s5382_s30 + $0xe4] sm:$0xf] %v295_v57 }
  0x3b   : > { %298 = vst [vmem:[%s5382_s30 + $0xe8] sm:$0xf] %v297_v58  ;;  %v299_v59 = vld [vmem:[%s5378_s29 + $0x1d8] sm:$0xf]  ;;  %v301_v60 = vld [vmem:[%s5378_s29 + $0x1e0] sm:$0xf] }
  0x3c   : > { %v303_v61 = vld [vmem:[%s5378_s29 + $0x1e8] sm:$0xf]  ;;  %300 = vst [vmem:[%s5382_s30 + $0xec] sm:$0xf] %v299_v59  ;;  %302 = vst [vmem:[%s5382_s30 + $0xf0] sm:$0xf] %v301_v60 }
  0x3d   : > { %304 = vst [vmem:[%s5382_s30 + $0xf4] sm:$0xf] %v303_v61  ;;  %v305_v62 = vld [vmem:[%s5378_s29 + $0x1f0] sm:$0xf]  ;;  %v307_v63 = vld [vmem:[%s5378_s29 + $0x1f8] sm:$0xf] }
  0x3e   : > { %v309_v0 = vld [vmem:[%s5378_s29 + $0x200] sm:$0xf]  ;;  %306 = vst [vmem:[%s5382_s30 + $0xf8] sm:$0xf] %v305_v62  ;;  %308 = vst [vmem:[%s5382_s30 + $0xfc] sm:$0xf] %v307_v63 }
  0x3f   : > { %310 = vst [vmem:[%s5382_s30 + $0x100] sm:$0xf] %v309_v0  ;;  %v311_v1 = vld [vmem:[%s5378_s29 + $0x208] sm:$0xf]  ;;  %v313_v2 = vld [vmem:[%s5378_s29 + $0x210] sm:$0xf] }
  0x40   : > { %v315_v3 = vld [vmem:[%s5378_s29 + $0x218] sm:$0xf]  ;;  %312 = vst [vmem:[%s5382_s30 + $0x104] sm:$0xf] %v311_v1  ;;  %314 = vst [vmem:[%s5382_s30 + $0x108] sm:$0xf] %v313_v2 }
  0x41   : > { %316 = vst [vmem:[%s5382_s30 + $0x10c] sm:$0xf] %v315_v3  ;;  %v317_v4 = vld [vmem:[%s5378_s29 + $0x220] sm:$0xf]  ;;  %v319_v5 = vld [vmem:[%s5378_s29 + $0x228] sm:$0xf] }
  0x42   : > { %v321_v6 = vld [vmem:[%s5378_s29 + $0x230] sm:$0xf]  ;;  %318 = vst [vmem:[%s5382_s30 + $0x110] sm:$0xf] %v317_v4  ;;  %320 = vst [vmem:[%s5382_s30 + $0x114] sm:$0xf] %v319_v5 }
  0x43   : > { %322 = vst [vmem:[%s5382_s30 + $0x118] sm:$0xf] %v321_v6  ;;  %v323_v7 = vld [vmem:[%s5378_s29 + $0x238] sm:$0xf]  ;;  %v325_v8 = vld [vmem:[%s5378_s29 + $0x240] sm:$0xf] }
  0x44   : > { %v327_v9 = vld [vmem:[%s5378_s29 + $0x248] sm:$0xf]  ;;  %324 = vst [vmem:[%s5382_s30 + $0x11c] sm:$0xf] %v323_v7  ;;  %326 = vst [vmem:[%s5382_s30 + $0x120] sm:$0xf] %v325_v8 }
  0x45   : > { %328 = vst [vmem:[%s5382_s30 + $0x124] sm:$0xf] %v327_v9  ;;  %v329_v10 = vld [vmem:[%s5378_s29 + $0x250] sm:$0xf]  ;;  %v331_v11 = vld [vmem:[%s5378_s29 + $0x258] sm:$0xf] }
  0x46   : > { %v333_v12 = vld [vmem:[%s5378_s29 + $0x260] sm:$0xf]  ;;  %330 = vst [vmem:[%s5382_s30 + $0x128] sm:$0xf] %v329_v10  ;;  %332 = vst [vmem:[%s5382_s30 + $0x12c] sm:$0xf] %v331_v11 }
  0x47   : > { %334 = vst [vmem:[%s5382_s30 + $0x130] sm:$0xf] %v333_v12  ;;  %v335_v13 = vld [vmem:[%s5378_s29 + $0x268] sm:$0xf]  ;;  %v337_v14 = vld [vmem:[%s5378_s29 + $0x270] sm:$0xf] }
  0x48   : > { %v339_v15 = vld [vmem:[%s5378_s29 + $0x278] sm:$0xf]  ;;  %336 = vst [vmem:[%s5382_s30 + $0x134] sm:$0xf] %v335_v13  ;;  %338 = vst [vmem:[%s5382_s30 + $0x138] sm:$0xf] %v337_v14 }
  0x49   : > { %340 = vst [vmem:[%s5382_s30 + $0x13c] sm:$0xf] %v339_v15  ;;  %v341_v16 = vld [vmem:[%s5378_s29 + $0x280] sm:$0xf]  ;;  %v343_v17 = vld [vmem:[%s5378_s29 + $0x288] sm:$0xf] }
  0x4a   : > { %v345_v18 = vld [vmem:[%s5378_s29 + $0x290] sm:$0xf]  ;;  %342 = vst [vmem:[%s5382_s30 + $0x140] sm:$0xf] %v341_v16  ;;  %344 = vst [vmem:[%s5382_s30 + $0x144] sm:$0xf] %v343_v17 }
  0x4b   : > { %346 = vst [vmem:[%s5382_s30 + $0x148] sm:$0xf] %v345_v18  ;;  %v347_v19 = vld [vmem:[%s5378_s29 + $0x298] sm:$0xf]  ;;  %v349_v20 = vld [vmem:[%s5378_s29 + $0x2a0] sm:$0xf] }
  0x4c   : > { %v351_v21 = vld [vmem:[%s5378_s29 + $0x2a8] sm:$0xf]  ;;  %348 = vst [vmem:[%s5382_s30 + $0x14c] sm:$0xf] %v347_v19  ;;  %350 = vst [vmem:[%s5382_s30 + $0x150] sm:$0xf] %v349_v20 }
  0x4d   : > { %352 = vst [vmem:[%s5382_s30 + $0x154] sm:$0xf] %v351_v21  ;;  %v353_v22 = vld [vmem:[%s5378_s29 + $0x2b0] sm:$0xf]  ;;  %v355_v23 = vld [vmem:[%s5378_s29 + $0x2b8] sm:$0xf] }
  0x4e   : > { %v357_v24 = vld [vmem:[%s5378_s29 + $0x2c0] sm:$0xf]  ;;  %354 = vst [vmem:[%s5382_s30 + $0x158] sm:$0xf] %v353_v22  ;;  %356 = vst [vmem:[%s5382_s30 + $0x15c] sm:$0xf] %v355_v23 }
  0x4f   : > { %358 = vst [vmem:[%s5382_s30 + $0x160] sm:$0xf] %v357_v24  ;;  %v359_v25 = vld [vmem:[%s5378_s29 + $0x2c8] sm:$0xf]  ;;  %v361_v26 = vld [vmem:[%s5378_s29 + $0x2d0] sm:$0xf] }
  0x50   : > { %v363_v27 = vld [vmem:[%s5378_s29 + $0x2d8] sm:$0xf]  ;;  %360 = vst [vmem:[%s5382_s30 + $0x164] sm:$0xf] %v359_v25  ;;  %362 = vst [vmem:[%s5382_s30 + $0x168] sm:$0xf] %v361_v26 }
  0x51   : > { %364 = vst [vmem:[%s5382_s30 + $0x16c] sm:$0xf] %v363_v27  ;;  %v365_v28 = vld [vmem:[%s5378_s29 + $0x2e0] sm:$0xf]  ;;  %v367_v29 = vld [vmem:[%s5378_s29 + $0x2e8] sm:$0xf] }
  0x52   : > { %v369_v30 = vld [vmem:[%s5378_s29 + $0x2f0] sm:$0xf]  ;;  %366 = vst [vmem:[%s5382_s30 + $0x170] sm:$0xf] %v365_v28  ;;  %368 = vst [vmem:[%s5382_s30 + $0x174] sm:$0xf] %v367_v29 }
  0x53   : > { %370 = vst [vmem:[%s5382_s30 + $0x178] sm:$0xf] %v369_v30  ;;  %v371_v31 = vld [vmem:[%s5378_s29 + $0x2f8] sm:$0xf]  ;;  %v373_v32 = vld [vmem:[%s5378_s29 + $0x300] sm:$0xf] }
  0x54   : > { %v375_v33 = vld [vmem:[%s5378_s29 + $0x308] sm:$0xf]  ;;  %372 = vst [vmem:[%s5382_s30 + $0x17c] sm:$0xf] %v371_v31  ;;  %374 = vst [vmem:[%s5382_s30 + $0x180] sm:$0xf] %v373_v32 }
  0x55   : > { %376 = vst [vmem:[%s5382_s30 + $0x184] sm:$0xf] %v375_v33  ;;  %v377_v34 = vld [vmem:[%s5378_s29 + $0x310] sm:$0xf]  ;;  %v379_v35 = vld [vmem:[%s5378_s29 + $0x318] sm:$0xf] }
  0x56   : > { %v381_v36 = vld [vmem:[%s5378_s29 + $0x320] sm:$0xf]  ;;  %378 = vst [vmem:[%s5382_s30 + $0x188] sm:$0xf] %v377_v34  ;;  %380 = vst [vmem:[%s5382_s30 + $0x18c] sm:$0xf] %v379_v35 }
  0x57   : > { %382 = vst [vmem:[%s5382_s30 + $0x190] sm:$0xf] %v381_v36  ;;  %v383_v37 = vld [vmem:[%s5378_s29 + $0x328] sm:$0xf]  ;;  %v385_v38 = vld [vmem:[%s5378_s29 + $0x330] sm:$0xf] }
  0x58   : > { %v387_v39 = vld [vmem:[%s5378_s29 + $0x338] sm:$0xf]  ;;  %384 = vst [vmem:[%s5382_s30 + $0x194] sm:$0xf] %v383_v37  ;;  %386 = vst [vmem:[%s5382_s30 + $0x198] sm:$0xf] %v385_v38 }
  0x59   : > { %388 = vst [vmem:[%s5382_s30 + $0x19c] sm:$0xf] %v387_v39  ;;  %v389_v40 = vld [vmem:[%s5378_s29 + $0x340] sm:$0xf]  ;;  %v391_v41 = vld [vmem:[%s5378_s29 + $0x348] sm:$0xf] }
  0x5a   : > { %v393_v42 = vld [vmem:[%s5378_s29 + $0x350] sm:$0xf]  ;;  %390 = vst [vmem:[%s5382_s30 + $0x1a0] sm:$0xf] %v389_v40  ;;  %392 = vst [vmem:[%s5382_s30 + $0x1a4] sm:$0xf] %v391_v41 }
  0x5b   : > { %394 = vst [vmem:[%s5382_s30 + $0x1a8] sm:$0xf] %v393_v42  ;;  %v395_v43 = vld [vmem:[%s5378_s29 + $0x358] sm:$0xf]  ;;  %v397_v44 = vld [vmem:[%s5378_s29 + $0x360] sm:$0xf] }
  0x5c   : > { %v399_v45 = vld [vmem:[%s5378_s29 + $0x368] sm:$0xf]  ;;  %396 = vst [vmem:[%s5382_s30 + $0x1ac] sm:$0xf] %v395_v43  ;;  %398 = vst [vmem:[%s5382_s30 + $0x1b0] sm:$0xf] %v397_v44 }
  0x5d   : > { %400 = vst [vmem:[%s5382_s30 + $0x1b4] sm:$0xf] %v399_v45  ;;  %v401_v46 = vld [vmem:[%s5378_s29 + $0x370] sm:$0xf]  ;;  %v403_v47 = vld [vmem:[%s5378_s29 + $0x378] sm:$0xf] }
  0x5e   : > { %v405_v48 = vld [vmem:[%s5378_s29 + $0x380] sm:$0xf]  ;;  %402 = vst [vmem:[%s5382_s30 + $0x1b8] sm:$0xf] %v401_v46  ;;  %404 = vst [vmem:[%s5382_s30 + $0x1bc] sm:$0xf] %v403_v47 }
  0x5f   : > { %406 = vst [vmem:[%s5382_s30 + $0x1c0] sm:$0xf] %v405_v48  ;;  %v407_v49 = vld [vmem:[%s5378_s29 + $0x388] sm:$0xf]  ;;  %v409_v50 = vld [vmem:[%s5378_s29 + $0x390] sm:$0xf] }
  0x60   : > { %v411_v51 = vld [vmem:[%s5378_s29 + $0x398] sm:$0xf]  ;;  %408 = vst [vmem:[%s5382_s30 + $0x1c4] sm:$0xf] %v407_v49  ;;  %410 = vst [vmem:[%s5382_s30 + $0x1c8] sm:$0xf] %v409_v50 }
  0x61   : > { %412 = vst [vmem:[%s5382_s30 + $0x1cc] sm:$0xf] %v411_v51  ;;  %v413_v52 = vld [vmem:[%s5378_s29 + $0x3a0] sm:$0xf]  ;;  %v415_v53 = vld [vmem:[%s5378_s29 + $0x3a8] sm:$0xf] }
  0x62   : > { %v417_v54 = vld [vmem:[%s5378_s29 + $0x3b0] sm:$0xf]  ;;  %414 = vst [vmem:[%s5382_s30 + $0x1d0] sm:$0xf] %v413_v52  ;;  %416 = vst [vmem:[%s5382_s30 + $0x1d4] sm:$0xf] %v415_v53 }
  0x63   : > { %418 = vst [vmem:[%s5382_s30 + $0x1d8] sm:$0xf] %v417_v54  ;;  %v419_v55 = vld [vmem:[%s5378_s29 + $0x3b8] sm:$0xf]  ;;  %v421_v56 = vld [vmem:[%s5378_s29 + $0x3c0] sm:$0xf] }
  0x64   : > { %v423_v57 = vld [vmem:[%s5378_s29 + $0x3c8] sm:$0xf]  ;;  %420 = vst [vmem:[%s5382_s30 + $0x1dc] sm:$0xf] %v419_v55  ;;  %422 = vst [vmem:[%s5382_s30 + $0x1e0] sm:$0xf] %v421_v56 }
  0x65   : > { %424 = vst [vmem:[%s5382_s30 + $0x1e4] sm:$0xf] %v423_v57  ;;  %v425_v58 = vld [vmem:[%s5378_s29 + $0x3d0] sm:$0xf]  ;;  %v427_v59 = vld [vmem:[%s5378_s29 + $0x3d8] sm:$0xf] }
  0x66   : > { %v429_v60 = vld [vmem:[%s5378_s29 + $0x3e0] sm:$0xf]  ;;  %426 = vst [vmem:[%s5382_s30 + $0x1e8] sm:$0xf] %v425_v58  ;;  %428 = vst [vmem:[%s5382_s30 + $0x1ec] sm:$0xf] %v427_v59 }
  0x67   : > { %430 = vst [vmem:[%s5382_s30 + $0x1f0] sm:$0xf] %v429_v60  ;;  %v431_v61 = vld [vmem:[%s5378_s29 + $0x3e8] sm:$0xf]  ;;  %v433_v62 = vld [vmem:[%s5378_s29 + $0x3f0] sm:$0xf] }
  0x68   : > { %v435_v63 = vld [vmem:[%s5378_s29 + $0x3f8] sm:$0xf]  ;;  %432 = vst [vmem:[%s5382_s30 + $0x1f4] sm:$0xf] %v431_v61  ;;  %434 = vst [vmem:[%s5382_s30 + $0x1f8] sm:$0xf] %v433_v62 }
  0x69   : > { %436 = vst [vmem:[%s5382_s30 + $0x1fc] sm:$0xf] %v435_v63  ;;  %v437_v0 = vld [vmem:[%s5378_s29 + $0x400] sm:$0xf]  ;;  %v439_v1 = vld [vmem:[%s5378_s29 + $0x408] sm:$0xf] }
  0x6a   : > { %v441_v2 = vld [vmem:[%s5378_s29 + $0x410] sm:$0xf]  ;;  %438 = vst [vmem:[%s5382_s30 + $0x200] sm:$0xf] %v437_v0  ;;  %440 = vst [vmem:[%s5382_s30 + $0x204] sm:$0xf] %v439_v1 }
  0x6b   : > { %442 = vst [vmem:[%s5382_s30 + $0x208] sm:$0xf] %v441_v2  ;;  %v443_v3 = vld [vmem:[%s5378_s29 + $0x418] sm:$0xf]  ;;  %v445_v4 = vld [vmem:[%s5378_s29 + $0x420] sm:$0xf] }
  0x6c   : > { %v447_v5 = vld [vmem:[%s5378_s29 + $0x428] sm:$0xf]  ;;  %444 = vst [vmem:[%s5382_s30 + $0x20c] sm:$0xf] %v443_v3  ;;  %446 = vst [vmem:[%s5382_s30 + $0x210] sm:$0xf] %v445_v4 }
  0x6d   : > { %448 = vst [vmem:[%s5382_s30 + $0x214] sm:$0xf] %v447_v5  ;;  %v449_v6 = vld [vmem:[%s5378_s29 + $0x430] sm:$0xf]  ;;  %v451_v7 = vld [vmem:[%s5378_s29 + $0x438] sm:$0xf] }
  0x6e   : > { %v453_v8 = vld [vmem:[%s5378_s29 + $0x440] sm:$0xf]  ;;  %450 = vst [vmem:[%s5382_s30 + $0x218] sm:$0xf] %v449_v6  ;;  %452 = vst [vmem:[%s5382_s30 + $0x21c] sm:$0xf] %v451_v7 }
  0x6f   : > { %454 = vst [vmem:[%s5382_s30 + $0x220] sm:$0xf] %v453_v8  ;;  %v455_v9 = vld [vmem:[%s5378_s29 + $0x448] sm:$0xf]  ;;  %v457_v10 = vld [vmem:[%s5378_s29 + $0x450] sm:$0xf] }
  0x70   : > { %v459_v11 = vld [vmem:[%s5378_s29 + $0x458] sm:$0xf]  ;;  %456 = vst [vmem:[%s5382_s30 + $0x224] sm:$0xf] %v455_v9  ;;  %458 = vst [vmem:[%s5382_s30 + $0x228] sm:$0xf] %v457_v10 }
  0x71   : > { %460 = vst [vmem:[%s5382_s30 + $0x22c] sm:$0xf] %v459_v11  ;;  %v461_v12 = vld [vmem:[%s5378_s29 + $0x460] sm:$0xf]  ;;  %v463_v13 = vld [vmem:[%s5378_s29 + $0x468] sm:$0xf] }
  0x72   : > { %v465_v14 = vld [vmem:[%s5378_s29 + $0x470] sm:$0xf]  ;;  %462 = vst [vmem:[%s5382_s30 + $0x230] sm:$0xf] %v461_v12  ;;  %464 = vst [vmem:[%s5382_s30 + $0x234] sm:$0xf] %v463_v13 }
  0x73   : > { %466 = vst [vmem:[%s5382_s30 + $0x238] sm:$0xf] %v465_v14  ;;  %v467_v15 = vld [vmem:[%s5378_s29 + $0x478] sm:$0xf]  ;;  %v469_v16 = vld [vmem:[%s5378_s29 + $0x480] sm:$0xf] }
  0x74   : > { %v471_v17 = vld [vmem:[%s5378_s29 + $0x488] sm:$0xf]  ;;  %468 = vst [vmem:[%s5382_s30 + $0x23c] sm:$0xf] %v467_v15  ;;  %470 = vst [vmem:[%s5382_s30 + $0x240] sm:$0xf] %v469_v16 }
  0x75   : > { %472 = vst [vmem:[%s5382_s30 + $0x244] sm:$0xf] %v471_v17  ;;  %v473_v18 = vld [vmem:[%s5378_s29 + $0x490] sm:$0xf]  ;;  %v475_v19 = vld [vmem:[%s5378_s29 + $0x498] sm:$0xf] }
  0x76   : > { %v477_v20 = vld [vmem:[%s5378_s29 + $0x4a0] sm:$0xf]  ;;  %474 = vst [vmem:[%s5382_s30 + $0x248] sm:$0xf] %v473_v18  ;;  %476 = vst [vmem:[%s5382_s30 + $0x24c] sm:$0xf] %v475_v19 }
  0x77   : > { %478 = vst [vmem:[%s5382_s30 + $0x250] sm:$0xf] %v477_v20  ;;  %v479_v21 = vld [vmem:[%s5378_s29 + $0x4a8] sm:$0xf]  ;;  %v481_v22 = vld [vmem:[%s5378_s29 + $0x4b0] sm:$0xf] }
  0x78   : > { %v483_v23 = vld [vmem:[%s5378_s29 + $0x4b8] sm:$0xf]  ;;  %480 = vst [vmem:[%s5382_s30 + $0x254] sm:$0xf] %v479_v21  ;;  %482 = vst [vmem:[%s5382_s30 + $0x258] sm:$0xf] %v481_v22 }
  0x79   : > { %484 = vst [vmem:[%s5382_s30 + $0x25c] sm:$0xf] %v483_v23  ;;  %v485_v24 = vld [vmem:[%s5378_s29 + $0x4c0] sm:$0xf]  ;;  %v487_v25 = vld [vmem:[%s5378_s29 + $0x4c8] sm:$0xf] }
  0x7a   : > { %v489_v26 = vld [vmem:[%s5378_s29 + $0x4d0] sm:$0xf]  ;;  %486 = vst [vmem:[%s5382_s30 + $0x260] sm:$0xf] %v485_v24  ;;  %488 = vst [vmem:[%s5382_s30 + $0x264] sm:$0xf] %v487_v25 }
  0x7b   : > { %490 = vst [vmem:[%s5382_s30 + $0x268] sm:$0xf] %v489_v26  ;;  %v491_v27 = vld [vmem:[%s5378_s29 + $0x4d8] sm:$0xf]  ;;  %v493_v28 = vld [vmem:[%s5378_s29 + $0x4e0] sm:$0xf] }
  0x7c   : > { %v495_v29 = vld [vmem:[%s5378_s29 + $0x4e8] sm:$0xf]  ;;  %492 = vst [vmem:[%s5382_s30 + $0x26c] sm:$0xf] %v491_v27  ;;  %494 = vst [vmem:[%s5382_s30 + $0x270] sm:$0xf] %v493_v28 }
  0x7d   : > { %496 = vst [vmem:[%s5382_s30 + $0x274] sm:$0xf] %v495_v29  ;;  %v497_v30 = vld [vmem:[%s5378_s29 + $0x4f0] sm:$0xf]  ;;  %v499_v31 = vld [vmem:[%s5378_s29 + $0x4f8] sm:$0xf] }
  0x7e   : > { %v501_v32 = vld [vmem:[%s5378_s29 + $0x500] sm:$0xf]  ;;  %498 = vst [vmem:[%s5382_s30 + $0x278] sm:$0xf] %v497_v30  ;;  %500 = vst [vmem:[%s5382_s30 + $0x27c] sm:$0xf] %v499_v31 }
  0x7f   : > { %502 = vst [vmem:[%s5382_s30 + $0x280] sm:$0xf] %v501_v32  ;;  %v503_v33 = vld [vmem:[%s5378_s29 + $0x508] sm:$0xf]  ;;  %v505_v34 = vld [vmem:[%s5378_s29 + $0x510] sm:$0xf] }
  0x80   : > { %v507_v35 = vld [vmem:[%s5378_s29 + $0x518] sm:$0xf]  ;;  %504 = vst [vmem:[%s5382_s30 + $0x284] sm:$0xf] %v503_v33  ;;  %506 = vst [vmem:[%s5382_s30 + $0x288] sm:$0xf] %v505_v34 }
  0x81   : > { %508 = vst [vmem:[%s5382_s30 + $0x28c] sm:$0xf] %v507_v35  ;;  %v509_v36 = vld [vmem:[%s5378_s29 + $0x520] sm:$0xf]  ;;  %v511_v37 = vld [vmem:[%s5378_s29 + $0x528] sm:$0xf] }
  0x82   : > { %v513_v38 = vld [vmem:[%s5378_s29 + $0x530] sm:$0xf]  ;;  %510 = vst [vmem:[%s5382_s30 + $0x290] sm:$0xf] %v509_v36  ;;  %512 = vst [vmem:[%s5382_s30 + $0x294] sm:$0xf] %v511_v37 }
  0x83   : > { %514 = vst [vmem:[%s5382_s30 + $0x298] sm:$0xf] %v513_v38  ;;  %v515_v39 = vld [vmem:[%s5378_s29 + $0x538] sm:$0xf]  ;;  %v517_v40 = vld [vmem:[%s5378_s29 + $0x540] sm:$0xf] }
  0x84   : > { %v519_v41 = vld [vmem:[%s5378_s29 + $0x548] sm:$0xf]  ;;  %516 = vst [vmem:[%s5382_s30 + $0x29c] sm:$0xf] %v515_v39  ;;  %518 = vst [vmem:[%s5382_s30 + $0x2a0] sm:$0xf] %v517_v40 }
  0x85   : > { %520 = vst [vmem:[%s5382_s30 + $0x2a4] sm:$0xf] %v519_v41  ;;  %v521_v42 = vld [vmem:[%s5378_s29 + $0x550] sm:$0xf]  ;;  %v523_v43 = vld [vmem:[%s5378_s29 + $0x558] sm:$0xf] }
  0x86   : > { %v525_v44 = vld [vmem:[%s5378_s29 + $0x560] sm:$0xf]  ;;  %522 = vst [vmem:[%s5382_s30 + $0x2a8] sm:$0xf] %v521_v42  ;;  %524 = vst [vmem:[%s5382_s30 + $0x2ac] sm:$0xf] %v523_v43 }
  0x87   : > { %526 = vst [vmem:[%s5382_s30 + $0x2b0] sm:$0xf] %v525_v44  ;;  %v527_v45 = vld [vmem:[%s5378_s29 + $0x568] sm:$0xf]  ;;  %v529_v46 = vld [vmem:[%s5378_s29 + $0x570] sm:$0xf] }
  0x88   : > { %v531_v47 = vld [vmem:[%s5378_s29 + $0x578] sm:$0xf]  ;;  %528 = vst [vmem:[%s5382_s30 + $0x2b4] sm:$0xf] %v527_v45  ;;  %530 = vst [vmem:[%s5382_s30 + $0x2b8] sm:$0xf] %v529_v46 }
  0x89   : > { %532 = vst [vmem:[%s5382_s30 + $0x2bc] sm:$0xf] %v531_v47  ;;  %v533_v48 = vld [vmem:[%s5378_s29 + $0x580] sm:$0xf]  ;;  %v535_v49 = vld [vmem:[%s5378_s29 + $0x588] sm:$0xf] }
  0x8a   : > { %v537_v50 = vld [vmem:[%s5378_s29 + $0x590] sm:$0xf]  ;;  %534 = vst [vmem:[%s5382_s30 + $0x2c0] sm:$0xf] %v533_v48  ;;  %536 = vst [vmem:[%s5382_s30 + $0x2c4] sm:$0xf] %v535_v49 }
  0x8b   : > { %538 = vst [vmem:[%s5382_s30 + $0x2c8] sm:$0xf] %v537_v50  ;;  %v539_v51 = vld [vmem:[%s5378_s29 + $0x598] sm:$0xf]  ;;  %v541_v52 = vld [vmem:[%s5378_s29 + $0x5a0] sm:$0xf] }
  0x8c   : > { %v543_v53 = vld [vmem:[%s5378_s29 + $0x5a8] sm:$0xf]  ;;  %540 = vst [vmem:[%s5382_s30 + $0x2cc] sm:$0xf] %v539_v51  ;;  %542 = vst [vmem:[%s5382_s30 + $0x2d0] sm:$0xf] %v541_v52 }
  0x8d   : > { %544 = vst [vmem:[%s5382_s30 + $0x2d4] sm:$0xf] %v543_v53  ;;  %v545_v54 = vld [vmem:[%s5378_s29 + $0x5b0] sm:$0xf]  ;;  %v547_v55 = vld [vmem:[%s5378_s29 + $0x5b8] sm:$0xf] }
  0x8e   : > { %v549_v56 = vld [vmem:[%s5378_s29 + $0x5c0] sm:$0xf]  ;;  %546 = vst [vmem:[%s5382_s30 + $0x2d8] sm:$0xf] %v545_v54  ;;  %548 = vst [vmem:[%s5382_s30 + $0x2dc] sm:$0xf] %v547_v55 }
  0x8f   : > { %550 = vst [vmem:[%s5382_s30 + $0x2e0] sm:$0xf] %v549_v56  ;;  %v551_v57 = vld [vmem:[%s5378_s29 + $0x5c8] sm:$0xf]  ;;  %v553_v58 = vld [vmem:[%s5378_s29 + $0x5d0] sm:$0xf] }
  0x90   : > { %v555_v59 = vld [vmem:[%s5378_s29 + $0x5d8] sm:$0xf]  ;;  %552 = vst [vmem:[%s5382_s30 + $0x2e4] sm:$0xf] %v551_v57  ;;  %554 = vst [vmem:[%s5382_s30 + $0x2e8] sm:$0xf] %v553_v58 }
  0x91   : > { %556 = vst [vmem:[%s5382_s30 + $0x2ec] sm:$0xf] %v555_v59  ;;  %v557_v60 = vld [vmem:[%s5378_s29 + $0x5e0] sm:$0xf]  ;;  %v559_v61 = vld [vmem:[%s5378_s29 + $0x5e8] sm:$0xf] }
  0x92   : > { %v561_v62 = vld [vmem:[%s5378_s29 + $0x5f0] sm:$0xf]  ;;  %558 = vst [vmem:[%s5382_s30 + $0x2f0] sm:$0xf] %v557_v60  ;;  %560 = vst [vmem:[%s5382_s30 + $0x2f4] sm:$0xf] %v559_v61 }
  0x93   : > { %562 = vst [vmem:[%s5382_s30 + $0x2f8] sm:$0xf] %v561_v62  ;;  %v563_v63 = vld [vmem:[%s5378_s29 + $0x5f8] sm:$0xf]  ;;  %v565_v0 = vld [vmem:[%s5378_s29 + $0x600] sm:$0xf] }
  0x94   : > { %v567_v1 = vld [vmem:[%s5378_s29 + $0x608] sm:$0xf]  ;;  %564 = vst [vmem:[%s5382_s30 + $0x2fc] sm:$0xf] %v563_v63  ;;  %566 = vst [vmem:[%s5382_s30 + $0x300] sm:$0xf] %v565_v0 }
  0x95   : > { %568 = vst [vmem:[%s5382_s30 + $0x304] sm:$0xf] %v567_v1  ;;  %v569_v2 = vld [vmem:[%s5378_s29 + $0x610] sm:$0xf]  ;;  %v571_v3 = vld [vmem:[%s5378_s29 + $0x618] sm:$0xf] }
  0x96   : > { %v573_v4 = vld [vmem:[%s5378_s29 + $0x620] sm:$0xf]  ;;  %570 = vst [vmem:[%s5382_s30 + $0x308] sm:$0xf] %v569_v2  ;;  %572 = vst [vmem:[%s5382_s30 + $0x30c] sm:$0xf] %v571_v3 }
  0x97   : > { %574 = vst [vmem:[%s5382_s30 + $0x310] sm:$0xf] %v573_v4  ;;  %v575_v5 = vld [vmem:[%s5378_s29 + $0x628] sm:$0xf]  ;;  %v577_v6 = vld [vmem:[%s5378_s29 + $0x630] sm:$0xf] }
  0x98   : > { %v579_v7 = vld [vmem:[%s5378_s29 + $0x638] sm:$0xf]  ;;  %576 = vst [vmem:[%s5382_s30 + $0x314] sm:$0xf] %v575_v5  ;;  %578 = vst [vmem:[%s5382_s30 + $0x318] sm:$0xf] %v577_v6 }
  0x99   : > { %580 = vst [vmem:[%s5382_s30 + $0x31c] sm:$0xf] %v579_v7  ;;  %v581_v8 = vld [vmem:[%s5378_s29 + $0x640] sm:$0xf]  ;;  %v583_v9 = vld [vmem:[%s5378_s29 + $0x648] sm:$0xf] }
  0x9a   : > { %v585_v10 = vld [vmem:[%s5378_s29 + $0x650] sm:$0xf]  ;;  %582 = vst [vmem:[%s5382_s30 + $0x320] sm:$0xf] %v581_v8  ;;  %584 = vst [vmem:[%s5382_s30 + $0x324] sm:$0xf] %v583_v9 }
  0x9b   : > { %586 = vst [vmem:[%s5382_s30 + $0x328] sm:$0xf] %v585_v10  ;;  %v587_v11 = vld [vmem:[%s5378_s29 + $0x658] sm:$0xf]  ;;  %v589_v12 = vld [vmem:[%s5378_s29 + $0x660] sm:$0xf] }
  0x9c   : > { %v591_v13 = vld [vmem:[%s5378_s29 + $0x668] sm:$0xf]  ;;  %588 = vst [vmem:[%s5382_s30 + $0x32c] sm:$0xf] %v587_v11  ;;  %590 = vst [vmem:[%s5382_s30 + $0x330] sm:$0xf] %v589_v12 }
  0x9d   : > { %592 = vst [vmem:[%s5382_s30 + $0x334] sm:$0xf] %v591_v13  ;;  %v593_v14 = vld [vmem:[%s5378_s29 + $0x670] sm:$0xf]  ;;  %v595_v15 = vld [vmem:[%s5378_s29 + $0x678] sm:$0xf] }
  0x9e   : > { %v597_v16 = vld [vmem:[%s5378_s29 + $0x680] sm:$0xf]  ;;  %594 = vst [vmem:[%s5382_s30 + $0x338] sm:$0xf] %v593_v14  ;;  %596 = vst [vmem:[%s5382_s30 + $0x33c] sm:$0xf] %v595_v15 }
  0x9f   : > { %598 = vst [vmem:[%s5382_s30 + $0x340] sm:$0xf] %v597_v16  ;;  %v599_v17 = vld [vmem:[%s5378_s29 + $0x688] sm:$0xf]  ;;  %v601_v18 = vld [vmem:[%s5378_s29 + $0x690] sm:$0xf] }
  0xa0   : > { %v603_v19 = vld [vmem:[%s5378_s29 + $0x698] sm:$0xf]  ;;  %600 = vst [vmem:[%s5382_s30 + $0x344] sm:$0xf] %v599_v17  ;;  %602 = vst [vmem:[%s5382_s30 + $0x348] sm:$0xf] %v601_v18 }
  0xa1   : > { %604 = vst [vmem:[%s5382_s30 + $0x34c] sm:$0xf] %v603_v19  ;;  %v605_v20 = vld [vmem:[%s5378_s29 + $0x6a0] sm:$0xf]  ;;  %v607_v21 = vld [vmem:[%s5378_s29 + $0x6a8] sm:$0xf] }
  0xa2   : > { %v609_v22 = vld [vmem:[%s5378_s29 + $0x6b0] sm:$0xf]  ;;  %606 = vst [vmem:[%s5382_s30 + $0x350] sm:$0xf] %v605_v20  ;;  %608 = vst [vmem:[%s5382_s30 + $0x354] sm:$0xf] %v607_v21 }
  0xa3   : > { %610 = vst [vmem:[%s5382_s30 + $0x358] sm:$0xf] %v609_v22  ;;  %v611_v23 = vld [vmem:[%s5378_s29 + $0x6b8] sm:$0xf]  ;;  %v613_v24 = vld [vmem:[%s5378_s29 + $0x6c0] sm:$0xf] }
  0xa4   : > { %v615_v25 = vld [vmem:[%s5378_s29 + $0x6c8] sm:$0xf]  ;;  %612 = vst [vmem:[%s5382_s30 + $0x35c] sm:$0xf] %v611_v23  ;;  %614 = vst [vmem:[%s5382_s30 + $0x360] sm:$0xf] %v613_v24 }
  0xa5   : > { %616 = vst [vmem:[%s5382_s30 + $0x364] sm:$0xf] %v615_v25  ;;  %v617_v26 = vld [vmem:[%s5378_s29 + $0x6d0] sm:$0xf]  ;;  %v619_v27 = vld [vmem:[%s5378_s29 + $0x6d8] sm:$0xf] }
  0xa6   : > { %v621_v28 = vld [vmem:[%s5378_s29 + $0x6e0] sm:$0xf]  ;;  %618 = vst [vmem:[%s5382_s30 + $0x368] sm:$0xf] %v617_v26  ;;  %620 = vst [vmem:[%s5382_s30 + $0x36c] sm:$0xf] %v619_v27 }
  0xa7   : > { %622 = vst [vmem:[%s5382_s30 + $0x370] sm:$0xf] %v621_v28  ;;  %v623_v29 = vld [vmem:[%s5378_s29 + $0x6e8] sm:$0xf]  ;;  %v625_v30 = vld [vmem:[%s5378_s29 + $0x6f0] sm:$0xf] }
  0xa8   : > { %v627_v31 = vld [vmem:[%s5378_s29 + $0x6f8] sm:$0xf]  ;;  %624 = vst [vmem:[%s5382_s30 + $0x374] sm:$0xf] %v623_v29  ;;  %626 = vst [vmem:[%s5382_s30 + $0x378] sm:$0xf] %v625_v30 }
  0xa9   : > { %628 = vst [vmem:[%s5382_s30 + $0x37c] sm:$0xf] %v627_v31  ;;  %v629_v32 = vld [vmem:[%s5378_s29 + $0x700] sm:$0xf]  ;;  %v631_v33 = vld [vmem:[%s5378_s29 + $0x708] sm:$0xf] }
  0xaa   : > { %v633_v34 = vld [vmem:[%s5378_s29 + $0x710] sm:$0xf]  ;;  %630 = vst [vmem:[%s5382_s30 + $0x380] sm:$0xf] %v629_v32  ;;  %632 = vst [vmem:[%s5382_s30 + $0x384] sm:$0xf] %v631_v33 }
  0xab   : > { %634 = vst [vmem:[%s5382_s30 + $0x388] sm:$0xf] %v633_v34  ;;  %v635_v35 = vld [vmem:[%s5378_s29 + $0x718] sm:$0xf]  ;;  %v637_v36 = vld [vmem:[%s5378_s29 + $0x720] sm:$0xf] }
  0xac   : > { %v639_v37 = vld [vmem:[%s5378_s29 + $0x728] sm:$0xf]  ;;  %636 = vst [vmem:[%s5382_s30 + $0x38c] sm:$0xf] %v635_v35  ;;  %638 = vst [vmem:[%s5382_s30 + $0x390] sm:$0xf] %v637_v36 }
  0xad   : > { %640 = vst [vmem:[%s5382_s30 + $0x394] sm:$0xf] %v639_v37  ;;  %v641_v38 = vld [vmem:[%s5378_s29 + $0x730] sm:$0xf]  ;;  %v643_v39 = vld [vmem:[%s5378_s29 + $0x738] sm:$0xf] }
  0xae   : > { %v645_v40 = vld [vmem:[%s5378_s29 + $0x740] sm:$0xf]  ;;  %642 = vst [vmem:[%s5382_s30 + $0x398] sm:$0xf] %v641_v38  ;;  %644 = vst [vmem:[%s5382_s30 + $0x39c] sm:$0xf] %v643_v39 }
  0xaf   : > { %646 = vst [vmem:[%s5382_s30 + $0x3a0] sm:$0xf] %v645_v40  ;;  %v647_v41 = vld [vmem:[%s5378_s29 + $0x748] sm:$0xf]  ;;  %v649_v42 = vld [vmem:[%s5378_s29 + $0x750] sm:$0xf] }
  0xb0   : > { %v651_v43 = vld [vmem:[%s5378_s29 + $0x758] sm:$0xf]  ;;  %648 = vst [vmem:[%s5382_s30 + $0x3a4] sm:$0xf] %v647_v41  ;;  %650 = vst [vmem:[%s5382_s30 + $0x3a8] sm:$0xf] %v649_v42 }
  0xb1   : > { %652 = vst [vmem:[%s5382_s30 + $0x3ac] sm:$0xf] %v651_v43  ;;  %v653_v44 = vld [vmem:[%s5378_s29 + $0x760] sm:$0xf]  ;;  %v655_v45 = vld [vmem:[%s5378_s29 + $0x768] sm:$0xf] }
  0xb2   : > { %v657_v46 = vld [vmem:[%s5378_s29 + $0x770] sm:$0xf]  ;;  %654 = vst [vmem:[%s5382_s30 + $0x3b0] sm:$0xf] %v653_v44  ;;  %656 = vst [vmem:[%s5382_s30 + $0x3b4] sm:$0xf] %v655_v45 }
  0xb3   : > { %658 = vst [vmem:[%s5382_s30 + $0x3b8] sm:$0xf] %v657_v46  ;;  %v659_v47 = vld [vmem:[%s5378_s29 + $0x778] sm:$0xf]  ;;  %v661_v48 = vld [vmem:[%s5378_s29 + $0x780] sm:$0xf] }
  0xb4   : > { %v663_v49 = vld [vmem:[%s5378_s29 + $0x788] sm:$0xf]  ;;  %660 = vst [vmem:[%s5382_s30 + $0x3bc] sm:$0xf] %v659_v47  ;;  %662 = vst [vmem:[%s5382_s30 + $0x3c0] sm:$0xf] %v661_v48 }
  0xb5   : > { %664 = vst [vmem:[%s5382_s30 + $0x3c4] sm:$0xf] %v663_v49  ;;  %v665_v50 = vld [vmem:[%s5378_s29 + $0x790] sm:$0xf]  ;;  %v667_v51 = vld [vmem:[%s5378_s29 + $0x798] sm:$0xf] }
  0xb6   : > { %v669_v52 = vld [vmem:[%s5378_s29 + $0x7a0] sm:$0xf]  ;;  %666 = vst [vmem:[%s5382_s30 + $0x3c8] sm:$0xf] %v665_v50  ;;  %668 = vst [vmem:[%s5382_s30 + $0x3cc] sm:$0xf] %v667_v51 }
  0xb7   : > { %670 = vst [vmem:[%s5382_s30 + $0x3d0] sm:$0xf] %v669_v52  ;;  %v671_v53 = vld [vmem:[%s5378_s29 + $0x7a8] sm:$0xf]  ;;  %v673_v54 = vld [vmem:[%s5378_s29 + $0x7b0] sm:$0xf] }
  0xb8   : > { %v675_v55 = vld [vmem:[%s5378_s29 + $0x7b8] sm:$0xf]  ;;  %672 = vst [vmem:[%s5382_s30 + $0x3d4] sm:$0xf] %v671_v53  ;;  %674 = vst [vmem:[%s5382_s30 + $0x3d8] sm:$0xf] %v673_v54 }
  0xb9   : > { %676 = vst [vmem:[%s5382_s30 + $0x3dc] sm:$0xf] %v675_v55  ;;  %v677_v56 = vld [vmem:[%s5378_s29 + $0x7c0] sm:$0xf]  ;;  %v679_v57 = vld [vmem:[%s5378_s29 + $0x7c8] sm:$0xf] }
  0xba   : > { %v681_v58 = vld [vmem:[%s5378_s29 + $0x7d0] sm:$0xf]  ;;  %678 = vst [vmem:[%s5382_s30 + $0x3e0] sm:$0xf] %v677_v56  ;;  %680 = vst [vmem:[%s5382_s30 + $0x3e4] sm:$0xf] %v679_v57 }
  0xbb   : > { %682 = vst [vmem:[%s5382_s30 + $0x3e8] sm:$0xf] %v681_v58  ;;  %v683_v59 = vld [vmem:[%s5378_s29 + $0x7d8] sm:$0xf]  ;;  %v685_v60 = vld [vmem:[%s5378_s29 + $0x7e0] sm:$0xf] }
  0xbc   : > { %v687_v61 = vld [vmem:[%s5378_s29 + $0x7e8] sm:$0xf]  ;;  %684 = vst [vmem:[%s5382_s30 + $0x3ec] sm:$0xf] %v683_v59  ;;  %686 = vst [vmem:[%s5382_s30 + $0x3f0] sm:$0xf] %v685_v60 }
  0xbd   : > { %688 = vst [vmem:[%s5382_s30 + $0x3f4] sm:$0xf] %v687_v61  ;;  %v689_v62 = vld [vmem:[%s5378_s29 + $0x7f0] sm:$0xf]  ;;  %v691_v63 = vld [vmem:[%s5378_s29 + $0x7f8] sm:$0xf] }
  0xbe   : > { %690 = vst [vmem:[%s5382_s30 + $0x3f8] sm:$0xf] %v689_v62  ;;  %692 = vst [vmem:[%s5382_s30 + $0x3fc] sm:$0xf] %v691_v63 }
  0xbf PF: > { %p4280_p7 = scmp.ge.s32.totalorder %s5310_s17, 1  ;;  %p1238_p8 = scmp.lt.s32.totalorder %s5310_s17, 3 }
  0xc1   : > { %p1239_p9 = pnand %p4280_p7, %p1238_p8 }
  0xc2   : > { %s1245_s5 = sand.u32 (!%p1239_p9), 1, %s5302_s15   ;;  %v5900_v0 = vld [vmem:[%s6728_s0] sm:$0xff] (!%p1239_p9)  ;;  %v5910_v2 = vld [vmem:[%s6728_s0 + $0x8] sm:$0xff] (!%p1239_p9)  ;;  %p1275_p10 = scmp.lt.s32.totalorder (!%p1239_p9), %s5353_s18, 1 }
  0xc3   : > { %1242 = sbr.rel (%p1239_p9) target bundleno = 781 (0x30d), region = 73  ;;  %v5905_v1 = vld [vmem:[%s6728_s0 + $0x40] sm:$0xff] (!%p1239_p9)  ;;  %s4281_s12 = sshll.u32 (!%p1239_p9), %s1245_s5, 10  ;;  %v5919_v4 = vld [vmem:[%s6728_s0 + $0x48] sm:$0xff] (!%p1239_p9) }
  0xc4   : > { %v4284_v3 = vcombine.high (!%p1239_p9), %v5900_v0, %v5905_v1  ;;  %v4286_v5 = vcombine.high (!%p1239_p9), %v5910_v2, %v5919_v4  ;;  %s5923_s17 = scalar_lea.vmem (!%p1239_p9), [#allocation2], %s4281_s12  ;;  %v1298_v35 = vld [vmem:[%s6728_s0 + $0x80] sm:$0xff] (!%p1239_p9)  ;;  %v1299_v38 = vld [vmem:[%s6728_s0 + $0x88] sm:$0xff] (!%p1239_p9)  ;;  %v4283_v42 = vcombine.low (!%p1239_p9), %v5900_v0, %v5905_v1  ;;  %v4285_v43 = vcombine.low (!%p1239_p9), %v5910_v2, %v5919_v4  ;;  %s6667_s13 = sshll.u32 (!%p1239_p9), %s1245_s5, 6 }
  0xc5   : > { %v5158_v6 = vld [vmem:[%s5923_s17 + $0x40] sm:$0xff] (!%p1239_p9)   ;;  %v5162_v10 = vld [vmem:[%s5923_s17 + $0x48] sm:$0xff] (!%p1239_p9)   ;;  %v5166_v14 = vld [vmem:[%s5923_s17 + $0x50] sm:$0xff] (!%p1239_p9)   ;;  %s6686_s15 = scalar_lea.vmem (!%p1239_p9), [#allocation3], %s6667_s13 }
  0xc6   : > { %3106 = vmatprep.mubr.bf16.mxu0 (!%p1239_p9), %v4284_v3  ;;  %v5159_v7 = vld [vmem:[%s5923_s17 + $0xc0] sm:$0xff] (!%p1239_p9)   ;;  %3203 = vmatprep.mubr.bf16.mxu1 (!%p1239_p9), %v4286_v5  ;;  %v5163_v11 = vld [vmem:[%s5923_s17 + $0xc8] sm:$0xff] (!%p1239_p9)   ;;  %v5167_v15 = vld [vmem:[%s5923_s17 + $0xd0] sm:$0xff] (!%p1239_p9)  }
  0xc7   : > { %4622 = vmatprep.subr.bf16.mxu0 (!%p1239_p9), %v5158_v6  ;;  %v5160_v8 = vld [vmem:[%s5923_s17] sm:$0xff] (!%p1239_p9)   ;;  %4686 = vmatprep.subr.bf16.mxu1 (!%p1239_p9), %v5159_v7  ;;  %v5164_v12 = vld [vmem:[%s5923_s17 + $0x8] sm:$0xff] (!%p1239_p9)   ;;  %v5168_v16 = vld [vmem:[%s5923_s17 + $0x10] sm:$0xff] (!%p1239_p9)  }
  0xc8   : > { %v5161_v9 = vld [vmem:[%s5923_s17 + $0x80] sm:$0xff] (!%p1239_p9)   ;;  %4623 = vmatpush3.bf16.msra.mxu0 (!%p1239_p9), %v5160_v8  ;;  %v5165_v13 = vld [vmem:[%s5923_s17 + $0x88] sm:$0xff] (!%p1239_p9)   ;;  %v5169_v17 = vld [vmem:[%s5923_s17 + $0x90] sm:$0xff] (!%p1239_p9)  }
  0xc9   : > { %4687 = vmatpush3.bf16.msra.mxu1 (!%p1239_p9), %v5161_v9  ;;  %4624 = vmatprep.subr.bf16.mxu0 (!%p1239_p9), %v5162_v10  ;;  %v5170_v18 = vld [vmem:[%s5923_s17 + $0x58] sm:$0xff] (!%p1239_p9)   ;;  %v5174_v22 = vld [vmem:[%s5923_s17 + $0x60] sm:$0xff] (!%p1239_p9)   ;;  %v5178_v26 = vld [vmem:[%s5923_s17 + $0x68] sm:$0xff] (!%p1239_p9)  }
  0xca   : > { %4688 = vmatprep.subr.bf16.mxu1 %v5163_v11  ;;  %v5171_v19 = vld [vmem:[%s5923_s17 + $0xd8] sm:$0xff]   ;;  %v5175_v23 = vld [vmem:[%s5923_s17 + $0xe0] sm:$0xff]   ;;  %v5179_v27 = vld [vmem:[%s5923_s17 + $0xe8] sm:$0xff]   ;;  %s4556_s5 = sshll.u32 (%p5368_p5), %s5353_s18, 2 }
  0xcb   : > { %v5172_v20 = vld [vmem:[%s5923_s17 + $0x18] sm:$0xff]   ;;  %v5176_v24 = vld [vmem:[%s5923_s17 + $0x20] sm:$0xff]   ;;  %v5180_v28 = vld [vmem:[%s5923_s17 + $0x28] sm:$0xff]   ;;  %s4100_s21 = scalar_lea.vmem (%p5368_p5), %s6732_s4, %s4556_s5 }
  0xcc   : > { %4625 = vmatpush3.bf16.msra.mxu0 %v5164_v12  ;;  %v5173_v21 = vld [vmem:[%s5923_s17 + $0x98] sm:$0xff]   ;;  %v5177_v25 = vld [vmem:[%s5923_s17 + $0xa0] sm:$0xff]   ;;  %v5181_v29 = vld [vmem:[%s5923_s17 + $0xa8] sm:$0xff]  }
  0xcd   : > { %4689 = vmatpush3.bf16.msra.mxu1 %v5165_v13  ;;  %4626 = vmatprep.subr.bf16.mxu0 %v5166_v14  ;;  %v5182_v30 = vld [vmem:[%s5923_s17 + $0x70] sm:$0xff]   ;;  %v5186_v34 = vld [vmem:[%s5923_s17 + $0x78] sm:$0xff]   ;;  %v1306_v36 = vld [vmem:[%s6728_s0 + $0xc0] sm:$0xff] }
  0xce   : > { %4690 = vmatprep.subr.bf16.mxu1 %v5167_v15  ;;  %v5183_v31 = vld [vmem:[%s5923_s17 + $0xf0] sm:$0xff]   ;;  %v5187_v37 = vld [vmem:[%s5923_s17 + $0xf8] sm:$0xff]   ;;  %v1307_v39 = vld [vmem:[%s6728_s0 + $0xc8] sm:$0xff]  ;;  %v4300_v46 = vcombine.high %v1298_v35, %v1306_v36  ;;  %v4299_v54 = vcombine.low %v1298_v35, %v1306_v36 }
  0xcf   : > { %v5184_v32 = vld [vmem:[%s5923_s17 + $0x30] sm:$0xff]   ;;  %v5188_v40 = vld [vmem:[%s5923_s17 + $0x38] sm:$0xff]   ;;  %v5190_v44 = vld [vmem:[%s5923_s17 + $0x140] sm:$0xff]   ;;  %v4302_v48 = vcombine.high %v1299_v38, %v1307_v39  ;;  %v4301_v56 = vcombine.low %v1299_v38, %v1307_v39 }
  0xd0   : > { %4627 = vmatpush3.bf16.msra.mxu0 %v5168_v16  ;;  %v5185_v33 = vld [vmem:[%s5923_s17 + $0xb0] sm:$0xff]   ;;  %v5189_v41 = vld [vmem:[%s5923_s17 + $0xb8] sm:$0xff]   ;;  %v5191_v45 = vld [vmem:[%s5923_s17 + $0x100] sm:$0xff]  }
  0xd1   : > { %4691 = vmatpush3.bf16.msra.mxu1 %v5169_v17  ;;  %4628 = vmatprep.subr.bf16.mxu0 %v5170_v18  ;;  %v5192_v47 = vld [vmem:[%s5923_s17 + $0x1c0] sm:$0xff]   ;;  %v5194_v50 = vld [vmem:[%s5923_s17 + $0x148] sm:$0xff]   ;;  %v5198_v62 = vld [vmem:[%s5923_s17 + $0x150] sm:$0xff]  }
  0xd2   : > { %4692 = vmatprep.subr.bf16.mxu1 %v5171_v19  ;;  %v5193_v49 = vld [vmem:[%s5923_s17 + $0x180] sm:$0xff]   ;;  %v5195_v52 = vld [vmem:[%s5923_s17 + $0x108] sm:$0xff]   ;;  %v5199_v63 = vld [vmem:[%s5923_s17 + $0x110] sm:$0xff]  }
  0xd3   : > { %v1314_v51 = vld [vmem:[%s6728_s0 + $0x100] sm:$0xff]  ;;  %v5196_v53 = vld [vmem:[%s5923_s17 + $0x1c8] sm:$0xff]   ;;  %v5200_v0 = vld [vmem:[%s5923_s17 + $0x1d0] sm:$0xff]  }
  0xd4   : > { %4629 = vmatpush3.bf16.msra.mxu0 %v5172_v20  ;;  %v5197_v55 = vld [vmem:[%s5923_s17 + $0x188] sm:$0xff]   ;;  %v1322_v57 = vld [vmem:[%s6728_s0 + $0x140] sm:$0xff]  ;;  %v5201_v1 = vld [vmem:[%s5923_s17 + $0x190] sm:$0xff]  }
  0xd5   : > { %4693 = vmatpush3.bf16.msra.mxu1 %v5173_v21  ;;  %4630 = vmatprep.subr.bf16.mxu0 %v5174_v22  ;;  %v1315_v58 = vld [vmem:[%s6728_s0 + $0x108] sm:$0xff]  ;;  %v4316_v60 = vcombine.high %v1314_v51, %v1322_v57  ;;  %v1330_v2 = vld [vmem:[%s6728_s0 + $0x180] sm:$0xff]  ;;  %v4315_v6 = vcombine.low %v1314_v51, %v1322_v57  ;;  %v5202_v7 = vld [vmem:[%s5923_s17 + $0x158] sm:$0xff]  }
  0xd6   : > { %4694 = vmatprep.subr.bf16.mxu1 %v5175_v23  ;;  %v1323_v59 = vld [vmem:[%s6728_s0 + $0x148] sm:$0xff]  ;;  %v1338_v3 = vld [vmem:[%s6728_s0 + $0x1c0] sm:$0xff]  ;;  %v5203_v10 = vld [vmem:[%s5923_s17 + $0x118] sm:$0xff]  }
  0xd7   : > { %v4318_v61 = vcombine.high %v1315_v58, %v1323_v59  ;;  %v1331_v4 = vld [vmem:[%s6728_s0 + $0x188] sm:$0xff]  ;;  %v4317_v8 = vcombine.low %v1315_v58, %v1323_v59  ;;  %v4332_v9 = vcombine.high %v1330_v2, %v1338_v3  ;;  %v5204_v12 = vld [vmem:[%s5923_s17 + $0x1d8] sm:$0xff]   ;;  %v1346_v14 = vld [vmem:[%s6728_s0 + $0x200] sm:$0xff]  ;;  %v4331_v21 = vcombine.low %v1330_v2, %v1338_v3 }
  0xd8   : > { %4631 = vmatpush3.bf16.msra.mxu0 %v5176_v24  ;;  %v1339_v5 = vld [vmem:[%s6728_s0 + $0x1c8] sm:$0xff]  ;;  %v5205_v13 = vld [vmem:[%s5923_s17 + $0x198] sm:$0xff]   ;;  %v1354_v15 = vld [vmem:[%s6728_s0 + $0x240] sm:$0xff] }
  0xd9   : > { %4695 = vmatpush3.bf16.msra.mxu1 %v5177_v25  ;;  %4632 = vmatprep.subr.bf16.mxu0 %v5178_v26  ;;  %v4334_v11 = vcombine.high %v1331_v4, %v1339_v5  ;;  %v1347_v16 = vld [vmem:[%s6728_s0 + $0x208] sm:$0xff]  ;;  %v5206_v18 = vld [vmem:[%s5923_s17 + $0x160] sm:$0xff]   ;;  %v4333_v23 = vcombine.low %v1331_v4, %v1339_v5  ;;  %v4348_v24 = vcombine.high %v1346_v14, %v1354_v15  ;;  %v5214_v35 = vld [vmem:[%s5923_s17 + $0x170] sm:$0xff]  }
  0xda   : > { %4696 = vmatprep.subr.bf16.mxu1 %v5179_v27  ;;  %v1355_v17 = vld [vmem:[%s6728_s0 + $0x248] sm:$0xff]  ;;  %v5207_v19 = vld [vmem:[%s5923_s17 + $0x120] sm:$0xff]   ;;  %v5215_v38 = vld [vmem:[%s5923_s17 + $0x130] sm:$0xff]  }
  0xdb   : > { %v5208_v20 = vld [vmem:[%s5923_s17 + $0x1e0] sm:$0xff]   ;;  %v4350_v25 = vcombine.high %v1347_v16, %v1355_v17  ;;  %v5210_v26 = vld [vmem:[%s5923_s17 + $0x168] sm:$0xff]   ;;  %v4349_v36 = vcombine.low %v1347_v16, %v1355_v17  ;;  %v1285_v2 = vld [vmem:[%s6728_s0 + $0x18] sm:$0xff] }
  0xdc   : > { %4633 = vmatpush3.bf16.msra.mxu0 %v5180_v28  ;;  %v5209_v22 = vld [vmem:[%s5923_s17 + $0x1a0] sm:$0xff]   ;;  %v5211_v27 = vld [vmem:[%s5923_s17 + $0x128] sm:$0xff]   ;;  %v1293_v3 = vld [vmem:[%s6728_s0 + $0x58] sm:$0xff] }
  0xdd   : > { %4697 = vmatpush3.bf16.msra.mxu1 %v5181_v29  ;;  %4634 = vmatprep.subr.bf16.mxu0 %v5182_v30  ;;  %v5212_v28 = vld [vmem:[%s5923_s17 + $0x1e8] sm:$0xff]   ;;  %v1362_v30 = vld [vmem:[%s6728_s0 + $0x280] sm:$0xff] }
  0xde   : > { %4698 = vmatprep.subr.bf16.mxu1 %v5183_v31  ;;  %v5213_v29 = vld [vmem:[%s5923_s17 + $0x1a8] sm:$0xff]   ;;  %v1370_v31 = vld [vmem:[%s6728_s0 + $0x2c0] sm:$0xff] }
  0xdf   : > { %v1402_v57 = vld [vmem:[%s6728_s0 + $0x3c0] sm:$0xff]  ;;  %v1395_v58 = vld [vmem:[%s6728_s0 + $0x388] sm:$0xff] }
  0xe0   : > { %4635 = vmatpush3.bf16.msra.mxu0 %v5184_v32  ;;  %v1363_v32 = vld [vmem:[%s6728_s0 + $0x288] sm:$0xff] }
  0xe1   : > { %4699 = vmatpush3.bf16.msra.mxu1 %v5185_v33  ;;  %4636 = vmatprep.subr.bf16.mxu0 %v5186_v34  ;;  %v1371_v33 = vld [vmem:[%s6728_s0 + $0x2c8] sm:$0xff]  ;;  %v4347_v34 = vcombine.low %v1346_v14, %v1354_v15  ;;  %v5223_v14 = vld [vmem:[%s5923_s17 + $0x200] sm:$0xff]  }
  0xe2   : > { %4700 = vmatprep.subr.bf16.mxu1 %v5187_v37  ;;  %v4364_v37 = vcombine.high %v1362_v30, %v1370_v31  ;;  %v4366_v39 = vcombine.high %v1363_v32, %v1371_v33  ;;  %v4365_v51 = vcombine.low %v1363_v32, %v1371_v33  ;;  %v1403_v59 = vld [vmem:[%s6728_s0 + $0x3c8] sm:$0xff]  ;;  %v5225_v15 = vld [vmem:[%s5923_s17 + $0x280] sm:$0xff]   ;;  %v5233_v33 = vld [vmem:[%s5923_s17 + $0x290] sm:$0xff]  }
  0xe3   : > { %v4397_v5 = vcombine.low %v1395_v58, %v1403_v59 }
  0xe4   : > { %4637 = vmatpush3.bf16.msra.mxu0 %v5188_v40  ;;  %v5216_v40 = vld [vmem:[%s5923_s17 + $0x1f0] sm:$0xff]  }
  0xe5   : > { %4701 = vmatpush3.bf16.msra.mxu1 %v5189_v41  ;;  %4750 = vmatprep.subr.bf16.mxu0 %v5190_v44  ;;  %v5217_v41 = vld [vmem:[%s5923_s17 + $0x1b0] sm:$0xff]   ;;  %v1379_v44 = vld [vmem:[%s6728_s0 + $0x308] sm:$0xff] }
  0xe6   : > { %4814 = vmatprep.subr.bf16.mxu1 %v5192_v47  ;;  %v5219_v47 = vld [vmem:[%s5923_s17 + $0x138] sm:$0xff]  }
  0xe7   : > { %3107 = vmatmul.mubr.bf16.vlgmr.msra.gmra.mrb[0].mxu0 %v4283_v42  ;;  %v1378_v42 = vld [vmem:[%s6728_s0 + $0x300] sm:$0xff] }
  0xe8   : > { %3204 = vmatmul.mubr.bf16.vlgmr.msra.gmra.mrb[0].mxu1 %v4285_v43  ;;  %4751 = vmatpush3.bf16.msra.mxu0 %v5191_v45  ;;  %v1386_v43 = vld [vmem:[%s6728_s0 + $0x340] sm:$0xff]  ;;  %v1387_v45 = vld [vmem:[%s6728_s0 + $0x348] sm:$0xff] }
  0xe9   : > { %3114 = vmatprep.mubr.bf16.mxu0 %v4300_v46  ;;  %4815 = vmatpush3.bf16.msra.mxu1 %v5193_v49  ;;  %v5218_v46 = vld [vmem:[%s5923_s17 + $0x178] sm:$0xff]   ;;  %v4363_v49 = vcombine.low %v1362_v30, %v1370_v31  ;;  %v5231_v31 = vld [vmem:[%s5923_s17 + $0x210] sm:$0xff]  }
  0xea   : > { %3211 = vmatprep.mubr.bf16.mxu1 %v4302_v48  ;;  %4752 = vmatprep.subr.bf16.mxu0 %v5194_v50  ;;  %v5220_v48 = vld [vmem:[%s5923_s17 + $0x1f8] sm:$0xff]  }
  0xeb   : > { %4816 = vmatprep.subr.bf16.mxu1 %v5196_v53  ;;  %v5221_v50 = vld [vmem:[%s5923_s17 + $0x1b8] sm:$0xff]   ;;  %v4382_v53 = vcombine.high %v1379_v44, %v1387_v45 }
  0xec   : > { %4753 = vmatpush3.bf16.msra.mxu0 %v5195_v52  ;;  %v4380_v52 = vcombine.high %v1378_v42, %v1386_v43 }
  0xed   : > { %4817 = vmatpush3.bf16.msra.mxu1 %v5197_v55  ;;  %4754 = vmatprep.subr.bf16.mxu0 %v5198_v62  ;;  %v5224_v55 = vld [vmem:[%s5923_s17 + $0x2c0] sm:$0xff]  }
  0xee   : > { %4818 = vmatprep.subr.bf16.mxu1 %v5200_v0  ;;  %v1284_v0 = vld [vmem:[%s6728_s0 + $0x10] sm:$0xff] }
  0xef   : > { %3115 = vmatmul.mubr.bf16.gmra.mrb[4].mxu0 %v4299_v54  ;;  %v5222_v54 = vld [vmem:[%s5923_s17 + $0x240] sm:$0xff]  }
  0xf0   : > { %3212 = vmatmul.mubr.bf16.gmra.mrb[4].mxu1 %v4301_v56  ;;  %3122 = vmatprep.mubr.bf16.mxu0 %v4316_v60  ;;  %v1394_v56 = vld [vmem:[%s6728_s0 + $0x380] sm:$0xff]  ;;  %v4379_v60 = vcombine.low %v1378_v42, %v1386_v43 }
  0xf1   : > { %3219 = vmatprep.mubr.bf16.mxu1 %v4318_v61  ;;  %4755 = vmatpush3.bf16.msra.mxu0 %v5199_v63  ;;  %v4381_v61 = vcombine.low %v1379_v44, %v1387_v45  ;;  %v4396_v62 = vcombine.high %v1394_v56, %v1402_v57  ;;  %v4398_v63 = vcombine.high %v1395_v58, %v1403_v59  ;;  %v5238_v42 = vld [vmem:[%s5923_s17 + $0x260] sm:$0xff]   ;;  %v5246_v58 = vld [vmem:[%s5923_s17 + $0x270] sm:$0xff]  }
  0xf2   : > { %4819 = vmatpush3.bf16.msra.mxu1 %v5201_v1  ;;  %4756 = vmatprep.subr.bf16.mxu0 %v5202_v7  ;;  %v1292_v1 = vld [vmem:[%s6728_s0 + $0x50] sm:$0xff]  ;;  %v4395_v4 = vcombine.low %v1394_v56, %v1402_v57  ;;  %v4290_v7 = vcombine.high %v1285_v2, %v1293_v3  ;;  %v5240_v44 = vld [vmem:[%s5923_s17 + $0x2e0] sm:$0xff]   ;;  %v5243_v56 = vld [vmem:[%s5923_s17 + $0x228] sm:$0xff]  }
  0xf3   : > { %4820 = vmatprep.subr.bf16.mxu1 %v5204_v12  ;;  %v1309_v12 = vld [vmem:[%s6728_s0 + $0xd8] sm:$0xff]  ;;  %v5245_v57 = vld [vmem:[%s5923_s17 + $0x2a8] sm:$0xff]  }
  0xf5   : > { %4757 = vmatpush3.bf16.msra.mxu0 %v5203_v10  ;;  %v1301_v10 = vld [vmem:[%s6728_s0 + $0x98] sm:$0xff] }
  0xf6   : > { %4821 = vmatpush3.bf16.msra.mxu1 %v5205_v13  ;;  %4758 = vmatprep.subr.bf16.mxu0 %v5206_v18  ;;  %v4289_v13 = vcombine.low %v1285_v2, %v1293_v3  ;;  %v4306_v17 = vcombine.high %v1301_v10, %v1309_v12  ;;  %v5226_v18 = vld [vmem:[%s5923_s17 + $0x248] sm:$0xff]   ;;  %v5250_v2 = vld [vmem:[%s5923_s17 + $0x278] sm:$0xff]   ;;  %v1364_v3 = vld [vmem:[%s6728_s0 + $0x290] sm:$0xff] }
  0xf7   : > { %3123 = vmatmul.mubr.bf16.gmra.mrb[8].mxu0 %v4315_v6  ;;  %4822 = vmatprep.subr.bf16.mxu1 %v5208_v20  ;;  %v4288_v6 = vcombine.high %v1284_v0, %v1292_v1  ;;  %v5228_v20 = vld [vmem:[%s5923_s17 + $0x2c8] sm:$0xff]  }
  0xf8   : > { %3220 = vmatmul.mubr.bf16.gmra.mrb[8].mxu1 %v4317_v8  ;;  %3130 = vmatprep.mubr.bf16.mxu0 %v4332_v9  ;;  %v1300_v8 = vld [vmem:[%s6728_s0 + $0x90] sm:$0xff] }
  0xf9   : > { %3227 = vmatprep.mubr.bf16.mxu1 %v4334_v11  ;;  %4759 = vmatpush3.bf16.msra.mxu0 %v5207_v19  ;;  %v1308_v9 = vld [vmem:[%s6728_s0 + $0xd0] sm:$0xff]  ;;  %v4287_v11 = vcombine.low %v1284_v0, %v1292_v1  ;;  %v5227_v19 = vld [vmem:[%s5923_s17 + $0x208] sm:$0xff]  }
  0xfa   : > { %4823 = vmatpush3.bf16.msra.mxu1 %v5209_v22  ;;  %4760 = vmatprep.subr.bf16.mxu0 %v5210_v26  ;;  %v4304_v16 = vcombine.high %v1300_v8, %v1308_v9  ;;  %v1316_v22 = vld [vmem:[%s6728_s0 + $0x110] sm:$0xff] }
  0xfb   : > { %4824 = vmatprep.subr.bf16.mxu1 %v5212_v28  ;;  %v5230_v26 = vld [vmem:[%s5923_s17 + $0x250] sm:$0xff]   ;;  %v4303_v28 = vcombine.low %v1300_v8, %v1308_v9  ;;  %v5251_v8 = vld [vmem:[%s5923_s17 + $0x238] sm:$0xff]  }
  0xfc   : > { %v5249_v1 = vld [vmem:[%s5923_s17 + $0x2b0] sm:$0xff]   ;;  %v5253_v9 = vld [vmem:[%s5923_s17 + $0x2b8] sm:$0xff]  }
  0xfd   : > { %4761 = vmatpush3.bf16.msra.mxu0 %v5211_v27  ;;  %v5232_v27 = vld [vmem:[%s5923_s17 + $0x2d0] sm:$0xff]  }
  0xfe   : > { %4825 = vmatpush3.bf16.msra.mxu1 %v5213_v29  ;;  %4762 = vmatprep.subr.bf16.mxu0 %v5214_v35  ;;  %v4305_v29 = vcombine.low %v1301_v10, %v1309_v12  ;;  %v1332_v35 = vld [vmem:[%s6728_s0 + $0x190] sm:$0xff]  ;;  %v5254_v10 = vld [vmem:[%s5923_s17 + $0x340] sm:$0xff]  }
  0xff   : > { %3131 = vmatmul.mubr.bf16.gmra.mrb[12].mxu0 %v4331_v21  ;;  %4826 = vmatprep.subr.bf16.mxu1 %v5216_v40  ;;  %v5229_v21 = vld [vmem:[%s5923_s17 + $0x288] sm:$0xff]   ;;  %v5235_v40 = vld [vmem:[%s5923_s17 + $0x218] sm:$0xff]   ;;  %v5256_v12 = vld [vmem:[%s5923_s17 + $0x3c0] sm:$0xff]  }
 0x100   : > { %3228 = vmatmul.mubr.bf16.gmra.mrb[12].mxu1 %v4333_v23  ;;  %3138 = vmatprep.mubr.bf16.mxu0 %v4348_v24  ;;  %v1324_v23 = vld [vmem:[%s6728_s0 + $0x150] sm:$0xff]  ;;  %v1317_v24 = vld [vmem:[%s6728_s0 + $0x118] sm:$0xff] }
 0x101   : > { %3235 = vmatprep.mubr.bf16.mxu1 %v4350_v25  ;;  %4763 = vmatpush3.bf16.msra.mxu0 %v5215_v38  ;;  %v1325_v25 = vld [vmem:[%s6728_s0 + $0x158] sm:$0xff]  ;;  %v4320_v30 = vcombine.high %v1316_v22, %v1324_v23  ;;  %v4319_v43 = vcombine.low %v1316_v22, %v1324_v23 }
 0x102   : > { %4827 = vmatpush3.bf16.msra.mxu1 %v5217_v41  ;;  %4764 = vmatprep.subr.bf16.mxu0 %v5218_v46  ;;  %v4322_v32 = vcombine.high %v1317_v24, %v1325_v25  ;;  %v1333_v38 = vld [vmem:[%s6728_s0 + $0x198] sm:$0xff]  ;;  %v4321_v45 = vcombine.low %v1317_v24, %v1325_v25  ;;  %v1396_v24 = vld [vmem:[%s6728_s0 + $0x390] sm:$0xff] }
 0x103   : > { %4828 = vmatprep.subr.bf16.mxu1 %v5220_v48  ;;  %v5237_v41 = vld [vmem:[%s5923_s17 + $0x298] sm:$0xff]   ;;  %v5239_v48 = vld [vmem:[%s5923_s17 + $0x220] sm:$0xff]   ;;  %v1404_v25 = vld [vmem:[%s6728_s0 + $0x3d0] sm:$0xff] }
 0x105   : > { %4765 = vmatpush3.bf16.msra.mxu0 %v5219_v47 }
 0x106   : > { %4829 = vmatpush3.bf16.msra.mxu1 %v5221_v50  ;;  %4878 = vmatprep.subr.bf16.mxu0 %v5222_v54  ;;  %v5242_v50 = vld [vmem:[%s5923_s17 + $0x268] sm:$0xff]   ;;  %v1349_v54 = vld [vmem:[%s6728_s0 + $0x218] sm:$0xff] }
 0x107   : > { %3139 = vmatmul.mubr.bf16.gmra.mrb[16].mxu0 %v4347_v34  ;;  %4942 = vmatprep.subr.bf16.mxu1 %v5224_v55  ;;  %v5234_v34 = vld [vmem:[%s5923_s17 + $0x258] sm:$0xff]  }
 0x108   : > { %3236 = vmatmul.mubr.bf16.gmra.mrb[16].mxu1 %v4349_v36  ;;  %3146 = vmatprep.mubr.bf16.mxu0 %v4364_v37  ;;  %v1340_v36 = vld [vmem:[%s6728_s0 + $0x1d0] sm:$0xff]  ;;  %v5236_v37 = vld [vmem:[%s5923_s17 + $0x2d8] sm:$0xff]  }
 0x109   : > { %3243 = vmatprep.mubr.bf16.mxu1 %v4366_v39  ;;  %v1341_v39 = vld [vmem:[%s6728_s0 + $0x1d8] sm:$0xff]  ;;  %v4336_v46 = vcombine.high %v1332_v35, %v1340_v36  ;;  %v4335_v59 = vcombine.low %v1332_v35, %v1340_v36  ;;  %v1295_v35 = vld [vmem:[%s6728_s0 + $0x68] sm:$0xff]  ;;  %v4399_v36 = vcombine.low %v1396_v24, %v1404_v25 }
 0x10a   : > { %v4338_v47 = vcombine.high %v1333_v38, %v1341_v39  ;;  %v1357_v55 = vld [vmem:[%s6728_s0 + $0x258] sm:$0xff] }
 0x10b   : > { %v4354_v0 = vcombine.high %v1349_v54, %v1357_v55 }
 0x10f   : > { %3147 = vmatmul.mubr.bf16.gmra.mrb[20].mxu0 %v4363_v49  ;;  %v5241_v49 = vld [vmem:[%s5923_s17 + $0x2a0] sm:$0xff]  }
 0x110   : > { %3244 = vmatmul.mubr.bf16.gmra.mrb[20].mxu1 %v4365_v51  ;;  %3154 = vmatprep.mubr.bf16.mxu0 %v4380_v52  ;;  %v1348_v51 = vld [vmem:[%s6728_s0 + $0x210] sm:$0xff] }
 0x111   : > { %3251 = vmatprep.mubr.bf16.mxu1 %v4382_v53  ;;  %v1356_v52 = vld [vmem:[%s6728_s0 + $0x250] sm:$0xff]  ;;  %v5244_v53 = vld [vmem:[%s5923_s17 + $0x2e8] sm:$0xff]  }
 0x117   : > { %3155 = vmatmul.mubr.bf16.gmra.mrb[24].mxu0 %v4379_v60  ;;  %v5248_v60 = vld [vmem:[%s5923_s17 + $0x2f0] sm:$0xff]  }
 0x118   : > { %3252 = vmatmul.mubr.bf16.gmra.mrb[24].mxu1 %v4381_v61  ;;  %3162 = vmatprep.mubr.bf16.mxu0 %v4396_v62  ;;  %v4337_v61 = vcombine.low %v1333_v38, %v1341_v39  ;;  %v4352_v62 = vcombine.high %v1348_v51, %v1356_v52 }
 0x119   : > { %3259 = vmatprep.mubr.bf16.mxu1 %v4398_v63  ;;  %v5247_v63 = vld [vmem:[%s5923_s17 + $0x230] sm:$0xff]  }
 0x11f   : > { %3163 = vmatmul.mubr.bf16.gmra.mrb[28].mxu0 %v4395_v4  ;;  %v1372_v4 = vld [vmem:[%s6728_s0 + $0x2d0] sm:$0xff] }
 0x120   : > { %3260 = vmatmul.mubr.bf16.gmra.mrb[28].mxu1 %v4397_v5  ;;  %3300 = vmatprep.mubr.bf16.mxu0 %v4288_v6  ;;  %v5252_v5 = vld [vmem:[%s5923_s17 + $0x2f8] sm:$0xff]  }
 0x121   : > { %3397 = vmatprep.mubr.bf16.mxu1 %v4290_v7  ;;  %v1365_v6 = vld [vmem:[%s6728_s0 + $0x298] sm:$0xff] }
 0x122   : > { %v1373_v7 = vld [vmem:[%s6728_s0 + $0x2d8] sm:$0xff] }
 0x127   : > { %3301 = vmatmul.mubr.bf16.vlgmr.msra.gmra.mrb[32].mxu0 %v4287_v11  ;;  %v4351_v11 = vcombine.low %v1348_v51, %v1356_v52  ;;  %v5260_v51 = vld [vmem:[%s5923_s17 + $0x3c8] sm:$0xff]  }
 0x128   : > { %3398 = vmatmul.mubr.bf16.vlgmr.msra.gmra.mrb[32].mxu1 %v4289_v13  ;;  %4879 = vmatpush3.bf16.msra.mxu0 %v5223_v14  ;;  %v4353_v13 = vcombine.low %v1349_v54, %v1357_v55  ;;  %v4368_v14 = vcombine.high %v1364_v3, %v1372_v4  ;;  %v5259_v52 = vld [vmem:[%s5923_s17 + $0x308] sm:$0xff]   ;;  %v1318_v54 = vld [vmem:[%s6728_s0 + $0x120] sm:$0xff] }
 0x129   : > { %4943 = vmatpush3.bf16.msra.mxu1 %v5225_v15  ;;  %3308 = vmatprep.mubr.bf16.mxu0 %v4304_v16  ;;  %v4370_v15 = vcombine.high %v1365_v6, %v1373_v7  ;;  %v1380_v16 = vld [vmem:[%s6728_s0 + $0x310] sm:$0xff]  ;;  %v1326_v55 = vld [vmem:[%s6728_s0 + $0x160] sm:$0xff] }
 0x12a   : > { %3405 = vmatprep.mubr.bf16.mxu1 %v4306_v17  ;;  %4880 = vmatprep.subr.bf16.mxu0 %v5226_v18  ;;  %v1388_v17 = vld [vmem:[%s6728_s0 + $0x350] sm:$0xff]  ;;  %v1381_v18 = vld [vmem:[%s6728_s0 + $0x318] sm:$0xff] }
 0x12b   : > { %4944 = vmatprep.subr.bf16.mxu1 %v5228_v20  ;;  %v4367_v20 = vcombine.low %v1364_v3, %v1372_v4  ;;  %v4384_v22 = vcombine.high %v1380_v16, %v1388_v17  ;;  %v5268_v3 = vld [vmem:[%s5923_s17 + $0x3d8] sm:$0xff]   ;;  %v1334_v4 = vld [vmem:[%s6728_s0 + $0x1a0] sm:$0xff] }
 0x12c   : > { %4881 = vmatpush3.bf16.msra.mxu0 %v5227_v19  ;;  %v1389_v19 = vld [vmem:[%s6728_s0 + $0x358] sm:$0xff] }
 0x12d   : > { %4945 = vmatpush3.bf16.msra.mxu1 %v5229_v21  ;;  %4882 = vmatprep.subr.bf16.mxu0 %v5230_v26  ;;  %v4369_v21 = vcombine.low %v1365_v6, %v1373_v7  ;;  %v4386_v23 = vcombine.high %v1381_v18, %v1389_v19  ;;  %v1397_v26 = vld [vmem:[%s6728_s0 + $0x398] sm:$0xff]  ;;  %v1335_v6 = vld [vmem:[%s6728_s0 + $0x1a8] sm:$0xff] }
 0x12e   : > { %4946 = vmatprep.subr.bf16.mxu1 %v5232_v27  ;;  %v1405_v27 = vld [vmem:[%s6728_s0 + $0x3d8] sm:$0xff] }
 0x12f   : > { %3309 = vmatmul.mubr.bf16.gmra.mrb[36].mxu0 %v4303_v28  ;;  %v4383_v28 = vcombine.low %v1380_v16, %v1388_v17  ;;  %v5267_v7 = vld [vmem:[%s5923_s17 + $0x318] sm:$0xff]   ;;  %v5271_v16 = vld [vmem:[%s5923_s17 + $0x320] sm:$0xff]  }
 0x130   : > { %3406 = vmatmul.mubr.bf16.gmra.mrb[36].mxu1 %v4305_v29  ;;  %3316 = vmatprep.mubr.bf16.mxu0 %v4320_v30  ;;  %v4385_v29 = vcombine.low %v1381_v18, %v1389_v19  ;;  %v4400_v30 = vcombine.high %v1396_v24, %v1404_v25  ;;  %v5273_v17 = vld [vmem:[%s5923_s17 + $0x3a0] sm:$0xff]   ;;  %v5274_v18 = vld [vmem:[%s5923_s17 + $0x368] sm:$0xff]  }
 0x131   : > { %3413 = vmatprep.mubr.bf16.mxu1 %v4322_v32  ;;  %4883 = vmatpush3.bf16.msra.mxu0 %v5231_v31  ;;  %v4402_v31 = vcombine.high %v1397_v26, %v1405_v27  ;;  %v1286_v32 = vld [vmem:[%s6728_s0 + $0x20] sm:$0xff]  ;;  %v5276_v19 = vld [vmem:[%s5923_s17 + $0x3e8] sm:$0xff]  }
 0x132   : > { %4947 = vmatpush3.bf16.msra.mxu1 %v5233_v33  ;;  %4884 = vmatprep.subr.bf16.mxu0 %v5234_v34  ;;  %v1294_v33 = vld [vmem:[%s6728_s0 + $0x60] sm:$0xff]  ;;  %v1287_v34 = vld [vmem:[%s6728_s0 + $0x28] sm:$0xff] }
 0x133   : > { %4948 = vmatprep.subr.bf16.mxu1 %v5236_v37  ;;  %v4401_v37 = vcombine.low %v1397_v26, %v1405_v27  ;;  %v4292_v38 = vcombine.high %v1286_v32, %v1294_v33  ;;  %v4294_v39 = vcombine.high %v1287_v34, %v1295_v35  ;;  %v1359_v24 = vld [vmem:[%s6728_s0 + $0x268] sm:$0xff]  ;;  %v5278_v26 = vld [vmem:[%s5923_s17 + $0x370] sm:$0xff]  }
 0x134   : > { %v5277_v25 = vld [vmem:[%s5923_s17 + $0x3a8] sm:$0xff]  }
 0x135   : > { %4885 = vmatpush3.bf16.msra.mxu0 %v5235_v40  ;;  %v1302_v40 = vld [vmem:[%s6728_s0 + $0xa0] sm:$0xff] }
 0x136   : > { %4949 = vmatpush3.bf16.msra.mxu1 %v5237_v41  ;;  %4886 = vmatprep.subr.bf16.mxu0 %v5238_v42  ;;  %v1310_v41 = vld [vmem:[%s6728_s0 + $0xe0] sm:$0xff]  ;;  %v4291_v42 = vcombine.low %v1286_v32, %v1294_v33  ;;  %v5279_v32 = vld [vmem:[%s5923_s17 + $0x330] sm:$0xff]  }
 0x137   : > { %3317 = vmatmul.mubr.bf16.gmra.mrb[40].mxu0 %v4319_v43  ;;  %4950 = vmatprep.subr.bf16.mxu1 %v5240_v44  ;;  %v1303_v43 = vld [vmem:[%s6728_s0 + $0xa8] sm:$0xff]  ;;  %v5281_v33 = vld [vmem:[%s5923_s17 + $0x3b0] sm:$0xff]  }
 0x138   : > { %3414 = vmatmul.mubr.bf16.gmra.mrb[40].mxu1 %v4321_v45  ;;  %3324 = vmatprep.mubr.bf16.mxu0 %v4336_v46  ;;  %v1311_v44 = vld [vmem:[%s6728_s0 + $0xe8] sm:$0xff]  ;;  %v4293_v45 = vcombine.low %v1287_v34, %v1295_v35  ;;  %v5255_v46 = vld [vmem:[%s5923_s17 + $0x300] sm:$0xff]   ;;  %v5282_v34 = vld [vmem:[%s5923_s17 + $0x378] sm:$0xff]  }
 0x139   : > { %3421 = vmatprep.mubr.bf16.mxu1 %v4338_v47  ;;  %4887 = vmatpush3.bf16.msra.mxu0 %v5239_v48  ;;  %v5257_v47 = vld [vmem:[%s5923_s17 + $0x380] sm:$0xff]   ;;  %v4308_v48 = vcombine.high %v1302_v40, %v1310_v41  ;;  %v5284_v35 = vld [vmem:[%s5923_s17 + $0x3f8] sm:$0xff]  }
 0x13a   : > { %4951 = vmatpush3.bf16.msra.mxu1 %v5241_v49  ;;  %4888 = vmatprep.subr.bf16.mxu0 %v5242_v50  ;;  %v4310_v49 = vcombine.high %v1303_v43, %v1311_v44  ;;  %v5258_v50 = vld [vmem:[%s5923_s17 + $0x348] sm:$0xff]  }
 0x13b   : > { %4952 = vmatprep.subr.bf16.mxu1 %v5244_v53  ;;  %v5261_v53 = vld [vmem:[%s5923_s17 + $0x388] sm:$0xff]  }
 0x13d   : > { %4889 = vmatpush3.bf16.msra.mxu0 %v5243_v56  ;;  %v5262_v56 = vld [vmem:[%s5923_s17 + $0x350] sm:$0xff]  }
 0x13e   : > { %4953 = vmatpush3.bf16.msra.mxu1 %v5245_v57  ;;  %4890 = vmatprep.subr.bf16.mxu0 %v5246_v58  ;;  %v1319_v57 = vld [vmem:[%s6728_s0 + $0x128] sm:$0xff] }
 0x13f   : > { %3325 = vmatmul.mubr.bf16.gmra.mrb[44].mxu0 %v4335_v59  ;;  %4954 = vmatprep.subr.bf16.mxu1 %v5248_v60  ;;  %v1327_v58 = vld [vmem:[%s6728_s0 + $0x168] sm:$0xff]  ;;  %v5264_v59 = vld [vmem:[%s5923_s17 + $0x3d0] sm:$0xff]   ;;  %v4307_v60 = vcombine.low %v1302_v40, %v1310_v41  ;;  %v5285_v41 = vld [vmem:[%s5923_s17 + $0x3b8] sm:$0xff]  }
 0x140   : > { %3422 = vmatmul.mubr.bf16.gmra.mrb[44].mxu1 %v4337_v61  ;;  %3332 = vmatprep.mubr.bf16.mxu0 %v4352_v62  ;;  %v4309_v61 = vcombine.low %v1303_v43, %v1311_v44  ;;  %v4324_v62 = vcombine.high %v1318_v54, %v1326_v55  ;;  %v1375_v40 = vld [vmem:[%s6728_s0 + $0x2e8] sm:$0xff] }
 0x141   : > { %3429 = vmatprep.mubr.bf16.mxu1 %v4354_v0  ;;  %4891 = vmatpush3.bf16.msra.mxu0 %v5247_v63  ;;  %v4326_v63 = vcombine.high %v1319_v57, %v1327_v58  ;;  %v5263_v0 = vld [vmem:[%s5923_s17 + $0x310] sm:$0xff]  }
 0x142   : > { %4955 = vmatpush3.bf16.msra.mxu1 %v5249_v1  ;;  %4892 = vmatprep.subr.bf16.mxu0 %v5250_v2  ;;  %v5265_v1 = vld [vmem:[%s5923_s17 + $0x390] sm:$0xff]   ;;  %v5266_v2 = vld [vmem:[%s5923_s17 + $0x358] sm:$0xff]  }
 0x143   : > { %4956 = vmatprep.subr.bf16.mxu1 %v5252_v5  ;;  %v1342_v5 = vld [vmem:[%s6728_s0 + $0x1e0] sm:$0xff] }
 0x144   : > { %v4339_v27 = vcombine.low %v1334_v4, %v1342_v5 }
 0x145   : > { %4893 = vmatpush3.bf16.msra.mxu0 %v5251_v8  ;;  %v1343_v8 = vld [vmem:[%s6728_s0 + $0x1e8] sm:$0xff] }
 0x146   : > { %4957 = vmatpush3.bf16.msra.mxu1 %v5253_v9  ;;  %5006 = vmatprep.subr.bf16.mxu0 %v5254_v10  ;;  %v5269_v9 = vld [vmem:[%s5923_s17 + $0x398] sm:$0xff]   ;;  %v5270_v10 = vld [vmem:[%s5923_s17 + $0x360] sm:$0xff]  }
 0x147   : > { %3333 = vmatmul.mubr.bf16.gmra.mrb[48].mxu0 %v4351_v11  ;;  %5070 = vmatprep.subr.bf16.mxu1 %v5256_v12  ;;  %v4323_v11 = vcombine.low %v1318_v54, %v1326_v55  ;;  %v5272_v12 = vld [vmem:[%s5923_s17 + $0x3e0] sm:$0xff]  }
 0x148   : > { %3430 = vmatmul.mubr.bf16.gmra.mrb[48].mxu1 %v4353_v13  ;;  %3340 = vmatprep.mubr.bf16.mxu0 %v4368_v14  ;;  %v4325_v13 = vcombine.low %v1319_v57, %v1327_v58  ;;  %v4340_v14 = vcombine.high %v1334_v4, %v1342_v5  ;;  %v1398_v54 = vld [vmem:[%s6728_s0 + $0x3a0] sm:$0xff]  ;;  %v1407_v57 = vld [vmem:[%s6728_s0 + $0x3e8] sm:$0xff] }
 0x149   : > { %3437 = vmatprep.mubr.bf16.mxu1 %v4370_v15  ;;  %v4342_v15 = vcombine.high %v1335_v6, %v1343_v8  ;;  %v1406_v55 = vld [vmem:[%s6728_s0 + $0x3e0] sm:$0xff] }
 0x14f   : > { %3341 = vmatmul.mubr.bf16.gmra.mrb[52].mxu0 %v4367_v20  ;;  %v1350_v20 = vld [vmem:[%s6728_s0 + $0x220] sm:$0xff] }
 0x150   : > { %3438 = vmatmul.mubr.bf16.gmra.mrb[52].mxu1 %v4369_v21  ;;  %3348 = vmatprep.mubr.bf16.mxu0 %v4384_v22  ;;  %v1358_v21 = vld [vmem:[%s6728_s0 + $0x260] sm:$0xff]  ;;  %v1351_v22 = vld [vmem:[%s6728_s0 + $0x228] sm:$0xff] }
 0x151   : > { %3445 = vmatprep.mubr.bf16.mxu1 %v4386_v23  ;;  %v5275_v23 = vld [vmem:[%s5923_s17 + $0x328] sm:$0xff]   ;;  %v4357_v43 = vcombine.low %v1351_v22, %v1359_v24 }
 0x157   : > { %3349 = vmatmul.mubr.bf16.gmra.mrb[56].mxu0 %v4383_v28  ;;  %v5280_v28 = vld [vmem:[%s5923_s17 + $0x3f0] sm:$0xff]  }
 0x158   : > { %3446 = vmatmul.mubr.bf16.gmra.mrb[56].mxu1 %v4385_v29  ;;  %3356 = vmatprep.mubr.bf16.mxu0 %v4400_v30  ;;  %v4341_v29 = vcombine.low %v1335_v6, %v1343_v8  ;;  %v4356_v30 = vcombine.high %v1350_v20, %v1358_v21  ;;  %v1304_v6 = vld [vmem:[%s6728_s0 + $0xb0] sm:$0xff]  ;;  %v1305_v8 = vld [vmem:[%s6728_s0 + $0xb8] sm:$0xff] }
 0x159   : > { %3453 = vmatprep.mubr.bf16.mxu1 %v4402_v31  ;;  %v4358_v31 = vcombine.high %v1351_v22, %v1359_v24  ;;  %v1336_v22 = vld [vmem:[%s6728_s0 + $0x1b0] sm:$0xff]  ;;  %v1337_v24 = vld [vmem:[%s6728_s0 + $0x1b8] sm:$0xff] }
 0x15f   : > { %3357 = vmatmul.mubr.bf16.gmra.mrb[60].mxu0 %v4399_v36  ;;  %v1366_v36 = vld [vmem:[%s6728_s0 + $0x2a0] sm:$0xff] }
 0x160   : > { %3454 = vmatmul.mubr.bf16.gmra.mrb[60].mxu1 %v4401_v37  ;;  %3494 = vmatprep.mubr.bf16.mxu0 %v4292_v38  ;;  %v1374_v37 = vld [vmem:[%s6728_s0 + $0x2e0] sm:$0xff]  ;;  %v5283_v38 = vld [vmem:[%s5923_s17 + $0x338] sm:$0xff]   ;;  %s1276_s17 = scalar_select %p1275_p10, %s5353_s18, 1 }
 0x161   : > { %3591 = vmatprep.mubr.bf16.mxu1 %v4294_v39  ;;  %v1367_v39 = vld [vmem:[%s6728_s0 + $0x2a8] sm:$0xff]  ;;  %v4372_v44 = vcombine.high %v1366_v36, %v1374_v37 }
 0x162   : > { %s1277_s9 = scalar_lea.vmem %s6730_s2, %s1276_s17  ;;  %s1280_s12 = scalar_lea.vmem %s6731_s3, %s1276_s17 }
 0x167   : > { %3495 = vmatmul.mubr.bf16.vlgmr.msra.gmra.mrb[64].mxu0 %v4291_v42  ;;  %v4355_v42 = vcombine.low %v1350_v20, %v1358_v21 }
 0x168   : > { %3592 = vmatmul.mubr.bf16.vlgmr.msra.gmra.mrb[64].mxu1 %v4293_v45  ;;  %5007 = vmatpush3.bf16.msra.mxu0 %v5255_v46  ;;  %v4374_v45 = vcombine.high %v1367_v39, %v1375_v40  ;;  %v1382_v46 = vld [vmem:[%s6728_s0 + $0x320] sm:$0xff] }
 0x169   : > { %5071 = vmatpush3.bf16.msra.mxu1 %v5257_v47  ;;  %3502 = vmatprep.mubr.bf16.mxu0 %v4308_v48  ;;  %v1390_v47 = vld [vmem:[%s6728_s0 + $0x360] sm:$0xff]  ;;  %v1383_v48 = vld [vmem:[%s6728_s0 + $0x328] sm:$0xff] }
 0x16a   : > { %3599 = vmatprep.mubr.bf16.mxu1 %v4310_v49  ;;  %5008 = vmatprep.subr.bf16.mxu0 %v5258_v50  ;;  %v1391_v49 = vld [vmem:[%s6728_s0 + $0x368] sm:$0xff]  ;;  %v4371_v50 = vcombine.low %v1366_v36, %v1374_v37  ;;  %v4387_v58 = vcombine.low %v1382_v46, %v1390_v47 }
 0x16b   : > { %5072 = vmatprep.subr.bf16.mxu1 %v5260_v51  ;;  %v4373_v51 = vcombine.low %v1367_v39, %v1375_v40 }
 0x16c   : > { %5009 = vmatpush3.bf16.msra.mxu0 %v5259_v52  ;;  %v4388_v52 = vcombine.high %v1382_v46, %v1390_v47 }
 0x16d   : > { %5073 = vmatpush3.bf16.msra.mxu1 %v5261_v53  ;;  %5010 = vmatprep.subr.bf16.mxu0 %v5262_v56  ;;  %v4390_v53 = vcombine.high %v1383_v48, %v1391_v49  ;;  %v1399_v56 = vld [vmem:[%s6728_s0 + $0x3a8] sm:$0xff] }
 0x16e   : > { %5074 = vmatprep.subr.bf16.mxu1 %v5264_v59  ;;  %v4389_v59 = vcombine.low %v1383_v48, %v1391_v49 }
 0x16f   : > { %3503 = vmatmul.mubr.bf16.gmra.mrb[68].mxu0 %v4307_v60  ;;  %v4404_v60 = vcombine.high %v1398_v54, %v1406_v55 }
 0x170   : > { %3600 = vmatmul.mubr.bf16.gmra.mrb[68].mxu1 %v4309_v61  ;;  %3510 = vmatprep.mubr.bf16.mxu0 %v4324_v62  ;;  %v4406_v61 = vcombine.high %v1399_v56, %v1407_v57  ;;  %v1288_v62 = vld [vmem:[%s6728_s0 + $0x30] sm:$0xff] }
 0x171   : > { %3607 = vmatprep.mubr.bf16.mxu1 %v4326_v63  ;;  %5011 = vmatpush3.bf16.msra.mxu0 %v5263_v0  ;;  %v1296_v63 = vld [vmem:[%s6728_s0 + $0x70] sm:$0xff]  ;;  %v1289_v0 = vld [vmem:[%s6728_s0 + $0x38] sm:$0xff] }
 0x172   : > { %5075 = vmatpush3.bf16.msra.mxu1 %v5265_v1  ;;  %5012 = vmatprep.subr.bf16.mxu0 %v5266_v2  ;;  %v1297_v1 = vld [vmem:[%s6728_s0 + $0x78] sm:$0xff]  ;;  %v4403_v2 = vcombine.low %v1398_v54, %v1406_v55  ;;  %v4296_v4 = vcombine.high %v1288_v62, %v1296_v63 }
 0x173   : > { %5076 = vmatprep.subr.bf16.mxu1 %v5268_v3  ;;  %v4405_v3 = vcombine.low %v1399_v56, %v1407_v57  ;;  %v4298_v5 = vcombine.high %v1289_v0, %v1297_v1  ;;  %v1369_v55 = vld [vmem:[%s6728_s0 + $0x2b8] sm:$0xff] }
 0x174   : > { %v1377_v56 = vld [vmem:[%s6728_s0 + $0x2f8] sm:$0xff] }
 0x175   : > { %5013 = vmatpush3.bf16.msra.mxu0 %v5267_v7  ;;  %v1312_v7 = vld [vmem:[%s6728_s0 + $0xf0] sm:$0xff] }
 0x176   : > { %5077 = vmatpush3.bf16.msra.mxu1 %v5269_v9  ;;  %5014 = vmatprep.subr.bf16.mxu0 %v5270_v10  ;;  %v1313_v9 = vld [vmem:[%s6728_s0 + $0xf8] sm:$0xff]  ;;  %v4295_v10 = vcombine.low %v1288_v62, %v1296_v63 }
 0x177   : > { %3511 = vmatmul.mubr.bf16.gmra.mrb[72].mxu0 %v4323_v11  ;;  %5078 = vmatprep.subr.bf16.mxu1 %v5272_v12  ;;  %v4297_v11 = vcombine.low %v1289_v0, %v1297_v1  ;;  %v4312_v12 = vcombine.high %v1304_v6, %v1312_v7 }
 0x178   : > { %3608 = vmatmul.mubr.bf16.gmra.mrb[72].mxu1 %v4325_v13  ;;  %3518 = vmatprep.mubr.bf16.mxu0 %v4340_v14  ;;  %v4314_v13 = vcombine.high %v1305_v8, %v1313_v9  ;;  %v1320_v14 = vld [vmem:[%s6728_s0 + $0x130] sm:$0xff] }
 0x179   : > { %3615 = vmatprep.mubr.bf16.mxu1 %v4342_v15  ;;  %5015 = vmatpush3.bf16.msra.mxu0 %v5271_v16  ;;  %v1328_v15 = vld [vmem:[%s6728_s0 + $0x170] sm:$0xff]  ;;  %v1321_v16 = vld [vmem:[%s6728_s0 + $0x138] sm:$0xff] }
 0x17a   : > { %5079 = vmatpush3.bf16.msra.mxu1 %v5273_v17  ;;  %5016 = vmatprep.subr.bf16.mxu0 %v5274_v18  ;;  %v1329_v17 = vld [vmem:[%s6728_s0 + $0x178] sm:$0xff]  ;;  %v4311_v18 = vcombine.low %v1304_v6, %v1312_v7  ;;  %v4328_v20 = vcombine.high %v1320_v14, %v1328_v15 }
 0x17b   : > { %5080 = vmatprep.subr.bf16.mxu1 %v5276_v19  ;;  %v4313_v19 = vcombine.low %v1305_v8, %v1313_v9  ;;  %v4330_v21 = vcombine.high %v1321_v16, %v1329_v17 }
 0x17d   : > { %5017 = vmatpush3.bf16.msra.mxu0 %v5275_v23  ;;  %v1344_v23 = vld [vmem:[%s6728_s0 + $0x1f0] sm:$0xff] }
 0x17e   : > { %5081 = vmatpush3.bf16.msra.mxu1 %v5277_v25  ;;  %5018 = vmatprep.subr.bf16.mxu0 %v5278_v26  ;;  %v1345_v25 = vld [vmem:[%s6728_s0 + $0x1f8] sm:$0xff]  ;;  %v4327_v26 = vcombine.low %v1320_v14, %v1328_v15  ;;  %v4343_v37 = vcombine.low %v1336_v22, %v1344_v23 }
 0x17f   : > { %3519 = vmatmul.mubr.bf16.gmra.mrb[76].mxu0 %v4339_v27  ;;  %5082 = vmatprep.subr.bf16.mxu1 %v5280_v28  ;;  %v4329_v27 = vcombine.low %v1321_v16, %v1329_v17  ;;  %v4344_v28 = vcombine.high %v1336_v22, %v1344_v23  ;;  %v1393_v14 = vld [vmem:[%s6728_s0 + $0x378] sm:$0xff] }
 0x180   : > { %3616 = vmatmul.mubr.bf16.gmra.mrb[76].mxu1 %v4341_v29  ;;  %3526 = vmatprep.mubr.bf16.mxu0 %v4356_v30  ;;  %v4346_v29 = vcombine.high %v1337_v24, %v1345_v25  ;;  %v1352_v30 = vld [vmem:[%s6728_s0 + $0x230] sm:$0xff] }
 0x181   : > { %3623 = vmatprep.mubr.bf16.mxu1 %v4358_v31  ;;  %5019 = vmatpush3.bf16.msra.mxu0 %v5279_v32  ;;  %v1360_v31 = vld [vmem:[%s6728_s0 + $0x270] sm:$0xff] }
 0x182   : > { %5083 = vmatpush3.bf16.msra.mxu1 %v5281_v33  ;;  %5020 = vmatprep.subr.bf16.mxu0 %v5282_v34  ;;  %v1353_v33 = vld [vmem:[%s6728_s0 + $0x238] sm:$0xff] }
 0x183   : > { %5084 = vmatprep.subr.bf16.mxu1 %v5284_v35  ;;  %v1361_v34 = vld [vmem:[%s6728_s0 + $0x278] sm:$0xff] }
 0x184   : > { %v4362_v46 = vcombine.high %v1353_v33, %v1361_v34  ;;  %v4361_v63 = vcombine.low %v1353_v33, %v1361_v34  ;;  %v1408_v33 = vld [vmem:[%s6728_s0 + $0x3f0] sm:$0xff] }
 0x185   : > { %5021 = vmatpush3.bf16.msra.mxu0 %v5283_v38 }
 0x186   : > { %5085 = vmatpush3.bf16.msra.mxu1 %v5285_v41  ;;  %v4345_v41 = vcombine.low %v1337_v24, %v1345_v25 }
 0x187   : > { %3527 = vmatmul.mubr.bf16.gmra.mrb[80].mxu0 %v4355_v42  ;;  %v4360_v42 = vcombine.high %v1352_v30, %v1360_v31 }
 0x188   : > { %3624 = vmatmul.mubr.bf16.gmra.mrb[80].mxu1 %v4357_v43  ;;  %3534 = vmatprep.mubr.bf16.mxu0 %v4372_v44 }
 0x189   : > { %3631 = vmatprep.mubr.bf16.mxu1 %v4374_v45 }
 0x18f   : > { %3535 = vmatmul.mubr.bf16.gmra.mrb[84].mxu0 %v4371_v50 }
 0x190   : > { %3632 = vmatmul.mubr.bf16.gmra.mrb[84].mxu1 %v4373_v51  ;;  %3542 = vmatprep.mubr.bf16.mxu0 %v4388_v52  ;;  %v1368_v52 = vld [vmem:[%s6728_s0 + $0x2b0] sm:$0xff] }
 0x191   : > { %3639 = vmatprep.mubr.bf16.mxu1 %v4390_v53  ;;  %v1376_v53 = vld [vmem:[%s6728_s0 + $0x2f0] sm:$0xff] }
 0x192   : > { %v4376_v0 = vcombine.high %v1368_v52, %v1376_v53  ;;  %v4375_v17 = vcombine.low %v1368_v52, %v1376_v53 }
 0x197   : > { %3543 = vmatmul.mubr.bf16.gmra.mrb[88].mxu0 %v4387_v58 }
 0x198   : > { %3640 = vmatmul.mubr.bf16.gmra.mrb[88].mxu1 %v4389_v59  ;;  %3550 = vmatprep.mubr.bf16.mxu0 %v4404_v60  ;;  %v4359_v59 = vcombine.low %v1352_v30, %v1360_v31 }
 0x199   : > { %3647 = vmatprep.mubr.bf16.mxu1 %v4406_v61 }
 0x19f   : > { %3551 = vmatmul.mubr.bf16.gmra.mrb[92].mxu0 %v4403_v2 }
 0x1a0   : > { %3648 = vmatmul.mubr.bf16.gmra.mrb[92].mxu1 %v4405_v3  ;;  %3688 = vmatprep.mubr.bf16.mxu0 %v4296_v4  ;;  %v4378_v4 = vcombine.high %v1369_v55, %v1377_v56 }
 0x1a1   : > { %3785 = vmatprep.mubr.bf16.mxu1 %v4298_v5 }
 0x1a7   : > { %3689 = vmatmul.mubr.bf16.vlgmr.msra.gmra.mrb[96].mxu0 %v4295_v10  ;;  %v1384_v10 = vld [vmem:[%s6728_s0 + $0x330] sm:$0xff] }
 0x1a8   : > { %3786 = vmatmul.mubr.bf16.vlgmr.msra.gmra.mrb[96].mxu1 %v4297_v11  ;;  %3696 = vmatprep.mubr.bf16.mxu0 %v4312_v12  ;;  %v1392_v11 = vld [vmem:[%s6728_s0 + $0x370] sm:$0xff] }
 0x1a9   : > { %3793 = vmatprep.mubr.bf16.mxu1 %v4314_v13  ;;  %v1385_v13 = vld [vmem:[%s6728_s0 + $0x338] sm:$0xff]  ;;  %v4392_v22 = vcombine.high %v1384_v10, %v1392_v11 }
 0x1af   : > { %3697 = vmatmul.mubr.bf16.gmra.mrb[100].mxu0 %v4311_v18 }
 0x1b0   : > { %3794 = vmatmul.mubr.bf16.gmra.mrb[100].mxu1 %v4313_v19  ;;  %3704 = vmatprep.mubr.bf16.mxu0 %v4328_v20 }
 0x1b1   : > { %3801 = vmatprep.mubr.bf16.mxu1 %v4330_v21  ;;  %v4377_v21 = vcombine.low %v1369_v55, %v1377_v56 }
 0x1b7   : > { %3705 = vmatmul.mubr.bf16.gmra.mrb[104].mxu0 %v4327_v26  ;;  %v4394_v26 = vcombine.high %v1385_v13, %v1393_v14 }
 0x1b8   : > { %3802 = vmatmul.mubr.bf16.gmra.mrb[104].mxu1 %v4329_v27  ;;  %3712 = vmatprep.mubr.bf16.mxu0 %v4344_v28 }
 0x1b9   : > { %3809 = vmatprep.mubr.bf16.mxu1 %v4346_v29 }
 0x1ba   : > { %v4638_v32 = vpop.f32.mrb[0].mxu0 }
 0x1bb   : > { %v4702_v35 = vpop.f32.mrb[0].mxu1  ;;  %v4639_v36 = vpop.f32.mrb[1].mxu0 }
 0x1bc   : > { %v4640_v38 = vadd.f32 %v4639_v36, %v4638_v32  ;;  %v4703_v39 = vpop.f32.mrb[1].mxu1  ;;  %v4641_v40 = vpop.f32.mrb[2].mxu0  ;;  %v1400_v32 = vld [vmem:[%s6728_s0 + $0x3b0] sm:$0xff]  ;;  %v1409_v36 = vld [vmem:[%s6728_s0 + $0x3f8] sm:$0xff] }
 0x1bd   : > { %v4704_v43 = vadd.f32 %v4703_v39, %v4702_v35  ;;  %v4705_v44 = vpop.f32.mrb[2].mxu1  ;;  %v4642_v45 = vpop.f32.mrb[3].mxu0  ;;  %v1401_v35 = vld [vmem:[%s6728_s0 + $0x3b8] sm:$0xff]  ;;  %v4391_v39 = vcombine.low %v1384_v10, %v1392_v11 }
 0x1be   : > { %v4643_v47 = vadd.f32 %v4642_v45, %v4641_v40  ;;  %v4706_v48 = vpop.f32.mrb[3].mxu1 }
 0x1bf   : > { %v6393_v49 = vadd.f32 %v4704_v43, %v4640_v38  ;;  %v4707_v50 = vadd.f32 %v4706_v48, %v4705_v44  ;;  %3713 = vmatmul.mubr.bf16.gmra.mrb[108].mxu0 %v4343_v37  ;;  %v4393_v43 = vcombine.low %v1385_v13, %v1393_v14  ;;  %v4408_v44 = vcombine.high %v1400_v32, %v1408_v33 }
 0x1c0   : > { %3810 = vmatmul.mubr.bf16.gmra.mrb[108].mxu1 %v4345_v41  ;;  %3720 = vmatprep.mubr.bf16.mxu0 %v4360_v42  ;;  %v4410_v48 = vcombine.high %v1401_v35, %v1409_v36 }
 0x1c1   : > { %v6395_v51 = vadd.f32 %v4707_v50, %v4643_v47  ;;  %3817 = vmatprep.mubr.bf16.mxu1 %v4362_v46 }
 0x1c2   : > { %v4644_v54 = vpop.f32.mrb[4].mxu0 }
 0x1c3   : > { %v4708_v57 = vpop.f32.mrb[4].mxu1  ;;  %v4645_v58 = vpop.f32.mrb[5].mxu0 }
 0x1c4   : > { %v4646_v60 = vadd.f32 %v4645_v58, %v4644_v54  ;;  %v4709_v61 = vpop.f32.mrb[5].mxu1  ;;  %v4647_v62 = vpop.f32.mrb[6].mxu0 }
 0x1c5   : > { %v4710_v1 = vadd.f32 %v4709_v61, %v4708_v57  ;;  %v4711_v2 = vpop.f32.mrb[6].mxu1  ;;  %v4648_v3 = vpop.f32.mrb[7].mxu0 }
 0x1c6   : > { %v4649_v5 = vadd.f32 %v4648_v3, %v4647_v62  ;;  %v4712_v6 = vpop.f32.mrb[7].mxu1 }
 0x1c7   : > { %v6409_v7 = vadd.f32 %v4710_v1, %v4646_v60  ;;  %v4713_v8 = vadd.f32 %v4712_v6, %v4711_v2  ;;  %3721 = vmatmul.mubr.bf16.gmra.mrb[112].mxu0 %v4359_v59  ;;  %v4407_v59 = vcombine.low %v1400_v32, %v1408_v33 }
 0x1c8   : > { %3818 = vmatmul.mubr.bf16.gmra.mrb[112].mxu1 %v4361_v63  ;;  %3728 = vmatprep.mubr.bf16.mxu0 %v4376_v0  ;;  %v4409_v63 = vcombine.low %v1401_v35, %v1409_v36 }
 0x1c9   : > { %v6411_v9 = vadd.f32 %v4713_v8, %v4649_v5  ;;  %3825 = vmatprep.mubr.bf16.mxu1 %v4378_v4 }
 0x1ca   : > { %v4650_v12 = vpop.f32.mrb[8].mxu0 }
 0x1cb   : > { %v4714_v15 = vpop.f32.mrb[8].mxu1  ;;  %v4651_v16 = vpop.f32.mrb[9].mxu0 }
 0x1cc   : > { %v4652_v18 = vadd.f32 %v4651_v16, %v4650_v12  ;;  %v4715_v19 = vpop.f32.mrb[9].mxu1  ;;  %v4653_v20 = vpop.f32.mrb[10].mxu0 }
 0x1cd   : > { %v4716_v23 = vadd.f32 %v4715_v19, %v4714_v15  ;;  %v4717_v24 = vpop.f32.mrb[10].mxu1  ;;  %v4654_v25 = vpop.f32.mrb[11].mxu0 }
 0x1ce   : > { %v4655_v27 = vadd.f32 %v4654_v25, %v4653_v20  ;;  %v4718_v28 = vpop.f32.mrb[11].mxu1 }
 0x1cf   : > { %v6425_v29 = vadd.f32 %v4716_v23, %v4652_v18  ;;  %v4719_v30 = vadd.f32 %v4718_v28, %v4717_v24  ;;  %3729 = vmatmul.mubr.bf16.gmra.mrb[116].mxu0 %v4375_v17 }
 0x1d0   : > { %3826 = vmatmul.mubr.bf16.gmra.mrb[116].mxu1 %v4377_v21  ;;  %3736 = vmatprep.mubr.bf16.mxu0 %v4392_v22 }
 0x1d1   : > { %v6427_v31 = vadd.f32 %v4719_v30, %v4655_v27  ;;  %3833 = vmatprep.mubr.bf16.mxu1 %v4394_v26 }
 0x1d2   : > { %v4656_v34 = vpop.f32.mrb[12].mxu0 }
 0x1d3   : > { %v4720_v37 = vpop.f32.mrb[12].mxu1  ;;  %v4657_v38 = vpop.f32.mrb[13].mxu0 }
 0x1d4   : > { %v4658_v40 = vadd.f32 %v4657_v38, %v4656_v34  ;;  %v4721_v41 = vpop.f32.mrb[13].mxu1  ;;  %v4659_v42 = vpop.f32.mrb[14].mxu0 }
 0x1d5   : > { %v4722_v45 = vadd.f32 %v4721_v41, %v4720_v37  ;;  %v4723_v46 = vpop.f32.mrb[14].mxu1  ;;  %v4660_v47 = vpop.f32.mrb[15].mxu0 }
 0x1d6   : > { %v4661_v50 = vadd.f32 %v4660_v47, %v4659_v42  ;;  %v4724_v52 = vpop.f32.mrb[15].mxu1 }
 0x1d7   : > { %v6441_v53 = vadd.f32 %v4722_v45, %v4658_v40  ;;  %v4725_v54 = vadd.f32 %v4724_v52, %v4723_v46  ;;  %3737 = vmatmul.mubr.bf16.gmra.mrb[120].mxu0 %v4391_v39 }
 0x1d8   : > { %3834 = vmatmul.mubr.bf16.gmra.mrb[120].mxu1 %v4393_v43  ;;  %3744 = vmatprep.mubr.bf16.mxu0 %v4408_v44 }
 0x1d9   : > { %v6443_v55 = vadd.f32 %v4725_v54, %v4661_v50  ;;  %3841 = vmatprep.mubr.bf16.mxu1 %v4410_v48 }
 0x1da   : > { %v4662_v56 = vpop.f32.mrb[16].mxu0 }
 0x1db   : > { %v4726_v57 = vpop.f32.mrb[16].mxu1  ;;  %v4663_v58 = vpop.f32.mrb[17].mxu0 }
 0x1dc   : > { %v4664_v60 = vadd.f32 %v4663_v58, %v4662_v56  ;;  %v4727_v61 = vpop.f32.mrb[17].mxu1  ;;  %v4665_v62 = vpop.f32.mrb[18].mxu0 }
 0x1dd   : > { %v4728_v0 = vadd.f32 %v4727_v61, %v4726_v57  ;;  %v4729_v1 = vpop.f32.mrb[18].mxu1  ;;  %v4666_v2 = vpop.f32.mrb[19].mxu0 }
 0x1de   : > { %v4667_v3 = vadd.f32 %v4666_v2, %v4665_v62  ;;  %v4730_v4 = vpop.f32.mrb[19].mxu1 }
 0x1df   : > { %v6445_v5 = vadd.f32 %v4728_v0, %v4664_v60  ;;  %v4731_v6 = vadd.f32 %v4730_v4, %v4729_v1  ;;  %3745 = vmatmul.mubr.bf16.gmra.mrb[124].mxu0 %v4407_v59 }
 0x1e0   : > { %3842 = vmatmul.mubr.bf16.gmra.mrb[124].mxu1 %v4409_v63 }
 0x1e1   : > { %v6447_v8 = vadd.f32 %v4731_v6, %v4667_v3 }
 0x1e2   : > { %v4668_v10 = vpop.f32.mrb[20].mxu0 }
 0x1e3   : > { %v4732_v11 = vpop.f32.mrb[20].mxu1  ;;  %v4669_v12 = vpop.f32.mrb[21].mxu0 }
 0x1e4   : > { %v4670_v13 = vadd.f32 %v4669_v12, %v4668_v10  ;;  %v4733_v14 = vpop.f32.mrb[21].mxu1  ;;  %v4671_v15 = vpop.f32.mrb[22].mxu0 }
 0x1e5   : > { %v4734_v16 = vadd.f32 %v4733_v14, %v4732_v11  ;;  %v4735_v17 = vpop.f32.mrb[22].mxu1  ;;  %v4672_v18 = vpop.f32.mrb[23].mxu0 }
 0x1e6   : > { %v4673_v19 = vadd.f32 %v4672_v18, %v4671_v15  ;;  %v4736_v20 = vpop.f32.mrb[23].mxu1 }
 0x1e7   : > { %v6449_v21 = vadd.f32 %v4734_v16, %v4670_v13  ;;  %v4737_v22 = vadd.f32 %v4736_v20, %v4735_v17 }
 0x1e9   : > { %v6451_v23 = vadd.f32 %v4737_v22, %v4673_v19 }
 0x1ea   : > { %v4674_v24 = vpop.f32.mrb[24].mxu0 }
 0x1eb   : > { %v4738_v25 = vpop.f32.mrb[24].mxu1  ;;  %v4675_v26 = vpop.f32.mrb[25].mxu0 }
 0x1ec   : > { %v4676_v27 = vadd.f32 %v4675_v26, %v4674_v24  ;;  %v4739_v28 = vpop.f32.mrb[25].mxu1  ;;  %v4677_v30 = vpop.f32.mrb[26].mxu0 }
 0x1ed   : > { %v4740_v32 = vadd.f32 %v4739_v28, %v4738_v25  ;;  %v4741_v33 = vpop.f32.mrb[26].mxu1  ;;  %v4678_v34 = vpop.f32.mrb[27].mxu0 }
 0x1ee   : > { %v4679_v35 = vadd.f32 %v4678_v34, %v4677_v30  ;;  %v4742_v36 = vpop.f32.mrb[27].mxu1 }
 0x1ef   : > { %v6453_v37 = vadd.f32 %v4740_v32, %v4676_v27  ;;  %v4743_v38 = vadd.f32 %v4742_v36, %v4741_v33 }
 0x1f1   : > { %v6455_v39 = vadd.f32 %v4743_v38, %v4679_v35 }
 0x1f2   : > { %v4680_v40 = vpop.f32.mrb[28].mxu0 }
 0x1f3   : > { %v4744_v41 = vpop.f32.mrb[28].mxu1  ;;  %v4681_v42 = vpop.f32.mrb[29].mxu0 }
 0x1f4   : > { %v4682_v43 = vadd.f32 %v4681_v42, %v4680_v40  ;;  %v4745_v44 = vpop.f32.mrb[29].mxu1  ;;  %v4683_v45 = vpop.f32.mrb[30].mxu0 }
 0x1f5   : > { %v4746_v46 = vadd.f32 %v4745_v44, %v4744_v41  ;;  %v4747_v47 = vpop.f32.mrb[30].mxu1  ;;  %v4684_v48 = vpop.f32.mrb[31].mxu0 }
 0x1f6   : > { %v4685_v50 = vadd.f32 %v4684_v48, %v4683_v45  ;;  %v4748_v52 = vpop.f32.mrb[31].mxu1 }
 0x1f7   : > { %v6457_v54 = vadd.f32 %v4746_v46, %v4682_v43  ;;  %v4749_v56 = vadd.f32 %v4748_v52, %v4747_v47 }
 0x1f9   : > { %v6459_v57 = vadd.f32 %v4749_v56, %v4685_v50 }
 0x1fa   : > { %v4766_v58 = vpop.f32.mrb[32].mxu0 }
 0x1fb   : > { %v4830_v59 = vpop.f32.mrb[32].mxu1  ;;  %v4767_v60 = vpop.f32.mrb[33].mxu0 }
 0x1fc   : > { %v4768_v61 = vadd.f32 %v4767_v60, %v4766_v58  ;;  %v4831_v62 = vpop.f32.mrb[33].mxu1  ;;  %v4769_v63 = vpop.f32.mrb[34].mxu0 }
 0x1fd   : > { %v4832_v0 = vadd.f32 %v4831_v62, %v4830_v59  ;;  %v4833_v1 = vpop.f32.mrb[34].mxu1  ;;  %v4770_v2 = vpop.f32.mrb[35].mxu0 }
 0x1fe   : > { %v3303_v3 = vadd.f32 %v4768_v61, %v6393_v49  ;;  %v4771_v4 = vadd.f32 %v4770_v2, %v4769_v63  ;;  %v4834_v6 = vpop.f32.mrb[35].mxu1 }
 0x1ff   : > { %v4835_v10 = vadd.f32 %v4834_v6, %v4833_v1 }
 0x200   : > { %v6462_v11 = vadd.f32 %v4832_v0, %v3303_v3  ;;  %v3306_v12 = vadd.f32 %v4771_v4, %v6395_v51 }
 0x202   : > { %v6465_v13 = vadd.f32 %v4835_v10, %v3306_v12  ;;  %v4772_v14 = vpop.f32.mrb[36].mxu0 }
 0x203   : > { %v4836_v15 = vpop.f32.mrb[36].mxu1  ;;  %v4773_v16 = vpop.f32.mrb[37].mxu0 }
 0x204   : > { %v4774_v17 = vadd.f32 %v4773_v16, %v4772_v14  ;;  %v4837_v18 = vpop.f32.mrb[37].mxu1  ;;  %v4775_v19 = vpop.f32.mrb[38].mxu0 }
 0x205   : > { %v4838_v20 = vadd.f32 %v4837_v18, %v4836_v15  ;;  %v4839_v22 = vpop.f32.mrb[38].mxu1  ;;  %v4776_v24 = vpop.f32.mrb[39].mxu0 }
 0x206   : > { %v3311_v49 = vadd.f32 %v4774_v17, %v6409_v7  ;;  %v4777_v25 = vadd.f32 %v4776_v24, %v4775_v19  ;;  %v4840_v26 = vpop.f32.mrb[39].mxu1 }
 0x207   : > { %v4841_v27 = vadd.f32 %v4840_v26, %v4839_v22 }
 0x208   : > { %v6468_v28 = vadd.f32 %v4838_v20, %v3311_v49  ;;  %v3314_v51 = vadd.f32 %v4777_v25, %v6411_v9 }
 0x20a   : > { %v6471_v30 = vadd.f32 %v4841_v27, %v3314_v51  ;;  %v4778_v32 = vpop.f32.mrb[40].mxu0 }
 0x20b   : > { %v4842_v33 = vpop.f32.mrb[40].mxu1  ;;  %v4779_v34 = vpop.f32.mrb[41].mxu0 }
 0x20c   : > { %v4780_v35 = vadd.f32 %v4779_v34, %v4778_v32  ;;  %v4843_v36 = vpop.f32.mrb[41].mxu1  ;;  %v4781_v38 = vpop.f32.mrb[42].mxu0 }
 0x20d   : > { %v4844_v40 = vadd.f32 %v4843_v36, %v4842_v33  ;;  %v4845_v41 = vpop.f32.mrb[42].mxu1  ;;  %v4782_v42 = vpop.f32.mrb[43].mxu0 }
 0x20e   : > { %v3319_v7 = vadd.f32 %v4780_v35, %v6425_v29  ;;  %v4783_v43 = vadd.f32 %v4782_v42, %v4781_v38  ;;  %v4846_v44 = vpop.f32.mrb[43].mxu1 }
 0x20f   : > { %v4847_v45 = vadd.f32 %v4846_v44, %v4845_v41 }
 0x210   : > { %v6474_v46 = vadd.f32 %v4844_v40, %v3319_v7  ;;  %v3322_v9 = vadd.f32 %v4783_v43, %v6427_v31 }
 0x212   : > { %v6477_v47 = vadd.f32 %v4847_v45, %v3322_v9  ;;  %v4784_v48 = vpop.f32.mrb[44].mxu0 }
 0x213   : > { %v4848_v50 = vpop.f32.mrb[44].mxu1  ;;  %v4785_v52 = vpop.f32.mrb[45].mxu0 }
 0x214   : > { %v4786_v56 = vadd.f32 %v4785_v52, %v4784_v48  ;;  %v4849_v58 = vpop.f32.mrb[45].mxu1  ;;  %v4787_v59 = vpop.f32.mrb[46].mxu0 }
 0x215   : > { %v4850_v60 = vadd.f32 %v4849_v58, %v4848_v50  ;;  %v4851_v61 = vpop.f32.mrb[46].mxu1  ;;  %v4788_v62 = vpop.f32.mrb[47].mxu0 }
 0x216   : > { %v3327_v29 = vadd.f32 %v4786_v56, %v6441_v53  ;;  %v4789_v63 = vadd.f32 %v4788_v62, %v4787_v59  ;;  %v4852_v0 = vpop.f32.mrb[47].mxu1 }
 0x217   : > { %v4853_v1 = vadd.f32 %v4852_v0, %v4851_v61 }
 0x218   : > { %v6480_v2 = vadd.f32 %v4850_v60, %v3327_v29  ;;  %v3330_v31 = vadd.f32 %v4789_v63, %v6443_v55 }
 0x21a   : > { %v6483_v3 = vadd.f32 %v4853_v1, %v3330_v31  ;;  %v4790_v4 = vpop.f32.mrb[48].mxu0 }
 0x21b   : > { %v4854_v6 = vpop.f32.mrb[48].mxu1  ;;  %v4791_v10 = vpop.f32.mrb[49].mxu0 }
 0x21c   : > { %v4792_v12 = vadd.f32 %v4791_v10, %v4790_v4  ;;  %v4855_v14 = vpop.f32.mrb[49].mxu1  ;;  %v4793_v15 = vpop.f32.mrb[50].mxu0 }
 0x21d   : > { %v4856_v16 = vadd.f32 %v4855_v14, %v4854_v6  ;;  %v4857_v17 = vpop.f32.mrb[50].mxu1  ;;  %v4794_v18 = vpop.f32.mrb[51].mxu0 }
 0x21e   : > { %v3335_v53 = vadd.f32 %v4792_v12, %v6445_v5  ;;  %v4795_v19 = vadd.f32 %v4794_v18, %v4793_v15  ;;  %v4858_v20 = vpop.f32.mrb[51].mxu1 }
 0x21f   : > { %v4859_v22 = vadd.f32 %v4858_v20, %v4857_v17 }
 0x220   : > { %v6486_v24 = vadd.f32 %v4856_v16, %v3335_v53  ;;  %v3338_v55 = vadd.f32 %v4795_v19, %v6447_v8 }
 0x222   : > { %v6489_v49 = vadd.f32 %v4859_v22, %v3338_v55  ;;  %v4796_v25 = vpop.f32.mrb[52].mxu0 }
 0x223   : > { %v4860_v26 = vpop.f32.mrb[52].mxu1  ;;  %v4797_v27 = vpop.f32.mrb[53].mxu0 }
 0x224   : > { %v4798_v51 = vadd.f32 %v4797_v27, %v4796_v25  ;;  %v4861_v32 = vpop.f32.mrb[53].mxu1  ;;  %v4799_v33 = vpop.f32.mrb[54].mxu0 }
 0x225   : > { %v4862_v34 = vadd.f32 %v4861_v32, %v4860_v26  ;;  %v4863_v35 = vpop.f32.mrb[54].mxu1  ;;  %v4800_v36 = vpop.f32.mrb[55].mxu0 }
 0x226   : > { %v3343_v5 = vadd.f32 %v4798_v51, %v6449_v21  ;;  %v4801_v38 = vadd.f32 %v4800_v36, %v4799_v33  ;;  %v4864_v40 = vpop.f32.mrb[55].mxu1 }
 0x227   : > { %v4865_v41 = vadd.f32 %v4864_v40, %v4863_v35 }
 0x228   : > { %v6492_v42 = vadd.f32 %v4862_v34, %v3343_v5  ;;  %v3346_v8 = vadd.f32 %v4801_v38, %v6451_v23 }
 0x22a   : > { %v6495_v7 = vadd.f32 %v4865_v41, %v3346_v8  ;;  %v4802_v43 = vpop.f32.mrb[56].mxu0 }
 0x22b   : > { %v4866_v44 = vpop.f32.mrb[56].mxu1  ;;  %v4803_v45 = vpop.f32.mrb[57].mxu0 }
 0x22c   : > { %v4804_v9 = vadd.f32 %v4803_v45, %v4802_v43  ;;  %v4867_v48 = vpop.f32.mrb[57].mxu1  ;;  %v4805_v50 = vpop.f32.mrb[58].mxu0 }
 0x22d   : > { %v4868_v52 = vadd.f32 %v4867_v48, %v4866_v44  ;;  %v4869_v56 = vpop.f32.mrb[58].mxu1  ;;  %v4806_v58 = vpop.f32.mrb[59].mxu0 }
 0x22e   : > { %v3351_v21 = vadd.f32 %v4804_v9, %v6453_v37  ;;  %v4807_v59 = vadd.f32 %v4806_v58, %v4805_v50  ;;  %v4870_v60 = vpop.f32.mrb[59].mxu1 }
 0x22f   : > { %v4871_v61 = vadd.f32 %v4870_v60, %v4869_v56 }
 0x230   : > { %v6498_v62 = vadd.f32 %v4868_v52, %v3351_v21  ;;  %v3354_v23 = vadd.f32 %v4807_v59, %v6455_v39 }
 0x232   : > { %v6501_v29 = vadd.f32 %v4871_v61, %v3354_v23  ;;  %v4808_v63 = vpop.f32.mrb[60].mxu0 }
 0x233   : > { %v4872_v0 = vpop.f32.mrb[60].mxu1  ;;  %v4809_v1 = vpop.f32.mrb[61].mxu0 }
 0x234   : > { %v4810_v31 = vadd.f32 %v4809_v1, %v4808_v63  ;;  %v4873_v4 = vpop.f32.mrb[61].mxu1  ;;  %v4811_v6 = vpop.f32.mrb[62].mxu0 }
 0x235   : > { %v4874_v10 = vadd.f32 %v4873_v4, %v4872_v0  ;;  %v4875_v12 = vpop.f32.mrb[62].mxu1  ;;  %v4812_v14 = vpop.f32.mrb[63].mxu0 }
 0x236   : > { %v3359_v37 = vadd.f32 %v4810_v31, %v6457_v54  ;;  %v4813_v15 = vadd.f32 %v4812_v14, %v4811_v6  ;;  %v4876_v16 = vpop.f32.mrb[63].mxu1 }
 0x237   : > { %v4877_v17 = vadd.f32 %v4876_v16, %v4875_v12 }
 0x238   : > { %v6504_v18 = vadd.f32 %v4874_v10, %v3359_v37  ;;  %v3362_v39 = vadd.f32 %v4813_v15, %v6459_v57 }
 0x23a   : > { %v6507_v53 = vadd.f32 %v4877_v17, %v3362_v39  ;;  %v4894_v19 = vpop.f32.mrb[64].mxu0 }
 0x23b   : > { %v4958_v20 = vpop.f32.mrb[64].mxu1  ;;  %v4895_v22 = vpop.f32.mrb[65].mxu0 }
 0x23c   : > { %v4896_v55 = vadd.f32 %v4895_v22, %v4894_v19  ;;  %v4959_v25 = vpop.f32.mrb[65].mxu1  ;;  %v4897_v26 = vpop.f32.mrb[66].mxu0 }
 0x23d   : > { %v4960_v27 = vadd.f32 %v4959_v25, %v4958_v20  ;;  %v4961_v51 = vpop.f32.mrb[66].mxu1  ;;  %v4898_v32 = vpop.f32.mrb[67].mxu0 }
 0x23e   : > { %v3497_v54 = vadd.f32 %v4896_v55, %v6462_v11  ;;  %v4899_v33 = vadd.f32 %v4898_v32, %v4897_v26  ;;  %v4962_v34 = vpop.f32.mrb[67].mxu1 }
 0x23f   : > { %v4963_v35 = vadd.f32 %v4962_v34, %v4961_v51 }
 0x240   : > { %v6510_v36 = vadd.f32 %v4960_v27, %v3497_v54  ;;  %v3500_v57 = vadd.f32 %v4899_v33, %v6465_v13 }
 0x242   : > { %v6513_v5 = vadd.f32 %v4963_v35, %v3500_v57  ;;  %v4900_v38 = vpop.f32.mrb[68].mxu0 }
 0x243   : > { %v4964_v40 = vpop.f32.mrb[68].mxu1  ;;  %v4901_v41 = vpop.f32.mrb[69].mxu0 }
 0x244   : > { %v4902_v8 = vadd.f32 %v4901_v41, %v4900_v38  ;;  %v4965_v43 = vpop.f32.mrb[69].mxu1  ;;  %v4903_v44 = vpop.f32.mrb[70].mxu0 }
 0x245   : > { %v4966_v45 = vadd.f32 %v4965_v43, %v4964_v40  ;;  %v4967_v9 = vpop.f32.mrb[70].mxu1  ;;  %v4904_v48 = vpop.f32.mrb[71].mxu0 }
 0x246   : > { %v3505_v11 = vadd.f32 %v4902_v8, %v6468_v28  ;;  %v4905_v50 = vadd.f32 %v4904_v48, %v4903_v44  ;;  %v4968_v52 = vpop.f32.mrb[71].mxu1 }
 0x247   : > { %v4969_v56 = vadd.f32 %v4968_v52, %v4967_v9 }
 0x248   : > { %v6516_v58 = vadd.f32 %v4966_v45, %v3505_v11  ;;  %v3508_v13 = vadd.f32 %v4905_v50, %v6471_v30 }
 0x24a   : > { %v6519_v21 = vadd.f32 %v4969_v56, %v3508_v13  ;;  %v4906_v59 = vpop.f32.mrb[72].mxu0 }
 0x24b   : > { %v4970_v60 = vpop.f32.mrb[72].mxu1  ;;  %v4907_v61 = vpop.f32.mrb[73].mxu0 }
 0x24c   : > { %v4908_v23 = vadd.f32 %v4907_v61, %v4906_v59  ;;  %v4971_v63 = vpop.f32.mrb[73].mxu1  ;;  %v4909_v0 = vpop.f32.mrb[74].mxu0 }
 0x24d   : > { %v4972_v1 = vadd.f32 %v4971_v63, %v4970_v60  ;;  %v4973_v31 = vpop.f32.mrb[74].mxu1  ;;  %v4910_v4 = vpop.f32.mrb[75].mxu0 }
 0x24e   : > { %v3513_v28 = vadd.f32 %v4908_v23, %v6474_v46  ;;  %v4911_v6 = vadd.f32 %v4910_v4, %v4909_v0  ;;  %v4974_v10 = vpop.f32.mrb[75].mxu1 }
 0x24f   : > { %v4975_v12 = vadd.f32 %v4974_v10, %v4973_v31 }
 0x250   : > { %v6522_v14 = vadd.f32 %v4972_v1, %v3513_v28  ;;  %v3516_v30 = vadd.f32 %v4911_v6, %v6477_v47 }
 0x252   : > { %v6525_v37 = vadd.f32 %v4975_v12, %v3516_v30  ;;  %v4912_v15 = vpop.f32.mrb[76].mxu0 }
 0x253   : > { %v4976_v16 = vpop.f32.mrb[76].mxu1  ;;  %v4913_v17 = vpop.f32.mrb[77].mxu0 }
 0x254   : > { %v4914_v39 = vadd.f32 %v4913_v17, %v4912_v15  ;;  %v4977_v19 = vpop.f32.mrb[77].mxu1  ;;  %v4915_v20 = vpop.f32.mrb[78].mxu0 }
 0x255   : > { %v4978_v22 = vadd.f32 %v4977_v19, %v4976_v16  ;;  %v4979_v55 = vpop.f32.mrb[78].mxu1  ;;  %v4916_v25 = vpop.f32.mrb[79].mxu0 }
 0x256   : > { %v3521_v46 = vadd.f32 %v4914_v39, %v6480_v2  ;;  %v4917_v26 = vadd.f32 %v4916_v25, %v4915_v20  ;;  %v4980_v27 = vpop.f32.mrb[79].mxu1 }
 0x257   : > { %v4981_v51 = vadd.f32 %v4980_v27, %v4979_v55 }
 0x258   : > { %v6528_v32 = vadd.f32 %v4978_v22, %v3521_v46  ;;  %v3524_v47 = vadd.f32 %v4917_v26, %v6483_v3 }
 0x25a   : > { %v6531_v54 = vadd.f32 %v4981_v51, %v3524_v47  ;;  %v4918_v33 = vpop.f32.mrb[80].mxu0 }
 0x25b   : > { %v4982_v34 = vpop.f32.mrb[80].mxu1  ;;  %v4919_v35 = vpop.f32.mrb[81].mxu0 }
 0x25c   : > { %v4920_v57 = vadd.f32 %v4919_v35, %v4918_v33  ;;  %v4983_v38 = vpop.f32.mrb[81].mxu1  ;;  %v4921_v40 = vpop.f32.mrb[82].mxu0 }
 0x25d   : > { %v4984_v41 = vadd.f32 %v4983_v38, %v4982_v34  ;;  %v4985_v8 = vpop.f32.mrb[82].mxu1  ;;  %v4922_v43 = vpop.f32.mrb[83].mxu0 }
 0x25e   : > { %v3529_v2 = vadd.f32 %v4920_v57, %v6486_v24  ;;  %v4923_v44 = vadd.f32 %v4922_v43, %v4921_v40  ;;  %v4986_v45 = vpop.f32.mrb[83].mxu1 }
 0x25f   : > { %v4987_v9 = vadd.f32 %v4986_v45, %v4985_v8 }
 0x260   : > { %v6534_v48 = vadd.f32 %v4984_v41, %v3529_v2  ;;  %v3532_v3 = vadd.f32 %v4923_v44, %v6489_v49 }
 0x262   : > { %v6537_v11 = vadd.f32 %v4987_v9, %v3532_v3  ;;  %v4924_v50 = vpop.f32.mrb[84].mxu0 }
 0x263   : > { %v4988_v52 = vpop.f32.mrb[84].mxu1  ;;  %v4925_v56 = vpop.f32.mrb[85].mxu0 }
 0x264   : > { %v4926_v13 = vadd.f32 %v4925_v56, %v4924_v50  ;;  %v4989_v59 = vpop.f32.mrb[85].mxu1  ;;  %v4927_v60 = vpop.f32.mrb[86].mxu0 }
 0x265   : > { %v4990_v61 = vadd.f32 %v4989_v59, %v4988_v52  ;;  %v4991_v23 = vpop.f32.mrb[86].mxu1  ;;  %v4928_v63 = vpop.f32.mrb[87].mxu0 }
 0x266   : > { %v3537_v24 = vadd.f32 %v4926_v13, %v6492_v42  ;;  %v4929_v0 = vadd.f32 %v4928_v63, %v4927_v60  ;;  %v4992_v1 = vpop.f32.mrb[87].mxu1 }
 0x267   : > { %v4993_v31 = vadd.f32 %v4992_v1, %v4991_v23 }
 0x268   : > { %v6540_v4 = vadd.f32 %v4990_v61, %v3537_v24  ;;  %v3540_v49 = vadd.f32 %v4929_v0, %v6495_v7 }
 0x26a   : > { %v6543_v28 = vadd.f32 %v4993_v31, %v3540_v49  ;;  %v4930_v6 = vpop.f32.mrb[88].mxu0 }
 0x26b   : > { %v4994_v10 = vpop.f32.mrb[88].mxu1  ;;  %v4931_v12 = vpop.f32.mrb[89].mxu0 }
 0x26c   : > { %v4932_v30 = vadd.f32 %v4931_v12, %v4930_v6  ;;  %v4995_v15 = vpop.f32.mrb[89].mxu1  ;;  %v4933_v16 = vpop.f32.mrb[90].mxu0 }
 0x26d   : > { %v4996_v17 = vadd.f32 %v4995_v15, %v4994_v10  ;;  %v4997_v39 = vpop.f32.mrb[90].mxu1  ;;  %v4934_v19 = vpop.f32.mrb[91].mxu0 }
 0x26e   : > { %v3545_v42 = vadd.f32 %v4932_v30, %v6498_v62  ;;  %v4935_v20 = vadd.f32 %v4934_v19, %v4933_v16  ;;  %v4998_v22 = vpop.f32.mrb[91].mxu1 }
 0x26f   : > { %v4999_v55 = vadd.f32 %v4998_v22, %v4997_v39 }
 0x270   : > { %v6546_v25 = vadd.f32 %v4996_v17, %v3545_v42  ;;  %v3548_v7 = vadd.f32 %v4935_v20, %v6501_v29 }
 0x272   : > { %v6549_v46 = vadd.f32 %v4999_v55, %v3548_v7  ;;  %v4936_v26 = vpop.f32.mrb[92].mxu0 }
 0x273   : > { %v5000_v27 = vpop.f32.mrb[92].mxu1  ;;  %v4937_v51 = vpop.f32.mrb[93].mxu0 }
 0x274   : > { %v4938_v47 = vadd.f32 %v4937_v51, %v4936_v26  ;;  %v5001_v33 = vpop.f32.mrb[93].mxu1  ;;  %v4939_v34 = vpop.f32.mrb[94].mxu0 }
 0x275   : > { %v5002_v35 = vadd.f32 %v5001_v33, %v5000_v27  ;;  %v5003_v57 = vpop.f32.mrb[94].mxu1  ;;  %v4940_v38 = vpop.f32.mrb[95].mxu0 }
 0x276   : > { %v3553_v62 = vadd.f32 %v4938_v47, %v6504_v18  ;;  %v4941_v40 = vadd.f32 %v4940_v38, %v4939_v34  ;;  %v5004_v41 = vpop.f32.mrb[95].mxu1 }
 0x277   : > { %v5005_v8 = vadd.f32 %v5004_v41, %v5003_v57 }
 0x278   : > { %v6552_v43 = vadd.f32 %v5002_v35, %v3553_v62  ;;  %v3556_v29 = vadd.f32 %v4941_v40, %v6507_v53 }
 0x27a   : > { %v6555_v2 = vadd.f32 %v5005_v8, %v3556_v29  ;;  %v5022_v44 = vpop.f32.mrb[96].mxu0 }
 0x27b   : > { %v5086_v45 = vpop.f32.mrb[96].mxu1  ;;  %v5023_v9 = vpop.f32.mrb[97].mxu0 }
 0x27c   : > { %v5024_v3 = vadd.f32 %v5023_v9, %v5022_v44  ;;  %v5087_v50 = vpop.f32.mrb[97].mxu1  ;;  %v5025_v52 = vpop.f32.mrb[98].mxu0 }
 0x27d   : > { %v5088_v56 = vadd.f32 %v5087_v50, %v5086_v45  ;;  %v5089_v13 = vpop.f32.mrb[98].mxu1  ;;  %v5026_v59 = vpop.f32.mrb[99].mxu0 }
 0x27e   : > { %v3691_v18 = vadd.f32 %v5024_v3, %v6510_v36  ;;  %v5027_v60 = vadd.f32 %v5026_v59, %v5025_v52  ;;  %v5090_v61 = vpop.f32.mrb[99].mxu1 }
 0x27f   : > { %v5091_v23 = vadd.f32 %v5090_v61, %v5089_v13 }
 0x280   : > { %v6558_v63 = vadd.f32 %v5088_v56, %v3691_v18  ;;  %v3694_v53 = vadd.f32 %v5027_v60, %v6513_v5 }
 0x282   : > { %v6561_v24 = vadd.f32 %v5091_v23, %v3694_v53  ;;  %v5028_v0 = vpop.f32.mrb[100].mxu0  ;;  %v3872_v20 = vmul.f32 %v6558_v63, %v6558_v63 }
 0x283   : > { %v5092_v1 = vpop.f32.mrb[100].mxu1  ;;  %v5029_v31 = vpop.f32.mrb[101].mxu0 }
 0x284   : > { %v5030_v49 = vadd.f32 %v5029_v31, %v5028_v0  ;;  %v5093_v6 = vpop.f32.mrb[101].mxu1  ;;  %v5031_v10 = vpop.f32.mrb[102].mxu0  ;;  %v3873_v19 = vmul.f32 %v6561_v24, %v6561_v24  ;;  %v3850_v22 = vadd.f32 %v6561_v24, %v6558_v63 }
 0x285   : > { %v5094_v12 = vadd.f32 %v5093_v6, %v5092_v1  ;;  %v5095_v30 = vpop.f32.mrb[102].mxu1  ;;  %v5032_v15 = vpop.f32.mrb[103].mxu0 }
 0x286   : > { %v3699_v36 = vadd.f32 %v5030_v49, %v6516_v58  ;;  %v5033_v16 = vadd.f32 %v5032_v15, %v5031_v10  ;;  %v5096_v17 = vpop.f32.mrb[103].mxu1  ;;  %v3888_v51 = vadd.f32 %v3873_v19, %v3872_v20 }
 0x287   : > { %v5097_v39 = vadd.f32 %v5096_v17, %v5095_v30 }
 0x288   : > { %v6566_v5 = vadd.f32 %v5094_v12, %v3699_v36  ;;  %v3702_v42 = vadd.f32 %v5033_v16, %v6519_v21 }
 0x28a   : > { %v3874_v55 = vmul.f32 %v6566_v5, %v6566_v5  ;;  %v6575_v58 = vadd.f32 %v5097_v39, %v3702_v42  ;;  %v5034_v7 = vpop.f32.mrb[104].mxu0  ;;  %v3851_v47 = vadd.f32 %v3850_v22, %v6566_v5 }
 0x28b   : > { %v5098_v26 = vpop.f32.mrb[104].mxu1  ;;  %v5035_v27 = vpop.f32.mrb[105].mxu0 }
 0x28c   : > { %v5036_v33 = vadd.f32 %v5035_v27, %v5034_v7  ;;  %v5099_v34 = vpop.f32.mrb[105].mxu1  ;;  %v5037_v21 = vpop.f32.mrb[106].mxu0  ;;  %v3889_v62 = vadd.f32 %v3888_v51, %v3874_v55  ;;  %v3875_v40 = vmul.f32 %v6575_v58, %v6575_v58  ;;  %v3852_v45 = vadd.f32 %v3851_v47, %v6575_v58 }
 0x28d   : > { %v5100_v35 = vadd.f32 %v5099_v34, %v5098_v26  ;;  %v5101_v57 = vpop.f32.mrb[106].mxu1  ;;  %v5038_v38 = vpop.f32.mrb[107].mxu0 }
 0x28e   : > { %v3707_v41 = vadd.f32 %v5036_v33, %v6522_v14  ;;  %v5039_v8 = vadd.f32 %v5038_v38, %v5037_v21  ;;  %v5102_v29 = vpop.f32.mrb[107].mxu1  ;;  %v3890_v50 = vadd.f32 %v3889_v62, %v3875_v40 }
 0x28f   : > { %v5103_v44 = vadd.f32 %v5102_v29, %v5101_v57 }
 0x290   : > { %v6582_v9 = vadd.f32 %v5100_v35, %v3707_v41  ;;  %v3710_v3 = vadd.f32 %v5039_v8, %v6525_v37 }
 0x292   : > { %v3853_v52 = vadd.f32 %v3852_v45, %v6582_v9  ;;  %v3876_v56 = vmul.f32 %v6582_v9, %v6582_v9  ;;  %v6588_v13 = vadd.f32 %v5103_v44, %v3710_v3  ;;  %v5040_v59 = vpop.f32.mrb[108].mxu0 }
 0x293   : > { %v5104_v18 = vpop.f32.mrb[108].mxu1  ;;  %v5041_v14 = vpop.f32.mrb[109].mxu0 }
 0x294   : > { %v3891_v60 = vadd.f32 %v3890_v50, %v3876_v56  ;;  %v3854_v61 = vadd.f32 %v3853_v52, %v6588_v13  ;;  %v3877_v23 = vmul.f32 %v6588_v13, %v6588_v13  ;;  %v5042_v53 = vadd.f32 %v5041_v14, %v5040_v59  ;;  %v5105_v0 = vpop.f32.mrb[109].mxu1  ;;  %v5043_v37 = vpop.f32.mrb[110].mxu0 }
 0x295   : > { %v5106_v1 = vadd.f32 %v5105_v0, %v5104_v18  ;;  %v5107_v31 = vpop.f32.mrb[110].mxu1  ;;  %v5044_v49 = vpop.f32.mrb[111].mxu0 }
 0x296   : > { %v3892_v6 = vadd.f32 %v3891_v60, %v3877_v23  ;;  %v3715_v10 = vadd.f32 %v5042_v53, %v6528_v32  ;;  %v5045_v12 = vadd.f32 %v5044_v49, %v5043_v37  ;;  %v5108_v30 = vpop.f32.mrb[111].mxu1 }
 0x297   : > { %v5109_v15 = vadd.f32 %v5108_v30, %v5107_v31 }
 0x298   : > { %v6594_v36 = vadd.f32 %v5106_v1, %v3715_v10  ;;  %v3718_v16 = vadd.f32 %v5045_v12, %v6531_v54 }
 0x29a   : > { %v3855_v17 = vadd.f32 %v3854_v61, %v6594_v36  ;;  %v3878_v39 = vmul.f32 %v6594_v36, %v6594_v36  ;;  %v6600_v19 = vadd.f32 %v5109_v15, %v3718_v16  ;;  %v5046_v42 = vpop.f32.mrb[112].mxu0 }
 0x29b   : > { %v5110_v20 = vpop.f32.mrb[112].mxu1  ;;  %v5047_v22 = vpop.f32.mrb[113].mxu0 }
 0x29c   : > { %v3893_v55 = vadd.f32 %v3892_v6, %v3878_v39  ;;  %v3856_v32 = vadd.f32 %v3855_v17, %v6600_v19  ;;  %v3879_v7 = vmul.f32 %v6600_v19, %v6600_v19  ;;  %v5048_v26 = vadd.f32 %v5047_v22, %v5046_v42  ;;  %v5111_v27 = vpop.f32.mrb[113].mxu1  ;;  %v5049_v51 = vpop.f32.mrb[114].mxu0 }
 0x29d   : > { %v5112_v54 = vadd.f32 %v5111_v27, %v5110_v20  ;;  %v5113_v47 = vpop.f32.mrb[114].mxu1  ;;  %v5050_v33 = vpop.f32.mrb[115].mxu0 }
 0x29e   : > { %v3894_v34 = vadd.f32 %v3893_v55, %v3879_v7  ;;  %v3723_v21 = vadd.f32 %v5048_v26, %v6534_v48  ;;  %v5051_v35 = vadd.f32 %v5050_v33, %v5049_v51  ;;  %v5114_v57 = vpop.f32.mrb[115].mxu1 }
 0x29f   : > { %v5115_v38 = vadd.f32 %v5114_v57, %v5113_v47 }
 0x2a0   : > { %v6606_v62 = vadd.f32 %v5112_v54, %v3723_v21  ;;  %v3726_v40 = vadd.f32 %v5051_v35, %v6537_v11 }
 0x2a2   : > { %v3857_v41 = vadd.f32 %v3856_v32, %v6606_v62  ;;  %v3880_v8 = vmul.f32 %v6606_v62, %v6606_v62  ;;  %v6612_v29 = vadd.f32 %v5115_v38, %v3726_v40  ;;  %v5052_v44 = vpop.f32.mrb[116].mxu0 }
 0x2a3   : > { %v5116_v45 = vpop.f32.mrb[116].mxu1  ;;  %v5053_v3 = vpop.f32.mrb[117].mxu0 }
 0x2a4   : > { %v3895_v50 = vadd.f32 %v3894_v34, %v3880_v8  ;;  %v3858_v48 = vadd.f32 %v3857_v41, %v6612_v29  ;;  %v3881_v52 = vmul.f32 %v6612_v29, %v6612_v29  ;;  %v5054_v56 = vadd.f32 %v5053_v3, %v5052_v44  ;;  %v5117_v59 = vpop.f32.mrb[117].mxu1  ;;  %v5055_v18 = vpop.f32.mrb[118].mxu0 }
 0x2a5   : > { %v5118_v11 = vadd.f32 %v5117_v59, %v5116_v45  ;;  %v5119_v14 = vpop.f32.mrb[118].mxu1  ;;  %v5056_v60 = vpop.f32.mrb[119].mxu0 }
 0x2a6   : > { %v3896_v61 = vadd.f32 %v3895_v50, %v3881_v52  ;;  %v3731_v23 = vadd.f32 %v5054_v56, %v6540_v4  ;;  %v5057_v53 = vadd.f32 %v5056_v60, %v5055_v18  ;;  %v5120_v0 = vpop.f32.mrb[119].mxu1 }
 0x2a7   : > { %v5121_v37 = vadd.f32 %v5120_v0, %v5119_v14 }
 0x2a8   : > { %v6618_v1 = vadd.f32 %v5118_v11, %v3731_v23  ;;  %v3734_v31 = vadd.f32 %v5057_v53, %v6543_v28 }
 0x2aa   : > { %v3859_v49 = vadd.f32 %v3858_v48, %v6618_v1  ;;  %v3882_v6 = vmul.f32 %v6618_v1, %v6618_v1  ;;  %v6624_v10 = vadd.f32 %v5121_v37, %v3734_v31  ;;  %v5058_v12 = vpop.f32.mrb[120].mxu0 }
 0x2ab   : > { %v5122_v30 = vpop.f32.mrb[120].mxu1  ;;  %v5059_v15 = vpop.f32.mrb[121].mxu0 }
 0x2ac   : > { %v3897_v16 = vadd.f32 %v3896_v61, %v3882_v6  ;;  %v3860_v4 = vadd.f32 %v3859_v49, %v6624_v10  ;;  %v3883_v17 = vmul.f32 %v6624_v10, %v6624_v10  ;;  %v5060_v39 = vadd.f32 %v5059_v15, %v5058_v12  ;;  %v5123_v42 = vpop.f32.mrb[121].mxu1  ;;  %v5061_v20 = vpop.f32.mrb[122].mxu0 }
 0x2ad   : > { %v5124_v28 = vadd.f32 %v5123_v42, %v5122_v30  ;;  %v5125_v22 = vpop.f32.mrb[122].mxu1  ;;  %v5062_v55 = vpop.f32.mrb[123].mxu0 }
 0x2ae   : > { %v3898_v32 = vadd.f32 %v3897_v16, %v3883_v17  ;;  %v3739_v7 = vadd.f32 %v5060_v39, %v6546_v25  ;;  %v5063_v26 = vadd.f32 %v5062_v55, %v5061_v20  ;;  %v5126_v27 = vpop.f32.mrb[123].mxu1 }
 0x2af   : > { %v5127_v51 = vadd.f32 %v5126_v27, %v5125_v22 }
 0x2b0   : > { %v6630_v54 = vadd.f32 %v5124_v28, %v3739_v7  ;;  %v3742_v47 = vadd.f32 %v5063_v26, %v6549_v46  ;;  %v3921_v26 = vlaneseq }
 0x2b2   : > { %v3861_v33 = vadd.f32 %v3860_v4, %v6630_v54  ;;  %v3884_v34 = vmul.f32 %v6630_v54, %v6630_v54  ;;  %v6636_v21 = vadd.f32 %v5127_v51, %v3742_v47  ;;  %v5064_v35 = vpop.f32.mrb[124].mxu0  ;;  %v3922_v27 = vshrl.u32 %v3921_v26, 7  ;;  %v3913_v51 = vld [vmem:[%s1277_s9] sm:$0x1] }
 0x2b3   : > { %v5128_v57 = vpop.f32.mrb[124].mxu1  ;;  %v5065_v38 = vpop.f32.mrb[125].mxu0 }
 0x2b4   : > { %v3899_v40 = vadd.f32 %v3898_v32, %v3884_v34  ;;  %v3862_v25 = vadd.f32 %v3861_v33, %v6636_v21  ;;  %v3885_v41 = vmul.f32 %v6636_v21, %v6636_v21  ;;  %v5066_v8 = vadd.f32 %v5065_v38, %v5064_v35  ;;  %v5129_v44 = vpop.f32.mrb[125].mxu1  ;;  %v5067_v45 = vpop.f32.mrb[126].mxu0  ;;  %v3917_v35 = vld [vmem:[%s1280_s12] sm:$0x1] }
 0x2b5   : > { %v5130_v46 = vadd.f32 %v5129_v44, %v5128_v57  ;;  %v5131_v3 = vpop.f32.mrb[126].mxu1  ;;  %v5068_v50 = vpop.f32.mrb[127].mxu0  ;;  %v3923_v47 = vsub.s32 0, %v3922_v27 }
 0x2b6   : > { %v3900_v48 = vadd.f32 %v3899_v40, %v3885_v41  ;;  %v3747_v52 = vadd.f32 %v5066_v8, %v6552_v43  ;;  %v5069_v56 = vadd.f32 %v5068_v50, %v5067_v45  ;;  %v5132_v59 = vpop.f32.mrb[127].mxu1 }
 0x2b7   : > { %v5133_v18 = vadd.f32 %v5132_v59, %v5131_v3 }
 0x2b8   : > { %v3844_v11 = vadd.f32 %v5130_v46, %v3747_v52  ;;  %v3750_v14 = vadd.f32 %v5069_v56, %v6555_v2 }
 0x2ba   : > { %v3863_v60 = vadd.f32 %v3862_v25, %v3844_v11  ;;  %v3886_v61 = vmul.f32 %v3844_v11, %v3844_v11  ;;  %v3847_v23 = vadd.f32 %v5133_v18, %v3750_v14 }
 0x2bc   : > { %v3901_v53 = vadd.f32 %v3900_v48, %v3886_v61  ;;  %v3864_v0 = vadd.f32 %v3863_v60, %v3847_v23  ;;  %v3887_v37 = vmul.f32 %v3847_v23, %v3847_v23 }
 0x2be   : > { %v3865_v31 = vrot.slane %v3864_v0, 4  ;;  %v3902_v49 = vadd.f32 %v3901_v53, %v3887_v37 }
 0x2c0   : > { %v3866_v6 = vadd.f32 %v3865_v31, %v3864_v0  ;;  %v3903_v12 = vrot.slane %v3902_v49, 4 }
 0x2c2   : > { %v3867_v30 = vrot.slane %v3866_v6, 2  ;;  %v3904_v15 = vadd.f32 %v3903_v12, %v3902_v49 }
 0x2c4   : > { %v3868_v43 = vadd.f32 %v3867_v30, %v3866_v6  ;;  %v3905_v16 = vrot.slane %v3904_v15, 2 }
 0x2c6   : > { %v3869_v4 = vrot.slane %v3868_v43, 1  ;;  %v3906_v17 = vadd.f32 %v3905_v16, %v3904_v15 }
 0x2c8   : > { %v3870_v39 = vadd.f32 %v3869_v4, %v3868_v43  ;;  %v3907_v2 = vrot.slane %v3906_v17, 1 }
 0x2ca   : > { %v3871_v42 = vmul.f32 0.0078125, %v3870_v39  ;;  %v3908_v20 = vadd.f32 %v3907_v2, %v3906_v17 }
 0x2cc   : > { %v3909_v28 = vmul.f32 0.0078125, %v3908_v20  ;;  %v3910_v22 = vmul.f32 %v3871_v42, %v3871_v42 }
 0x2ce   : > { %v3911_v55 = vsub.f32 %v3909_v28, %v3910_v22 }
 0x2d0   : > { %v3912_v32 = vmax.f32 %v3911_v55, 0.0 }
 0x2d2   : > { %v3914_v7 = vadd.f32 1e-05, %v3912_v32 }
 0x2d4   : > { %5286 = vrsqrt.f32 %v3914_v7 }
 0x2de   : > { %v5287_v33 = vpop.eup %5286 }
 0x2df   : > { %v3916_v34 = vmul.f32 %v5287_v33, %v3913_v51 }
 0x2e1   : > { %v3918_v57 = vmul.f32 %v3916_v34, %v3871_v42  ;;  %v3924_v38 = vrot.slane %v3916_v34, %v3923_v47 }
 0x2e3   : > { %v3919_v40 = vsub.f32 %v3917_v35, %v3918_v57  ;;  %v3926_v25 = vmul.f32 %v3924_v38, %v6558_v63  ;;  %v3927_v41 = vmul.f32 %v3924_v38, %v6561_v24  ;;  %v3930_v8 = vmul.f32 %v3924_v38, %v6582_v9 }
 0x2e4   : > { %v3931_v44 = vmul.f32 %v3924_v38, %v6588_v13  ;;  %v3932_v45 = vmul.f32 %v3924_v38, %v6594_v36  ;;  %v3933_v46 = vmul.f32 %v3924_v38, %v6600_v19  ;;  %v3934_v3 = vmul.f32 %v3924_v38, %v6606_v62 }
 0x2e5   : > { %v3935_v50 = vmul.f32 %v3924_v38, %v6612_v29  ;;  %v3936_v48 = vmul.f32 %v3924_v38, %v6618_v1  ;;  %v3937_v52 = vmul.f32 %v3924_v38, %v6624_v10  ;;  %v3938_v63 = vmul.f32 %v3924_v38, %v6630_v54 }
 0x2e6   : > { %v3939_v24 = vmul.f32 %v3924_v38, %v6636_v21  ;;  %v3940_v56 = vmul.f32 %v3924_v38, %v3844_v11  ;;  %v3928_v9 = vmul.f32 %v3924_v38, %v6566_v5  ;;  %v3929_v13 = vmul.f32 %v3924_v38, %v6575_v58 }
 0x2e7   : > { %v3941_v36 = vmul.f32 %v3924_v38, %v3847_v23  ;;  %v3946_v59 = vrot.slane %v3919_v40, %v3923_v47 }
 0x2e9   : > { %v3948_v19 = vadd.f32 %v3946_v59, %v3926_v25  ;;  %v3949_v18 = vadd.f32 %v3946_v59, %v3927_v41  ;;  %v3950_v62 = vadd.f32 %v3946_v59, %v3928_v9  ;;  %v3951_v14 = vadd.f32 %v3946_v59, %v3929_v13 }
 0x2ea   : > { %v3952_v29 = vadd.f32 %v3946_v59, %v3930_v8  ;;  %v3953_v60 = vadd.f32 %v3946_v59, %v3931_v44  ;;  %v3954_v1 = vadd.f32 %v3946_v59, %v3932_v45  ;;  %v3955_v61 = vadd.f32 %v3946_v59, %v3933_v46 }
 0x2eb   : > { %v3956_v10 = vadd.f32 %v3946_v59, %v3934_v3  ;;  %v3957_v53 = vadd.f32 %v3946_v59, %v3935_v50  ;;  %v3958_v54 = vadd.f32 %v3946_v59, %v3936_v48  ;;  %v3959_v0 = vadd.f32 %v3946_v59, %v3937_v52 }
 0x2ec   : > { %v3960_v21 = vadd.f32 %v3946_v59, %v3938_v63  ;;  %v3961_v11 = vadd.f32 %v3946_v59, %v3939_v24  ;;  %v3962_v5 = vadd.f32 %v3946_v59, %v3940_v56  ;;  %v3963_v37 = vadd.f32 %v3946_v59, %v3941_v36 }
 0x2ed   : > { %vm3964_vm0 = vcmp.ge.f32.partialorder %v3948_v19, 0.0  ;;  %vm3965_vm1 = vcmp.ge.f32.partialorder %v3949_v18, 0.0  ;;  %vm3966_vm2 = vcmp.ge.f32.partialorder %v3950_v62, 0.0  ;;  %vm3967_vm3 = vcmp.ge.f32.partialorder %v3951_v14, 0.0 }
 0x2ee   : > { %vm3968_vm4 = vcmp.ge.f32.partialorder %v3952_v29, 0.0  ;;  %vm3969_vm5 = vcmp.ge.f32.partialorder %v3953_v60, 0.0  ;;  %vm3970_vm6 = vcmp.ge.f32.partialorder %v3954_v1, 0.0  ;;  %vm3971_vm7 = vcmp.ge.f32.partialorder %v3955_v61, 0.0 }
 0x2ef   : > { %vm3972_vm8 = vcmp.ge.f32.partialorder %v3956_v10, 0.0  ;;  %vm3973_vm9 = vcmp.ge.f32.partialorder %v3957_v53, 0.0  ;;  %vm3974_vm10 = vcmp.ge.f32.partialorder %v3958_v54, 0.0  ;;  %vm3975_vm11 = vcmp.ge.f32.partialorder %v3959_v0, 0.0 }
 0x2f0   : > { %vm3976_vm12 = vcmp.ge.f32.partialorder %v3960_v21, 0.0  ;;  %vm3977_vm13 = vcmp.ge.f32.partialorder %v3961_v11, 0.0  ;;  %vm3978_vm14 = vcmp.ge.f32.partialorder %v3962_v5, 0.0  ;;  %vm3979_vm15 = vcmp.ge.f32.partialorder %v3963_v37, 0.0 }
 0x2f1   : > { %v3980_v58 = vmul.f32 0.2, %v3948_v19  ;;  %v3981_v23 = vmul.f32 0.2, %v3949_v18  ;;  %v3982_v31 = vmul.f32 0.2, %v3950_v62 }
 0x2f2   : > { %v3983_v49 = vmul.f32 0.2, %v3951_v14  ;;  %v3984_v6 = vmul.f32 0.2, %v3952_v29  ;;  %v3985_v12 = vmul.f32 0.2, %v3953_v60 }
 0x2f3   : > { %v3986_v30 = vmul.f32 0.2, %v3954_v1  ;;  %v3987_v15 = vmul.f32 0.2, %v3955_v61  ;;  %v3988_v43 = vmul.f32 0.2, %v3956_v10  ;;  %v3996_v16 = vsel %vm3964_vm0, %v3948_v19, %v3980_v58 }
 0x2f4   : > { %v3989_v4 = vmul.f32 0.2, %v3957_v53  ;;  %v3990_v17 = vmul.f32 0.2, %v3958_v54  ;;  %v3991_v39 = vmul.f32 0.2, %v3959_v0  ;;  %v3997_v2 = vsel %vm3965_vm1, %v3949_v18, %v3981_v23 }
 0x2f5   : > { %v3992_v42 = vmul.f32 0.2, %v3960_v21  ;;  %v3993_v20 = vmul.f32 0.2, %v3961_v11  ;;  %v3994_v28 = vmul.f32 0.2, %v3962_v5  ;;  %v3998_v22 = vsel %vm3966_vm2, %v3950_v62, %v3982_v31 }
 0x2f6   : > { %v3995_v55 = vmul.f32 0.2, %v3963_v37  ;;  %v3999_v32 = vsel %vm3967_vm3, %v3951_v14, %v3983_v49  ;;  %v4000_v7 = vsel %vm3968_vm4, %v3952_v29, %v3984_v6  ;;  %v4001_v26 = vsel %vm3969_vm5, %v3953_v60, %v3985_v12 }
 0x2f7   : > { %v4002_v27 = vsel %vm3970_vm6, %v3954_v1, %v3986_v30  ;;  %v4003_v51 = vsel %vm3971_vm7, %v3955_v61, %v3987_v15  ;;  %v4004_v47 = vsel %vm3972_vm8, %v3956_v10, %v3988_v43  ;;  %v4005_v33 = vsel %vm3973_vm9, %v3957_v53, %v3989_v4 }
 0x2f8   : > { %v4006_v34 = vsel %vm3974_vm10, %v3958_v54, %v3990_v17  ;;  %v4007_v35 = vsel %vm3975_vm11, %v3959_v0, %v3991_v39  ;;  %v4008_v57 = vsel %vm3976_vm12, %v3960_v21, %v3992_v42  ;;  %v4009_v38 = vsel %vm3977_vm13, %v3961_v11, %v3993_v20  ;;  %4098 = sbr.rel (!%p5368_p5) target bundleno = 781 (0x30d), region = 81 }
 0x2f9   : > { %v4010_v40 = vsel %vm3978_vm14, %v3962_v5, %v3994_v28  ;;  %v4011_v25 = vsel %vm3979_vm15, %v3963_v37, %v3995_v55  ;;  %v4578_v41 = vpack.c.bf16 %v3997_v2, %v3996_v16  ;;  %v4583_v8 = vpack.c.bf16 %v3999_v32, %v3998_v22 }
 0x2fa   : > { %v4588_v44 = vpack.c.bf16 %v4001_v26, %v4000_v7  ;;  %v4593_v45 = vpack.c.bf16 %v4003_v51, %v4002_v27  ;;  %v4598_v46 = vpack.c.bf16 %v4005_v33, %v4004_v47  ;;  %v4603_v3 = vpack.c.bf16 %v4007_v35, %v4006_v34 }
 0x2fb   : > { %4579 = vst [vmem:[%s6686_s15] sm:$0xff] %v4578_v41   ;;  %4615 = vst [vmem:[%s6686_s15 + $0x8] sm:$0xff] %v4583_v8   ;;  %v4608_v50 = vpack.c.bf16 %v4009_v38, %v4008_v57  ;;  %v4613_v48 = vpack.c.bf16 %v4011_v25, %v4010_v40 }
 0x2fc   : > { %4616 = vst [vmem:[%s6686_s15 + $0x10] sm:$0xff] %v4588_v44   ;;  %4617 = vst [vmem:[%s6686_s15 + $0x18] sm:$0xff] %v4593_v45  }
 0x2fd   : > { %4618 = vst [vmem:[%s6686_s15 + $0x20] sm:$0xff] %v4598_v46   ;;  %4619 = vst [vmem:[%s6686_s15 + $0x28] sm:$0xff] %v4603_v3  }
 0x2fe   : > { %4620 = vst [vmem:[%s6686_s15 + $0x30] sm:$0xff] %v4608_v50   ;;  %4621 = vst [vmem:[%s6686_s15 + $0x38] sm:$0xff] %v4613_v48  }
 0x302   : > { %v4116_v52 = vld [vmem:[%s6686_s15] sm:$0xf]  ;;  %v4118_v63 = vld [vmem:[%s6686_s15 + $0x4] sm:$0xf]  ;;  %v4120_v24 = vld [vmem:[%s6686_s15 + $0x8] sm:$0xf] }
 0x303   : > { %v4122_v56 = vld [vmem:[%s6686_s15 + $0xc] sm:$0xf]  ;;  %v4124_v9 = vld [vmem:[%s6686_s15 + $0x10] sm:$0xf]  ;;  %4117 = vst [vmem:[%s4100_s21] sm:$0xf] %v4116_v52 }
 0x304   : > { %4119 = vst [vmem:[%s4100_s21 + $0x8] sm:$0xf] %v4118_v63  ;;  %4121 = vst [vmem:[%s4100_s21 + $0x10] sm:$0xf] %v4120_v24  ;;  %v4126_v13 = vld [vmem:[%s6686_s15 + $0x14] sm:$0xf] }
 0x305   : > { %4123 = vst [vmem:[%s4100_s21 + $0x18] sm:$0xf] %v4122_v56  ;;  %4125 = vst [vmem:[%s4100_s21 + $0x20] sm:$0xf] %v4124_v9  ;;  %v4128_v36 = vld [vmem:[%s6686_s15 + $0x18] sm:$0xf] }
 0x306   : > { %v4130_v59 = vld [vmem:[%s6686_s15 + $0x1c] sm:$0xf]  ;;  %4127 = vst [vmem:[%s4100_s21 + $0x28] sm:$0xf] %v4126_v13  ;;  %4129 = vst [vmem:[%s4100_s21 + $0x30] sm:$0xf] %v4128_v36 }
 0x307   : > { %4131 = vst [vmem:[%s4100_s21 + $0x38] sm:$0xf] %v4130_v59  ;;  %v4132_v19 = vld [vmem:[%s6686_s15 + $0x20] sm:$0xf]  ;;  %v4134_v18 = vld [vmem:[%s6686_s15 + $0x24] sm:$0xf] }
 0x308   : > { %v4136_v62 = vld [vmem:[%s6686_s15 + $0x28] sm:$0xf]  ;;  %4133 = vst [vmem:[%s4100_s21 + $0x40] sm:$0xf] %v4132_v19  ;;  %4135 = vst [vmem:[%s4100_s21 + $0x48] sm:$0xf] %v4134_v18 }
 0x309   : > { %4137 = vst [vmem:[%s4100_s21 + $0x50] sm:$0xf] %v4136_v62  ;;  %v4138_v14 = vld [vmem:[%s6686_s15 + $0x2c] sm:$0xf]  ;;  %v4140_v29 = vld [vmem:[%s6686_s15 + $0x30] sm:$0xf] }
 0x30a   : > { %v4142_v60 = vld [vmem:[%s6686_s15 + $0x34] sm:$0xf]  ;;  %4139 = vst [vmem:[%s4100_s21 + $0x58] sm:$0xf] %v4138_v14  ;;  %4141 = vst [vmem:[%s4100_s21 + $0x60] sm:$0xf] %v4140_v29 }
 0x30b   : > { %4143 = vst [vmem:[%s4100_s21 + $0x68] sm:$0xf] %v4142_v60  ;;  %v4144_v1 = vld [vmem:[%s6686_s15 + $0x38] sm:$0xf]  ;;  %v4146_v61 = vld [vmem:[%s6686_s15 + $0x3c] sm:$0xf] }
 0x30c   : > { %4145 = vst [vmem:[%s4100_s21 + $0x70] sm:$0xf] %v4144_v1  ;;  %4147 = vst [vmem:[%s4100_s21 + $0x78] sm:$0xf] %v4146_v61 }
 0x30d PF: > { %p11_p11 = scmp.ge.s32.totalorder %s5356_s19, 4   ;;  %s6734_s15 = smov %s5306_s16 }
 0x30e   : > { %s6735_s16 = smov %s5366_s22  ;;  %s6736_s17 = smov %s5356_s19 }
 0x30f   :  { %13 = sbr.rel (!%p11_p11) target bundleno = 2 (0x2), region = 159 }

// kernel: discriminator_forward.7
= control target key start
LH: loop header
LB: loop body
LE: loop exit
PB: predicated region body
PF: predicated region fallthrough
CT: control target
= control target key end

     0   :  { %v80_v1 = vlaneseq  ;;  %v1532_v11 = vmov 1983009808   ;;  %vm1376_vm0 = vcmask 1041408   ;;  %vm1520_vm1 = vcmask 1024   ;;  %s2521_s2 = inlined_call_operand.<no memory space> [shape: f32[1,1], index: 2, kind: input, shape index: {}]   ;;  %s2522_s1 = inlined_call_operand.vmem [shape: bf16[1,8192], index: 1, kind: input, shape index: {}]   ;;  %s2523_s0 = inlined_call_operand.vmem [shape: bf16[2,8192], index: 0, kind: input, shape index: {}]   ;;  %s2524_s3 = inlined_call_operand.vmem [shape: f32[2,1], index: 3, kind: output, shape index: {}]  }
   0x1   :  { %v8_v0 = vstv %s2521_s2  ;;  %v44_v2 = vld [vmem:[%s2522_s1 + $0x20] sm:$0xff]  ;;  %v45_v3 = vld [vmem:[%s2522_s1 + $0x28] sm:$0xff]  ;;  %v46_v5 = vld [vmem:[%s2522_s1 + $0x30] sm:$0xff]  ;;  %v1578_v12 = vunpack.c.l.s4 %v1532_v11 }
   0x2   :  { %9 = vst [vmem:[#allocation2] sm:$0x1] %v8_v0  ;;  %v1562_v4 = vshrl.u32 %v80_v1, 7  ;;  %v47_v6 = vld [vmem:[%s2522_s1 + $0x38] sm:$0xff]  ;;  %v1570_v7 = vunpack.c.l.bf16 %v44_v2  ;;  %v1572_v8 = vunpack.c.h.bf16 %v44_v2  ;;  %v1574_v9 = vunpack.c.l.bf16 %v45_v3  ;;  %v1659_v49 = vld [vmem:[%s2523_s0] sm:$0xff]  ;;  %v1664_v50 = vld [vmem:[%s2523_s0 + $0x8] sm:$0xff] }
   0x3   :  { %v1576_v10 = vunpack.c.h.bf16 %v45_v3  ;;  %v1592_v17 = vunpack.c.l.bf16 %v46_v5  ;;  %v1594_v18 = vunpack.c.h.bf16 %v46_v5  ;;  %v1596_v19 = vunpack.c.l.bf16 %v47_v6  ;;  %2545 = vst [vmem:[#allocation5_spill] sm:$0xff] %v1659_v49  ;;  %2546 = vst [vmem:[#allocation6_spill] sm:$0xff] %v1664_v50  ;;  %v1677_v55 = vld [vmem:[%s2523_s0 + $0x20] sm:$0xff]  ;;  %v1685_v57 = vld [vmem:[%s2523_s0 + $0x28] sm:$0xff] }
   0x4   :  { %v1581_v13 = vsub.s32 0, %v1562_v4  ;;  %v1584_v14 = vsub.s32 2, %v1562_v4  ;;  %v1587_v15 = vsub.s32 4, %v1562_v4  ;;  %v1590_v16 = vsub.s32 6, %v1562_v4  ;;  %v40_v56 = vld [vmem:[%s2522_s1] sm:$0xff]  ;;  %v1690_v58 = vld [vmem:[%s2523_s0 + $0x30] sm:$0xff] }
   0x5   :  { %v1598_v20 = vunpack.c.h.bf16 %v47_v6  ;;  %2547 = vst [vmem:[#allocation7_spill] sm:$0xff] %v1690_v58  ;;  %v1695_v59 = vld [vmem:[%s2523_s0 + $0x38] sm:$0xff]  ;;  %v41_v1 = vld [vmem:[%s2522_s1 + $0x8] sm:$0xff]  ;;  %v42_v2 = vld [vmem:[%s2522_s1 + $0x10] sm:$0xff]  ;;  %v1708_v3 = vunpack.c.l.bf16 %v40_v56  ;;  %v724_v5 = vunpack.c.0.s8 %v1578_v12  ;;  %v1723_v12 = vunpack.c.h.bf16 %v40_v56 }
   0x6   :  { %2543 = vst [vmem:[#allocation3_spill] sm:$0xff] %v1584_v14  ;;  %2544 = vst [vmem:[#allocation4_spill] sm:$0xff] %v1587_v15  ;;  %v211_v21 = vrot.slane %v1570_v7, %v1581_v13  ;;  %v215_v22 = vrot.slane %v1570_v7, %v1584_v14  ;;  %v219_v23 = vrot.slane %v1570_v7, %v1587_v15  ;;  %v1718_v61 = vld [vmem:[%s2522_s1 + $0x18] sm:$0xff]  ;;  %v1725_v6 = vunpack.c.l.bf16 %v41_v1 }
   0x7   :  { %v223_v24 = vrot.slane %v1570_v7, %v1590_v16  ;;  %v227_v25 = vrot.slane %v1572_v8, %v1581_v13  ;;  %v231_v26 = vrot.slane %v1572_v8, %v1584_v14  ;;  %v235_v27 = vrot.slane %v1572_v8, %v1587_v15  ;;  %2548 = vst [vmem:[#allocation8_spill] sm:$0xff] %v1695_v59 }
   0x8   :  { %v239_v28 = vrot.slane %v1572_v8, %v1590_v16  ;;  %v243_v29 = vrot.slane %v1574_v9, %v1581_v13  ;;  %v247_v30 = vrot.slane %v1574_v9, %v1584_v14  ;;  %v251_v31 = vrot.slane %v1574_v9, %v1587_v15  ;;  %2549 = vst [vmem:[#allocation9_spill] sm:$0xff] %v1718_v61 }
   0x9   :  { %v255_v32 = vrot.slane %v1574_v9, %v1590_v16  ;;  %v259_v33 = vrot.slane %v1576_v10, %v1581_v13  ;;  %v263_v34 = vrot.slane %v1576_v10, %v1584_v14  ;;  %v267_v35 = vrot.slane %v1576_v10, %v1587_v15 }
   0xa   :  { %v271_v36 = vrot.slane %v1576_v10, %v1590_v16  ;;  %v275_v37 = vrot.slane %v1592_v17, %v1581_v13  ;;  %v279_v38 = vrot.slane %v1592_v17, %v1584_v14  ;;  %v283_v39 = vrot.slane %v1592_v17, %v1587_v15 }
   0xb   :  { %v287_v40 = vrot.slane %v1592_v17, %v1590_v16  ;;  %v291_v41 = vrot.slane %v1594_v18, %v1581_v13  ;;  %v295_v42 = vrot.slane %v1594_v18, %v1584_v14  ;;  %v299_v43 = vrot.slane %v1594_v18, %v1587_v15 }
   0xc   :  { %v303_v44 = vrot.slane %v1594_v18, %v1590_v16  ;;  %v307_v45 = vrot.slane %v1596_v19, %v1581_v13  ;;  %v311_v46 = vrot.slane %v1596_v19, %v1584_v14  ;;  %v315_v47 = vrot.slane %v1596_v19, %v1587_v15 }
   0xd   :  { %v319_v48 = vrot.slane %v1596_v19, %v1590_v16  ;;  %v323_v51 = vrot.slane %v1598_v20, %v1581_v13  ;;  %v327_v52 = vrot.slane %v1598_v20, %v1584_v14  ;;  %v1727_v11 = vunpack.c.h.bf16 %v41_v1 }
   0xe   :  { %v1729_v63 = vunpack.c.l.bf16 %v42_v2  ;;  %v1731_v62 = vunpack.c.h.bf16 %v42_v2  ;;  %v1734_v53 = vunpack.c.l.bf16 %v1718_v61  ;;  %v83_v60 = vrot.slane %v1708_v3, %v1581_v13 }
   0xf   :  { %v87_v0 = vrot.slane %v1708_v3, %v1584_v14  ;;  %v1741_v56 = vsub.s32 %v724_v5, %v1562_v4  ;;  %v1747_v1 = vrot.slane %v211_v21, %v1581_v13  ;;  %v1753_v2 = vrot.slane %v215_v22, %v1581_v13 }
  0x10   :  { %2550 = vst [vmem:[#allocation10_spill] sm:$0xff] %v1731_v62  ;;  %2551 = vst [vmem:[#allocation11_spill] sm:$0xff] %v1734_v53  ;;  %v1759_v54 = vrot.slane %v219_v23, %v1581_v13  ;;  %v1765_v4 = vrot.slane %v223_v24, %v1581_v13  ;;  %v1771_v21 = vrot.slane %v227_v25, %v1581_v13 }
  0x11   :  { %2552 = vst [vmem:[#allocation12_spill] sm:$0xff] %v1741_v56  ;;  %v1777_v22 = vrot.slane %v231_v26, %v1581_v13  ;;  %v1783_v23 = vrot.slane %v235_v27, %v1581_v13  ;;  %v1789_v7 = vrot.slane %v239_v28, %v1581_v13  ;;  %v1795_v24 = vrot.slane %v243_v29, %v1581_v13 }
  0x12   :  { %v1801_v25 = vrot.slane %v247_v30, %v1581_v13  ;;  %v1807_v26 = vrot.slane %v251_v31, %v1581_v13  ;;  %v1813_v8 = vrot.slane %v255_v32, %v1581_v13  ;;  %v1819_v27 = vrot.slane %v259_v33, %v1581_v13 }
  0x13   :  { %v1825_v28 = vrot.slane %v263_v34, %v1581_v13  ;;  %v1831_v29 = vrot.slane %v267_v35, %v1581_v13  ;;  %v1837_v9 = vrot.slane %v271_v36, %v1581_v13  ;;  %v1843_v30 = vrot.slane %v275_v37, %v1581_v13 }
  0x14   :  { %v1849_v31 = vrot.slane %v279_v38, %v1581_v13  ;;  %v1855_v32 = vrot.slane %v283_v39, %v1581_v13  ;;  %v1861_v10 = vrot.slane %v287_v40, %v1581_v13  ;;  %v1867_v33 = vrot.slane %v291_v41, %v1581_v13 }
  0x15   :  { %v1873_v34 = vrot.slane %v295_v42, %v1581_v13  ;;  %v1879_v35 = vrot.slane %v299_v43, %v1581_v13  ;;  %v1885_v17 = vrot.slane %v303_v44, %v1581_v13  ;;  %v1891_v36 = vrot.slane %v307_v45, %v1581_v13 }
  0x16   :  { %v1897_v37 = vrot.slane %v311_v46, %v1581_v13  ;;  %v1903_v38 = vrot.slane %v315_v47, %v1581_v13  ;;  %v1909_v18 = vrot.slane %v319_v48, %v1581_v13  ;;  %v1915_v39 = vrot.slane %v323_v51, %v1581_v13 }
  0x17   :  { %v1921_v40 = vrot.slane %v327_v52, %v1581_v13  ;;  %v2553_v41 = vrot.slane %v1598_v20, %v1587_v15  ;;  %v2554_v19 = vrot.slane %v1598_v20, %v1590_v16  ;;  %v91_v44 = vrot.slane %v1708_v3, %v1587_v15 }
  0x18   :  { %v95_v45 = vrot.slane %v1708_v3, %v1590_v16  ;;  %v99_v46 = vrot.slane %v1723_v12, %v1581_v13  ;;  %v103_v47 = vrot.slane %v1723_v12, %v1584_v14  ;;  %v107_v48 = vrot.slane %v1723_v12, %v1587_v15 }
  0x19   :  { %v1927_v42 = vrot.slane %v2553_v41, %v1581_v13  ;;  %v1933_v43 = vrot.slane %v2554_v19, %v1581_v13  ;;  %v111_v20 = vrot.slane %v1723_v12, %v1590_v16  ;;  %v115_v51 = vrot.slane %v1725_v6, %v1581_v13 }
  0x1a   :  { %v119_v52 = vrot.slane %v1725_v6, %v1584_v14  ;;  %v123_v3 = vrot.slane %v1725_v6, %v1587_v15  ;;  %v127_v5 = vrot.slane %v1725_v6, %v1590_v16  ;;  %v131_v41 = vrot.slane %v1727_v11, %v1581_v13 }
  0x1b   :  { %v135_v19 = vrot.slane %v1727_v11, %v1584_v14  ;;  %v139_v12 = vrot.slane %v1727_v11, %v1587_v15  ;;  %v143_v50 = vrot.slane %v1727_v11, %v1590_v16  ;;  %v147_v49 = vrot.slane %v1729_v63, %v1581_v13 }
  0x1c   :  { %v151_v61 = vrot.slane %v1729_v63, %v1584_v14  ;;  %v155_v6 = vrot.slane %v1729_v63, %v1587_v15  ;;  %v159_v53 = vrot.slane %v1729_v63, %v1590_v16  ;;  %v1972_v62 = vrot.slane %v83_v60, %v1581_v13 }
  0x1d   :  { %v1975_v59 = vrot.slane %v87_v0, %v1581_v13  ;;  %v1978_v11 = vrot.slane %v91_v44, %v1581_v13  ;;  %v1981_v58 = vrot.slane %v95_v45, %v1581_v13  ;;  %v1984_v14 = vrot.slane %v99_v46, %v1581_v13 }
  0x1e   :  { %v1987_v15 = vrot.slane %v103_v47, %v1581_v13  ;;  %v1990_v63 = vrot.slane %v107_v48, %v1581_v13  ;;  %v1993_v60 = vrot.slane %v111_v20, %v1581_v13  ;;  %v1996_v0 = vrot.slane %v115_v51, %v1581_v13 }
  0x1f   :  { %v1999_v44 = vrot.slane %v119_v52, %v1581_v13  ;;  %v2002_v45 = vrot.slane %v123_v3, %v1581_v13  ;;  %v2005_v46 = vrot.slane %v127_v5, %v1581_v13  ;;  %v2008_v47 = vrot.slane %v131_v41, %v1581_v13 }
  0x20   :  { %v2011_v48 = vrot.slane %v135_v19, %v1581_v13  ;;  %v2014_v20 = vrot.slane %v139_v12, %v1581_v13  ;;  %v2017_v51 = vrot.slane %v143_v50, %v1581_v13  ;;  %v2020_v52 = vrot.slane %v147_v49, %v1581_v13 }
  0x21   :  { %v856_v3 = vcombine.low %v1747_v1, %v1753_v2  ;;  %v2025_v5 = vrot.slane %v151_v61, %v1581_v13  ;;  %v2028_v41 = vrot.slane %v155_v6, %v1581_v13  ;;  %v2031_v19 = vrot.slane %v159_v53, %v1581_v13 }
  0x22   :  { %v857_v12 = vcombine.low %v1759_v54, %v1765_v4  ;;  %v720_v50 = vcombine.low %v1972_v62, %v1975_v59  ;;  %v873_v1 = vcombine.low %v1771_v21, %v1777_v22  ;;  %v874_v61 = vcombine.low %v1783_v23, %v1789_v7 }
  0x23   :  { %v864_v49 = vrot.slane %v856_v3, %v1741_v56  ;;  %v721_v2 = vcombine.low %v1978_v11, %v1981_v58  ;;  %v890_v6 = vcombine.low %v1795_v24, %v1801_v25  ;;  %v891_v54 = vcombine.low %v1807_v26, %v1813_v8 }
  0x24   :  { %v871_v53 = vrot.slane %v857_v12, %v1741_v56  ;;  %v881_v59 = vrot.slane %v873_v1, %v1741_v56  ;;  %v888_v62 = vrot.slane %v874_v61, %v1741_v56  ;;  %v907_v4 = vcombine.low %v1819_v27, %v1825_v28 }
  0x25   :  { %v908_v21 = vcombine.low %v1831_v29, %v1837_v9  ;;  %v898_v58 = vrot.slane %v890_v6, %v1741_v56  ;;  %v905_v23 = vrot.slane %v891_v54, %v1741_v56  ;;  %v924_v7 = vcombine.low %v1843_v30, %v1849_v31  ;;  %v2562_v6 = vld [vmem:[#allocation8_spill] sm:$0xff] }
  0x26   :  { %v872_v22 = vcombine.low %v864_v49, %v871_v53  ;;  %v889_v24 = vcombine.low %v881_v59, %v888_v62  ;;  %v915_v25 = vrot.slane %v907_v4, %v1741_v56  ;;  %v925_v8 = vcombine.low %v1855_v32, %v1861_v10 }
  0x27   :  { %v922_v26 = vrot.slane %v908_v21, %v1741_v56  ;;  %v906_v27 = vcombine.low %v898_v58, %v905_v23  ;;  %v932_v28 = vrot.slane %v924_v7, %v1741_v56  ;;  %v941_v29 = vcombine.low %v1867_v33, %v1873_v34  ;;  %v2566_v21 = vld [vmem:[#allocation3_spill] sm:$0xff]  ;;  %v2567_v7 = vld [vmem:[#allocation4_spill] sm:$0xff] }
  0x28   :  { %v942_v9 = vcombine.low %v1879_v35, %v1885_v17  ;;  %v939_v30 = vrot.slane %v925_v8, %v1741_v56  ;;  %v958_v31 = vcombine.low %v1891_v36, %v1897_v37  ;;  %v959_v3 = vcombine.low %v1903_v38, %v1909_v18 }
  0x29   :  { %v923_v11 = vcombine.low %v915_v25, %v922_v26  ;;  %v949_v32 = vrot.slane %v941_v29, %v1741_v56  ;;  %v975_v12 = vcombine.low %v1915_v39, %v1921_v40  ;;  %v976_v33 = vcombine.low %v1927_v42, %v1933_v43 }
  0x2a   :  { %v956_v10 = vrot.slane %v942_v9, %v1741_v56  ;;  %v737_v34 = vcombine.low %v1984_v14, %v1987_v15  ;;  %v940_v35 = vcombine.low %v932_v28, %v939_v30  ;;  %v966_v17 = vrot.slane %v958_v31, %v1741_v56  ;;  %v2146_v30 = vld [vmem:[%s2523_s0 + $0x10] sm:$0xff] }
  0x2b   :  { %v973_v36 = vrot.slane %v959_v3, %v1741_v56  ;;  %v738_v37 = vcombine.low %v1990_v63, %v1993_v60  ;;  %v983_v18 = vrot.slane %v975_v12, %v1741_v56  ;;  %v990_v49 = vrot.slane %v976_v33, %v1741_v56 }
  0x2c   :  { %v957_v38 = vcombine.low %v949_v32, %v956_v10  ;;  %v754_v39 = vcombine.low %v1996_v0, %v1999_v44  ;;  %v755_v40 = vcombine.low %v2002_v45, %v2005_v46  ;;  %v771_v14 = vcombine.low %v2008_v47, %v2011_v48 }
  0x2d   :  { %v974_v15 = vcombine.low %v966_v17, %v973_v36  ;;  %v728_v42 = vrot.slane %v720_v50, %v1741_v56  ;;  %v735_v43 = vrot.slane %v721_v2, %v1741_v56  ;;  %v772_v63 = vcombine.low %v2014_v20, %v2017_v51  ;;  %v2559_v50 = vld [vmem:[#allocation7_spill] sm:$0xff]  ;;  %v2569_v36 = vld [vmem:[#allocation9_spill] sm:$0xff] }
  0x2e   :  { %v991_v60 = vcombine.low %v983_v18, %v990_v49  ;;  %v2555_v1 = vunpack.c.l.bf16 %v1677_v55  ;;  %v2556_v0 = vunpack.c.h.bf16 %v1677_v55  ;;  %v2557_v45 = vunpack.c.l.bf16 %v1685_v57 }
  0x2f   :  { %v2558_v47 = vunpack.c.h.bf16 %v1685_v57  ;;  %v2560_v53 = vunpack.c.l.bf16 %v2559_v50  ;;  %v2561_v20 = vunpack.c.h.bf16 %v2559_v50  ;;  %v2563_v54 = vunpack.c.l.bf16 %v2562_v6  ;;  %v2565_v57 = vld [vmem:[#allocation10_spill] sm:$0xff] }
  0x30   :  { %v1016_v61 = vmul.f32 %v872_v22, %v2555_v1  ;;  %v1017_v44 = vmul.f32 %v889_v24, %v2556_v0  ;;  %v1018_v46 = vmul.f32 %v906_v27, %v2557_v45  ;;  %v2564_v55 = vunpack.c.h.bf16 %v2562_v6  ;;  %v2568_v27 = vld [vmem:[#allocation11_spill] sm:$0xff] }
  0x31   :  { %v2105_v48 = vmul.f32 %v923_v11, %v2558_v47  ;;  %v2109_v2 = vmul.f32 %v940_v35, %v2560_v53  ;;  %v2113_v51 = vmul.f32 %v957_v38, %v2561_v20  ;;  %v2117_v59 = vmul.f32 %v974_v15, %v2563_v54  ;;  %v2574_v20 = vld [vmem:[#allocation6_spill] sm:$0xff] }
  0x32   :  { %v2121_v62 = vmul.f32 %v991_v60, %v2564_v55  ;;  %v163_v4 = vrot.slane %v2565_v57, %v1581_v13  ;;  %v167_v22 = vrot.slane %v2565_v57, %v2566_v21  ;;  %v745_v58 = vrot.slane %v737_v34, %v1741_v56 }
  0x33   :  { %v752_v23 = vrot.slane %v738_v37, %v1741_v56  ;;  %v171_v24 = vrot.slane %v2565_v57, %v2567_v7  ;;  %v175_v25 = vrot.slane %v2565_v57, %v1590_v16  ;;  %v788_v26 = vcombine.low %v2020_v52, %v2025_v5 }
  0x34   :  { %v789_v8 = vcombine.low %v2028_v41, %v2031_v19  ;;  %v179_v28 = vrot.slane %v2568_v27, %v1581_v13  ;;  %v183_v29 = vrot.slane %v2568_v27, %v2566_v21  ;;  %v762_v9 = vrot.slane %v754_v39, %v1741_v56 }
  0x35   :  { %v769_v11 = vrot.slane %v755_v40, %v1741_v56  ;;  %v187_v52 = vrot.slane %v2568_v27, %v2567_v7  ;;  %v736_v5 = vcombine.low %v728_v42, %v735_v43  ;;  %v779_v41 = vrot.slane %v771_v14, %v1741_v56  ;;  %v2570_v14 = vld [vmem:[#allocation5_spill] sm:$0xff] }
  0x36   :  { %v786_v19 = vrot.slane %v772_v63, %v1741_v56  ;;  %v191_v31 = vrot.slane %v2568_v27, %v1590_v16  ;;  %v483_v3 = vrot.slane %v163_v4, %v1581_v13  ;;  %v487_v32 = vrot.slane %v167_v22, %v1581_v13 }
  0x37   :  { %v753_v10 = vcombine.low %v745_v58, %v752_v23  ;;  %v491_v12 = vrot.slane %v171_v24, %v1581_v13  ;;  %v495_v33 = vrot.slane %v175_v25, %v1581_v13  ;;  %v796_v34 = vrot.slane %v788_v26, %v1741_v56 }
  0x38   :  { %v803_v35 = vrot.slane %v789_v8, %v1741_v56  ;;  %v28_v17 = vunpack.c.l.bf16 %v2146_v30  ;;  %v2162_v37 = vunpack.c.h.bf16 %v2569_v36  ;;  %v2165_v38 = vrot.slane %v179_v28, %v1581_v13 }
  0x39   :  { %v770_v18 = vcombine.low %v762_v9, %v769_v11  ;;  %v2168_v49 = vrot.slane %v183_v29, %v1581_v13  ;;  %v2171_v39 = vrot.slane %v187_v52, %v1581_v13  ;;  %v787_v40 = vcombine.low %v779_v41, %v786_v19 }
  0x3a   :  { %v2571_v15 = vunpack.c.l.bf16 %v2570_v14  ;;  %v2176_v43 = vrot.slane %v191_v31, %v1581_v13  ;;  %v805_v63 = vcombine.low %v483_v3, %v487_v32  ;;  %v2572_v60 = vunpack.c.h.bf16 %v2570_v14 }
  0x3b   :  { %v1176_v0 = vcombine.high %v1016_v61, %v1016_v61  ;;  %v804_v45 = vcombine.low %v796_v34, %v803_v35  ;;  %v806_v47 = vcombine.low %v491_v12, %v495_v33  ;;  %v2181_v53 = vrot.slane %v1016_v61, %v1741_v56 }
  0x3c   :  { %v1008_v42 = vmul.f32 %v736_v5, %v2571_v15  ;;  %v1009_v1 = vmul.f32 %v753_v10, %v2572_v60  ;;  %v2575_v6 = vunpack.c.l.bf16 %v2574_v20  ;;  %v1193_v57 = vcombine.high %v1017_v44, %v1017_v44 }
  0x3d   :  { %2573 = vst [vmem:[#allocation7_spill] sm:$0xff] %v2181_v53  ;;  %v2186_v55 = vrot.slane %v1176_v0, %v1741_v56  ;;  %v2189_v4 = vrot.slane %v1017_v44, %v1741_v56  ;;  %v2576_v22 = vunpack.c.h.bf16 %v2574_v20  ;;  %v1210_v24 = vcombine.high %v1018_v46, %v1018_v46 }
  0x3e   :  { %v1040_v50 = vcombine.high %v1008_v42, %v1008_v42  ;;  %v1010_v54 = vmul.f32 %v770_v18, %v2575_v6  ;;  %v1047_v23 = vrot.slane %v1008_v42, %v1741_v56  ;;  %v2195_v25 = vrot.slane %v1018_v46, %v1741_v56 }
  0x3f   :  { %v1011_v58 = vmul.f32 %v787_v40, %v2576_v22  ;;  %v1057_v61 = vcombine.high %v1009_v1, %v1009_v1  ;;  %v1064_v26 = vrot.slane %v1009_v1, %v1741_v56  ;;  %v2199_v8 = vrot.slane %v1193_v57, %v1741_v56 }
  0x40   :  { %v1227_v27 = vcombine.high %v2105_v48, %v2105_v48  ;;  %v1054_v44 = vrot.slane %v1040_v50, %v1741_v56  ;;  %v2205_v28 = vrot.slane %v1210_v24, %v1741_v56  ;;  %v2209_v29 = vrot.slane %v2105_v48, %v1741_v56 }
  0x41   :  { %v1244_v46 = vcombine.high %v2109_v2, %v2109_v2  ;;  %v1074_v9 = vcombine.high %v1010_v54, %v1010_v54  ;;  %v2218_v52 = vrot.slane %v2109_v2, %v1741_v56  ;;  %v1261_v5 = vcombine.high %v2113_v51, %v2113_v51 }
  0x42   :  { %v2214_v11 = vrot.slane %v1227_v27, %v1741_v56  ;;  %v1055_v41 = vcombine.high %v1047_v23, %v1047_v23  ;;  %v1081_v19 = vrot.slane %v1010_v54, %v1741_v56  ;;  %v2228_v31 = vrot.slane %v2113_v51, %v1741_v56 }
  0x43   :  { %v2224_v48 = vrot.slane %v1244_v46, %v1741_v56  ;;  %v1091_v3 = vcombine.high %v1011_v58, %v1011_v58  ;;  %v2231_v32 = vrot.slane %v1011_v58, %v1741_v56  ;;  %v2234_v2 = vrot.slane %v1261_v5, %v1741_v56 }
  0x44   :  { %v1278_v10 = vcombine.high %v2117_v59, %v2117_v59  ;;  %v1056_v12 = vcombine.high %v1054_v44, %v1054_v44  ;;  %v1071_v33 = vrot.slane %v1057_v61, %v1741_v56  ;;  %v2241_v34 = vrot.slane %v2117_v59, %v1741_v56 }
  0x45   :  { %v1295_v51 = vcombine.high %v2121_v62, %v2121_v62  ;;  %v1088_v35 = vrot.slane %v1074_v9, %v1741_v56  ;;  %v2251_v18 = vrot.slane %v2121_v62, %v1741_v56  ;;  %v1377_v40 = vsel %vm1376_vm0, %v1047_v23, 0.0 }
  0x46   :  { %v2247_v36 = vrot.slane %v1278_v10, %v1741_v56  ;;  %v2255_v14 = vrot.slane %v805_v63, %v1741_v56  ;;  %v1378_v15 = vsel %vm1376_vm0, %v1055_v41, 0.0  ;;  %v1380_v42 = vsel %vm1376_vm0, %v1054_v44, 0.0 }
  0x47   :  { %v2258_v59 = vrot.slane %v1295_v51, %v1741_v56  ;;  %v2263_v60 = vrot.slane %v806_v47, %v1741_v56  ;;  %v2265_v1 = vmul.f32 %v804_v45, %v28_v17  ;;  %v1072_v0 = vcombine.high %v1064_v26, %v1064_v26 }
  0x48   :  { %v1379_v62 = vadd.f32 %v1378_v15, %v1377_v40  ;;  %v1089_v50 = vcombine.high %v1081_v19, %v1081_v19  ;;  %v2268_v20 = vrot.slane %v1091_v3, %v1741_v56  ;;  %v1382_v6 = vsel %vm1376_vm0, %v1056_v12, 0.0 }
  0x49   :  { %v1073_v54 = vcombine.high %v1071_v33, %v1071_v33  ;;  %v1090_v57 = vcombine.high %v1088_v35, %v1088_v35  ;;  %v1191_v22 = vcombine.high %v2181_v53, %v2181_v53  ;;  %v1192_v17 = vcombine.high %v2186_v55, %v2186_v55 }
  0x4a   :  { %v1381_v47 = vadd.f32 %v1380_v42, %v1379_v62  ;;  %v1208_v45 = vcombine.high %v2189_v4, %v2189_v4  ;;  %v1225_v58 = vcombine.high %v2195_v25, %v2195_v25  ;;  %v1384_v23 = vsel %vm1376_vm0, %v1064_v26, 0.0 }
  0x4b   :  { %v1209_v24 = vcombine.high %v2199_v8, %v2199_v8  ;;  %v1226_v61 = vcombine.high %v2205_v28, %v2205_v28  ;;  %v1242_v27 = vcombine.high %v2209_v29, %v2209_v29  ;;  %v1243_v46 = vcombine.high %v2214_v11, %v2214_v11 }
  0x4c   :  { %v1383_v44 = vadd.f32 %v1382_v6, %v1381_v47  ;;  %v1259_v9 = vcombine.high %v2218_v52, %v2218_v52  ;;  %v1260_v5 = vcombine.high %v2224_v48, %v2224_v48  ;;  %v1386_v26 = vsel %vm1376_vm0, %v1072_v0, 0.0 }
  0x4d   :  { %v1276_v41 = vcombine.high %v2228_v31, %v2228_v31  ;;  %v1277_v3 = vcombine.high %v2234_v2, %v2234_v2  ;;  %v1293_v10 = vcombine.high %v2241_v34, %v2241_v34  ;;  %v1294_v51 = vcombine.high %v2247_v36, %v2247_v36 }
  0x4e   :  { %v1385_v12 = vadd.f32 %v1384_v23, %v1383_v44  ;;  %v1310_v40 = vcombine.high %v2251_v18, %v2251_v18  ;;  %v1311_v15 = vcombine.high %v2258_v59, %v2258_v59  ;;  %v1388_v42 = vsel %vm1376_vm0, %v1071_v33, 0.0 }
  0x4f   :  { %v1390_v62 = vsel %vm1376_vm0, %v1073_v54, 0.0  ;;  %v1392_v6 = vsel %vm1376_vm0, %v1081_v19, 0.0  ;;  %v1394_v47 = vsel %vm1376_vm0, %v1089_v50, 0.0  ;;  %v1396_v23 = vsel %vm1376_vm0, %v1088_v35, 0.0 }
  0x50   :  { %v1387_v0 = vadd.f32 %v1386_v26, %v1385_v12  ;;  %v1398_v44 = vsel %vm1376_vm0, %v1090_v57, 0.0  ;;  %v2314_v63 = vsel %vm1376_vm0, %v1191_v22, 0.0  ;;  %v2318_v53 = vsel %vm1376_vm0, %v2186_v55, 0.0 }
  0x51   :  { %v2321_v33 = vsel %vm1376_vm0, %v1192_v17, 0.0  ;;  %v2325_v19 = vsel %vm1376_vm0, %v2189_v4, 0.0  ;;  %v2328_v50 = vsel %vm1376_vm0, %v1208_v45, 0.0  ;;  %v2332_v35 = vsel %vm1376_vm0, %v2199_v8, 0.0 }
  0x52   :  { %v1389_v56 = vadd.f32 %v1388_v42, %v1387_v0  ;;  %v2335_v54 = vsel %vm1376_vm0, %v1209_v24, 0.0  ;;  %v2339_v55 = vsel %vm1376_vm0, %v2195_v25, 0.0  ;;  %v2342_v57 = vsel %vm1376_vm0, %v1225_v58, 0.0 }
  0x53   :  { %v2346_v4 = vsel %vm1376_vm0, %v2205_v28, 0.0  ;;  %v2349_v17 = vsel %vm1376_vm0, %v1226_v61, 0.0  ;;  %v2353_v8 = vsel %vm1376_vm0, %v2209_v29, 0.0  ;;  %v2356_v45 = vsel %vm1376_vm0, %v1242_v27, 0.0 }
  0x54   :  { %v1391_v22 = vadd.f32 %v1390_v62, %v1389_v56  ;;  %v2360_v25 = vsel %vm1376_vm0, %v2214_v11, 0.0  ;;  %v2363_v56 = vsel %vm1376_vm0, %v1243_v46, 0.0  ;;  %v2367_v28 = vsel %vm1376_vm0, %v2218_v52, 0.0 }
  0x55   :  { %v2370_v24 = vsel %vm1376_vm0, %v1259_v9, 0.0  ;;  %v2374_v29 = vsel %vm1376_vm0, %v2224_v48, 0.0  ;;  %v2377_v61 = vsel %vm1376_vm0, %v1260_v5, 0.0  ;;  %v2381_v11 = vsel %vm1376_vm0, %v2228_v31, 0.0 }
  0x56   :  { %v1393_v58 = vadd.f32 %v1392_v6, %v1391_v22  ;;  %v2384_v27 = vsel %vm1376_vm0, %v1276_v41, 0.0  ;;  %v2388_v52 = vsel %vm1376_vm0, %v2234_v2, 0.0  ;;  %v2391_v46 = vsel %vm1376_vm0, %v1277_v3, 0.0  ;;  %v19_v6 = vld [vmem:[%s2523_s0 + $0x18] sm:$0xff] }
  0x57   :  { %v2395_v48 = vsel %vm1376_vm0, %v2241_v34, 0.0  ;;  %v2398_v5 = vsel %vm1376_vm0, %v1293_v10, 0.0  ;;  %v2402_v31 = vsel %vm1376_vm0, %v2247_v36, 0.0  ;;  %v2405_v26 = vsel %vm1376_vm0, %v1294_v51, 0.0 }
  0x58   :  { %v1395_v9 = vadd.f32 %v1394_v47, %v1393_v58  ;;  %v2409_v2 = vsel %vm1376_vm0, %v2251_v18, 0.0  ;;  %v2412_v41 = vsel %vm1376_vm0, %v1310_v40, 0.0  ;;  %v2416_v34 = vsel %vm1376_vm0, %v2258_v59, 0.0 }
  0x59   :  { %v29_v3 = vunpack.c.h.bf16 %v2146_v30  ;;  %v195_v36 = vrot.slane %v2162_v37, %v1581_v13  ;;  %v2422_v12 = vsel %vm1376_vm0, %v1311_v15, 0.0  ;;  %v199_v18 = vrot.slane %v2162_v37, %v2566_v21 }
  0x5a   :  { %v1397_v10 = vadd.f32 %v1396_v23, %v1395_v9  ;;  %v203_v51 = vrot.slane %v2162_v37, %v2567_v7  ;;  %v207_v40 = vrot.slane %v2162_v37, %v1590_v16  ;;  %v1400_v59 = vsel %vm1376_vm0, %v2231_v32, 0.0  ;;  %v2577_v16 = vld [vmem:[#allocation12_spill] sm:$0xff] }
  0x5b   :  { %v821_v30 = vcombine.low %v2255_v14, %v2263_v60  ;;  %v822_v42 = vcombine.low %v2165_v38, %v2168_v49  ;;  %v823_v15 = vcombine.low %v2171_v39, %v2176_v43  ;;  %v1107_v21 = vcombine.high %v2268_v20, %v2268_v20 }
  0x5c   :  { %v1399_v0 = vadd.f32 %v1398_v44, %v1397_v10  ;;  %v1108_v7 = vcombine.high %v2265_v1, %v2265_v1  ;;  %v1115_v37 = vrot.slane %v2265_v1, %v2577_v16  ;;  %v2578_v62 = vcombine.high %v2231_v32, %v2231_v32 }
  0x5d   :  { %v515_v38 = vrot.slane %v195_v36, %v1581_v13  ;;  %v519_v49 = vrot.slane %v199_v18, %v1581_v13  ;;  %v523_v39 = vrot.slane %v203_v51, %v1581_v13  ;;  %v1404_v43 = vsel %vm1376_vm0, %v2268_v20, 0.0 }
  0x5e   :  { %v1402_v14 = vsel %vm1376_vm0, %v2578_v62, 0.0  ;;  %v1401_v60 = vadd.f32 %v1400_v59, %v1399_v0  ;;  %v527_v1 = vrot.slane %v207_v40, %v1581_v13  ;;  %v830_v32 = vrot.slane %v822_v42, %v2577_v16 }
  0x5f   :  { %v837_v47 = vrot.slane %v823_v15, %v2577_v16  ;;  %v1013_v44 = vmul.f32 %v821_v30, %v29_v3  ;;  %v1122_v22 = vrot.slane %v1108_v7, %v2577_v16  ;;  %v1123_v58 = vcombine.high %v1115_v37, %v1115_v37 }
  0x60   :  { %v1403_v23 = vadd.f32 %v1402_v14, %v1401_v60  ;;  %v1406_v9 = vsel %vm1376_vm0, %v1107_v21, 0.0  ;;  %v30_v10 = vunpack.c.l.bf16 %v19_v6  ;;  %v1408_v20 = vsel %vm1376_vm0, %v1115_v37, 0.0 }
  0x61   :  { %v838_v18 = vcombine.low %v830_v32, %v837_v47  ;;  %v839_v51 = vcombine.low %v515_v38, %v519_v49  ;;  %v840_v59 = vcombine.low %v523_v39, %v527_v1  ;;  %v1124_v13 = vcombine.high %v1122_v22, %v1122_v22 }
  0x62   :  { %v1405_v36 = vadd.f32 %v1404_v43, %v1403_v23  ;;  %v1125_v40 = vcombine.high %v1013_v44, %v1013_v44  ;;  %v1132_v42 = vrot.slane %v1013_v44, %v2577_v16  ;;  %v1410_v15 = vsel %vm1376_vm0, %v1123_v58, 0.0 }
  0x63   :  { %v1412_v30 = vsel %vm1376_vm0, %v1122_v22, 0.0  ;;  %v847_v7 = vrot.slane %v839_v51, %v2577_v16  ;;  %v854_v21 = vrot.slane %v840_v59, %v2577_v16  ;;  %v1014_v14 = vmul.f32 %v838_v18, %v30_v10 }
  0x64   :  { %v1407_v0 = vadd.f32 %v1406_v9, %v1405_v36  ;;  %v1139_v37 = vrot.slane %v1125_v40, %v2577_v16  ;;  %v1140_v60 = vcombine.high %v1132_v42, %v1132_v42  ;;  %v1414_v38 = vsel %vm1376_vm0, %v1124_v13, 0.0 }
  0x65   :  { %v1416_v39 = vsel %vm1376_vm0, %v1132_v42, 0.0  ;;  %v31_v43 = vunpack.c.h.bf16 %v19_v6  ;;  %v855_v1 = vcombine.low %v847_v7, %v854_v21  ;;  %v1142_v23 = vcombine.high %v1014_v14, %v1014_v14 }
  0x66   :  { %v1409_v3 = vadd.f32 %v1408_v20, %v1407_v0  ;;  %v1141_v47 = vcombine.high %v1139_v37, %v1139_v37  ;;  %v1149_v44 = vrot.slane %v1014_v14, %v2577_v16  ;;  %v1418_v22 = vsel %vm1376_vm0, %v1140_v60, 0.0 }
  0x67   :  { %v1420_v9 = vsel %vm1376_vm0, %v1139_v37, 0.0  ;;  %v1015_v10 = vmul.f32 %v855_v1, %v31_v43  ;;  %v1156_v20 = vrot.slane %v1142_v23, %v2577_v16 }
  0x68   :  { %v1411_v62 = vadd.f32 %v1410_v15, %v1409_v3  ;;  %v1157_v18 = vcombine.high %v1149_v44, %v1149_v44  ;;  %v1422_v51 = vsel %vm1376_vm0, %v1141_v47, 0.0  ;;  %v1424_v6 = vsel %vm1376_vm0, %v1149_v44, 0.0  ;;  %v2579_v44 = vld [vmem:[#allocation7_spill] sm:$0xff] }
  0x69   :  { %v1158_v13 = vcombine.high %v1156_v20, %v1156_v20  ;;  %v1159_v40 = vcombine.high %v1015_v10, %v1015_v10  ;;  %v1166_v42 = vrot.slane %v1015_v10, %v2577_v16 }
  0x6a   :  { %v1413_v49 = vadd.f32 %v1412_v30, %v1411_v62  ;;  %v1426_v15 = vsel %vm1376_vm0, %v1157_v18, 0.0  ;;  %v1428_v30 = vsel %vm1376_vm0, %v1156_v20, 0.0 }
  0x6b   :  { %v1173_v21 = vrot.slane %v1159_v40, %v2577_v16  ;;  %v1174_v62 = vcombine.high %v1166_v42, %v1166_v42  ;;  %v1430_v14 = vsel %vm1376_vm0, %v1158_v13, 0.0  ;;  %v1432_v60 = vsel %vm1376_vm0, %v1166_v42, 0.0 }
  0x6c   :  { %v1415_v32 = vadd.f32 %v1414_v38, %v1413_v49  ;;  %v1440_v16 = vsel %vm1376_vm0, %v2579_v44, 0.0 }
  0x6d   :  { %v1175_v49 = vcombine.high %v1173_v21, %v1173_v21  ;;  %v1436_v1 = vsel %vm1376_vm0, %v1173_v21, 0.0 }
  0x6e   :  { %v1417_v58 = vadd.f32 %v1416_v39, %v1415_v32  ;;  %v1434_v39 = vsel %vm1376_vm0, %v1174_v62, 0.0 }
  0x6f   :  { %v1438_v47 = vsel %vm1376_vm0, %v1175_v49, 0.0 }
  0x70   :  { %v1419_v36 = vadd.f32 %v1418_v22, %v1417_v58 }
  0x72   :  { %v1421_v59 = vadd.f32 %v1420_v9, %v1419_v36 }
  0x74   :  { %v1423_v0 = vadd.f32 %v1422_v51, %v1421_v59 }
  0x76   :  { %v1425_v3 = vadd.f32 %v1424_v6, %v1423_v0 }
  0x78   :  { %v1427_v7 = vadd.f32 %v1426_v15, %v1425_v3 }
  0x7a   :  { %v1429_v37 = vadd.f32 %v1428_v30, %v1427_v7 }
  0x7c   :  { %v1431_v38 = vadd.f32 %v1430_v14, %v1429_v37 }
  0x7e   :  { %v1433_v43 = vadd.f32 %v1432_v60, %v1431_v38 }
  0x80   :  { %v1435_v32 = vadd.f32 %v1434_v39, %v1433_v43 }
  0x82   :  { %v1437_v23 = vadd.f32 %v1436_v1, %v1435_v32 }
  0x84   :  { %v1439_v22 = vadd.f32 %v1438_v47, %v1437_v23 }
  0x86   :  { %v1441_v58 = vadd.f32 %v1440_v16, %v1439_v22 }
  0x88   :  { %v1443_v9 = vadd.f32 %v2314_v63, %v1441_v58 }
  0x8a   :  { %v1445_v36 = vadd.f32 %v2318_v53, %v1443_v9 }
  0x8c   :  { %v1447_v10 = vadd.f32 %v2321_v33, %v1445_v36 }
  0x8e   :  { %v1449_v20 = vadd.f32 %v2325_v19, %v1447_v10 }
  0x90   :  { %v1451_v18 = vadd.f32 %v2328_v50, %v1449_v20 }
  0x92   :  { %v1453_v51 = vadd.f32 %v2332_v35, %v1451_v18 }
  0x94   :  { %v1455_v59 = vadd.f32 %v2335_v54, %v1453_v51 }
  0x96   :  { %v1457_v6 = vadd.f32 %v2339_v55, %v1455_v59 }
  0x98   :  { %v1459_v0 = vadd.f32 %v2342_v57, %v1457_v6 }
  0x9a   :  { %v1461_v13 = vadd.f32 %v2346_v4, %v1459_v0 }
  0x9c   :  { %v1463_v63 = vadd.f32 %v2349_v17, %v1461_v13 }
  0x9e   :  { %v1465_v53 = vadd.f32 %v2353_v8, %v1463_v63 }
  0xa0   :  { %v1467_v33 = vadd.f32 %v2356_v45, %v1465_v53 }
  0xa2   :  { %v1469_v19 = vadd.f32 %v2360_v25, %v1467_v33 }
  0xa4   :  { %v1471_v50 = vadd.f32 %v2363_v56, %v1469_v19 }
  0xa6   :  { %v1473_v35 = vadd.f32 %v2367_v28, %v1471_v50 }
  0xa8   :  { %v1475_v54 = vadd.f32 %v2370_v24, %v1473_v35 }
  0xaa   :  { %v1477_v55 = vadd.f32 %v2374_v29, %v1475_v54 }
  0xac   :  { %v1479_v57 = vadd.f32 %v2377_v61, %v1477_v55 }
  0xae   :  { %v1481_v4 = vadd.f32 %v2381_v11, %v1479_v57 }
  0xb0   :  { %v1483_v17 = vadd.f32 %v2384_v27, %v1481_v4 }
  0xb2   :  { %v1485_v8 = vadd.f32 %v2388_v52, %v1483_v17  ;;  %v1526_v52 = vld [vmem:[#allocation2] ss:$0 sm:$0xff] }
  0xb4   :  { %v1487_v45 = vadd.f32 %v2391_v46, %v1485_v8 }
  0xb6   :  { %v1489_v25 = vadd.f32 %v2395_v48, %v1487_v45 }
  0xb8   :  { %v1491_v56 = vadd.f32 %v2398_v5, %v1489_v25 }
  0xba   :  { %v1493_v28 = vadd.f32 %v2402_v31, %v1491_v56 }
  0xbc   :  { %v1495_v24 = vadd.f32 %v2405_v26, %v1493_v28 }
  0xbe   :  { %v1497_v29 = vadd.f32 %v2409_v2, %v1495_v24 }
  0xc0   :  { %v1499_v61 = vadd.f32 %v2412_v41, %v1497_v29 }
  0xc2   :  { %v1501_v11 = vadd.f32 %v2416_v34, %v1499_v61 }
  0xc4   :  { %v1503_v27 = vadd.f32 %v2422_v12, %v1501_v11 }
  0xc6   :  { %1504 = vadd.xlane.f32.xlu0 %v1503_v27 }
 0x153   :  { %v1505_v40 = vpop.xlane.xlu0 %1504 }
 0x154   :  { %v1513_v46 = vadd.f32 %v1526_v52, %v1505_v40 }
 0x156   :  { %v1514_v42 = vsub.f32 0.0, %v1513_v46 }
 0x158   :  { %v1515_v48 = vmul.f32 1.442695, %v1514_v42 }
 0x15a   :  { %1528 = vpow2.f32 %v1515_v48 }
 0x164   :  { %v1529_v5 = vpop.eup %1528 }
 0x165   :  { %v1517_v15 = vadd.f32 1.0, %v1529_v5 }
 0x167   :  { %1530 = vrcp.f32 %v1517_v15 }
 0x171   :  { %v1531_v31 = vpop.eup %1530 }
 0x172   :  { %1521 = vst.msk [vmem:[%s2524_s3] sm:$0x3] %vm1520_vm1, %v1531_v31 }

// kernel: discriminator_forward.6
= control target key start
LH: loop header
LB: loop body
LE: loop exit
PB: predicated region body
PF: predicated region fallthrough
CT: control target
= control target key end

     0   :  { %s10599_s15 = smov 0   ;;  %s10601_s16 = smov 0   ;;  %s12594_s0 = inlined_call_operand.vmem [shape: bf16[32,4096], index: 0, kind: input, shape index: {}]   ;;  %s12595_s1 = inlined_call_operand.vmem [shape: bf16[4096,512], index: 1, kind: input, shape index: {}]   ;;  %s12596_s2 = inlined_call_operand.vmem [shape: f32[1,512], index: 2, kind: input, shape index: {}]   ;;  %s12597_s3 = inlined_call_operand.vmem [shape: f32[1,512], index: 3, kind: input, shape index: {}]   ;;  %s12598_s4 = inlined_call_operand.vmem [shape: bf16[32,512], index: 4, kind: output, shape index: {}]  }
   0x1   :  { %s10603_s17 = smov 0  }
   0x2 LB: > { %s10615_s18 = sadd.s32 4294967295, %s10571_s17   ;;  %s10618_s19 = sadd.s32 1, %s10571_s17   ;;  %s10571_s17 = sphi %s10603_s17, %s12602_s17   ;;  %s10567_s16 = sphi %s10601_s16, %s12601_s16   ;;  %s10563_s15 = sphi %s10599_s15, %s12600_s15  }
   0x3   : > { %s39_s20 = ssub.s32 %s10571_s17, %s10618_s19  ;;  %s42_s21 = sadd.s32 1, %s10567_s16 }
   0x4   : > { %p40_p0 = scmp.eq.s32.totalorder %s39_s20, 0  ;;  %p49_p1 = scmp.ne.s32.totalorder %s10567_s16, %s10563_s15 }
   0x5   : > { %p50_p2 = scmp.eq.s32.totalorder %s10571_s17, 0  ;;  %p131_p3 = scmp.eq.s32.totalorder %s10615_s18, 1 }
   0x6   : > { %s10628_s22 = scalar_select %p40_p0, %s10567_s16, %s42_s21  }
   0x7   : > { %p51_p4 = por %p50_p2, %p49_p1  ;;  %p10630_p5 = por %p131_p3, %p49_p1 }
   0x8   : > { %p9032_p6 = scmp.ge.s32.totalorder %s10571_s17, 2 }
   0xa   : > { %156 = sbr.rel (%p9032_p6) target bundleno = 277 (0x115), region = 20 }
  0x11   : > { %159 = sbr.rel (!%p51_p4) target bundleno = 277 (0x115), region = 24  ;;  %s161_s24 = sand.u32 (%p51_p4), 1, %s10567_s16  }
  0x12   : > { %s9626_s25 = sshll.u32 (%p51_p4), %s10571_s17, 3  ;;  %s9033_s26 = sshll.u32 (%p51_p4), %s161_s24, 12 }
  0x13   : > { %s10640_s29 = scalar_lea.vmem (%p51_p4), %s12595_s1, %s9626_s25  ;;  %s10645_s30 = scalar_lea.vmem (%p51_p4), [#allocation2], %s9033_s26 }
  0x14   : > { %v1219_v0 = vld [vmem:[%s10640_s29] sm:$0xff] (%p51_p4)  ;;  %v1221_v1 = vld [vmem:[%s10640_s29 + $0x10] sm:$0xff] (%p51_p4) }
  0x15   : > { %v1223_v2 = vld [vmem:[%s10640_s29 + $0x20] sm:$0xff] (%p51_p4)  ;;  %1220 = vst [vmem:[%s10645_s30] sm:$0xff] (%p51_p4), %v1219_v0  ;;  %1222 = vst [vmem:[%s10645_s30 + $0x8] sm:$0xff] (%p51_p4), %v1221_v1  ;;  %v1225_v3 = vld [vmem:[%s10640_s29 + $0x30] sm:$0xff] (%p51_p4) }
  0x16   : > { %1224 = vst [vmem:[%s10645_s30 + $0x10] sm:$0xff] (%p51_p4), %v1223_v2  ;;  %v1227_v4 = vld [vmem:[%s10640_s29 + $0x40] sm:$0xff] (%p51_p4)  ;;  %v1229_v5 = vld [vmem:[%s10640_s29 + $0x50] sm:$0xff] (%p51_p4)  ;;  %1226 = vst [vmem:[%s10645_s30 + $0x18] sm:$0xff] (%p51_p4), %v1225_v3 }
  0x17   : > { %1228 = vst [vmem:[%s10645_s30 + $0x20] sm:$0xff] (%p51_p4), %v1227_v4  ;;  %1230 = vst [vmem:[%s10645_s30 + $0x28] sm:$0xff] (%p51_p4), %v1229_v5  ;;  %v1231_v6 = vld [vmem:[%s10640_s29 + $0x60] sm:$0xff] (%p51_p4)  ;;  %v1233_v7 = vld [vmem:[%s10640_s29 + $0x70] sm:$0xff] (%p51_p4) }
  0x18   : > { %v1235_v8 = vld [vmem:[%s10640_s29 + $0x80] sm:$0xff]  ;;  %1232 = vst [vmem:[%s10645_s30 + $0x30] sm:$0xff] %v1231_v6  ;;  %1234 = vst [vmem:[%s10645_s30 + $0x38] sm:$0xff] %v1233_v7  ;;  %v1237_v9 = vld [vmem:[%s10640_s29 + $0x90] sm:$0xff] }
  0x19   : > { %1236 = vst [vmem:[%s10645_s30 + $0x40] sm:$0xff] %v1235_v8  ;;  %v1239_v10 = vld [vmem:[%s10640_s29 + $0xa0] sm:$0xff]  ;;  %v1241_v11 = vld [vmem:[%s10640_s29 + $0xb0] sm:$0xff]  ;;  %1238 = vst [vmem:[%s10645_s30 + $0x48] sm:$0xff] %v1237_v9 }
  0x1a   : > { %1240 = vst [vmem:[%s10645_s30 + $0x50] sm:$0xff] %v1239_v10  ;;  %1242 = vst [vmem:[%s10645_s30 + $0x58] sm:$0xff] %v1241_v11  ;;  %v1243_v12 = vld [vmem:[%s10640_s29 + $0xc0] sm:$0xff]  ;;  %v1245_v13 = vld [vmem:[%s10640_s29 + $0xd0] sm:$0xff] }
  0x1b   : > { %v1247_v14 = vld [vmem:[%s10640_s29 + $0xe0] sm:$0xff]  ;;  %1244 = vst [vmem:[%s10645_s30 + $0x60] sm:$0xff] %v1243_v12  ;;  %1246 = vst [vmem:[%s10645_s30 + $0x68] sm:$0xff] %v1245_v13  ;;  %v1249_v15 = vld [vmem:[%s10640_s29 + $0xf0] sm:$0xff] }
  0x1c   : > { %1248 = vst [vmem:[%s10645_s30 + $0x70] sm:$0xff] %v1247_v14  ;;  %v1251_v16 = vld [vmem:[%s10640_s29 + $0x100] sm:$0xff]  ;;  %v1253_v17 = vld [vmem:[%s10640_s29 + $0x110] sm:$0xff]  ;;  %1250 = vst [vmem:[%s10645_s30 + $0x78] sm:$0xff] %v1249_v15 }
  0x1d   : > { %1252 = vst [vmem:[%s10645_s30 + $0x80] sm:$0xff] %v1251_v16  ;;  %1254 = vst [vmem:[%s10645_s30 + $0x88] sm:$0xff] %v1253_v17  ;;  %v1255_v18 = vld [vmem:[%s10640_s29 + $0x120] sm:$0xff]  ;;  %v1257_v19 = vld [vmem:[%s10640_s29 + $0x130] sm:$0xff] }
  0x1e   : > { %v1259_v20 = vld [vmem:[%s10640_s29 + $0x140] sm:$0xff]  ;;  %1256 = vst [vmem:[%s10645_s30 + $0x90] sm:$0xff] %v1255_v18  ;;  %1258 = vst [vmem:[%s10645_s30 + $0x98] sm:$0xff] %v1257_v19  ;;  %v1261_v21 = vld [vmem:[%s10640_s29 + $0x150] sm:$0xff] }
  0x1f   : > { %1260 = vst [vmem:[%s10645_s30 + $0xa0] sm:$0xff] %v1259_v20  ;;  %v1263_v22 = vld [vmem:[%s10640_s29 + $0x160] sm:$0xff]  ;;  %v1265_v23 = vld [vmem:[%s10640_s29 + $0x170] sm:$0xff]  ;;  %1262 = vst [vmem:[%s10645_s30 + $0xa8] sm:$0xff] %v1261_v21 }
  0x20   : > { %1264 = vst [vmem:[%s10645_s30 + $0xb0] sm:$0xff] %v1263_v22  ;;  %1266 = vst [vmem:[%s10645_s30 + $0xb8] sm:$0xff] %v1265_v23  ;;  %v1267_v24 = vld [vmem:[%s10640_s29 + $0x180] sm:$0xff]  ;;  %v1269_v25 = vld [vmem:[%s10640_s29 + $0x190] sm:$0xff] }
  0x21   : > { %v1271_v26 = vld [vmem:[%s10640_s29 + $0x1a0] sm:$0xff]  ;;  %1268 = vst [vmem:[%s10645_s30 + $0xc0] sm:$0xff] %v1267_v24  ;;  %1270 = vst [vmem:[%s10645_s30 + $0xc8] sm:$0xff] %v1269_v25  ;;  %v1273_v27 = vld [vmem:[%s10640_s29 + $0x1b0] sm:$0xff] }
  0x22   : > { %1272 = vst [vmem:[%s10645_s30 + $0xd0] sm:$0xff] %v1271_v26  ;;  %v1275_v28 = vld [vmem:[%s10640_s29 + $0x1c0] sm:$0xff]  ;;  %v1277_v29 = vld [vmem:[%s10640_s29 + $0x1d0] sm:$0xff]  ;;  %1274 = vst [vmem:[%s10645_s30 + $0xd8] sm:$0xff] %v1273_v27 }
  0x23   : > { %1276 = vst [vmem:[%s10645_s30 + $0xe0] sm:$0xff] %v1275_v28  ;;  %1278 = vst [vmem:[%s10645_s30 + $0xe8] sm:$0xff] %v1277_v29  ;;  %v1279_v30 = vld [vmem:[%s10640_s29 + $0x1e0] sm:$0xff]  ;;  %v1281_v31 = vld [vmem:[%s10640_s29 + $0x1f0] sm:$0xff] }
  0x24   : > { %v1283_v32 = vld [vmem:[%s10640_s29 + $0x200] sm:$0xff]  ;;  %1280 = vst [vmem:[%s10645_s30 + $0xf0] sm:$0xff] %v1279_v30  ;;  %1282 = vst [vmem:[%s10645_s30 + $0xf8] sm:$0xff] %v1281_v31  ;;  %v1285_v33 = vld [vmem:[%s10640_s29 + $0x210] sm:$0xff] }
  0x25   : > { %1284 = vst [vmem:[%s10645_s30 + $0x100] sm:$0xff] %v1283_v32  ;;  %v1287_v34 = vld [vmem:[%s10640_s29 + $0x220] sm:$0xff]  ;;  %v1289_v35 = vld [vmem:[%s10640_s29 + $0x230] sm:$0xff]  ;;  %1286 = vst [vmem:[%s10645_s30 + $0x108] sm:$0xff] %v1285_v33 }
  0x26   : > { %1288 = vst [vmem:[%s10645_s30 + $0x110] sm:$0xff] %v1287_v34  ;;  %1290 = vst [vmem:[%s10645_s30 + $0x118] sm:$0xff] %v1289_v35  ;;  %v1291_v36 = vld [vmem:[%s10640_s29 + $0x240] sm:$0xff]  ;;  %v1293_v37 = vld [vmem:[%s10640_s29 + $0x250] sm:$0xff] }
  0x27   : > { %v1295_v38 = vld [vmem:[%s10640_s29 + $0x260] sm:$0xff]  ;;  %1292 = vst [vmem:[%s10645_s30 + $0x120] sm:$0xff] %v1291_v36  ;;  %1294 = vst [vmem:[%s10645_s30 + $0x128] sm:$0xff] %v1293_v37  ;;  %v1297_v39 = vld [vmem:[%s10640_s29 + $0x270] sm:$0xff] }
  0x28   : > { %1296 = vst [vmem:[%s10645_s30 + $0x130] sm:$0xff] %v1295_v38  ;;  %v1299_v40 = vld [vmem:[%s10640_s29 + $0x280] sm:$0xff]  ;;  %v1301_v41 = vld [vmem:[%s10640_s29 + $0x290] sm:$0xff]  ;;  %1298 = vst [vmem:[%s10645_s30 + $0x138] sm:$0xff] %v1297_v39 }
  0x29   : > { %1300 = vst [vmem:[%s10645_s30 + $0x140] sm:$0xff] %v1299_v40  ;;  %1302 = vst [vmem:[%s10645_s30 + $0x148] sm:$0xff] %v1301_v41  ;;  %v1303_v42 = vld [vmem:[%s10640_s29 + $0x2a0] sm:$0xff]  ;;  %v1305_v43 = vld [vmem:[%s10640_s29 + $0x2b0] sm:$0xff] }
  0x2a   : > { %v1307_v44 = vld [vmem:[%s10640_s29 + $0x2c0] sm:$0xff]  ;;  %1304 = vst [vmem:[%s10645_s30 + $0x150] sm:$0xff] %v1303_v42  ;;  %1306 = vst [vmem:[%s10645_s30 + $0x158] sm:$0xff] %v1305_v43  ;;  %v1309_v45 = vld [vmem:[%s10640_s29 + $0x2d0] sm:$0xff] }
  0x2b   : > { %1308 = vst [vmem:[%s10645_s30 + $0x160] sm:$0xff] %v1307_v44  ;;  %v1311_v46 = vld [vmem:[%s10640_s29 + $0x2e0] sm:$0xff]  ;;  %v1313_v47 = vld [vmem:[%s10640_s29 + $0x2f0] sm:$0xff]  ;;  %1310 = vst [vmem:[%s10645_s30 + $0x168] sm:$0xff] %v1309_v45 }
  0x2c   : > { %1312 = vst [vmem:[%s10645_s30 + $0x170] sm:$0xff] %v1311_v46  ;;  %1314 = vst [vmem:[%s10645_s30 + $0x178] sm:$0xff] %v1313_v47  ;;  %v1315_v48 = vld [vmem:[%s10640_s29 + $0x300] sm:$0xff]  ;;  %v1317_v49 = vld [vmem:[%s10640_s29 + $0x310] sm:$0xff] }
  0x2d   : > { %v1319_v50 = vld [vmem:[%s10640_s29 + $0x320] sm:$0xff]  ;;  %1316 = vst [vmem:[%s10645_s30 + $0x180] sm:$0xff] %v1315_v48  ;;  %1318 = vst [vmem:[%s10645_s30 + $0x188] sm:$0xff] %v1317_v49  ;;  %v1321_v51 = vld [vmem:[%s10640_s29 + $0x330] sm:$0xff] }
  0x2e   : > { %1320 = vst [vmem:[%s10645_s30 + $0x190] sm:$0xff] %v1319_v50  ;;  %v1323_v52 = vld [vmem:[%s10640_s29 + $0x340] sm:$0xff]  ;;  %v1325_v53 = vld [vmem:[%s10640_s29 + $0x350] sm:$0xff]  ;;  %1322 = vst [vmem:[%s10645_s30 + $0x198] sm:$0xff] %v1321_v51 }
  0x2f   : > { %1324 = vst [vmem:[%s10645_s30 + $0x1a0] sm:$0xff] %v1323_v52  ;;  %1326 = vst [vmem:[%s10645_s30 + $0x1a8] sm:$0xff] %v1325_v53  ;;  %v1327_v54 = vld [vmem:[%s10640_s29 + $0x360] sm:$0xff]  ;;  %v1329_v55 = vld [vmem:[%s10640_s29 + $0x370] sm:$0xff] }
  0x30   : > { %v1331_v56 = vld [vmem:[%s10640_s29 + $0x380] sm:$0xff]  ;;  %1328 = vst [vmem:[%s10645_s30 + $0x1b0] sm:$0xff] %v1327_v54  ;;  %1330 = vst [vmem:[%s10645_s30 + $0x1b8] sm:$0xff] %v1329_v55  ;;  %v1333_v57 = vld [vmem:[%s10640_s29 + $0x390] sm:$0xff] }
  0x31   : > { %1332 = vst [vmem:[%s10645_s30 + $0x1c0] sm:$0xff] %v1331_v56  ;;  %v1335_v58 = vld [vmem:[%s10640_s29 + $0x3a0] sm:$0xff]  ;;  %v1337_v59 = vld [vmem:[%s10640_s29 + $0x3b0] sm:$0xff]  ;;  %1334 = vst [vmem:[%s10645_s30 + $0x1c8] sm:$0xff] %v1333_v57 }
  0x32   : > { %1336 = vst [vmem:[%s10645_s30 + $0x1d0] sm:$0xff] %v1335_v58  ;;  %1338 = vst [vmem:[%s10645_s30 + $0x1d8] sm:$0xff] %v1337_v59  ;;  %v1339_v60 = vld [vmem:[%s10640_s29 + $0x3c0] sm:$0xff]  ;;  %v1341_v61 = vld [vmem:[%s10640_s29 + $0x3d0] sm:$0xff] }
  0x33   : > { %v1343_v62 = vld [vmem:[%s10640_s29 + $0x3e0] sm:$0xff]  ;;  %1340 = vst [vmem:[%s10645_s30 + $0x1e0] sm:$0xff] %v1339_v60  ;;  %1342 = vst [vmem:[%s10645_s30 + $0x1e8] sm:$0xff] %v1341_v61  ;;  %v1345_v63 = vld [vmem:[%s10640_s29 + $0x3f0] sm:$0xff] }
  0x34   : > { %1344 = vst [vmem:[%s10645_s30 + $0x1f0] sm:$0xff] %v1343_v62  ;;  %v1347_v0 = vld [vmem:[%s10640_s29 + $0x400] sm:$0xff]  ;;  %v1349_v1 = vld [vmem:[%s10640_s29 + $0x410] sm:$0xff]  ;;  %1346 = vst [vmem:[%s10645_s30 + $0x1f8] sm:$0xff] %v1345_v63 }
  0x35   : > { %1348 = vst [vmem:[%s10645_s30 + $0x200] sm:$0xff] %v1347_v0  ;;  %1350 = vst [vmem:[%s10645_s30 + $0x208] sm:$0xff] %v1349_v1  ;;  %v1351_v2 = vld [vmem:[%s10640_s29 + $0x420] sm:$0xff]  ;;  %v1353_v3 = vld [vmem:[%s10640_s29 + $0x430] sm:$0xff] }
  0x36   : > { %v1355_v4 = vld [vmem:[%s10640_s29 + $0x440] sm:$0xff]  ;;  %1352 = vst [vmem:[%s10645_s30 + $0x210] sm:$0xff] %v1351_v2  ;;  %1354 = vst [vmem:[%s10645_s30 + $0x218] sm:$0xff] %v1353_v3  ;;  %v1357_v5 = vld [vmem:[%s10640_s29 + $0x450] sm:$0xff] }
  0x37   : > { %1356 = vst [vmem:[%s10645_s30 + $0x220] sm:$0xff] %v1355_v4  ;;  %v1359_v6 = vld [vmem:[%s10640_s29 + $0x460] sm:$0xff]  ;;  %v1361_v7 = vld [vmem:[%s10640_s29 + $0x470] sm:$0xff]  ;;  %1358 = vst [vmem:[%s10645_s30 + $0x228] sm:$0xff] %v1357_v5 }
  0x38   : > { %1360 = vst [vmem:[%s10645_s30 + $0x230] sm:$0xff] %v1359_v6  ;;  %1362 = vst [vmem:[%s10645_s30 + $0x238] sm:$0xff] %v1361_v7  ;;  %v1363_v8 = vld [vmem:[%s10640_s29 + $0x480] sm:$0xff]  ;;  %v1365_v9 = vld [vmem:[%s10640_s29 + $0x490] sm:$0xff] }
  0x39   : > { %v1367_v10 = vld [vmem:[%s10640_s29 + $0x4a0] sm:$0xff]  ;;  %1364 = vst [vmem:[%s10645_s30 + $0x240] sm:$0xff] %v1363_v8  ;;  %1366 = vst [vmem:[%s10645_s30 + $0x248] sm:$0xff] %v1365_v9  ;;  %v1369_v11 = vld [vmem:[%s10640_s29 + $0x4b0] sm:$0xff] }
  0x3a   : > { %1368 = vst [vmem:[%s10645_s30 + $0x250] sm:$0xff] %v1367_v10  ;;  %v1371_v12 = vld [vmem:[%s10640_s29 + $0x4c0] sm:$0xff]  ;;  %v1373_v13 = vld [vmem:[%s10640_s29 + $0x4d0] sm:$0xff]  ;;  %1370 = vst [vmem:[%s10645_s30 + $0x258] sm:$0xff] %v1369_v11 }
  0x3b   : > { %1372 = vst [vmem:[%s10645_s30 + $0x260] sm:$0xff] %v1371_v12  ;;  %1374 = vst [vmem:[%s10645_s30 + $0x268] sm:$0xff] %v1373_v13  ;;  %v1375_v14 = vld [vmem:[%s10640_s29 + $0x4e0] sm:$0xff]  ;;  %v1377_v15 = vld [vmem:[%s10640_s29 + $0x4f0] sm:$0xff] }
  0x3c   : > { %v1379_v16 = vld [vmem:[%s10640_s29 + $0x500] sm:$0xff]  ;;  %1376 = vst [vmem:[%s10645_s30 + $0x270] sm:$0xff] %v1375_v14  ;;  %1378 = vst [vmem:[%s10645_s30 + $0x278] sm:$0xff] %v1377_v15  ;;  %v1381_v17 = vld [vmem:[%s10640_s29 + $0x510] sm:$0xff] }
  0x3d   : > { %1380 = vst [vmem:[%s10645_s30 + $0x280] sm:$0xff] %v1379_v16  ;;  %v1383_v18 = vld [vmem:[%s10640_s29 + $0x520] sm:$0xff]  ;;  %v1385_v19 = vld [vmem:[%s10640_s29 + $0x530] sm:$0xff]  ;;  %1382 = vst [vmem:[%s10645_s30 + $0x288] sm:$0xff] %v1381_v17 }
  0x3e   : > { %1384 = vst [vmem:[%s10645_s30 + $0x290] sm:$0xff] %v1383_v18  ;;  %1386 = vst [vmem:[%s10645_s30 + $0x298] sm:$0xff] %v1385_v19  ;;  %v1387_v20 = vld [vmem:[%s10640_s29 + $0x540] sm:$0xff]  ;;  %v1389_v21 = vld [vmem:[%s10640_s29 + $0x550] sm:$0xff] }
  0x3f   : > { %v1391_v22 = vld [vmem:[%s10640_s29 + $0x560] sm:$0xff]  ;;  %1388 = vst [vmem:[%s10645_s30 + $0x2a0] sm:$0xff] %v1387_v20  ;;  %1390 = vst [vmem:[%s10645_s30 + $0x2a8] sm:$0xff] %v1389_v21  ;;  %v1393_v23 = vld [vmem:[%s10640_s29 + $0x570] sm:$0xff] }
  0x40   : > { %1392 = vst [vmem:[%s10645_s30 + $0x2b0] sm:$0xff] %v1391_v22  ;;  %v1395_v24 = vld [vmem:[%s10640_s29 + $0x580] sm:$0xff]  ;;  %v1397_v25 = vld [vmem:[%s10640_s29 + $0x590] sm:$0xff]  ;;  %1394 = vst [vmem:[%s10645_s30 + $0x2b8] sm:$0xff] %v1393_v23 }
  0x41   : > { %1396 = vst [vmem:[%s10645_s30 + $0x2c0] sm:$0xff] %v1395_v24  ;;  %1398 = vst [vmem:[%s10645_s30 + $0x2c8] sm:$0xff] %v1397_v25  ;;  %v1399_v26 = vld [vmem:[%s10640_s29 + $0x5a0] sm:$0xff]  ;;  %v1401_v27 = vld [vmem:[%s10640_s29 + $0x5b0] sm:$0xff] }
  0x42   : > { %v1403_v28 = vld [vmem:[%s10640_s29 + $0x5c0] sm:$0xff]  ;;  %1400 = vst [vmem:[%s10645_s30 + $0x2d0] sm:$0xff] %v1399_v26  ;;  %1402 = vst [vmem:[%s10645_s30 + $0x2d8] sm:$0xff] %v1401_v27  ;;  %v1405_v29 = vld [vmem:[%s10640_s29 + $0x5d0] sm:$0xff] }
  0x43   : > { %1404 = vst [vmem:[%s10645_s30 + $0x2e0] sm:$0xff] %v1403_v28  ;;  %v1407_v30 = vld [vmem:[%s10640_s29 + $0x5e0] sm:$0xff]  ;;  %v1409_v31 = vld [vmem:[%s10640_s29 + $0x5f0] sm:$0xff]  ;;  %1406 = vst [vmem:[%s10645_s30 + $0x2e8] sm:$0xff] %v1405_v29 }
  0x44   : > { %1408 = vst [vmem:[%s10645_s30 + $0x2f0] sm:$0xff] %v1407_v30  ;;  %1410 = vst [vmem:[%s10645_s30 + $0x2f8] sm:$0xff] %v1409_v31  ;;  %v1411_v32 = vld [vmem:[%s10640_s29 + $0x600] sm:$0xff]  ;;  %v1413_v33 = vld [vmem:[%s10640_s29 + $0x610] sm:$0xff] }
  0x45   : > { %v1415_v34 = vld [vmem:[%s10640_s29 + $0x620] sm:$0xff]  ;;  %1412 = vst [vmem:[%s10645_s30 + $0x300] sm:$0xff] %v1411_v32  ;;  %1414 = vst [vmem:[%s10645_s30 + $0x308] sm:$0xff] %v1413_v33  ;;  %v1417_v35 = vld [vmem:[%s10640_s29 + $0x630] sm:$0xff] }
  0x46   : > { %1416 = vst [vmem:[%s10645_s30 + $0x310] sm:$0xff] %v1415_v34  ;;  %v1419_v36 = vld [vmem:[%s10640_s29 + $0x640] sm:$0xff]  ;;  %v1421_v37 = vld [vmem:[%s10640_s29 + $0x650] sm:$0xff]  ;;  %1418 = vst [vmem:[%s10645_s30 + $0x318] sm:$0xff] %v1417_v35 }
  0x47   : > { %1420 = vst [vmem:[%s10645_s30 + $0x320] sm:$0xff] %v1419_v36  ;;  %1422 = vst [vmem:[%s10645_s30 + $0x328] sm:$0xff] %v1421_v37  ;;  %v1423_v38 = vld [vmem:[%s10640_s29 + $0x660] sm:$0xff]  ;;  %v1425_v39 = vld [vmem:[%s10640_s29 + $0x670] sm:$0xff] }
  0x48   : > { %v1427_v40 = vld [vmem:[%s10640_s29 + $0x680] sm:$0xff]  ;;  %1424 = vst [vmem:[%s10645_s30 + $0x330] sm:$0xff] %v1423_v38  ;;  %1426 = vst [vmem:[%s10645_s30 + $0x338] sm:$0xff] %v1425_v39  ;;  %v1429_v41 = vld [vmem:[%s10640_s29 + $0x690] sm:$0xff] }
  0x49   : > { %1428 = vst [vmem:[%s10645_s30 + $0x340] sm:$0xff] %v1427_v40  ;;  %v1431_v42 = vld [vmem:[%s10640_s29 + $0x6a0] sm:$0xff]  ;;  %v1433_v43 = vld [vmem:[%s10640_s29 + $0x6b0] sm:$0xff]  ;;  %1430 = vst [vmem:[%s10645_s30 + $0x348] sm:$0xff] %v1429_v41 }
  0x4a   : > { %1432 = vst [vmem:[%s10645_s30 + $0x350] sm:$0xff] %v1431_v42  ;;  %1434 = vst [vmem:[%s10645_s30 + $0x358] sm:$0xff] %v1433_v43  ;;  %v1435_v44 = vld [vmem:[%s10640_s29 + $0x6c0] sm:$0xff]  ;;  %v1437_v45 = vld [vmem:[%s10640_s29 + $0x6d0] sm:$0xff] }
  0x4b   : > { %v1439_v46 = vld [vmem:[%s10640_s29 + $0x6e0] sm:$0xff]  ;;  %1436 = vst [vmem:[%s10645_s30 + $0x360] sm:$0xff] %v1435_v44  ;;  %1438 = vst [vmem:[%s10645_s30 + $0x368] sm:$0xff] %v1437_v45  ;;  %v1441_v47 = vld [vmem:[%s10640_s29 + $0x6f0] sm:$0xff] }
  0x4c   : > { %1440 = vst [vmem:[%s10645_s30 + $0x370] sm:$0xff] %v1439_v46  ;;  %v1443_v48 = vld [vmem:[%s10640_s29 + $0x700] sm:$0xff]  ;;  %v1445_v49 = vld [vmem:[%s10640_s29 + $0x710] sm:$0xff]  ;;  %1442 = vst [vmem:[%s10645_s30 + $0x378] sm:$0xff] %v1441_v47 }
  0x4d   : > { %1444 = vst [vmem:[%s10645_s30 + $0x380] sm:$0xff] %v1443_v48  ;;  %1446 = vst [vmem:[%s10645_s30 + $0x388] sm:$0xff] %v1445_v49  ;;  %v1447_v50 = vld [vmem:[%s10640_s29 + $0x720] sm:$0xff]  ;;  %v1449_v51 = vld [vmem:[%s10640_s29 + $0x730] sm:$0xff] }
  0x4e   : > { %v1451_v52 = vld [vmem:[%s10640_s29 + $0x740] sm:$0xff]  ;;  %1448 = vst [vmem:[%s10645_s30 + $0x390] sm:$0xff] %v1447_v50  ;;  %1450 = vst [vmem:[%s10645_s30 + $0x398] sm:$0xff] %v1449_v51  ;;  %v1453_v53 = vld [vmem:[%s10640_s29 + $0x750] sm:$0xff] }
  0x4f   : > { %1452 = vst [vmem:[%s10645_s30 + $0x3a0] sm:$0xff] %v1451_v52  ;;  %v1455_v54 = vld [vmem:[%s10640_s29 + $0x760] sm:$0xff]  ;;  %v1457_v55 = vld [vmem:[%s10640_s29 + $0x770] sm:$0xff]  ;;  %1454 = vst [vmem:[%s10645_s30 + $0x3a8] sm:$0xff] %v1453_v53 }
  0x50   : > { %1456 = vst [vmem:[%s10645_s30 + $0x3b0] sm:$0xff] %v1455_v54  ;;  %1458 = vst [vmem:[%s10645_s30 + $0x3b8] sm:$0xff] %v1457_v55  ;;  %v1459_v56 = vld [vmem:[%s10640_s29 + $0x780] sm:$0xff]  ;;  %v1461_v57 = vld [vmem:[%s10640_s29 + $0x790] sm:$0xff] }
  0x51   : > { %v1463_v58 = vld [vmem:[%s10640_s29 + $0x7a0] sm:$0xff]  ;;  %1460 = vst [vmem:[%s10645_s30 + $0x3c0] sm:$0xff] %v1459_v56  ;;  %1462 = vst [vmem:[%s10645_s30 + $0x3c8] sm:$0xff] %v1461_v57  ;;  %v1465_v59 = vld [vmem:[%s10640_s29 + $0x7b0] sm:$0xff] }
  0x52   : > { %1464 = vst [vmem:[%s10645_s30 + $0x3d0] sm:$0xff] %v1463_v58  ;;  %v1467_v60 = vld [vmem:[%s10640_s29 + $0x7c0] sm:$0xff]  ;;  %v1469_v61 = vld [vmem:[%s10640_s29 + $0x7d0] sm:$0xff]  ;;  %1466 = vst [vmem:[%s10645_s30 + $0x3d8] sm:$0xff] %v1465_v59 }
  0x53   : > { %1468 = vst [vmem:[%s10645_s30 + $0x3e0] sm:$0xff] %v1467_v60  ;;  %1470 = vst [vmem:[%s10645_s30 + $0x3e8] sm:$0xff] %v1469_v61  ;;  %v1471_v62 = vld [vmem:[%s10640_s29 + $0x7e0] sm:$0xff]  ;;  %v1473_v63 = vld [vmem:[%s10640_s29 + $0x7f0] sm:$0xff] }
  0x54   : > { %v1475_v0 = vld [vmem:[%s10640_s29 + $0x800] sm:$0xff]  ;;  %1472 = vst [vmem:[%s10645_s30 + $0x3f0] sm:$0xff] %v1471_v62  ;;  %1474 = vst [vmem:[%s10645_s30 + $0x3f8] sm:$0xff] %v1473_v63  ;;  %v1477_v1 = vld [vmem:[%s10640_s29 + $0x810] sm:$0xff] }
  0x55   : > { %1476 = vst [vmem:[%s10645_s30 + $0x400] sm:$0xff] %v1475_v0  ;;  %v1479_v2 = vld [vmem:[%s10640_s29 + $0x820] sm:$0xff]  ;;  %v1481_v3 = vld [vmem:[%s10640_s29 + $0x830] sm:$0xff]  ;;  %1478 = vst [vmem:[%s10645_s30 + $0x408] sm:$0xff] %v1477_v1 }
  0x56   : > { %1480 = vst [vmem:[%s10645_s30 + $0x410] sm:$0xff] %v1479_v2  ;;  %1482 = vst [vmem:[%s10645_s30 + $0x418] sm:$0xff] %v1481_v3  ;;  %v1483_v4 = vld [vmem:[%s10640_s29 + $0x840] sm:$0xff]  ;;  %v1485_v5 = vld [vmem:[%s10640_s29 + $0x850] sm:$0xff] }
  0x57   : > { %v1487_v6 = vld [vmem:[%s10640_s29 + $0x860] sm:$0xff]  ;;  %1484 = vst [vmem:[%s10645_s30 + $0x420] sm:$0xff] %v1483_v4  ;;  %1486 = vst [vmem:[%s10645_s30 + $0x428] sm:$0xff] %v1485_v5  ;;  %v1489_v7 = vld [vmem:[%s10640_s29 + $0x870] sm:$0xff] }
  0x58   : > { %1488 = vst [vmem:[%s10645_s30 + $0x430] sm:$0xff] %v1487_v6  ;;  %v1491_v8 = vld [vmem:[%s10640_s29 + $0x880] sm:$0xff]  ;;  %v1493_v9 = vld [vmem:[%s10640_s29 + $0x890] sm:$0xff]  ;;  %1490 = vst [vmem:[%s10645_s30 + $0x438] sm:$0xff] %v1489_v7 }
  0x59   : > { %1492 = vst [vmem:[%s10645_s30 + $0x440] sm:$0xff] %v1491_v8  ;;  %1494 = vst [vmem:[%s10645_s30 + $0x448] sm:$0xff] %v1493_v9  ;;  %v1495_v10 = vld [vmem:[%s10640_s29 + $0x8a0] sm:$0xff]  ;;  %v1497_v11 = vld [vmem:[%s10640_s29 + $0x8b0] sm:$0xff] }
  0x5a   : > { %v1499_v12 = vld [vmem:[%s10640_s29 + $0x8c0] sm:$0xff]  ;;  %1496 = vst [vmem:[%s10645_s30 + $0x450] sm:$0xff] %v1495_v10  ;;  %1498 = vst [vmem:[%s10645_s30 + $0x458] sm:$0xff] %v1497_v11  ;;  %v1501_v13 = vld [vmem:[%s10640_s29 + $0x8d0] sm:$0xff] }
  0x5b   : > { %1500 = vst [vmem:[%s10645_s30 + $0x460] sm:$0xff] %v1499_v12  ;;  %v1503_v14 = vld [vmem:[%s10640_s29 + $0x8e0] sm:$0xff]  ;;  %v1505_v15 = vld [vmem:[%s10640_s29 + $0x8f0] sm:$0xff]  ;;  %1502 = vst [vmem:[%s10645_s30 + $0x468] sm:$0xff] %v1501_v13 }
  0x5c   : > { %1504 = vst [vmem:[%s10645_s30 + $0x470] sm:$0xff] %v1503_v14  ;;  %1506 = vst [vmem:[%s10645_s30 + $0x478] sm:$0xff] %v1505_v15  ;;  %v1507_v16 = vld [vmem:[%s10640_s29 + $0x900] sm:$0xff]  ;;  %v1509_v17 = vld [vmem:[%s10640_s29 + $0x910] sm:$0xff] }
  0x5d   : > { %v1511_v18 = vld [vmem:[%s10640_s29 + $0x920] sm:$0xff]  ;;  %1508 = vst [vmem:[%s10645_s30 + $0x480] sm:$0xff] %v1507_v16  ;;  %1510 = vst [vmem:[%s10645_s30 + $0x488] sm:$0xff] %v1509_v17  ;;  %v1513_v19 = vld [vmem:[%s10640_s29 + $0x930] sm:$0xff] }
  0x5e   : > { %1512 = vst [vmem:[%s10645_s30 + $0x490] sm:$0xff] %v1511_v18  ;;  %v1515_v20 = vld [vmem:[%s10640_s29 + $0x940] sm:$0xff]  ;;  %v1517_v21 = vld [vmem:[%s10640_s29 + $0x950] sm:$0xff]  ;;  %1514 = vst [vmem:[%s10645_s30 + $0x498] sm:$0xff] %v1513_v19 }
  0x5f   : > { %1516 = vst [vmem:[%s10645_s30 + $0x4a0] sm:$0xff] %v1515_v20  ;;  %1518 = vst [vmem:[%s10645_s30 + $0x4a8] sm:$0xff] %v1517_v21  ;;  %v1519_v22 = vld [vmem:[%s10640_s29 + $0x960] sm:$0xff]  ;;  %v1521_v23 = vld [vmem:[%s10640_s29 + $0x970] sm:$0xff] }
  0x60   : > { %v1523_v24 = vld [vmem:[%s10640_s29 + $0x980] sm:$0xff]  ;;  %1520 = vst [vmem:[%s10645_s30 + $0x4b0] sm:$0xff] %v1519_v22  ;;  %1522 = vst [vmem:[%s10645_s30 + $0x4b8] sm:$0xff] %v1521_v23  ;;  %v1525_v25 = vld [vmem:[%s10640_s29 + $0x990] sm:$0xff] }
  0x61   : > { %1524 = vst [vmem:[%s10645_s30 + $0x4c0] sm:$0xff] %v1523_v24  ;;  %v1527_v26 = vld [vmem:[%s10640_s29 + $0x9a0] sm:$0xff]  ;;  %v1529_v27 = vld [vmem:[%s10640_s29 + $0x9b0] sm:$0xff]  ;;  %1526 = vst [vmem:[%s10645_s30 + $0x4c8] sm:$0xff] %v1525_v25 }
  0x62   : > { %1528 = vst [vmem:[%s10645_s30 + $0x4d0] sm:$0xff] %v1527_v26  ;;  %1530 = vst [vmem:[%s10645_s30 + $0x4d8] sm:$0xff] %v1529_v27  ;;  %v1531_v28 = vld [vmem:[%s10640_s29 + $0x9c0] sm:$0xff]  ;;  %v1533_v29 = vld [vmem:[%s10640_s29 + $0x9d0] sm:$0xff] }
  0x63   : > { %v1535_v30 = vld [vmem:[%s10640_s29 + $0x9e0] sm:$0xff]  ;;  %1532 = vst [vmem:[%s10645_s30 + $0x4e0] sm:$0xff] %v1531_v28  ;;  %1534 = vst [vmem:[%s10645_s30 + $0x4e8] sm:$0xff] %v1533_v29  ;;  %v1537_v31 = vld [vmem:[%s10640_s29 + $0x9f0] sm:$0xff] }
  0x64   : > { %1536 = vst [vmem:[%s10645_s30 + $0x4f0] sm:$0xff] %v1535_v30  ;;  %v1539_v32 = vld [vmem:[%s10640_s29 + $0xa00] sm:$0xff]  ;;  %v1541_v33 = vld [vmem:[%s10640_s29 + $0xa10] sm:$0xff]  ;;  %1538 = vst [vmem:[%s10645_s30 + $0x4f8] sm:$0xff] %v1537_v31 }
  0x65   : > { %1540 = vst [vmem:[%s10645_s30 + $0x500] sm:$0xff] %v1539_v32  ;;  %1542 = vst [vmem:[%s10645_s30 + $0x508] sm:$0xff] %v1541_v33  ;;  %v1543_v34 = vld [vmem:[%s10640_s29 + $0xa20] sm:$0xff]  ;;  %v1545_v35 = vld [vmem:[%s10640_s29 + $0xa30] sm:$0xff] }
  0x66   : > { %v1547_v36 = vld [vmem:[%s10640_s29 + $0xa40] sm:$0xff]  ;;  %1544 = vst [vmem:[%s10645_s30 + $0x510] sm:$0xff] %v1543_v34  ;;  %1546 = vst [vmem:[%s10645_s30 + $0x518] sm:$0xff] %v1545_v35  ;;  %v1549_v37 = vld [vmem:[%s10640_s29 + $0xa50] sm:$0xff] }
  0x67   : > { %1548 = vst [vmem:[%s10645_s30 + $0x520] sm:$0xff] %v1547_v36  ;;  %v1551_v38 = vld [vmem:[%s10640_s29 + $0xa60] sm:$0xff]  ;;  %v1553_v39 = vld [vmem:[%s10640_s29 + $0xa70] sm:$0xff]  ;;  %1550 = vst [vmem:[%s10645_s30 + $0x528] sm:$0xff] %v1549_v37 }
  0x68   : > { %1552 = vst [vmem:[%s10645_s30 + $0x530] sm:$0xff] %v1551_v38  ;;  %1554 = vst [vmem:[%s10645_s30 + $0x538] sm:$0xff] %v1553_v39  ;;  %v1555_v40 = vld [vmem:[%s10640_s29 + $0xa80] sm:$0xff]  ;;  %v1557_v41 = vld [vmem:[%s10640_s29 + $0xa90] sm:$0xff] }
  0x69   : > { %v1559_v42 = vld [vmem:[%s10640_s29 + $0xaa0] sm:$0xff]  ;;  %1556 = vst [vmem:[%s10645_s30 + $0x540] sm:$0xff] %v1555_v40  ;;  %1558 = vst [vmem:[%s10645_s30 + $0x548] sm:$0xff] %v1557_v41  ;;  %v1561_v43 = vld [vmem:[%s10640_s29 + $0xab0] sm:$0xff] }
  0x6a   : > { %1560 = vst [vmem:[%s10645_s30 + $0x550] sm:$0xff] %v1559_v42  ;;  %v1563_v44 = vld [vmem:[%s10640_s29 + $0xac0] sm:$0xff]  ;;  %v1565_v45 = vld [vmem:[%s10640_s29 + $0xad0] sm:$0xff]  ;;  %1562 = vst [vmem:[%s10645_s30 + $0x558] sm:$0xff] %v1561_v43 }
  0x6b   : > { %1564 = vst [vmem:[%s10645_s30 + $0x560] sm:$0xff] %v1563_v44  ;;  %1566 = vst [vmem:[%s10645_s30 + $0x568] sm:$0xff] %v1565_v45  ;;  %v1567_v46 = vld [vmem:[%s10640_s29 + $0xae0] sm:$0xff]  ;;  %v1569_v47 = vld [vmem:[%s10640_s29 + $0xaf0] sm:$0xff] }
  0x6c   : > { %v1571_v48 = vld [vmem:[%s10640_s29 + $0xb00] sm:$0xff]  ;;  %1568 = vst [vmem:[%s10645_s30 + $0x570] sm:$0xff] %v1567_v46  ;;  %1570 = vst [vmem:[%s10645_s30 + $0x578] sm:$0xff] %v1569_v47  ;;  %v1573_v49 = vld [vmem:[%s10640_s29 + $0xb10] sm:$0xff] }
  0x6d   : > { %1572 = vst [vmem:[%s10645_s30 + $0x580] sm:$0xff] %v1571_v48  ;;  %v1575_v50 = vld [vmem:[%s10640_s29 + $0xb20] sm:$0xff]  ;;  %v1577_v51 = vld [vmem:[%s10640_s29 + $0xb30] sm:$0xff]  ;;  %1574 = vst [vmem:[%s10645_s30 + $0x588] sm:$0xff] %v1573_v49 }
  0x6e   : > { %1576 = vst [vmem:[%s10645_s30 + $0x590] sm:$0xff] %v1575_v50  ;;  %1578 = vst [vmem:[%s10645_s30 + $0x598] sm:$0xff] %v1577_v51  ;;  %v1579_v52 = vld [vmem:[%s10640_s29 + $0xb40] sm:$0xff]  ;;  %v1581_v53 = vld [vmem:[%s10640_s29 + $0xb50] sm:$0xff] }
  0x6f   : > { %v1583_v54 = vld [vmem:[%s10640_s29 + $0xb60] sm:$0xff]  ;;  %1580 = vst [vmem:[%s10645_s30 + $0x5a0] sm:$0xff] %v1579_v52  ;;  %1582 = vst [vmem:[%s10645_s30 + $0x5a8] sm:$0xff] %v1581_v53  ;;  %v1585_v55 = vld [vmem:[%s10640_s29 + $0xb70] sm:$0xff] }
  0x70   : > { %1584 = vst [vmem:[%s10645_s30 + $0x5b0] sm:$0xff] %v1583_v54  ;;  %v1587_v56 = vld [vmem:[%s10640_s29 + $0xb80] sm:$0xff]  ;;  %v1589_v57 = vld [vmem:[%s10640_s29 + $0xb90] sm:$0xff]  ;;  %1586 = vst [vmem:[%s10645_s30 + $0x5b8] sm:$0xff] %v1585_v55 }
  0x71   : > { %1588 = vst [vmem:[%s10645_s30 + $0x5c0] sm:$0xff] %v1587_v56  ;;  %1590 = vst [vmem:[%s10645_s30 + $0x5c8] sm:$0xff] %v1589_v57  ;;  %v1591_v58 = vld [vmem:[%s10640_s29 + $0xba0] sm:$0xff]  ;;  %v1593_v59 = vld [vmem:[%s10640_s29 + $0xbb0] sm:$0xff] }
  0x72   : > { %v1595_v60 = vld [vmem:[%s10640_s29 + $0xbc0] sm:$0xff]  ;;  %1592 = vst [vmem:[%s10645_s30 + $0x5d0] sm:$0xff] %v1591_v58  ;;  %1594 = vst [vmem:[%s10645_s30 + $0x5d8] sm:$0xff] %v1593_v59  ;;  %v1597_v61 = vld [vmem:[%s10640_s29 + $0xbd0] sm:$0xff] }
  0x73   : > { %1596 = vst [vmem:[%s10645_s30 + $0x5e0] sm:$0xff] %v1595_v60  ;;  %v1599_v62 = vld [vmem:[%s10640_s29 + $0xbe0] sm:$0xff]  ;;  %v1601_v63 = vld [vmem:[%s10640_s29 + $0xbf0] sm:$0xff]  ;;  %1598 = vst [vmem:[%s10645_s30 + $0x5e8] sm:$0xff] %v1597_v61 }
  0x74   : > { %1600 = vst [vmem:[%s10645_s30 + $0x5f0] sm:$0xff] %v1599_v62  ;;  %1602 = vst [vmem:[%s10645_s30 + $0x5f8] sm:$0xff] %v1601_v63  ;;  %v1603_v0 = vld [vmem:[%s10640_s29 + $0xc00] sm:$0xff]  ;;  %v1605_v1 = vld [vmem:[%s10640_s29 + $0xc10] sm:$0xff] }
  0x75   : > { %v1607_v2 = vld [vmem:[%s10640_s29 + $0xc20] sm:$0xff]  ;;  %1604 = vst [vmem:[%s10645_s30 + $0x600] sm:$0xff] %v1603_v0  ;;  %1606 = vst [vmem:[%s10645_s30 + $0x608] sm:$0xff] %v1605_v1  ;;  %v1609_v3 = vld [vmem:[%s10640_s29 + $0xc30] sm:$0xff] }
  0x76   : > { %1608 = vst [vmem:[%s10645_s30 + $0x610] sm:$0xff] %v1607_v2  ;;  %v1611_v4 = vld [vmem:[%s10640_s29 + $0xc40] sm:$0xff]  ;;  %v1613_v5 = vld [vmem:[%s10640_s29 + $0xc50] sm:$0xff]  ;;  %1610 = vst [vmem:[%s10645_s30 + $0x618] sm:$0xff] %v1609_v3 }
  0x77   : > { %1612 = vst [vmem:[%s10645_s30 + $0x620] sm:$0xff] %v1611_v4  ;;  %1614 = vst [vmem:[%s10645_s30 + $0x628] sm:$0xff] %v1613_v5  ;;  %v1615_v6 = vld [vmem:[%s10640_s29 + $0xc60] sm:$0xff]  ;;  %v1617_v7 = vld [vmem:[%s10640_s29 + $0xc70] sm:$0xff] }
  0x78   : > { %v1619_v8 = vld [vmem:[%s10640_s29 + $0xc80] sm:$0xff]  ;;  %1616 = vst [vmem:[%s10645_s30 + $0x630] sm:$0xff] %v1615_v6  ;;  %1618 = vst [vmem:[%s10645_s30 + $0x638] sm:$0xff] %v1617_v7  ;;  %v1621_v9 = vld [vmem:[%s10640_s29 + $0xc90] sm:$0xff] }
  0x79   : > { %1620 = vst [vmem:[%s10645_s30 + $0x640] sm:$0xff] %v1619_v8  ;;  %v1623_v10 = vld [vmem:[%s10640_s29 + $0xca0] sm:$0xff]  ;;  %v1625_v11 = vld [vmem:[%s10640_s29 + $0xcb0] sm:$0xff]  ;;  %1622 = vst [vmem:[%s10645_s30 + $0x648] sm:$0xff] %v1621_v9 }
  0x7a   : > { %1624 = vst [vmem:[%s10645_s30 + $0x650] sm:$0xff] %v1623_v10  ;;  %1626 = vst [vmem:[%s10645_s30 + $0x658] sm:$0xff] %v1625_v11  ;;  %v1627_v12 = vld [vmem:[%s10640_s29 + $0xcc0] sm:$0xff]  ;;  %v1629_v13 = vld [vmem:[%s10640_s29 + $0xcd0] sm:$0xff] }
  0x7b   : > { %v1631_v14 = vld [vmem:[%s10640_s29 + $0xce0] sm:$0xff]  ;;  %1628 = vst [vmem:[%s10645_s30 + $0x660] sm:$0xff] %v1627_v12  ;;  %1630 = vst [vmem:[%s10645_s30 + $0x668] sm:$0xff] %v1629_v13  ;;  %v1633_v15 = vld [vmem:[%s10640_s29 + $0xcf0] sm:$0xff] }
  0x7c   : > { %1632 = vst [vmem:[%s10645_s30 + $0x670] sm:$0xff] %v1631_v14  ;;  %v1635_v16 = vld [vmem:[%s10640_s29 + $0xd00] sm:$0xff]  ;;  %v1637_v17 = vld [vmem:[%s10640_s29 + $0xd10] sm:$0xff]  ;;  %1634 = vst [vmem:[%s10645_s30 + $0x678] sm:$0xff] %v1633_v15 }
  0x7d   : > { %1636 = vst [vmem:[%s10645_s30 + $0x680] sm:$0xff] %v1635_v16  ;;  %1638 = vst [vmem:[%s10645_s30 + $0x688] sm:$0xff] %v1637_v17  ;;  %v1639_v18 = vld [vmem:[%s10640_s29 + $0xd20] sm:$0xff]  ;;  %v1641_v19 = vld [vmem:[%s10640_s29 + $0xd30] sm:$0xff] }
  0x7e   : > { %v1643_v20 = vld [vmem:[%s10640_s29 + $0xd40] sm:$0xff]  ;;  %1640 = vst [vmem:[%s10645_s30 + $0x690] sm:$0xff] %v1639_v18  ;;  %1642 = vst [vmem:[%s10645_s30 + $0x698] sm:$0xff] %v1641_v19  ;;  %v1645_v21 = vld [vmem:[%s10640_s29 + $0xd50] sm:$0xff] }
  0x7f   : > { %1644 = vst [vmem:[%s10645_s30 + $0x6a0] sm:$0xff] %v1643_v20  ;;  %v1647_v22 = vld [vmem:[%s10640_s29 + $0xd60] sm:$0xff]  ;;  %v1649_v23 = vld [vmem:[%s10640_s29 + $0xd70] sm:$0xff]  ;;  %1646 = vst [vmem:[%s10645_s30 + $0x6a8] sm:$0xff] %v1645_v21 }
  0x80   : > { %1648 = vst [vmem:[%s10645_s30 + $0x6b0] sm:$0xff] %v1647_v22  ;;  %1650 = vst [vmem:[%s10645_s30 + $0x6b8] sm:$0xff] %v1649_v23  ;;  %v1651_v24 = vld [vmem:[%s10640_s29 + $0xd80] sm:$0xff]  ;;  %v1653_v25 = vld [vmem:[%s10640_s29 + $0xd90] sm:$0xff] }
  0x81   : > { %v1655_v26 = vld [vmem:[%s10640_s29 + $0xda0] sm:$0xff]  ;;  %1652 = vst [vmem:[%s10645_s30 + $0x6c0] sm:$0xff] %v1651_v24  ;;  %1654 = vst [vmem:[%s10645_s30 + $0x6c8] sm:$0xff] %v1653_v25  ;;  %v1657_v27 = vld [vmem:[%s10640_s29 + $0xdb0] sm:$0xff] }
  0x82   : > { %1656 = vst [vmem:[%s10645_s30 + $0x6d0] sm:$0xff] %v1655_v26  ;;  %v1659_v28 = vld [vmem:[%s10640_s29 + $0xdc0] sm:$0xff]  ;;  %v1661_v29 = vld [vmem:[%s10640_s29 + $0xdd0] sm:$0xff]  ;;  %1658 = vst [vmem:[%s10645_s30 + $0x6d8] sm:$0xff] %v1657_v27 }
  0x83   : > { %1660 = vst [vmem:[%s10645_s30 + $0x6e0] sm:$0xff] %v1659_v28  ;;  %1662 = vst [vmem:[%s10645_s30 + $0x6e8] sm:$0xff] %v1661_v29  ;;  %v1663_v30 = vld [vmem:[%s10640_s29 + $0xde0] sm:$0xff]  ;;  %v1665_v31 = vld [vmem:[%s10640_s29 + $0xdf0] sm:$0xff] }
  0x84   : > { %v1667_v32 = vld [vmem:[%s10640_s29 + $0xe00] sm:$0xff]  ;;  %1664 = vst [vmem:[%s10645_s30 + $0x6f0] sm:$0xff] %v1663_v30  ;;  %1666 = vst [vmem:[%s10645_s30 + $0x6f8] sm:$0xff] %v1665_v31  ;;  %v1669_v33 = vld [vmem:[%s10640_s29 + $0xe10] sm:$0xff] }
  0x85   : > { %1668 = vst [vmem:[%s10645_s30 + $0x700] sm:$0xff] %v1667_v32  ;;  %v1671_v34 = vld [vmem:[%s10640_s29 + $0xe20] sm:$0xff]  ;;  %v1673_v35 = vld [vmem:[%s10640_s29 + $0xe30] sm:$0xff]  ;;  %1670 = vst [vmem:[%s10645_s30 + $0x708] sm:$0xff] %v1669_v33 }
  0x86   : > { %1672 = vst [vmem:[%s10645_s30 + $0x710] sm:$0xff] %v1671_v34  ;;  %1674 = vst [vmem:[%s10645_s30 + $0x718] sm:$0xff] %v1673_v35  ;;  %v1675_v36 = vld [vmem:[%s10640_s29 + $0xe40] sm:$0xff]  ;;  %v1677_v37 = vld [vmem:[%s10640_s29 + $0xe50] sm:$0xff] }
  0x87   : > { %v1679_v38 = vld [vmem:[%s10640_s29 + $0xe60] sm:$0xff]  ;;  %1676 = vst [vmem:[%s10645_s30 + $0x720] sm:$0xff] %v1675_v36  ;;  %1678 = vst [vmem:[%s10645_s30 + $0x728] sm:$0xff] %v1677_v37  ;;  %v1681_v39 = vld [vmem:[%s10640_s29 + $0xe70] sm:$0xff] }
  0x88   : > { %1680 = vst [vmem:[%s10645_s30 + $0x730] sm:$0xff] %v1679_v38  ;;  %v1683_v40 = vld [vmem:[%s10640_s29 + $0xe80] sm:$0xff]  ;;  %v1685_v41 = vld [vmem:[%s10640_s29 + $0xe90] sm:$0xff]  ;;  %1682 = vst [vmem:[%s10645_s30 + $0x738] sm:$0xff] %v1681_v39 }
  0x89   : > { %1684 = vst [vmem:[%s10645_s30 + $0x740] sm:$0xff] %v1683_v40  ;;  %1686 = vst [vmem:[%s10645_s30 + $0x748] sm:$0xff] %v1685_v41  ;;  %v1687_v42 = vld [vmem:[%s10640_s29 + $0xea0] sm:$0xff]  ;;  %v1689_v43 = vld [vmem:[%s10640_s29 + $0xeb0] sm:$0xff] }
  0x8a   : > { %v1691_v44 = vld [vmem:[%s10640_s29 + $0xec0] sm:$0xff]  ;;  %1688 = vst [vmem:[%s10645_s30 + $0x750] sm:$0xff] %v1687_v42  ;;  %1690 = vst [vmem:[%s10645_s30 + $0x758] sm:$0xff] %v1689_v43  ;;  %v1693_v45 = vld [vmem:[%s10640_s29 + $0xed0] sm:$0xff] }
  0x8b   : > { %1692 = vst [vmem:[%s10645_s30 + $0x760] sm:$0xff] %v1691_v44  ;;  %v1695_v46 = vld [vmem:[%s10640_s29 + $0xee0] sm:$0xff]  ;;  %v1697_v47 = vld [vmem:[%s10640_s29 + $0xef0] sm:$0xff]  ;;  %1694 = vst [vmem:[%s10645_s30 + $0x768] sm:$0xff] %v1693_v45 }
  0x8c   : > { %1696 = vst [vmem:[%s10645_s30 + $0x770] sm:$0xff] %v1695_v46  ;;  %1698 = vst [vmem:[%s10645_s30 + $0x778] sm:$0xff] %v1697_v47  ;;  %v1699_v48 = vld [vmem:[%s10640_s29 + $0xf00] sm:$0xff]  ;;  %v1701_v49 = vld [vmem:[%s10640_s29 + $0xf10] sm:$0xff] }
  0x8d   : > { %v1703_v50 = vld [vmem:[%s10640_s29 + $0xf20] sm:$0xff]  ;;  %1700 = vst [vmem:[%s10645_s30 + $0x780] sm:$0xff] %v1699_v48  ;;  %1702 = vst [vmem:[%s10645_s30 + $0x788] sm:$0xff] %v1701_v49  ;;  %v1705_v51 = vld [vmem:[%s10640_s29 + $0xf30] sm:$0xff] }
  0x8e   : > { %1704 = vst [vmem:[%s10645_s30 + $0x790] sm:$0xff] %v1703_v50  ;;  %v1707_v52 = vld [vmem:[%s10640_s29 + $0xf40] sm:$0xff]  ;;  %v1709_v53 = vld [vmem:[%s10640_s29 + $0xf50] sm:$0xff]  ;;  %1706 = vst [vmem:[%s10645_s30 + $0x798] sm:$0xff] %v1705_v51 }
  0x8f   : > { %1708 = vst [vmem:[%s10645_s30 + $0x7a0] sm:$0xff] %v1707_v52  ;;  %1710 = vst [vmem:[%s10645_s30 + $0x7a8] sm:$0xff] %v1709_v53  ;;  %v1711_v54 = vld [vmem:[%s10640_s29 + $0xf60] sm:$0xff]  ;;  %v1713_v55 = vld [vmem:[%s10640_s29 + $0xf70] sm:$0xff] }
  0x90   : > { %v1715_v56 = vld [vmem:[%s10640_s29 + $0xf80] sm:$0xff]  ;;  %1712 = vst [vmem:[%s10645_s30 + $0x7b0] sm:$0xff] %v1711_v54  ;;  %1714 = vst [vmem:[%s10645_s30 + $0x7b8] sm:$0xff] %v1713_v55  ;;  %v1717_v57 = vld [vmem:[%s10640_s29 + $0xf90] sm:$0xff] }
  0x91   : > { %1716 = vst [vmem:[%s10645_s30 + $0x7c0] sm:$0xff] %v1715_v56  ;;  %v1719_v58 = vld [vmem:[%s10640_s29 + $0xfa0] sm:$0xff]  ;;  %v1721_v59 = vld [vmem:[%s10640_s29 + $0xfb0] sm:$0xff]  ;;  %1718 = vst [vmem:[%s10645_s30 + $0x7c8] sm:$0xff] %v1717_v57 }
  0x92   : > { %1720 = vst [vmem:[%s10645_s30 + $0x7d0] sm:$0xff] %v1719_v58  ;;  %1722 = vst [vmem:[%s10645_s30 + $0x7d8] sm:$0xff] %v1721_v59  ;;  %v1723_v60 = vld [vmem:[%s10640_s29 + $0xfc0] sm:$0xff]  ;;  %v1725_v61 = vld [vmem:[%s10640_s29 + $0xfd0] sm:$0xff] }
  0x93   : > { %v1727_v62 = vld [vmem:[%s10640_s29 + $0xfe0] sm:$0xff]  ;;  %1724 = vst [vmem:[%s10645_s30 + $0x7e0] sm:$0xff] %v1723_v60  ;;  %1726 = vst [vmem:[%s10645_s30 + $0x7e8] sm:$0xff] %v1725_v61  ;;  %v1729_v63 = vld [vmem:[%s10640_s29 + $0xff0] sm:$0xff] }
  0x94   : > { %1728 = vst [vmem:[%s10645_s30 + $0x7f0] sm:$0xff] %v1727_v62  ;;  %v1731_v0 = vld [vmem:[%s10640_s29 + $0x1000] sm:$0xff]  ;;  %v1733_v1 = vld [vmem:[%s10640_s29 + $0x1010] sm:$0xff]  ;;  %1730 = vst [vmem:[%s10645_s30 + $0x7f8] sm:$0xff] %v1729_v63 }
  0x95   : > { %1732 = vst [vmem:[%s10645_s30 + $0x800] sm:$0xff] %v1731_v0  ;;  %1734 = vst [vmem:[%s10645_s30 + $0x808] sm:$0xff] %v1733_v1  ;;  %v1735_v2 = vld [vmem:[%s10640_s29 + $0x1020] sm:$0xff]  ;;  %v1737_v3 = vld [vmem:[%s10640_s29 + $0x1030] sm:$0xff] }
  0x96   : > { %v1739_v4 = vld [vmem:[%s10640_s29 + $0x1040] sm:$0xff]  ;;  %1736 = vst [vmem:[%s10645_s30 + $0x810] sm:$0xff] %v1735_v2  ;;  %1738 = vst [vmem:[%s10645_s30 + $0x818] sm:$0xff] %v1737_v3  ;;  %v1741_v5 = vld [vmem:[%s10640_s29 + $0x1050] sm:$0xff] }
  0x97   : > { %1740 = vst [vmem:[%s10645_s30 + $0x820] sm:$0xff] %v1739_v4  ;;  %v1743_v6 = vld [vmem:[%s10640_s29 + $0x1060] sm:$0xff]  ;;  %v1745_v7 = vld [vmem:[%s10640_s29 + $0x1070] sm:$0xff]  ;;  %1742 = vst [vmem:[%s10645_s30 + $0x828] sm:$0xff] %v1741_v5 }
  0x98   : > { %1744 = vst [vmem:[%s10645_s30 + $0x830] sm:$0xff] %v1743_v6  ;;  %1746 = vst [vmem:[%s10645_s30 + $0x838] sm:$0xff] %v1745_v7  ;;  %v1747_v8 = vld [vmem:[%s10640_s29 + $0x1080] sm:$0xff]  ;;  %v1749_v9 = vld [vmem:[%s10640_s29 + $0x1090] sm:$0xff] }
  0x99   : > { %v1751_v10 = vld [vmem:[%s10640_s29 + $0x10a0] sm:$0xff]  ;;  %1748 = vst [vmem:[%s10645_s30 + $0x840] sm:$0xff] %v1747_v8  ;;  %1750 = vst [vmem:[%s10645_s30 + $0x848] sm:$0xff] %v1749_v9  ;;  %v1753_v11 = vld [vmem:[%s10640_s29 + $0x10b0] sm:$0xff] }
  0x9a   : > { %1752 = vst [vmem:[%s10645_s30 + $0x850] sm:$0xff] %v1751_v10  ;;  %v1755_v12 = vld [vmem:[%s10640_s29 + $0x10c0] sm:$0xff]  ;;  %v1757_v13 = vld [vmem:[%s10640_s29 + $0x10d0] sm:$0xff]  ;;  %1754 = vst [vmem:[%s10645_s30 + $0x858] sm:$0xff] %v1753_v11 }
  0x9b   : > { %1756 = vst [vmem:[%s10645_s30 + $0x860] sm:$0xff] %v1755_v12  ;;  %1758 = vst [vmem:[%s10645_s30 + $0x868] sm:$0xff] %v1757_v13  ;;  %v1759_v14 = vld [vmem:[%s10640_s29 + $0x10e0] sm:$0xff]  ;;  %v1761_v15 = vld [vmem:[%s10640_s29 + $0x10f0] sm:$0xff] }
  0x9c   : > { %v1763_v16 = vld [vmem:[%s10640_s29 + $0x1100] sm:$0xff]  ;;  %1760 = vst [vmem:[%s10645_s30 + $0x870] sm:$0xff] %v1759_v14  ;;  %1762 = vst [vmem:[%s10645_s30 + $0x878] sm:$0xff] %v1761_v15  ;;  %v1765_v17 = vld [vmem:[%s10640_s29 + $0x1110] sm:$0xff] }
  0x9d   : > { %1764 = vst [vmem:[%s10645_s30 + $0x880] sm:$0xff] %v1763_v16  ;;  %v1767_v18 = vld [vmem:[%s10640_s29 + $0x1120] sm:$0xff]  ;;  %v1769_v19 = vld [vmem:[%s10640_s29 + $0x1130] sm:$0xff]  ;;  %1766 = vst [vmem:[%s10645_s30 + $0x888] sm:$0xff] %v1765_v17 }
  0x9e   : > { %1768 = vst [vmem:[%s10645_s30 + $0x890] sm:$0xff] %v1767_v18  ;;  %1770 = vst [vmem:[%s10645_s30 + $0x898] sm:$0xff] %v1769_v19  ;;  %v1771_v20 = vld [vmem:[%s10640_s29 + $0x1140] sm:$0xff]  ;;  %v1773_v21 = vld [vmem:[%s10640_s29 + $0x1150] sm:$0xff] }
  0x9f   : > { %v1775_v22 = vld [vmem:[%s10640_s29 + $0x1160] sm:$0xff]  ;;  %1772 = vst [vmem:[%s10645_s30 + $0x8a0] sm:$0xff] %v1771_v20  ;;  %1774 = vst [vmem:[%s10645_s30 + $0x8a8] sm:$0xff] %v1773_v21  ;;  %v1777_v23 = vld [vmem:[%s10640_s29 + $0x1170] sm:$0xff] }
  0xa0   : > { %1776 = vst [vmem:[%s10645_s30 + $0x8b0] sm:$0xff] %v1775_v22  ;;  %v1779_v24 = vld [vmem:[%s10640_s29 + $0x1180] sm:$0xff]  ;;  %v1781_v25 = vld [vmem:[%s10640_s29 + $0x1190] sm:$0xff]  ;;  %1778 = vst [vmem:[%s10645_s30 + $0x8b8] sm:$0xff] %v1777_v23 }
  0xa1   : > { %1780 = vst [vmem:[%s10645_s30 + $0x8c0] sm:$0xff] %v1779_v24  ;;  %1782 = vst [vmem:[%s10645_s30 + $0x8c8] sm:$0xff] %v1781_v25  ;;  %v1783_v26 = vld [vmem:[%s10640_s29 + $0x11a0] sm:$0xff]  ;;  %v1785_v27 = vld [vmem:[%s10640_s29 + $0x11b0] sm:$0xff] }
  0xa2   : > { %v1787_v28 = vld [vmem:[%s10640_s29 + $0x11c0] sm:$0xff]  ;;  %1784 = vst [vmem:[%s10645_s30 + $0x8d0] sm:$0xff] %v1783_v26  ;;  %1786 = vst [vmem:[%s10645_s30 + $0x8d8] sm:$0xff] %v1785_v27  ;;  %v1789_v29 = vld [vmem:[%s10640_s29 + $0x11d0] sm:$0xff] }
  0xa3   : > { %1788 = vst [vmem:[%s10645_s30 + $0x8e0] sm:$0xff] %v1787_v28  ;;  %v1791_v30 = vld [vmem:[%s10640_s29 + $0x11e0] sm:$0xff]  ;;  %v1793_v31 = vld [vmem:[%s10640_s29 + $0x11f0] sm:$0xff]  ;;  %1790 = vst [vmem:[%s10645_s30 + $0x8e8] sm:$0xff] %v1789_v29 }
  0xa4   : > { %1792 = vst [vmem:[%s10645_s30 + $0x8f0] sm:$0xff] %v1791_v30  ;;  %1794 = vst [vmem:[%s10645_s30 + $0x8f8] sm:$0xff] %v1793_v31  ;;  %v1795_v32 = vld [vmem:[%s10640_s29 + $0x1200] sm:$0xff]  ;;  %v1797_v33 = vld [vmem:[%s10640_s29 + $0x1210] sm:$0xff] }
  0xa5   : > { %v1799_v34 = vld [vmem:[%s10640_s29 + $0x1220] sm:$0xff]  ;;  %1796 = vst [vmem:[%s10645_s30 + $0x900] sm:$0xff] %v1795_v32  ;;  %1798 = vst [vmem:[%s10645_s30 + $0x908] sm:$0xff] %v1797_v33  ;;  %v1801_v35 = vld [vmem:[%s10640_s29 + $0x1230] sm:$0xff] }
  0xa6   : > { %1800 = vst [vmem:[%s10645_s30 + $0x910] sm:$0xff] %v1799_v34  ;;  %v1803_v36 = vld [vmem:[%s10640_s29 + $0x1240] sm:$0xff]  ;;  %v1805_v37 = vld [vmem:[%s10640_s29 + $0x1250] sm:$0xff]  ;;  %1802 = vst [vmem:[%s10645_s30 + $0x918] sm:$0xff] %v1801_v35 }
  0xa7   : > { %1804 = vst [vmem:[%s10645_s30 + $0x920] sm:$0xff] %v1803_v36  ;;  %1806 = vst [vmem:[%s10645_s30 + $0x928] sm:$0xff] %v1805_v37  ;;  %v1807_v38 = vld [vmem:[%s10640_s29 + $0x1260] sm:$0xff]  ;;  %v1809_v39 = vld [vmem:[%s10640_s29 + $0x1270] sm:$0xff] }
  0xa8   : > { %v1811_v40 = vld [vmem:[%s10640_s29 + $0x1280] sm:$0xff]  ;;  %1808 = vst [vmem:[%s10645_s30 + $0x930] sm:$0xff] %v1807_v38  ;;  %1810 = vst [vmem:[%s10645_s30 + $0x938] sm:$0xff] %v1809_v39  ;;  %v1813_v41 = vld [vmem:[%s10640_s29 + $0x1290] sm:$0xff] }
  0xa9   : > { %1812 = vst [vmem:[%s10645_s30 + $0x940] sm:$0xff] %v1811_v40  ;;  %v1815_v42 = vld [vmem:[%s10640_s29 + $0x12a0] sm:$0xff]  ;;  %v1817_v43 = vld [vmem:[%s10640_s29 + $0x12b0] sm:$0xff]  ;;  %1814 = vst [vmem:[%s10645_s30 + $0x948] sm:$0xff] %v1813_v41 }
  0xaa   : > { %1816 = vst [vmem:[%s10645_s30 + $0x950] sm:$0xff] %v1815_v42  ;;  %1818 = vst [vmem:[%s10645_s30 + $0x958] sm:$0xff] %v1817_v43  ;;  %v1819_v44 = vld [vmem:[%s10640_s29 + $0x12c0] sm:$0xff]  ;;  %v1821_v45 = vld [vmem:[%s10640_s29 + $0x12d0] sm:$0xff] }
  0xab   : > { %v1823_v46 = vld [vmem:[%s10640_s29 + $0x12e0] sm:$0xff]  ;;  %1820 = vst [vmem:[%s10645_s30 + $0x960] sm:$0xff] %v1819_v44  ;;  %1822 = vst [vmem:[%s10645_s30 + $0x968] sm:$0xff] %v1821_v45  ;;  %v1825_v47 = vld [vmem:[%s10640_s29 + $0x12f0] sm:$0xff] }
  0xac   : > { %1824 = vst [vmem:[%s10645_s30 + $0x970] sm:$0xff] %v1823_v46  ;;  %v1827_v48 = vld [vmem:[%s10640_s29 + $0x1300] sm:$0xff]  ;;  %v1829_v49 = vld [vmem:[%s10640_s29 + $0x1310] sm:$0xff]  ;;  %1826 = vst [vmem:[%s10645_s30 + $0x978] sm:$0xff] %v1825_v47 }
  0xad   : > { %1828 = vst [vmem:[%s10645_s30 + $0x980] sm:$0xff] %v1827_v48  ;;  %1830 = vst [vmem:[%s10645_s30 + $0x988] sm:$0xff] %v1829_v49  ;;  %v1831_v50 = vld [vmem:[%s10640_s29 + $0x1320] sm:$0xff]  ;;  %v1833_v51 = vld [vmem:[%s10640_s29 + $0x1330] sm:$0xff] }
  0xae   : > { %v1835_v52 = vld [vmem:[%s10640_s29 + $0x1340] sm:$0xff]  ;;  %1832 = vst [vmem:[%s10645_s30 + $0x990] sm:$0xff] %v1831_v50  ;;  %1834 = vst [vmem:[%s10645_s30 + $0x998] sm:$0xff] %v1833_v51  ;;  %v1837_v53 = vld [vmem:[%s10640_s29 + $0x1350] sm:$0xff] }
  0xaf   : > { %1836 = vst [vmem:[%s10645_s30 + $0x9a0] sm:$0xff] %v1835_v52  ;;  %v1839_v54 = vld [vmem:[%s10640_s29 + $0x1360] sm:$0xff]  ;;  %v1841_v55 = vld [vmem:[%s10640_s29 + $0x1370] sm:$0xff]  ;;  %1838 = vst [vmem:[%s10645_s30 + $0x9a8] sm:$0xff] %v1837_v53 }
  0xb0   : > { %1840 = vst [vmem:[%s10645_s30 + $0x9b0] sm:$0xff] %v1839_v54  ;;  %1842 = vst [vmem:[%s10645_s30 + $0x9b8] sm:$0xff] %v1841_v55  ;;  %v1843_v56 = vld [vmem:[%s10640_s29 + $0x1380] sm:$0xff]  ;;  %v1845_v57 = vld [vmem:[%s10640_s29 + $0x1390] sm:$0xff] }
  0xb1   : > { %v1847_v58 = vld [vmem:[%s10640_s29 + $0x13a0] sm:$0xff]  ;;  %1844 = vst [vmem:[%s10645_s30 + $0x9c0] sm:$0xff] %v1843_v56  ;;  %1846 = vst [vmem:[%s10645_s30 + $0x9c8] sm:$0xff] %v1845_v57  ;;  %v1849_v59 = vld [vmem:[%s10640_s29 + $0x13b0] sm:$0xff] }
  0xb2   : > { %1848 = vst [vmem:[%s10645_s30 + $0x9d0] sm:$0xff] %v1847_v58  ;;  %v1851_v60 = vld [vmem:[%s10640_s29 + $0x13c0] sm:$0xff]  ;;  %v1853_v61 = vld [vmem:[%s10640_s29 + $0x13d0] sm:$0xff]  ;;  %1850 = vst [vmem:[%s10645_s30 + $0x9d8] sm:$0xff] %v1849_v59 }
  0xb3   : > { %1852 = vst [vmem:[%s10645_s30 + $0x9e0] sm:$0xff] %v1851_v60  ;;  %1854 = vst [vmem:[%s10645_s30 + $0x9e8] sm:$0xff] %v1853_v61  ;;  %v1855_v62 = vld [vmem:[%s10640_s29 + $0x13e0] sm:$0xff]  ;;  %v1857_v63 = vld [vmem:[%s10640_s29 + $0x13f0] sm:$0xff] }
  0xb4   : > { %v1859_v0 = vld [vmem:[%s10640_s29 + $0x1400] sm:$0xff]  ;;  %1856 = vst [vmem:[%s10645_s30 + $0x9f0] sm:$0xff] %v1855_v62  ;;  %1858 = vst [vmem:[%s10645_s30 + $0x9f8] sm:$0xff] %v1857_v63  ;;  %v1861_v1 = vld [vmem:[%s10640_s29 + $0x1410] sm:$0xff] }
  0xb5   : > { %1860 = vst [vmem:[%s10645_s30 + $0xa00] sm:$0xff] %v1859_v0  ;;  %v1863_v2 = vld [vmem:[%s10640_s29 + $0x1420] sm:$0xff]  ;;  %v1865_v3 = vld [vmem:[%s10640_s29 + $0x1430] sm:$0xff]  ;;  %1862 = vst [vmem:[%s10645_s30 + $0xa08] sm:$0xff] %v1861_v1 }
  0xb6   : > { %1864 = vst [vmem:[%s10645_s30 + $0xa10] sm:$0xff] %v1863_v2  ;;  %1866 = vst [vmem:[%s10645_s30 + $0xa18] sm:$0xff] %v1865_v3  ;;  %v1867_v4 = vld [vmem:[%s10640_s29 + $0x1440] sm:$0xff]  ;;  %v1869_v5 = vld [vmem:[%s10640_s29 + $0x1450] sm:$0xff] }
  0xb7   : > { %v1871_v6 = vld [vmem:[%s10640_s29 + $0x1460] sm:$0xff]  ;;  %1868 = vst [vmem:[%s10645_s30 + $0xa20] sm:$0xff] %v1867_v4  ;;  %1870 = vst [vmem:[%s10645_s30 + $0xa28] sm:$0xff] %v1869_v5  ;;  %v1873_v7 = vld [vmem:[%s10640_s29 + $0x1470] sm:$0xff] }
  0xb8   : > { %1872 = vst [vmem:[%s10645_s30 + $0xa30] sm:$0xff] %v1871_v6  ;;  %v1875_v8 = vld [vmem:[%s10640_s29 + $0x1480] sm:$0xff]  ;;  %v1877_v9 = vld [vmem:[%s10640_s29 + $0x1490] sm:$0xff]  ;;  %1874 = vst [vmem:[%s10645_s30 + $0xa38] sm:$0xff] %v1873_v7 }
  0xb9   : > { %1876 = vst [vmem:[%s10645_s30 + $0xa40] sm:$0xff] %v1875_v8  ;;  %1878 = vst [vmem:[%s10645_s30 + $0xa48] sm:$0xff] %v1877_v9  ;;  %v1879_v10 = vld [vmem:[%s10640_s29 + $0x14a0] sm:$0xff]  ;;  %v1881_v11 = vld [vmem:[%s10640_s29 + $0x14b0] sm:$0xff] }
  0xba   : > { %v1883_v12 = vld [vmem:[%s10640_s29 + $0x14c0] sm:$0xff]  ;;  %1880 = vst [vmem:[%s10645_s30 + $0xa50] sm:$0xff] %v1879_v10  ;;  %1882 = vst [vmem:[%s10645_s30 + $0xa58] sm:$0xff] %v1881_v11  ;;  %v1885_v13 = vld [vmem:[%s10640_s29 + $0x14d0] sm:$0xff] }
  0xbb   : > { %1884 = vst [vmem:[%s10645_s30 + $0xa60] sm:$0xff] %v1883_v12  ;;  %v1887_v14 = vld [vmem:[%s10640_s29 + $0x14e0] sm:$0xff]  ;;  %v1889_v15 = vld [vmem:[%s10640_s29 + $0x14f0] sm:$0xff]  ;;  %1886 = vst [vmem:[%s10645_s30 + $0xa68] sm:$0xff] %v1885_v13 }
  0xbc   : > { %1888 = vst [vmem:[%s10645_s30 + $0xa70] sm:$0xff] %v1887_v14  ;;  %1890 = vst [vmem:[%s10645_s30 + $0xa78] sm:$0xff] %v1889_v15  ;;  %v1891_v16 = vld [vmem:[%s10640_s29 + $0x1500] sm:$0xff]  ;;  %v1893_v17 = vld [vmem:[%s10640_s29 + $0x1510] sm:$0xff] }
  0xbd   : > { %v1895_v18 = vld [vmem:[%s10640_s29 + $0x1520] sm:$0xff]  ;;  %1892 = vst [vmem:[%s10645_s30 + $0xa80] sm:$0xff] %v1891_v16  ;;  %1894 = vst [vmem:[%s10645_s30 + $0xa88] sm:$0xff] %v1893_v17  ;;  %v1897_v19 = vld [vmem:[%s10640_s29 + $0x1530] sm:$0xff] }
  0xbe   : > { %1896 = vst [vmem:[%s10645_s30 + $0xa90] sm:$0xff] %v1895_v18  ;;  %v1899_v20 = vld [vmem:[%s10640_s29 + $0x1540] sm:$0xff]  ;;  %v1901_v21 = vld [vmem:[%s10640_s29 + $0x1550] sm:$0xff]  ;;  %1898 = vst [vmem:[%s10645_s30 + $0xa98] sm:$0xff] %v1897_v19 }
  0xbf   : > { %1900 = vst [vmem:[%s10645_s30 + $0xaa0] sm:$0xff] %v1899_v20  ;;  %1902 = vst [vmem:[%s10645_s30 + $0xaa8] sm:$0xff] %v1901_v21  ;;  %v1903_v22 = vld [vmem:[%s10640_s29 + $0x1560] sm:$0xff]  ;;  %v1905_v23 = vld [vmem:[%s10640_s29 + $0x1570] sm:$0xff] }
  0xc0   : > { %v1907_v24 = vld [vmem:[%s10640_s29 + $0x1580] sm:$0xff]  ;;  %1904 = vst [vmem:[%s10645_s30 + $0xab0] sm:$0xff] %v1903_v22  ;;  %1906 = vst [vmem:[%s10645_s30 + $0xab8] sm:$0xff] %v1905_v23  ;;  %v1909_v25 = vld [vmem:[%s10640_s29 + $0x1590] sm:$0xff] }
  0xc1   : > { %1908 = vst [vmem:[%s10645_s30 + $0xac0] sm:$0xff] %v1907_v24  ;;  %v1911_v26 = vld [vmem:[%s10640_s29 + $0x15a0] sm:$0xff]  ;;  %v1913_v27 = vld [vmem:[%s10640_s29 + $0x15b0] sm:$0xff]  ;;  %1910 = vst [vmem:[%s10645_s30 + $0xac8] sm:$0xff] %v1909_v25 }
  0xc2   : > { %1912 = vst [vmem:[%s10645_s30 + $0xad0] sm:$0xff] %v1911_v26  ;;  %1914 = vst [vmem:[%s10645_s30 + $0xad8] sm:$0xff] %v1913_v27  ;;  %v1915_v28 = vld [vmem:[%s10640_s29 + $0x15c0] sm:$0xff]  ;;  %v1917_v29 = vld [vmem:[%s10640_s29 + $0x15d0] sm:$0xff] }
  0xc3   : > { %v1919_v30 = vld [vmem:[%s10640_s29 + $0x15e0] sm:$0xff]  ;;  %1916 = vst [vmem:[%s10645_s30 + $0xae0] sm:$0xff] %v1915_v28  ;;  %1918 = vst [vmem:[%s10645_s30 + $0xae8] sm:$0xff] %v1917_v29  ;;  %v1921_v31 = vld [vmem:[%s10640_s29 + $0x15f0] sm:$0xff] }
  0xc4   : > { %1920 = vst [vmem:[%s10645_s30 + $0xaf0] sm:$0xff] %v1919_v30  ;;  %v1923_v32 = vld [vmem:[%s10640_s29 + $0x1600] sm:$0xff]  ;;  %v1925_v33 = vld [vmem:[%s10640_s29 + $0x1610] sm:$0xff]  ;;  %1922 = vst [vmem:[%s10645_s30 + $0xaf8] sm:$0xff] %v1921_v31 }
  0xc5   : > { %1924 = vst [vmem:[%s10645_s30 + $0xb00] sm:$0xff] %v1923_v32  ;;  %1926 = vst [vmem:[%s10645_s30 + $0xb08] sm:$0xff] %v1925_v33  ;;  %v1927_v34 = vld [vmem:[%s10640_s29 + $0x1620] sm:$0xff]  ;;  %v1929_v35 = vld [vmem:[%s10640_s29 + $0x1630] sm:$0xff] }
  0xc6   : > { %v1931_v36 = vld [vmem:[%s10640_s29 + $0x1640] sm:$0xff]  ;;  %1928 = vst [vmem:[%s10645_s30 + $0xb10] sm:$0xff] %v1927_v34  ;;  %1930 = vst [vmem:[%s10645_s30 + $0xb18] sm:$0xff] %v1929_v35  ;;  %v1933_v37 = vld [vmem:[%s10640_s29 + $0x1650] sm:$0xff] }
  0xc7   : > { %1932 = vst [vmem:[%s10645_s30 + $0xb20] sm:$0xff] %v1931_v36  ;;  %v1935_v38 = vld [vmem:[%s10640_s29 + $0x1660] sm:$0xff]  ;;  %v1937_v39 = vld [vmem:[%s10640_s29 + $0x1670] sm:$0xff]  ;;  %1934 = vst [vmem:[%s10645_s30 + $0xb28] sm:$0xff] %v1933_v37 }
  0xc8   : > { %1936 = vst [vmem:[%s10645_s30 + $0xb30] sm:$0xff] %v1935_v38  ;;  %1938 = vst [vmem:[%s10645_s30 + $0xb38] sm:$0xff] %v1937_v39  ;;  %v1939_v40 = vld [vmem:[%s10640_s29 + $0x1680] sm:$0xff]  ;;  %v1941_v41 = vld [vmem:[%s10640_s29 + $0x1690] sm:$0xff] }
  0xc9   : > { %v1943_v42 = vld [vmem:[%s10640_s29 + $0x16a0] sm:$0xff]  ;;  %1940 = vst [vmem:[%s10645_s30 + $0xb40] sm:$0xff] %v1939_v40  ;;  %1942 = vst [vmem:[%s10645_s30 + $0xb48] sm:$0xff] %v1941_v41  ;;  %v1945_v43 = vld [vmem:[%s10640_s29 + $0x16b0] sm:$0xff] }
  0xca   : > { %1944 = vst [vmem:[%s10645_s30 + $0xb50] sm:$0xff] %v1943_v42  ;;  %v1947_v44 = vld [vmem:[%s10640_s29 + $0x16c0] sm:$0xff]  ;;  %v1949_v45 = vld [vmem:[%s10640_s29 + $0x16d0] sm:$0xff]  ;;  %1946 = vst [vmem:[%s10645_s30 + $0xb58] sm:$0xff] %v1945_v43 }
  0xcb   : > { %1948 = vst [vmem:[%s10645_s30 + $0xb60] sm:$0xff] %v1947_v44  ;;  %1950 = vst [vmem:[%s10645_s30 + $0xb68] sm:$0xff] %v1949_v45  ;;  %v1951_v46 = vld [vmem:[%s10640_s29 + $0x16e0] sm:$0xff]  ;;  %v1953_v47 = vld [vmem:[%s10640_s29 + $0x16f0] sm:$0xff] }
  0xcc   : > { %v1955_v48 = vld [vmem:[%s10640_s29 + $0x1700] sm:$0xff]  ;;  %1952 = vst [vmem:[%s10645_s30 + $0xb70] sm:$0xff] %v1951_v46  ;;  %1954 = vst [vmem:[%s10645_s30 + $0xb78] sm:$0xff] %v1953_v47  ;;  %v1957_v49 = vld [vmem:[%s10640_s29 + $0x1710] sm:$0xff] }
  0xcd   : > { %1956 = vst [vmem:[%s10645_s30 + $0xb80] sm:$0xff] %v1955_v48  ;;  %v1959_v50 = vld [vmem:[%s10640_s29 + $0x1720] sm:$0xff]  ;;  %v1961_v51 = vld [vmem:[%s10640_s29 + $0x1730] sm:$0xff]  ;;  %1958 = vst [vmem:[%s10645_s30 + $0xb88] sm:$0xff] %v1957_v49 }
  0xce   : > { %1960 = vst [vmem:[%s10645_s30 + $0xb90] sm:$0xff] %v1959_v50  ;;  %1962 = vst [vmem:[%s10645_s30 + $0xb98] sm:$0xff] %v1961_v51  ;;  %v1963_v52 = vld [vmem:[%s10640_s29 + $0x1740] sm:$0xff]  ;;  %v1965_v53 = vld [vmem:[%s10640_s29 + $0x1750] sm:$0xff] }
  0xcf   : > { %v1967_v54 = vld [vmem:[%s10640_s29 + $0x1760] sm:$0xff]  ;;  %1964 = vst [vmem:[%s10645_s30 + $0xba0] sm:$0xff] %v1963_v52  ;;  %1966 = vst [vmem:[%s10645_s30 + $0xba8] sm:$0xff] %v1965_v53  ;;  %v1969_v55 = vld [vmem:[%s10640_s29 + $0x1770] sm:$0xff] }
  0xd0   : > { %1968 = vst [vmem:[%s10645_s30 + $0xbb0] sm:$0xff] %v1967_v54  ;;  %v1971_v56 = vld [vmem:[%s10640_s29 + $0x1780] sm:$0xff]  ;;  %v1973_v57 = vld [vmem:[%s10640_s29 + $0x1790] sm:$0xff]  ;;  %1970 = vst [vmem:[%s10645_s30 + $0xbb8] sm:$0xff] %v1969_v55 }
  0xd1   : > { %1972 = vst [vmem:[%s10645_s30 + $0xbc0] sm:$0xff] %v1971_v56  ;;  %1974 = vst [vmem:[%s10645_s30 + $0xbc8] sm:$0xff] %v1973_v57  ;;  %v1975_v58 = vld [vmem:[%s10640_s29 + $0x17a0] sm:$0xff]  ;;  %v1977_v59 = vld [vmem:[%s10640_s29 + $0x17b0] sm:$0xff] }
  0xd2   : > { %v1979_v60 = vld [vmem:[%s10640_s29 + $0x17c0] sm:$0xff]  ;;  %1976 = vst [vmem:[%s10645_s30 + $0xbd0] sm:$0xff] %v1975_v58  ;;  %1978 = vst [vmem:[%s10645_s30 + $0xbd8] sm:$0xff] %v1977_v59  ;;  %v1981_v61 = vld [vmem:[%s10640_s29 + $0x17d0] sm:$0xff] }
  0xd3   : > { %1980 = vst [vmem:[%s10645_s30 + $0xbe0] sm:$0xff] %v1979_v60  ;;  %v1983_v62 = vld [vmem:[%s10640_s29 + $0x17e0] sm:$0xff]  ;;  %v1985_v63 = vld [vmem:[%s10640_s29 + $0x17f0] sm:$0xff]  ;;  %1982 = vst [vmem:[%s10645_s30 + $0xbe8] sm:$0xff] %v1981_v61 }
  0xd4   : > { %1984 = vst [vmem:[%s10645_s30 + $0xbf0] sm:$0xff] %v1983_v62  ;;  %1986 = vst [vmem:[%s10645_s30 + $0xbf8] sm:$0xff] %v1985_v63  ;;  %v1987_v0 = vld [vmem:[%s10640_s29 + $0x1800] sm:$0xff]  ;;  %v1989_v1 = vld [vmem:[%s10640_s29 + $0x1810] sm:$0xff] }
  0xd5   : > { %v1991_v2 = vld [vmem:[%s10640_s29 + $0x1820] sm:$0xff]  ;;  %1988 = vst [vmem:[%s10645_s30 + $0xc00] sm:$0xff] %v1987_v0  ;;  %1990 = vst [vmem:[%s10645_s30 + $0xc08] sm:$0xff] %v1989_v1  ;;  %v1993_v3 = vld [vmem:[%s10640_s29 + $0x1830] sm:$0xff] }
  0xd6   : > { %1992 = vst [vmem:[%s10645_s30 + $0xc10] sm:$0xff] %v1991_v2  ;;  %v1995_v4 = vld [vmem:[%s10640_s29 + $0x1840] sm:$0xff]  ;;  %v1997_v5 = vld [vmem:[%s10640_s29 + $0x1850] sm:$0xff]  ;;  %1994 = vst [vmem:[%s10645_s30 + $0xc18] sm:$0xff] %v1993_v3 }
  0xd7   : > { %1996 = vst [vmem:[%s10645_s30 + $0xc20] sm:$0xff] %v1995_v4  ;;  %1998 = vst [vmem:[%s10645_s30 + $0xc28] sm:$0xff] %v1997_v5  ;;  %v1999_v6 = vld [vmem:[%s10640_s29 + $0x1860] sm:$0xff]  ;;  %v2001_v7 = vld [vmem:[%s10640_s29 + $0x1870] sm:$0xff] }
  0xd8   : > { %v2003_v8 = vld [vmem:[%s10640_s29 + $0x1880] sm:$0xff]  ;;  %2000 = vst [vmem:[%s10645_s30 + $0xc30] sm:$0xff] %v1999_v6  ;;  %2002 = vst [vmem:[%s10645_s30 + $0xc38] sm:$0xff] %v2001_v7  ;;  %v2005_v9 = vld [vmem:[%s10640_s29 + $0x1890] sm:$0xff] }
  0xd9   : > { %2004 = vst [vmem:[%s10645_s30 + $0xc40] sm:$0xff] %v2003_v8  ;;  %v2007_v10 = vld [vmem:[%s10640_s29 + $0x18a0] sm:$0xff]  ;;  %v2009_v11 = vld [vmem:[%s10640_s29 + $0x18b0] sm:$0xff]  ;;  %2006 = vst [vmem:[%s10645_s30 + $0xc48] sm:$0xff] %v2005_v9 }
  0xda   : > { %2008 = vst [vmem:[%s10645_s30 + $0xc50] sm:$0xff] %v2007_v10  ;;  %2010 = vst [vmem:[%s10645_s30 + $0xc58] sm:$0xff] %v2009_v11  ;;  %v2011_v12 = vld [vmem:[%s10640_s29 + $0x18c0] sm:$0xff]  ;;  %v2013_v13 = vld [vmem:[%s10640_s29 + $0x18d0] sm:$0xff] }
  0xdb   : > { %v2015_v14 = vld [vmem:[%s10640_s29 + $0x18e0] sm:$0xff]  ;;  %2012 = vst [vmem:[%s10645_s30 + $0xc60] sm:$0xff] %v2011_v12  ;;  %2014 = vst [vmem:[%s10645_s30 + $0xc68] sm:$0xff] %v2013_v13  ;;  %v2017_v15 = vld [vmem:[%s10640_s29 + $0x18f0] sm:$0xff] }
  0xdc   : > { %2016 = vst [vmem:[%s10645_s30 + $0xc70] sm:$0xff] %v2015_v14  ;;  %v2019_v16 = vld [vmem:[%s10640_s29 + $0x1900] sm:$0xff]  ;;  %v2021_v17 = vld [vmem:[%s10640_s29 + $0x1910] sm:$0xff]  ;;  %2018 = vst [vmem:[%s10645_s30 + $0xc78] sm:$0xff] %v2017_v15 }
  0xdd   : > { %2020 = vst [vmem:[%s10645_s30 + $0xc80] sm:$0xff] %v2019_v16  ;;  %2022 = vst [vmem:[%s10645_s30 + $0xc88] sm:$0xff] %v2021_v17  ;;  %v2023_v18 = vld [vmem:[%s10640_s29 + $0x1920] sm:$0xff]  ;;  %v2025_v19 = vld [vmem:[%s10640_s29 + $0x1930] sm:$0xff] }
  0xde   : > { %v2027_v20 = vld [vmem:[%s10640_s29 + $0x1940] sm:$0xff]  ;;  %2024 = vst [vmem:[%s10645_s30 + $0xc90] sm:$0xff] %v2023_v18  ;;  %2026 = vst [vmem:[%s10645_s30 + $0xc98] sm:$0xff] %v2025_v19  ;;  %v2029_v21 = vld [vmem:[%s10640_s29 + $0x1950] sm:$0xff] }
  0xdf   : > { %2028 = vst [vmem:[%s10645_s30 + $0xca0] sm:$0xff] %v2027_v20  ;;  %v2031_v22 = vld [vmem:[%s10640_s29 + $0x1960] sm:$0xff]  ;;  %v2033_v23 = vld [vmem:[%s10640_s29 + $0x1970] sm:$0xff]  ;;  %2030 = vst [vmem:[%s10645_s30 + $0xca8] sm:$0xff] %v2029_v21 }
  0xe0   : > { %2032 = vst [vmem:[%s10645_s30 + $0xcb0] sm:$0xff] %v2031_v22  ;;  %2034 = vst [vmem:[%s10645_s30 + $0xcb8] sm:$0xff] %v2033_v23  ;;  %v2035_v24 = vld [vmem:[%s10640_s29 + $0x1980] sm:$0xff]  ;;  %v2037_v25 = vld [vmem:[%s10640_s29 + $0x1990] sm:$0xff] }
  0xe1   : > { %v2039_v26 = vld [vmem:[%s10640_s29 + $0x19a0] sm:$0xff]  ;;  %2036 = vst [vmem:[%s10645_s30 + $0xcc0] sm:$0xff] %v2035_v24  ;;  %2038 = vst [vmem:[%s10645_s30 + $0xcc8] sm:$0xff] %v2037_v25  ;;  %v2041_v27 = vld [vmem:[%s10640_s29 + $0x19b0] sm:$0xff] }
  0xe2   : > { %2040 = vst [vmem:[%s10645_s30 + $0xcd0] sm:$0xff] %v2039_v26  ;;  %v2043_v28 = vld [vmem:[%s10640_s29 + $0x19c0] sm:$0xff]  ;;  %v2045_v29 = vld [vmem:[%s10640_s29 + $0x19d0] sm:$0xff]  ;;  %2042 = vst [vmem:[%s10645_s30 + $0xcd8] sm:$0xff] %v2041_v27 }
  0xe3   : > { %2044 = vst [vmem:[%s10645_s30 + $0xce0] sm:$0xff] %v2043_v28  ;;  %2046 = vst [vmem:[%s10645_s30 + $0xce8] sm:$0xff] %v2045_v29  ;;  %v2047_v30 = vld [vmem:[%s10640_s29 + $0x19e0] sm:$0xff]  ;;  %v2049_v31 = vld [vmem:[%s10640_s29 + $0x19f0] sm:$0xff] }
  0xe4   : > { %v2051_v32 = vld [vmem:[%s10640_s29 + $0x1a00] sm:$0xff]  ;;  %2048 = vst [vmem:[%s10645_s30 + $0xcf0] sm:$0xff] %v2047_v30  ;;  %2050 = vst [vmem:[%s10645_s30 + $0xcf8] sm:$0xff] %v2049_v31  ;;  %v2053_v33 = vld [vmem:[%s10640_s29 + $0x1a10] sm:$0xff] }
  0xe5   : > { %2052 = vst [vmem:[%s10645_s30 + $0xd00] sm:$0xff] %v2051_v32  ;;  %v2055_v34 = vld [vmem:[%s10640_s29 + $0x1a20] sm:$0xff]  ;;  %v2057_v35 = vld [vmem:[%s10640_s29 + $0x1a30] sm:$0xff]  ;;  %2054 = vst [vmem:[%s10645_s30 + $0xd08] sm:$0xff] %v2053_v33 }
  0xe6   : > { %2056 = vst [vmem:[%s10645_s30 + $0xd10] sm:$0xff] %v2055_v34  ;;  %2058 = vst [vmem:[%s10645_s30 + $0xd18] sm:$0xff] %v2057_v35  ;;  %v2059_v36 = vld [vmem:[%s10640_s29 + $0x1a40] sm:$0xff]  ;;  %v2061_v37 = vld [vmem:[%s10640_s29 + $0x1a50] sm:$0xff] }
  0xe7   : > { %v2063_v38 = vld [vmem:[%s10640_s29 + $0x1a60] sm:$0xff]  ;;  %2060 = vst [vmem:[%s10645_s30 + $0xd20] sm:$0xff] %v2059_v36  ;;  %2062 = vst [vmem:[%s10645_s30 + $0xd28] sm:$0xff] %v2061_v37  ;;  %v2065_v39 = vld [vmem:[%s10640_s29 + $0x1a70] sm:$0xff] }
  0xe8   : > { %2064 = vst [vmem:[%s10645_s30 + $0xd30] sm:$0xff] %v2063_v38  ;;  %v2067_v40 = vld [vmem:[%s10640_s29 + $0x1a80] sm:$0xff]  ;;  %v2069_v41 = vld [vmem:[%s10640_s29 + $0x1a90] sm:$0xff]  ;;  %2066 = vst [vmem:[%s10645_s30 + $0xd38] sm:$0xff] %v2065_v39 }
  0xe9   : > { %2068 = vst [vmem:[%s10645_s30 + $0xd40] sm:$0xff] %v2067_v40  ;;  %2070 = vst [vmem:[%s10645_s30 + $0xd48] sm:$0xff] %v2069_v41  ;;  %v2071_v42 = vld [vmem:[%s10640_s29 + $0x1aa0] sm:$0xff]  ;;  %v2073_v43 = vld [vmem:[%s10640_s29 + $0x1ab0] sm:$0xff] }
  0xea   : > { %v2075_v44 = vld [vmem:[%s10640_s29 + $0x1ac0] sm:$0xff]  ;;  %2072 = vst [vmem:[%s10645_s30 + $0xd50] sm:$0xff] %v2071_v42  ;;  %2074 = vst [vmem:[%s10645_s30 + $0xd58] sm:$0xff] %v2073_v43  ;;  %v2077_v45 = vld [vmem:[%s10640_s29 + $0x1ad0] sm:$0xff] }
  0xeb   : > { %2076 = vst [vmem:[%s10645_s30 + $0xd60] sm:$0xff] %v2075_v44  ;;  %v2079_v46 = vld [vmem:[%s10640_s29 + $0x1ae0] sm:$0xff]  ;;  %v2081_v47 = vld [vmem:[%s10640_s29 + $0x1af0] sm:$0xff]  ;;  %2078 = vst [vmem:[%s10645_s30 + $0xd68] sm:$0xff] %v2077_v45 }
  0xec   : > { %2080 = vst [vmem:[%s10645_s30 + $0xd70] sm:$0xff] %v2079_v46  ;;  %2082 = vst [vmem:[%s10645_s30 + $0xd78] sm:$0xff] %v2081_v47  ;;  %v2083_v48 = vld [vmem:[%s10640_s29 + $0x1b00] sm:$0xff]  ;;  %v2085_v49 = vld [vmem:[%s10640_s29 + $0x1b10] sm:$0xff] }
  0xed   : > { %v2087_v50 = vld [vmem:[%s10640_s29 + $0x1b20] sm:$0xff]  ;;  %2084 = vst [vmem:[%s10645_s30 + $0xd80] sm:$0xff] %v2083_v48  ;;  %2086 = vst [vmem:[%s10645_s30 + $0xd88] sm:$0xff] %v2085_v49  ;;  %v2089_v51 = vld [vmem:[%s10640_s29 + $0x1b30] sm:$0xff] }
  0xee   : > { %2088 = vst [vmem:[%s10645_s30 + $0xd90] sm:$0xff] %v2087_v50  ;;  %v2091_v52 = vld [vmem:[%s10640_s29 + $0x1b40] sm:$0xff]  ;;  %v2093_v53 = vld [vmem:[%s10640_s29 + $0x1b50] sm:$0xff]  ;;  %2090 = vst [vmem:[%s10645_s30 + $0xd98] sm:$0xff] %v2089_v51 }
  0xef   : > { %2092 = vst [vmem:[%s10645_s30 + $0xda0] sm:$0xff] %v2091_v52  ;;  %2094 = vst [vmem:[%s10645_s30 + $0xda8] sm:$0xff] %v2093_v53  ;;  %v2095_v54 = vld [vmem:[%s10640_s29 + $0x1b60] sm:$0xff]  ;;  %v2097_v55 = vld [vmem:[%s10640_s29 + $0x1b70] sm:$0xff] }
  0xf0   : > { %v2099_v56 = vld [vmem:[%s10640_s29 + $0x1b80] sm:$0xff]  ;;  %2096 = vst [vmem:[%s10645_s30 + $0xdb0] sm:$0xff] %v2095_v54  ;;  %2098 = vst [vmem:[%s10645_s30 + $0xdb8] sm:$0xff] %v2097_v55  ;;  %v2101_v57 = vld [vmem:[%s10640_s29 + $0x1b90] sm:$0xff] }
  0xf1   : > { %2100 = vst [vmem:[%s10645_s30 + $0xdc0] sm:$0xff] %v2099_v56  ;;  %v2103_v58 = vld [vmem:[%s10640_s29 + $0x1ba0] sm:$0xff]  ;;  %v2105_v59 = vld [vmem:[%s10640_s29 + $0x1bb0] sm:$0xff]  ;;  %2102 = vst [vmem:[%s10645_s30 + $0xdc8] sm:$0xff] %v2101_v57 }
  0xf2   : > { %2104 = vst [vmem:[%s10645_s30 + $0xdd0] sm:$0xff] %v2103_v58  ;;  %2106 = vst [vmem:[%s10645_s30 + $0xdd8] sm:$0xff] %v2105_v59  ;;  %v2107_v60 = vld [vmem:[%s10640_s29 + $0x1bc0] sm:$0xff]  ;;  %v2109_v61 = vld [vmem:[%s10640_s29 + $0x1bd0] sm:$0xff] }
  0xf3   : > { %v2111_v62 = vld [vmem:[%s10640_s29 + $0x1be0] sm:$0xff]  ;;  %2108 = vst [vmem:[%s10645_s30 + $0xde0] sm:$0xff] %v2107_v60  ;;  %2110 = vst [vmem:[%s10645_s30 + $0xde8] sm:$0xff] %v2109_v61  ;;  %v2113_v63 = vld [vmem:[%s10640_s29 + $0x1bf0] sm:$0xff] }
  0xf4   : > { %2112 = vst [vmem:[%s10645_s30 + $0xdf0] sm:$0xff] %v2111_v62  ;;  %v2115_v0 = vld [vmem:[%s10640_s29 + $0x1c00] sm:$0xff]  ;;  %v2117_v1 = vld [vmem:[%s10640_s29 + $0x1c10] sm:$0xff]  ;;  %2114 = vst [vmem:[%s10645_s30 + $0xdf8] sm:$0xff] %v2113_v63 }
  0xf5   : > { %2116 = vst [vmem:[%s10645_s30 + $0xe00] sm:$0xff] %v2115_v0  ;;  %2118 = vst [vmem:[%s10645_s30 + $0xe08] sm:$0xff] %v2117_v1  ;;  %v2119_v2 = vld [vmem:[%s10640_s29 + $0x1c20] sm:$0xff]  ;;  %v2121_v3 = vld [vmem:[%s10640_s29 + $0x1c30] sm:$0xff] }
  0xf6   : > { %v2123_v4 = vld [vmem:[%s10640_s29 + $0x1c40] sm:$0xff]  ;;  %2120 = vst [vmem:[%s10645_s30 + $0xe10] sm:$0xff] %v2119_v2  ;;  %2122 = vst [vmem:[%s10645_s30 + $0xe18] sm:$0xff] %v2121_v3  ;;  %v2125_v5 = vld [vmem:[%s10640_s29 + $0x1c50] sm:$0xff] }
  0xf7   : > { %2124 = vst [vmem:[%s10645_s30 + $0xe20] sm:$0xff] %v2123_v4  ;;  %v2127_v6 = vld [vmem:[%s10640_s29 + $0x1c60] sm:$0xff]  ;;  %v2129_v7 = vld [vmem:[%s10640_s29 + $0x1c70] sm:$0xff]  ;;  %2126 = vst [vmem:[%s10645_s30 + $0xe28] sm:$0xff] %v2125_v5 }
  0xf8   : > { %2128 = vst [vmem:[%s10645_s30 + $0xe30] sm:$0xff] %v2127_v6  ;;  %2130 = vst [vmem:[%s10645_s30 + $0xe38] sm:$0xff] %v2129_v7  ;;  %v2131_v8 = vld [vmem:[%s10640_s29 + $0x1c80] sm:$0xff]  ;;  %v2133_v9 = vld [vmem:[%s10640_s29 + $0x1c90] sm:$0xff] }
  0xf9   : > { %v2135_v10 = vld [vmem:[%s10640_s29 + $0x1ca0] sm:$0xff]  ;;  %2132 = vst [vmem:[%s10645_s30 + $0xe40] sm:$0xff] %v2131_v8  ;;  %2134 = vst [vmem:[%s10645_s30 + $0xe48] sm:$0xff] %v2133_v9  ;;  %v2137_v11 = vld [vmem:[%s10640_s29 + $0x1cb0] sm:$0xff] }
  0xfa   : > { %2136 = vst [vmem:[%s10645_s30 + $0xe50] sm:$0xff] %v2135_v10  ;;  %v2139_v12 = vld [vmem:[%s10640_s29 + $0x1cc0] sm:$0xff]  ;;  %v2141_v13 = vld [vmem:[%s10640_s29 + $0x1cd0] sm:$0xff]  ;;  %2138 = vst [vmem:[%s10645_s30 + $0xe58] sm:$0xff] %v2137_v11 }
  0xfb   : > { %2140 = vst [vmem:[%s10645_s30 + $0xe60] sm:$0xff] %v2139_v12  ;;  %2142 = vst [vmem:[%s10645_s30 + $0xe68] sm:$0xff] %v2141_v13  ;;  %v2143_v14 = vld [vmem:[%s10640_s29 + $0x1ce0] sm:$0xff]  ;;  %v2145_v15 = vld [vmem:[%s10640_s29 + $0x1cf0] sm:$0xff] }
  0xfc   : > { %v2147_v16 = vld [vmem:[%s10640_s29 + $0x1d00] sm:$0xff]  ;;  %2144 = vst [vmem:[%s10645_s30 + $0xe70] sm:$0xff] %v2143_v14  ;;  %2146 = vst [vmem:[%s10645_s30 + $0xe78] sm:$0xff] %v2145_v15  ;;  %v2149_v17 = vld [vmem:[%s10640_s29 + $0x1d10] sm:$0xff] }
  0xfd   : > { %2148 = vst [vmem:[%s10645_s30 + $0xe80] sm:$0xff] %v2147_v16  ;;  %v2151_v18 = vld [vmem:[%s10640_s29 + $0x1d20] sm:$0xff]  ;;  %v2153_v19 = vld [vmem:[%s10640_s29 + $0x1d30] sm:$0xff]  ;;  %2150 = vst [vmem:[%s10645_s30 + $0xe88] sm:$0xff] %v2149_v17 }
  0xfe   : > { %2152 = vst [vmem:[%s10645_s30 + $0xe90] sm:$0xff] %v2151_v18  ;;  %2154 = vst [vmem:[%s10645_s30 + $0xe98] sm:$0xff] %v2153_v19  ;;  %v2155_v20 = vld [vmem:[%s10640_s29 + $0x1d40] sm:$0xff]  ;;  %v2157_v21 = vld [vmem:[%s10640_s29 + $0x1d50] sm:$0xff] }
  0xff   : > { %v2159_v22 = vld [vmem:[%s10640_s29 + $0x1d60] sm:$0xff]  ;;  %2156 = vst [vmem:[%s10645_s30 + $0xea0] sm:$0xff] %v2155_v20  ;;  %2158 = vst [vmem:[%s10645_s30 + $0xea8] sm:$0xff] %v2157_v21  ;;  %v2161_v23 = vld [vmem:[%s10640_s29 + $0x1d70] sm:$0xff] }
 0x100   : > { %2160 = vst [vmem:[%s10645_s30 + $0xeb0] sm:$0xff] %v2159_v22  ;;  %v2163_v24 = vld [vmem:[%s10640_s29 + $0x1d80] sm:$0xff]  ;;  %v2165_v25 = vld [vmem:[%s10640_s29 + $0x1d90] sm:$0xff]  ;;  %2162 = vst [vmem:[%s10645_s30 + $0xeb8] sm:$0xff] %v2161_v23 }
 0x101   : > { %2164 = vst [vmem:[%s10645_s30 + $0xec0] sm:$0xff] %v2163_v24  ;;  %2166 = vst [vmem:[%s10645_s30 + $0xec8] sm:$0xff] %v2165_v25  ;;  %v2167_v26 = vld [vmem:[%s10640_s29 + $0x1da0] sm:$0xff]  ;;  %v2169_v27 = vld [vmem:[%s10640_s29 + $0x1db0] sm:$0xff] }
 0x102   : > { %v2171_v28 = vld [vmem:[%s10640_s29 + $0x1dc0] sm:$0xff]  ;;  %2168 = vst [vmem:[%s10645_s30 + $0xed0] sm:$0xff] %v2167_v26  ;;  %2170 = vst [vmem:[%s10645_s30 + $0xed8] sm:$0xff] %v2169_v27  ;;  %v2173_v29 = vld [vmem:[%s10640_s29 + $0x1dd0] sm:$0xff] }
 0x103   : > { %2172 = vst [vmem:[%s10645_s30 + $0xee0] sm:$0xff] %v2171_v28  ;;  %v2175_v30 = vld [vmem:[%s10640_s29 + $0x1de0] sm:$0xff]  ;;  %v2177_v31 = vld [vmem:[%s10640_s29 + $0x1df0] sm:$0xff]  ;;  %2174 = vst [vmem:[%s10645_s30 + $0xee8] sm:$0xff] %v2173_v29 }
 0x104   : > { %2176 = vst [vmem:[%s10645_s30 + $0xef0] sm:$0xff] %v2175_v30  ;;  %2178 = vst [vmem:[%s10645_s30 + $0xef8] sm:$0xff] %v2177_v31  ;;  %v2179_v32 = vld [vmem:[%s10640_s29 + $0x1e00] sm:$0xff]  ;;  %v2181_v33 = vld [vmem:[%s10640_s29 + $0x1e10] sm:$0xff] }
 0x105   : > { %v2183_v34 = vld [vmem:[%s10640_s29 + $0x1e20] sm:$0xff]  ;;  %2180 = vst [vmem:[%s10645_s30 + $0xf00] sm:$0xff] %v2179_v32  ;;  %2182 = vst [vmem:[%s10645_s30 + $0xf08] sm:$0xff] %v2181_v33  ;;  %v2185_v35 = vld [vmem:[%s10640_s29 + $0x1e30] sm:$0xff] }
 0x106   : > { %2184 = vst [vmem:[%s10645_s30 + $0xf10] sm:$0xff] %v2183_v34  ;;  %v2187_v36 = vld [vmem:[%s10640_s29 + $0x1e40] sm:$0xff]  ;;  %v2189_v37 = vld [vmem:[%s10640_s29 + $0x1e50] sm:$0xff]  ;;  %2186 = vst [vmem:[%s10645_s30 + $0xf18] sm:$0xff] %v2185_v35 }
 0x107   : > { %2188 = vst [vmem:[%s10645_s30 + $0xf20] sm:$0xff] %v2187_v36  ;;  %2190 = vst [vmem:[%s10645_s30 + $0xf28] sm:$0xff] %v2189_v37  ;;  %v2191_v38 = vld [vmem:[%s10640_s29 + $0x1e60] sm:$0xff]  ;;  %v2193_v39 = vld [vmem:[%s10640_s29 + $0x1e70] sm:$0xff] }
 0x108   : > { %v2195_v40 = vld [vmem:[%s10640_s29 + $0x1e80] sm:$0xff]  ;;  %2192 = vst [vmem:[%s10645_s30 + $0xf30] sm:$0xff] %v2191_v38  ;;  %2194 = vst [vmem:[%s10645_s30 + $0xf38] sm:$0xff] %v2193_v39  ;;  %v2197_v41 = vld [vmem:[%s10640_s29 + $0x1e90] sm:$0xff] }
 0x109   : > { %2196 = vst [vmem:[%s10645_s30 + $0xf40] sm:$0xff] %v2195_v40  ;;  %v2199_v42 = vld [vmem:[%s10640_s29 + $0x1ea0] sm:$0xff]  ;;  %v2201_v43 = vld [vmem:[%s10640_s29 + $0x1eb0] sm:$0xff]  ;;  %2198 = vst [vmem:[%s10645_s30 + $0xf48] sm:$0xff] %v2197_v41 }
 0x10a   : > { %2200 = vst [vmem:[%s10645_s30 + $0xf50] sm:$0xff] %v2199_v42  ;;  %2202 = vst [vmem:[%s10645_s30 + $0xf58] sm:$0xff] %v2201_v43  ;;  %v2203_v44 = vld [vmem:[%s10640_s29 + $0x1ec0] sm:$0xff]  ;;  %v2205_v45 = vld [vmem:[%s10640_s29 + $0x1ed0] sm:$0xff] }
 0x10b   : > { %v2207_v46 = vld [vmem:[%s10640_s29 + $0x1ee0] sm:$0xff]  ;;  %2204 = vst [vmem:[%s10645_s30 + $0xf60] sm:$0xff] %v2203_v44  ;;  %2206 = vst [vmem:[%s10645_s30 + $0xf68] sm:$0xff] %v2205_v45  ;;  %v2209_v47 = vld [vmem:[%s10640_s29 + $0x1ef0] sm:$0xff] }
 0x10c   : > { %2208 = vst [vmem:[%s10645_s30 + $0xf70] sm:$0xff] %v2207_v46  ;;  %v2211_v48 = vld [vmem:[%s10640_s29 + $0x1f00] sm:$0xff]  ;;  %v2213_v49 = vld [vmem:[%s10640_s29 + $0x1f10] sm:$0xff]  ;;  %2210 = vst [vmem:[%s10645_s30 + $0xf78] sm:$0xff] %v2209_v47 }
 0x10d   : > { %2212 = vst [vmem:[%s10645_s30 + $0xf80] sm:$0xff] %v2211_v48  ;;  %2214 = vst [vmem:[%s10645_s30 + $0xf88] sm:$0xff] %v2213_v49  ;;  %v2215_v50 = vld [vmem:[%s10640_s29 + $0x1f20] sm:$0xff]  ;;  %v2217_v51 = vld [vmem:[%s10640_s29 + $0x1f30] sm:$0xff] }
 0x10e   : > { %v2219_v52 = vld [vmem:[%s10640_s29 + $0x1f40] sm:$0xff]  ;;  %2216 = vst [vmem:[%s10645_s30 + $0xf90] sm:$0xff] %v2215_v50  ;;  %2218 = vst [vmem:[%s10645_s30 + $0xf98] sm:$0xff] %v2217_v51  ;;  %v2221_v53 = vld [vmem:[%s10640_s29 + $0x1f50] sm:$0xff] }
 0x10f   : > { %2220 = vst [vmem:[%s10645_s30 + $0xfa0] sm:$0xff] %v2219_v52  ;;  %v2223_v54 = vld [vmem:[%s10640_s29 + $0x1f60] sm:$0xff]  ;;  %v2225_v55 = vld [vmem:[%s10640_s29 + $0x1f70] sm:$0xff]  ;;  %2222 = vst [vmem:[%s10645_s30 + $0xfa8] sm:$0xff] %v2221_v53 }
 0x110   : > { %2224 = vst [vmem:[%s10645_s30 + $0xfb0] sm:$0xff] %v2223_v54  ;;  %2226 = vst [vmem:[%s10645_s30 + $0xfb8] sm:$0xff] %v2225_v55  ;;  %v2227_v56 = vld [vmem:[%s10640_s29 + $0x1f80] sm:$0xff]  ;;  %v2229_v57 = vld [vmem:[%s10640_s29 + $0x1f90] sm:$0xff] }
 0x111   : > { %v2231_v58 = vld [vmem:[%s10640_s29 + $0x1fa0] sm:$0xff]  ;;  %2228 = vst [vmem:[%s10645_s30 + $0xfc0] sm:$0xff] %v2227_v56  ;;  %2230 = vst [vmem:[%s10645_s30 + $0xfc8] sm:$0xff] %v2229_v57  ;;  %v2233_v59 = vld [vmem:[%s10640_s29 + $0x1fb0] sm:$0xff] }
 0x112   : > { %2232 = vst [vmem:[%s10645_s30 + $0xfd0] sm:$0xff] %v2231_v58  ;;  %v2235_v60 = vld [vmem:[%s10640_s29 + $0x1fc0] sm:$0xff]  ;;  %v2237_v61 = vld [vmem:[%s10640_s29 + $0x1fd0] sm:$0xff]  ;;  %2234 = vst [vmem:[%s10645_s30 + $0xfd8] sm:$0xff] %v2233_v59 }
 0x113   : > { %2236 = vst [vmem:[%s10645_s30 + $0xfe0] sm:$0xff] %v2235_v60  ;;  %2238 = vst [vmem:[%s10645_s30 + $0xfe8] sm:$0xff] %v2237_v61  ;;  %v2239_v62 = vld [vmem:[%s10640_s29 + $0x1fe0] sm:$0xff]  ;;  %v2241_v63 = vld [vmem:[%s10640_s29 + $0x1ff0] sm:$0xff] }
 0x114   : > { %2240 = vst [vmem:[%s10645_s30 + $0xff0] sm:$0xff] %v2239_v62  ;;  %2242 = vst [vmem:[%s10645_s30 + $0xff8] sm:$0xff] %v2241_v63 }
 0x115 PF: > { %p9036_p7 = scmp.ge.s32.totalorder %s10571_s17, 1  ;;  %p4347_p8 = scmp.lt.s32.totalorder %s10571_s17, 3 }
 0x117   : > { %p4348_p9 = pnand %p9036_p7, %p4347_p8 }
 0x118   : > { %s4354_s5 = sand.u32 (!%p4348_p9), 1, %s10563_s15   ;;  %v11674_v0 = vld [vmem:[%s12594_s0] sm:$0xff] (!%p4348_p9) }
 0x119   : > { %4351 = sbr.rel (%p4348_p9) target bundleno = 1100 (0x44c), region = 84  ;;  %v11679_v1 = vld [vmem:[%s12594_s0 + $0x80] sm:$0xff] (!%p4348_p9)  ;;  %s9037_s12 = sshll.u32 (!%p4348_p9), %s4354_s5, 12 }
 0x11a   : > { %v11684_v2 = vld [vmem:[%s12594_s0 + $0x40] sm:$0xff] (!%p4348_p9)  ;;  %v9041_v3 = vcombine.low (!%p4348_p9), %v11674_v0, %v11679_v1  ;;  %v9042_v4 = vcombine.high (!%p4348_p9), %v11674_v0, %v11679_v1  ;;  %s11701_s17 = scalar_lea.vmem (!%p4348_p9), [#allocation2], %s9037_s12  ;;  %s9038_s20 = sshll.u32 (!%p4348_p9), %s4354_s5, 5 }
 0x11b   : > { %v11695_v5 = vld [vmem:[%s12594_s0 + $0xc0] sm:$0xff] (!%p4348_p9)  ;;  %v9783_v12 = vld [vmem:[%s11701_s17 + $0x14] ss:$8 sps:$4 sm:$0xff] (!%p4348_p9)   ;;  %v9787_v14 = vld [vmem:[%s11701_s17 + $0x10] ss:$8 sps:$4 sm:$0xff] (!%p4348_p9)   ;;  %s4385_s15 = scalar_lea.vmem (!%p4348_p9), [#allocation3], %s9038_s20 }
 0x11c   : > { %v9057_v6 = vcombine.low (!%p4348_p9), %v11684_v2, %v11695_v5  ;;  %v9058_v7 = vcombine.high (!%p4348_p9), %v11684_v2, %v11695_v5  ;;  %v9777_v8 = vld [vmem:[%s11701_s17 + $0x4] ss:$8 sps:$4 sm:$0xff] (!%p4348_p9)   ;;  %7886 = vmatprep.mubr.bf16.mxu1 (!%p4348_p9), %v9042_v4  ;;  %v9781_v10 = vld [vmem:[%s11701_s17] ss:$8 sps:$4 sm:$0xff] (!%p4348_p9)   ;;  %v9785_v13 = vld [vmem:[%s11701_s17 + $0x814] ss:$8 sps:$4 sm:$0xff] (!%p4348_p9)  }
 0x11d   : > { %v9779_v9 = vld [vmem:[%s11701_s17 + $0x804] ss:$8 sps:$4 sm:$0xff] (!%p4348_p9)   ;;  %7854 = vmatprep.subr.bf16.mxu1 (!%p4348_p9), %v9777_v8  ;;  %v9782_v11 = vld [vmem:[%s11701_s17 + $0x800] ss:$8 sps:$4 sm:$0xff] (!%p4348_p9)   ;;  %v9788_v15 = vld [vmem:[%s11701_s17 + $0x810] ss:$8 sps:$4 sm:$0xff] (!%p4348_p9)  }
 0x11e   : > { %8310 = vmatprep.mubr.bf16.mxu0 (!%p4348_p9), %v9058_v7  ;;  %8278 = vmatprep.subr.bf16.mxu0 (!%p4348_p9), %v9779_v9  ;;  %v9789_v16 = vld [vmem:[%s11701_s17 + $0x24] ss:$8 sps:$4 sm:$0xff] (!%p4348_p9)   ;;  %v9793_v18 = vld [vmem:[%s11701_s17 + $0x20] ss:$8 sps:$4 sm:$0xff] (!%p4348_p9)   ;;  %v9795_v20 = vld [vmem:[%s11701_s17 + $0x34] ss:$8 sps:$4 sm:$0xff] (!%p4348_p9)  }
 0x11f   : > { %7855 = vmatpush1.bf16.msra.mxu1 (!%p4348_p9), %v9781_v10  ;;  %8279 = vmatpush1.bf16.msra.mxu0 (!%p4348_p9), %v9782_v11  ;;  %v9791_v17 = vld [vmem:[%s11701_s17 + $0x824] ss:$8 sps:$4 sm:$0xff] (!%p4348_p9)   ;;  %v9794_v19 = vld [vmem:[%s11701_s17 + $0x820] ss:$8 sps:$4 sm:$0xff] (!%p4348_p9)   ;;  %v9797_v21 = vld [vmem:[%s11701_s17 + $0x834] ss:$8 sps:$4 sm:$0xff] (!%p4348_p9)  }
 0x120   : > { %7856 = vmatprep.subr.bf16.mxu1 %v9783_v12  ;;  %8280 = vmatprep.subr.bf16.mxu0 %v9785_v13  ;;  %v9799_v22 = vld [vmem:[%s11701_s17 + $0x30] ss:$8 sps:$4 sm:$0xff]   ;;  %v9801_v24 = vld [vmem:[%s11701_s17 + $0x44] ss:$8 sps:$4 sm:$0xff]   ;;  %v9805_v26 = vld [vmem:[%s11701_s17 + $0x40] ss:$8 sps:$4 sm:$0xff]  }
 0x121   : > { %v9800_v23 = vld [vmem:[%s11701_s17 + $0x830] ss:$8 sps:$4 sm:$0xff]   ;;  %v9803_v25 = vld [vmem:[%s11701_s17 + $0x844] ss:$8 sps:$4 sm:$0xff]   ;;  %v9806_v27 = vld [vmem:[%s11701_s17 + $0x840] ss:$8 sps:$4 sm:$0xff]  }
 0x122   : > { %v9807_v28 = vld [vmem:[%s11701_s17 + $0x54] ss:$8 sps:$4 sm:$0xff]   ;;  %v9811_v30 = vld [vmem:[%s11701_s17 + $0x50] ss:$8 sps:$4 sm:$0xff]   ;;  %v9813_v32 = vld [vmem:[%s11701_s17 + $0x64] ss:$8 sps:$4 sm:$0xff]  }
 0x123   : > { %7857 = vmatpush1.bf16.msra.mxu1 %v9787_v14  ;;  %8281 = vmatpush1.bf16.msra.mxu0 %v9788_v15  ;;  %v9809_v29 = vld [vmem:[%s11701_s17 + $0x854] ss:$8 sps:$4 sm:$0xff]   ;;  %v9812_v31 = vld [vmem:[%s11701_s17 + $0x850] ss:$8 sps:$4 sm:$0xff]   ;;  %v9815_v33 = vld [vmem:[%s11701_s17 + $0x864] ss:$8 sps:$4 sm:$0xff]  }
 0x124   : > { %7858 = vmatprep.subr.bf16.mxu1 %v9789_v16  ;;  %8282 = vmatprep.subr.bf16.mxu0 %v9791_v17  ;;  %v9817_v34 = vld [vmem:[%s11701_s17 + $0x60] ss:$8 sps:$4 sm:$0xff]   ;;  %v9819_v36 = vld [vmem:[%s11701_s17 + $0x74] ss:$8 sps:$4 sm:$0xff]   ;;  %v9823_v38 = vld [vmem:[%s11701_s17 + $0x70] ss:$8 sps:$4 sm:$0xff]  }
 0x125   : > { %v9818_v35 = vld [vmem:[%s11701_s17 + $0x860] ss:$8 sps:$4 sm:$0xff]   ;;  %v9821_v37 = vld [vmem:[%s11701_s17 + $0x874] ss:$8 sps:$4 sm:$0xff]   ;;  %v9824_v39 = vld [vmem:[%s11701_s17 + $0x870] ss:$8 sps:$4 sm:$0xff]  }
 0x126   : > { %v9825_v40 = vld [vmem:[%s11701_s17 + $0x84] ss:$8 sps:$4 sm:$0xff]   ;;  %v9829_v42 = vld [vmem:[%s11701_s17 + $0x80] ss:$8 sps:$4 sm:$0xff]   ;;  %v9831_v44 = vld [vmem:[%s11701_s17 + $0x94] ss:$8 sps:$4 sm:$0xff]  }
 0x127   : > { %7859 = vmatpush1.bf16.msra.mxu1 %v9793_v18  ;;  %8283 = vmatpush1.bf16.msra.mxu0 %v9794_v19  ;;  %v9827_v41 = vld [vmem:[%s11701_s17 + $0x884] ss:$8 sps:$4 sm:$0xff]   ;;  %v9830_v43 = vld [vmem:[%s11701_s17 + $0x880] ss:$8 sps:$4 sm:$0xff]   ;;  %v9833_v45 = vld [vmem:[%s11701_s17 + $0x894] ss:$8 sps:$4 sm:$0xff]  }
 0x128   : > { %7860 = vmatprep.subr.bf16.mxu1 %v9795_v20  ;;  %8284 = vmatprep.subr.bf16.mxu0 %v9797_v21  ;;  %v9835_v46 = vld [vmem:[%s11701_s17 + $0x90] ss:$8 sps:$4 sm:$0xff]   ;;  %v9837_v48 = vld [vmem:[%s11701_s17 + $0xa4] ss:$8 sps:$4 sm:$0xff]   ;;  %v9841_v50 = vld [vmem:[%s11701_s17 + $0xa0] ss:$8 sps:$4 sm:$0xff]  }
 0x129   : > { %v9836_v47 = vld [vmem:[%s11701_s17 + $0x890] ss:$8 sps:$4 sm:$0xff]   ;;  %v9839_v49 = vld [vmem:[%s11701_s17 + $0x8a4] ss:$8 sps:$4 sm:$0xff]   ;;  %v9842_v51 = vld [vmem:[%s11701_s17 + $0x8a0] ss:$8 sps:$4 sm:$0xff]  }
 0x12a   : > { %v9843_v52 = vld [vmem:[%s11701_s17 + $0xb4] ss:$8 sps:$4 sm:$0xff]   ;;  %v9847_v54 = vld [vmem:[%s11701_s17 + $0xb0] ss:$8 sps:$4 sm:$0xff]   ;;  %v9849_v56 = vld [vmem:[%s11701_s17 + $0xc4] ss:$8 sps:$4 sm:$0xff]  }
 0x12b   : > { %7861 = vmatpush1.bf16.msra.mxu1 %v9799_v22  ;;  %8285 = vmatpush1.bf16.msra.mxu0 %v9800_v23  ;;  %v9845_v53 = vld [vmem:[%s11701_s17 + $0x8b4] ss:$8 sps:$4 sm:$0xff]   ;;  %v9848_v55 = vld [vmem:[%s11701_s17 + $0x8b0] ss:$8 sps:$4 sm:$0xff]   ;;  %v9851_v57 = vld [vmem:[%s11701_s17 + $0x8c4] ss:$8 sps:$4 sm:$0xff]  }
 0x12c   : > { %7862 = vmatprep.subr.bf16.mxu1 %v9801_v24  ;;  %8286 = vmatprep.subr.bf16.mxu0 %v9803_v25  ;;  %v9853_v58 = vld [vmem:[%s11701_s17 + $0xc0] ss:$8 sps:$4 sm:$0xff]   ;;  %v9855_v60 = vld [vmem:[%s11701_s17 + $0xd4] ss:$8 sps:$4 sm:$0xff]   ;;  %v9859_v62 = vld [vmem:[%s11701_s17 + $0xd0] ss:$8 sps:$4 sm:$0xff]  }
 0x12d   : > { %v9854_v59 = vld [vmem:[%s11701_s17 + $0x8c0] ss:$8 sps:$4 sm:$0xff]   ;;  %v9857_v61 = vld [vmem:[%s11701_s17 + $0x8d4] ss:$8 sps:$4 sm:$0xff]   ;;  %v9860_v63 = vld [vmem:[%s11701_s17 + $0x8d0] ss:$8 sps:$4 sm:$0xff]  }
 0x12e   : > { %v9861_v4 = vld [vmem:[%s11701_s17 + $0xe4] ss:$8 sps:$4 sm:$0xff]   ;;  %v9865_v8 = vld [vmem:[%s11701_s17 + $0xe0] ss:$8 sps:$4 sm:$0xff]   ;;  %v9867_v10 = vld [vmem:[%s11701_s17 + $0xf4] ss:$8 sps:$4 sm:$0xff]  }
 0x12f   : > { %7863 = vmatpush1.bf16.msra.mxu1 %v9805_v26  ;;  %8287 = vmatpush1.bf16.msra.mxu0 %v9806_v27  ;;  %v9863_v7 = vld [vmem:[%s11701_s17 + $0x8e4] ss:$8 sps:$4 sm:$0xff]   ;;  %v9866_v9 = vld [vmem:[%s11701_s17 + $0x8e0] ss:$8 sps:$4 sm:$0xff]   ;;  %v9869_v11 = vld [vmem:[%s11701_s17 + $0x8f4] ss:$8 sps:$4 sm:$0xff]  }
 0x130   : > { %7864 = vmatprep.subr.bf16.mxu1 %v9807_v28  ;;  %8288 = vmatprep.subr.bf16.mxu0 %v9809_v29  ;;  %v9871_v12 = vld [vmem:[%s11701_s17 + $0xf0] ss:$8 sps:$4 sm:$0xff]   ;;  %v9875_v14 = vld [vmem:[%s11701_s17 + $0x104] ss:$8 sps:$4 sm:$0xff]   ;;  %v9873_v20 = vld [vmem:[%s11701_s17 + $0x100] ss:$8 sps:$4 sm:$0xff]  }
 0x131   : > { %v9872_v13 = vld [vmem:[%s11701_s17 + $0x8f0] ss:$8 sps:$4 sm:$0xff]   ;;  %v9878_v15 = vld [vmem:[%s11701_s17 + $0x904] ss:$8 sps:$4 sm:$0xff]   ;;  %v9876_v21 = vld [vmem:[%s11701_s17 + $0x900] ss:$8 sps:$4 sm:$0xff]  }
 0x132   : > { %v4430_v16 = vld [vmem:[%s12594_s0 + $0x100] sm:$0xff]  ;;  %v9881_v22 = vld [vmem:[%s11701_s17 + $0x114] ss:$8 sps:$4 sm:$0xff]   ;;  %v9879_v26 = vld [vmem:[%s11701_s17 + $0x110] ss:$8 sps:$4 sm:$0xff]   ;;  %s9631_s5 = sshll.u32 (%p10630_p5), %s10615_s18, 3 }
 0x133   : > { %7865 = vmatpush1.bf16.msra.mxu1 %v9811_v30  ;;  %8289 = vmatpush1.bf16.msra.mxu0 %v9812_v31  ;;  %v4446_v17 = vld [vmem:[%s12594_s0 + $0x180] sm:$0xff]  ;;  %v9884_v23 = vld [vmem:[%s11701_s17 + $0x914] ss:$8 sps:$4 sm:$0xff]   ;;  %v9882_v27 = vld [vmem:[%s11701_s17 + $0x910] ss:$8 sps:$4 sm:$0xff]   ;;  %s8901_s25 = scalar_lea.vmem (%p10630_p5), %s12598_s4, %s9631_s5 }
 0x134   : > { %7866 = vmatprep.subr.bf16.mxu1 %v9813_v32  ;;  %8290 = vmatprep.subr.bf16.mxu0 %v9815_v33  ;;  %v4438_v18 = vld [vmem:[%s12594_s0 + $0x140] sm:$0xff]  ;;  %v9074_v24 = vcombine.high %v4430_v16, %v4446_v17  ;;  %v9893_v5 = vld [vmem:[%s11701_s17 + $0x134] ss:$8 sps:$4 sm:$0xff]   ;;  %v9891_v30 = vld [vmem:[%s11701_s17 + $0x130] ss:$8 sps:$4 sm:$0xff]  }
 0x135   : > { %v4454_v19 = vld [vmem:[%s12594_s0 + $0x1c0] sm:$0xff]  ;;  %v9894_v31 = vld [vmem:[%s11701_s17 + $0x930] ss:$8 sps:$4 sm:$0xff]  }
 0x136   : > { %v9090_v25 = vcombine.high %v4438_v18, %v4454_v19  ;;  %v9887_v28 = vld [vmem:[%s11701_s17 + $0x124] ss:$8 sps:$4 sm:$0xff]   ;;  %v9885_v0 = vld [vmem:[%s11701_s17 + $0x120] ss:$8 sps:$4 sm:$0xff]   ;;  %v9089_v2 = vcombine.low %v4438_v18, %v4454_v19  ;;  %v9951_v18 = vld [vmem:[%s11701_s17 + $0x1d0] ss:$8 sps:$4 sm:$0xff]  }
 0x137   : > { %7867 = vmatpush1.bf16.msra.mxu1 %v9817_v34  ;;  %8291 = vmatpush1.bf16.msra.mxu0 %v9818_v35  ;;  %v9890_v29 = vld [vmem:[%s11701_s17 + $0x924] ss:$8 sps:$4 sm:$0xff]   ;;  %v9888_v1 = vld [vmem:[%s11701_s17 + $0x920] ss:$8 sps:$4 sm:$0xff]   ;;  %v9954_v19 = vld [vmem:[%s11701_s17 + $0x9d0] ss:$8 sps:$4 sm:$0xff]  }
 0x138   : > { %7868 = vmatprep.subr.bf16.mxu1 %v9819_v36  ;;  %8292 = vmatprep.subr.bf16.mxu0 %v9821_v37  ;;  %v9899_v32 = vld [vmem:[%s11701_s17 + $0x144] ss:$8 sps:$4 sm:$0xff]   ;;  %v9897_v34 = vld [vmem:[%s11701_s17 + $0x140] ss:$8 sps:$4 sm:$0xff]   ;;  %v9905_v36 = vld [vmem:[%s11701_s17 + $0x154] ss:$8 sps:$4 sm:$0xff]  }
 0x139   : > { %v9902_v33 = vld [vmem:[%s11701_s17 + $0x944] ss:$8 sps:$4 sm:$0xff]   ;;  %v9900_v35 = vld [vmem:[%s11701_s17 + $0x940] ss:$8 sps:$4 sm:$0xff]   ;;  %v9908_v37 = vld [vmem:[%s11701_s17 + $0x954] ss:$8 sps:$4 sm:$0xff]  }
 0x13b   : > { %7869 = vmatpush1.bf16.msra.mxu1 %v9823_v38  ;;  %8293 = vmatpush1.bf16.msra.mxu0 %v9824_v39  ;;  %v9903_v38 = vld [vmem:[%s11701_s17 + $0x150] ss:$8 sps:$4 sm:$0xff]  }
 0x13c   : > { %7870 = vmatprep.subr.bf16.mxu1 %v9825_v40  ;;  %8294 = vmatprep.subr.bf16.mxu0 %v9827_v41  ;;  %v9906_v39 = vld [vmem:[%s11701_s17 + $0x950] ss:$8 sps:$4 sm:$0xff]   ;;  %v9911_v40 = vld [vmem:[%s11701_s17 + $0x164] ss:$8 sps:$4 sm:$0xff]  }
 0x13d   : > { %v9914_v41 = vld [vmem:[%s11701_s17 + $0x964] ss:$8 sps:$4 sm:$0xff]  }
 0x13f   : > { %7871 = vmatpush1.bf16.msra.mxu1 %v9829_v42  ;;  %8295 = vmatpush1.bf16.msra.mxu0 %v9830_v43  ;;  %v11814_v42 = vld [vmem:[%s12594_s0 + $0x8] sm:$0xff] }
 0x140   : > { %7872 = vmatprep.subr.bf16.mxu1 %v9831_v44  ;;  %8296 = vmatprep.subr.bf16.mxu0 %v9833_v45  ;;  %v11819_v43 = vld [vmem:[%s12594_s0 + $0x88] sm:$0xff] }
 0x141   : > { %v9909_v44 = vld [vmem:[%s11701_s17 + $0x160] ss:$8 sps:$4 sm:$0xff]   ;;  %v9044_v45 = vcombine.high %v11814_v42, %v11819_v43 }
 0x143   : > { %7873 = vmatpush1.bf16.msra.mxu1 %v9835_v46  ;;  %8297 = vmatpush1.bf16.msra.mxu0 %v9836_v47  ;;  %v9912_v46 = vld [vmem:[%s11701_s17 + $0x960] ss:$8 sps:$4 sm:$0xff]  }
 0x144   : > { %7874 = vmatprep.subr.bf16.mxu1 %v9837_v48  ;;  %8298 = vmatprep.subr.bf16.mxu0 %v9839_v49  ;;  %v11828_v47 = vld [vmem:[%s12594_s0 + $0x48] sm:$0xff]  ;;  %v9917_v49 = vld [vmem:[%s11701_s17 + $0x174] ss:$8 sps:$4 sm:$0xff]  }
 0x145   : > { %v11833_v48 = vld [vmem:[%s12594_s0 + $0xc8] sm:$0xff] }
 0x147   : > { %7875 = vmatpush1.bf16.msra.mxu1 %v9841_v50  ;;  %8299 = vmatpush1.bf16.msra.mxu0 %v9842_v51  ;;  %v9060_v50 = vcombine.high %v11828_v47, %v11833_v48  ;;  %v9920_v51 = vld [vmem:[%s11701_s17 + $0x974] ss:$8 sps:$4 sm:$0xff]  }
 0x148   : > { %7876 = vmatprep.subr.bf16.mxu1 %v9843_v52  ;;  %8300 = vmatprep.subr.bf16.mxu0 %v9845_v53  ;;  %v9915_v52 = vld [vmem:[%s11701_s17 + $0x170] ss:$8 sps:$4 sm:$0xff]  }
 0x149   : > { %v9918_v53 = vld [vmem:[%s11701_s17 + $0x970] ss:$8 sps:$4 sm:$0xff]  }
 0x14b   : > { %7877 = vmatpush1.bf16.msra.mxu1 %v9847_v54  ;;  %8301 = vmatpush1.bf16.msra.mxu0 %v9848_v55  ;;  %v9923_v54 = vld [vmem:[%s11701_s17 + $0x184] ss:$8 sps:$4 sm:$0xff]  }
 0x14c   : > { %7878 = vmatprep.subr.bf16.mxu1 %v9849_v56  ;;  %8302 = vmatprep.subr.bf16.mxu0 %v9851_v57  ;;  %v9926_v55 = vld [vmem:[%s11701_s17 + $0x984] ss:$8 sps:$4 sm:$0xff]   ;;  %v9921_v56 = vld [vmem:[%s11701_s17 + $0x180] ss:$8 sps:$4 sm:$0xff]  }
 0x14d   : > { %v9924_v57 = vld [vmem:[%s11701_s17 + $0x980] ss:$8 sps:$4 sm:$0xff]  }
 0x14f   : > { %7879 = vmatpush1.bf16.msra.mxu1 %v9853_v58  ;;  %8303 = vmatpush1.bf16.msra.mxu0 %v9854_v59  ;;  %v9929_v58 = vld [vmem:[%s11701_s17 + $0x194] ss:$8 sps:$4 sm:$0xff]  }
 0x150   : > { %7880 = vmatprep.subr.bf16.mxu1 %v9855_v60  ;;  %8304 = vmatprep.subr.bf16.mxu0 %v9857_v61  ;;  %v9932_v59 = vld [vmem:[%s11701_s17 + $0x994] ss:$8 sps:$4 sm:$0xff]   ;;  %v9927_v60 = vld [vmem:[%s11701_s17 + $0x190] ss:$8 sps:$4 sm:$0xff]  }
 0x151   : > { %v9930_v61 = vld [vmem:[%s11701_s17 + $0x990] ss:$8 sps:$4 sm:$0xff]  }
 0x153   : > { %7881 = vmatpush1.bf16.msra.mxu1 %v9859_v62  ;;  %8305 = vmatpush1.bf16.msra.mxu0 %v9860_v63  ;;  %v9935_v62 = vld [vmem:[%s11701_s17 + $0x1a4] ss:$8 sps:$4 sm:$0xff]  }
 0x154   : > { %7882 = vmatprep.subr.bf16.mxu1 %v9861_v4  ;;  %8306 = vmatprep.subr.bf16.mxu0 %v9863_v7  ;;  %v9938_v63 = vld [vmem:[%s11701_s17 + $0x9a4] ss:$8 sps:$4 sm:$0xff]   ;;  %v9933_v4 = vld [vmem:[%s11701_s17 + $0x1a0] ss:$8 sps:$4 sm:$0xff]  }
 0x155   : > { %v9936_v7 = vld [vmem:[%s11701_s17 + $0x9a0] ss:$8 sps:$4 sm:$0xff]  }
 0x157   : > { %7883 = vmatpush1.bf16.msra.mxu1 %v9865_v8  ;;  %8307 = vmatpush1.bf16.msra.mxu0 %v9866_v9  ;;  %v9941_v8 = vld [vmem:[%s11701_s17 + $0x1b4] ss:$8 sps:$4 sm:$0xff]  }
 0x158   : > { %7884 = vmatprep.subr.bf16.mxu1 %v9867_v10  ;;  %8308 = vmatprep.subr.bf16.mxu0 %v9869_v11  ;;  %v9944_v9 = vld [vmem:[%s11701_s17 + $0x9b4] ss:$8 sps:$4 sm:$0xff]   ;;  %v9939_v10 = vld [vmem:[%s11701_s17 + $0x1b0] ss:$8 sps:$4 sm:$0xff]  }
 0x159   : > { %v9942_v11 = vld [vmem:[%s11701_s17 + $0x9b0] ss:$8 sps:$4 sm:$0xff]  }
 0x15b   : > { %7885 = vmatpush1.bf16.msra.mxu1 %v9871_v12  ;;  %8309 = vmatpush1.bf16.msra.mxu0 %v9872_v13  ;;  %v9947_v12 = vld [vmem:[%s11701_s17 + $0x1c4] ss:$8 sps:$4 sm:$0xff]  }
 0x15c   : > { %7907 = vmatprep.subr.bf16.mxu1 %v9875_v14  ;;  %8331 = vmatprep.subr.bf16.mxu0 %v9878_v15  ;;  %v9950_v13 = vld [vmem:[%s11701_s17 + $0x9c4] ss:$8 sps:$4 sm:$0xff]   ;;  %v9945_v14 = vld [vmem:[%s11701_s17 + $0x1c0] ss:$8 sps:$4 sm:$0xff]  }
 0x15d   : > { %v9948_v15 = vld [vmem:[%s11701_s17 + $0x9c0] ss:$8 sps:$4 sm:$0xff]  }
 0x15e   : > { %7887 = vmatmul.mubr.bf16.vlgmr.msra.gmra.mrb[0].mxu1 %v9041_v3  ;;  %8311 = vmatmul.mubr.bf16.vlgmr.msra.gmra.mrb[0].mxu0 %v9057_v6  ;;  %v9073_v3 = vcombine.low %v4430_v16, %v4446_v17  ;;  %v9896_v6 = vld [vmem:[%s11701_s17 + $0x934] ss:$8 sps:$4 sm:$0xff]  }
 0x15f   : > { %7908 = vmatpush1.bf16.msra.mxu1 %v9873_v20  ;;  %8332 = vmatpush1.bf16.msra.mxu0 %v9876_v21  ;;  %v9953_v16 = vld [vmem:[%s11701_s17 + $0x1d4] ss:$8 sps:$4 sm:$0xff]   ;;  %v9959_v20 = vld [vmem:[%s11701_s17 + $0x1e4] ss:$8 sps:$4 sm:$0xff]  }
 0x160   : > { %7909 = vmatprep.subr.bf16.mxu1 %v9881_v22  ;;  %8333 = vmatprep.subr.bf16.mxu0 %v9884_v23  ;;  %v9956_v17 = vld [vmem:[%s11701_s17 + $0x9d4] ss:$8 sps:$4 sm:$0xff]   ;;  %v9962_v21 = vld [vmem:[%s11701_s17 + $0x9e4] ss:$8 sps:$4 sm:$0xff]   ;;  %v9957_v22 = vld [vmem:[%s11701_s17 + $0x1e0] ss:$8 sps:$4 sm:$0xff]  }
 0x161   : > { %7896 = vmatprep.mubr.bf16.mxu1 %v9074_v24  ;;  %8320 = vmatprep.mubr.bf16.mxu0 %v9090_v25  ;;  %v9960_v23 = vld [vmem:[%s11701_s17 + $0x9e0] ss:$8 sps:$4 sm:$0xff]   ;;  %v9965_v24 = vld [vmem:[%s11701_s17 + $0x1f4] ss:$8 sps:$4 sm:$0xff]  }
 0x162   : > { %v9968_v25 = vld [vmem:[%s11701_s17 + $0x9f4] ss:$8 sps:$4 sm:$0xff]  }
 0x163   : > { %7910 = vmatpush1.bf16.msra.mxu1 %v9879_v26  ;;  %8334 = vmatpush1.bf16.msra.mxu0 %v9882_v27  ;;  %v9963_v26 = vld [vmem:[%s11701_s17 + $0x1f0] ss:$8 sps:$4 sm:$0xff]  }
 0x164   : > { %7911 = vmatprep.subr.bf16.mxu1 %v9887_v28  ;;  %8335 = vmatprep.subr.bf16.mxu0 %v9890_v29  ;;  %v9966_v27 = vld [vmem:[%s11701_s17 + $0x9f0] ss:$8 sps:$4 sm:$0xff]   ;;  %v9971_v28 = vld [vmem:[%s11701_s17 + $0x204] ss:$8 sps:$4 sm:$0xff]  }
 0x165   : > { %v9974_v29 = vld [vmem:[%s11701_s17 + $0xa04] ss:$8 sps:$4 sm:$0xff]  }
 0x166   : > { %7897 = vmatmul.mubr.bf16.gmra.mrb[4].mxu1 %v9073_v3  ;;  %8321 = vmatmul.mubr.bf16.gmra.mrb[4].mxu0 %v9089_v2  ;;  %v4431_v3 = vld [vmem:[%s12594_s0 + $0x108] sm:$0xff] }
 0x167   : > { %7912 = vmatpush1.bf16.msra.mxu1 %v9885_v0  ;;  %8336 = vmatpush1.bf16.msra.mxu0 %v9888_v1  ;;  %v9969_v0 = vld [vmem:[%s11701_s17 + $0x200] ss:$8 sps:$4 sm:$0xff]  }
 0x168   : > { %7913 = vmatprep.subr.bf16.mxu1 %v9893_v5  ;;  %8337 = vmatprep.subr.bf16.mxu0 %v9896_v6  ;;  %v9972_v1 = vld [vmem:[%s11701_s17 + $0xa00] ss:$8 sps:$4 sm:$0xff]   ;;  %v9043_v5 = vcombine.low %v11814_v42, %v11819_v43  ;;  %v9059_v6 = vcombine.low %v11828_v47, %v11833_v48  ;;  %v11904_v42 = vld [vmem:[%s12594_s0 + $0x10] sm:$0xff] }
 0x169   : > { %7939 = vmatprep.mubr.bf16.mxu1 %v9044_v45  ;;  %8363 = vmatprep.mubr.bf16.mxu0 %v9060_v50  ;;  %v4447_v2 = vld [vmem:[%s12594_s0 + $0x188] sm:$0xff]  ;;  %v11909_v43 = vld [vmem:[%s12594_s0 + $0x90] sm:$0xff] }
 0x16a   : > { %v11919_v47 = vld [vmem:[%s12594_s0 + $0xd0] sm:$0xff]  ;;  %v9046_v50 = vcombine.high %v11904_v42, %v11909_v43 }
 0x16b   : > { %7914 = vmatpush1.bf16.msra.mxu1 %v9891_v30  ;;  %8338 = vmatpush1.bf16.msra.mxu0 %v9894_v31  ;;  %v4439_v30 = vld [vmem:[%s12594_s0 + $0x148] sm:$0xff]  ;;  %v9989_v48 = vld [vmem:[%s11701_s17 + $0x234] ss:$8 sps:$4 sm:$0xff]  }
 0x16c   : > { %7915 = vmatprep.subr.bf16.mxu1 %v9899_v32  ;;  %8339 = vmatprep.subr.bf16.mxu0 %v9902_v33  ;;  %v4455_v31 = vld [vmem:[%s12594_s0 + $0x1c8] sm:$0xff]  ;;  %v9977_v32 = vld [vmem:[%s11701_s17 + $0x214] ss:$8 sps:$4 sm:$0xff]  }
 0x16d   : > { %v9980_v33 = vld [vmem:[%s11701_s17 + $0xa14] ss:$8 sps:$4 sm:$0xff]   ;;  %v9091_v45 = vcombine.low %v4439_v30, %v4455_v31 }
 0x16f   : > { %7916 = vmatpush1.bf16.msra.mxu1 %v9897_v34  ;;  %8340 = vmatpush1.bf16.msra.mxu0 %v9900_v35  ;;  %v9076_v34 = vcombine.high %v4431_v3, %v4447_v2  ;;  %v9092_v35 = vcombine.high %v4439_v30, %v4455_v31  ;;  %v10055_v30 = vld [vmem:[%s11701_s17 + $0x2e4] ss:$8 sps:$4 sm:$0xff]  }
 0x170   : > { %7917 = vmatprep.subr.bf16.mxu1 %v9905_v36  ;;  %8341 = vmatprep.subr.bf16.mxu0 %v9908_v37  ;;  %v9975_v36 = vld [vmem:[%s11701_s17 + $0x210] ss:$8 sps:$4 sm:$0xff]   ;;  %v10058_v31 = vld [vmem:[%s11701_s17 + $0xae4] ss:$8 sps:$4 sm:$0xff]  }
 0x171   : > { %v9978_v37 = vld [vmem:[%s11701_s17 + $0xa10] ss:$8 sps:$4 sm:$0xff]  }
 0x173   : > { %7918 = vmatpush1.bf16.msra.mxu1 %v9903_v38  ;;  %8342 = vmatpush1.bf16.msra.mxu0 %v9906_v39  ;;  %v9983_v38 = vld [vmem:[%s11701_s17 + $0x224] ss:$8 sps:$4 sm:$0xff]  }
 0x174   : > { %7919 = vmatprep.subr.bf16.mxu1 %v9911_v40  ;;  %8343 = vmatprep.subr.bf16.mxu0 %v9914_v41  ;;  %v9986_v39 = vld [vmem:[%s11701_s17 + $0xa24] ss:$8 sps:$4 sm:$0xff]   ;;  %v9981_v40 = vld [vmem:[%s11701_s17 + $0x220] ss:$8 sps:$4 sm:$0xff]  }
 0x175   : > { %v9984_v41 = vld [vmem:[%s11701_s17 + $0xa20] ss:$8 sps:$4 sm:$0xff]  }
 0x177   : > { %7920 = vmatpush1.bf16.msra.mxu1 %v9909_v44  ;;  %8344 = vmatpush1.bf16.msra.mxu0 %v9912_v46  ;;  %v9075_v44 = vcombine.low %v4431_v3, %v4447_v2  ;;  %v11914_v46 = vld [vmem:[%s12594_s0 + $0x50] sm:$0xff] }
 0x178   : > { %7921 = vmatprep.subr.bf16.mxu1 %v9917_v49  ;;  %8345 = vmatprep.subr.bf16.mxu0 %v9920_v51  ;;  %v9992_v49 = vld [vmem:[%s11701_s17 + $0xa34] ss:$8 sps:$4 sm:$0xff]   ;;  %v9062_v51 = vcombine.high %v11914_v46, %v11919_v47 }
 0x179   : > { %v10049_v3 = vld [vmem:[%s11701_s17 + $0x2d4] ss:$8 sps:$4 sm:$0xff]  }
 0x17a   : > { %v10052_v2 = vld [vmem:[%s11701_s17 + $0xad4] ss:$8 sps:$4 sm:$0xff]  }
 0x17b   : > { %7922 = vmatpush1.bf16.msra.mxu1 %v9915_v52  ;;  %8346 = vmatpush1.bf16.msra.mxu0 %v9918_v53  ;;  %v9987_v52 = vld [vmem:[%s11701_s17 + $0x230] ss:$8 sps:$4 sm:$0xff]  }
 0x17c   : > { %7923 = vmatprep.subr.bf16.mxu1 %v9923_v54  ;;  %8347 = vmatprep.subr.bf16.mxu0 %v9926_v55  ;;  %v9990_v53 = vld [vmem:[%s11701_s17 + $0xa30] ss:$8 sps:$4 sm:$0xff]   ;;  %v9995_v54 = vld [vmem:[%s11701_s17 + $0x244] ss:$8 sps:$4 sm:$0xff]  }
 0x17d   : > { %v9998_v55 = vld [vmem:[%s11701_s17 + $0xa44] ss:$8 sps:$4 sm:$0xff]  }
 0x17f   : > { %7924 = vmatpush1.bf16.msra.mxu1 %v9921_v56  ;;  %8348 = vmatpush1.bf16.msra.mxu0 %v9924_v57  ;;  %v9993_v56 = vld [vmem:[%s11701_s17 + $0x240] ss:$8 sps:$4 sm:$0xff]  }
 0x180   : > { %7925 = vmatprep.subr.bf16.mxu1 %v9929_v58  ;;  %8349 = vmatprep.subr.bf16.mxu0 %v9932_v59  ;;  %v9996_v57 = vld [vmem:[%s11701_s17 + $0xa40] ss:$8 sps:$4 sm:$0xff]   ;;  %v10001_v58 = vld [vmem:[%s11701_s17 + $0x254] ss:$8 sps:$4 sm:$0xff]  }
 0x181   : > { %v10004_v59 = vld [vmem:[%s11701_s17 + $0xa54] ss:$8 sps:$4 sm:$0xff]  }
 0x183   : > { %7926 = vmatpush1.bf16.msra.mxu1 %v9927_v60  ;;  %8350 = vmatpush1.bf16.msra.mxu0 %v9930_v61  ;;  %v9999_v60 = vld [vmem:[%s11701_s17 + $0x250] ss:$8 sps:$4 sm:$0xff]  }
 0x184   : > { %7927 = vmatprep.subr.bf16.mxu1 %v9935_v62  ;;  %8351 = vmatprep.subr.bf16.mxu0 %v9938_v63  ;;  %v10002_v61 = vld [vmem:[%s11701_s17 + $0xa50] ss:$8 sps:$4 sm:$0xff]   ;;  %v10007_v62 = vld [vmem:[%s11701_s17 + $0x264] ss:$8 sps:$4 sm:$0xff]  }
 0x185   : > { %v10010_v63 = vld [vmem:[%s11701_s17 + $0xa64] ss:$8 sps:$4 sm:$0xff]  }
 0x187   : > { %7928 = vmatpush1.bf16.msra.mxu1 %v9933_v4  ;;  %8352 = vmatpush1.bf16.msra.mxu0 %v9936_v7  ;;  %v10005_v4 = vld [vmem:[%s11701_s17 + $0x260] ss:$8 sps:$4 sm:$0xff]  }
 0x188   : > { %7929 = vmatprep.subr.bf16.mxu1 %v9941_v8  ;;  %8353 = vmatprep.subr.bf16.mxu0 %v9944_v9  ;;  %v10008_v7 = vld [vmem:[%s11701_s17 + $0xa60] ss:$8 sps:$4 sm:$0xff]   ;;  %v10013_v8 = vld [vmem:[%s11701_s17 + $0x274] ss:$8 sps:$4 sm:$0xff]  }
 0x189   : > { %v10016_v9 = vld [vmem:[%s11701_s17 + $0xa74] ss:$8 sps:$4 sm:$0xff]  }
 0x18b   : > { %7930 = vmatpush1.bf16.msra.mxu1 %v9939_v10  ;;  %8354 = vmatpush1.bf16.msra.mxu0 %v9942_v11  ;;  %v10011_v10 = vld [vmem:[%s11701_s17 + $0x270] ss:$8 sps:$4 sm:$0xff]  }
 0x18c   : > { %7931 = vmatprep.subr.bf16.mxu1 %v9947_v12  ;;  %8355 = vmatprep.subr.bf16.mxu0 %v9950_v13  ;;  %v10014_v11 = vld [vmem:[%s11701_s17 + $0xa70] ss:$8 sps:$4 sm:$0xff]   ;;  %v10019_v12 = vld [vmem:[%s11701_s17 + $0x284] ss:$8 sps:$4 sm:$0xff]  }
 0x18d   : > { %v10022_v13 = vld [vmem:[%s11701_s17 + $0xa84] ss:$8 sps:$4 sm:$0xff]  }
 0x18f   : > { %7932 = vmatpush1.bf16.msra.mxu1 %v9945_v14  ;;  %8356 = vmatpush1.bf16.msra.mxu0 %v9948_v15  ;;  %v10017_v14 = vld [vmem:[%s11701_s17 + $0x280] ss:$8 sps:$4 sm:$0xff]  }
 0x190   : > { %7933 = vmatprep.subr.bf16.mxu1 %v9953_v16  ;;  %8357 = vmatprep.subr.bf16.mxu0 %v9956_v17  ;;  %v10020_v15 = vld [vmem:[%s11701_s17 + $0xa80] ss:$8 sps:$4 sm:$0xff]   ;;  %v10025_v16 = vld [vmem:[%s11701_s17 + $0x294] ss:$8 sps:$4 sm:$0xff]  }
 0x191   : > { %v10028_v17 = vld [vmem:[%s11701_s17 + $0xa94] ss:$8 sps:$4 sm:$0xff]  }
 0x193   : > { %7934 = vmatpush1.bf16.msra.mxu1 %v9951_v18  ;;  %8358 = vmatpush1.bf16.msra.mxu0 %v9954_v19  ;;  %v10023_v18 = vld [vmem:[%s11701_s17 + $0x290] ss:$8 sps:$4 sm:$0xff]  }
 0x194   : > { %7935 = vmatprep.subr.bf16.mxu1 %v9959_v20  ;;  %8359 = vmatprep.subr.bf16.mxu0 %v9962_v21  ;;  %v10026_v19 = vld [vmem:[%s11701_s17 + $0xa90] ss:$8 sps:$4 sm:$0xff]   ;;  %v10031_v20 = vld [vmem:[%s11701_s17 + $0x2a4] ss:$8 sps:$4 sm:$0xff]  }
 0x195   : > { %v10034_v21 = vld [vmem:[%s11701_s17 + $0xaa4] ss:$8 sps:$4 sm:$0xff]  }
 0x197   : > { %7936 = vmatpush1.bf16.msra.mxu1 %v9957_v22  ;;  %8360 = vmatpush1.bf16.msra.mxu0 %v9960_v23  ;;  %v10029_v22 = vld [vmem:[%s11701_s17 + $0x2a0] ss:$8 sps:$4 sm:$0xff]  }
 0x198   : > { %7937 = vmatprep.subr.bf16.mxu1 %v9965_v24  ;;  %8361 = vmatprep.subr.bf16.mxu0 %v9968_v25  ;;  %v10032_v23 = vld [vmem:[%s11701_s17 + $0xaa0] ss:$8 sps:$4 sm:$0xff]   ;;  %v10037_v24 = vld [vmem:[%s11701_s17 + $0x2b4] ss:$8 sps:$4 sm:$0xff]  }
 0x199   : > { %v10040_v25 = vld [vmem:[%s11701_s17 + $0xab4] ss:$8 sps:$4 sm:$0xff]  }
 0x19b   : > { %7938 = vmatpush1.bf16.msra.mxu1 %v9963_v26  ;;  %8362 = vmatpush1.bf16.msra.mxu0 %v9966_v27  ;;  %v10035_v26 = vld [vmem:[%s11701_s17 + $0x2b0] ss:$8 sps:$4 sm:$0xff]  }
 0x19c   : > { %7960 = vmatprep.subr.bf16.mxu1 %v9971_v28  ;;  %8384 = vmatprep.subr.bf16.mxu0 %v9974_v29  ;;  %v10038_v27 = vld [vmem:[%s11701_s17 + $0xab0] ss:$8 sps:$4 sm:$0xff]   ;;  %v10043_v28 = vld [vmem:[%s11701_s17 + $0x2c4] ss:$8 sps:$4 sm:$0xff]  }
 0x19d   : > { %v10046_v29 = vld [vmem:[%s11701_s17 + $0xac4] ss:$8 sps:$4 sm:$0xff]  }
 0x19e   : > { %7940 = vmatmul.mubr.bf16.vlgmr.msra.gmra.mrb[0].mxu1 %v9043_v5  ;;  %8364 = vmatmul.mubr.bf16.vlgmr.msra.gmra.mrb[0].mxu0 %v9059_v6  ;;  %v10047_v5 = vld [vmem:[%s11701_s17 + $0x2d0] ss:$8 sps:$4 sm:$0xff]  }
 0x19f   : > { %7961 = vmatpush1.bf16.msra.mxu1 %v9969_v0  ;;  %8385 = vmatpush1.bf16.msra.mxu0 %v9972_v1  ;;  %v10041_v0 = vld [vmem:[%s11701_s17 + $0x2c0] ss:$8 sps:$4 sm:$0xff]   ;;  %v10050_v6 = vld [vmem:[%s11701_s17 + $0xad0] ss:$8 sps:$4 sm:$0xff]  }
 0x1a0   : > { %7962 = vmatprep.subr.bf16.mxu1 %v9977_v32  ;;  %8386 = vmatprep.subr.bf16.mxu0 %v9980_v33  ;;  %v10044_v1 = vld [vmem:[%s11701_s17 + $0xac0] ss:$8 sps:$4 sm:$0xff]  }
 0x1a1   : > { %7949 = vmatprep.mubr.bf16.mxu1 %v9076_v34  ;;  %8373 = vmatprep.mubr.bf16.mxu0 %v9092_v35  ;;  %v10053_v32 = vld [vmem:[%s11701_s17 + $0x2e0] ss:$8 sps:$4 sm:$0xff]   ;;  %v10061_v34 = vld [vmem:[%s11701_s17 + $0x2f4] ss:$8 sps:$4 sm:$0xff]  }
 0x1a2   : > { %v10056_v33 = vld [vmem:[%s11701_s17 + $0xae0] ss:$8 sps:$4 sm:$0xff]   ;;  %v10064_v35 = vld [vmem:[%s11701_s17 + $0xaf4] ss:$8 sps:$4 sm:$0xff]  }
 0x1a3   : > { %7963 = vmatpush1.bf16.msra.mxu1 %v9975_v36  ;;  %8387 = vmatpush1.bf16.msra.mxu0 %v9978_v37  ;;  %v10059_v36 = vld [vmem:[%s11701_s17 + $0x2f0] ss:$8 sps:$4 sm:$0xff]  }
 0x1a4   : > { %7964 = vmatprep.subr.bf16.mxu1 %v9983_v38  ;;  %8388 = vmatprep.subr.bf16.mxu0 %v9986_v39  ;;  %v10062_v37 = vld [vmem:[%s11701_s17 + $0xaf0] ss:$8 sps:$4 sm:$0xff]   ;;  %v10067_v38 = vld [vmem:[%s11701_s17 + $0x304] ss:$8 sps:$4 sm:$0xff]  }
 0x1a5   : > { %v10070_v39 = vld [vmem:[%s11701_s17 + $0xb04] ss:$8 sps:$4 sm:$0xff]  }
 0x1a6   : > { %7950 = vmatmul.mubr.bf16.gmra.mrb[4].mxu1 %v9075_v44  ;;  %8374 = vmatmul.mubr.bf16.gmra.mrb[4].mxu0 %v9091_v45  ;;  %v4432_v44 = vld [vmem:[%s12594_s0 + $0x110] sm:$0xff] }
 0x1a7   : > { %7965 = vmatpush1.bf16.msra.mxu1 %v9981_v40  ;;  %8389 = vmatpush1.bf16.msra.mxu0 %v9984_v41  ;;  %v10065_v40 = vld [vmem:[%s11701_s17 + $0x300] ss:$8 sps:$4 sm:$0xff]   ;;  %v4448_v45 = vld [vmem:[%s12594_s0 + $0x190] sm:$0xff] }
 0x1a8   : > { %7966 = vmatprep.subr.bf16.mxu1 %v9989_v48  ;;  %8390 = vmatprep.subr.bf16.mxu0 %v9992_v49  ;;  %v10068_v41 = vld [vmem:[%s11701_s17 + $0xb00] ss:$8 sps:$4 sm:$0xff]   ;;  %v9045_v48 = vcombine.low %v11904_v42, %v11909_v43  ;;  %v9061_v49 = vcombine.low %v11914_v46, %v11919_v47  ;;  %v10076_v42 = vld [vmem:[%s11701_s17 + $0xb14] ss:$8 sps:$4 sm:$0xff]   ;;  %v9078_v43 = vcombine.high %v4432_v44, %v4448_v45  ;;  %v10071_v47 = vld [vmem:[%s11701_s17 + $0x310] ss:$8 sps:$4 sm:$0xff]  }
 0x1a9   : > { %7992 = vmatprep.mubr.bf16.mxu1 %v9046_v50  ;;  %8416 = vmatprep.mubr.bf16.mxu0 %v9062_v51  ;;  %v4440_v50 = vld [vmem:[%s12594_s0 + $0x150] sm:$0xff] }
 0x1aa   : > { %v4456_v51 = vld [vmem:[%s12594_s0 + $0x1d0] sm:$0xff] }
 0x1ab   : > { %7967 = vmatpush1.bf16.msra.mxu1 %v9987_v52  ;;  %8391 = vmatpush1.bf16.msra.mxu0 %v9990_v53  ;;  %v10073_v52 = vld [vmem:[%s11701_s17 + $0x314] ss:$8 sps:$4 sm:$0xff]   ;;  %v9094_v46 = vcombine.high %v4440_v50, %v4456_v51  ;;  %v10074_v53 = vld [vmem:[%s11701_s17 + $0xb10] ss:$8 sps:$4 sm:$0xff]  }
 0x1ac   : > { %7968 = vmatprep.subr.bf16.mxu1 %v9995_v54  ;;  %8392 = vmatprep.subr.bf16.mxu0 %v9998_v55  ;;  %v10079_v54 = vld [vmem:[%s11701_s17 + $0x324] ss:$8 sps:$4 sm:$0xff]  }
 0x1ad   : > { %v10082_v55 = vld [vmem:[%s11701_s17 + $0xb24] ss:$8 sps:$4 sm:$0xff]  }
 0x1af   : > { %7969 = vmatpush1.bf16.msra.mxu1 %v9993_v56  ;;  %8393 = vmatpush1.bf16.msra.mxu0 %v9996_v57  ;;  %v10077_v56 = vld [vmem:[%s11701_s17 + $0x320] ss:$8 sps:$4 sm:$0xff]  }
 0x1b0   : > { %7970 = vmatprep.subr.bf16.mxu1 %v10001_v58  ;;  %8394 = vmatprep.subr.bf16.mxu0 %v10004_v59  ;;  %v10080_v57 = vld [vmem:[%s11701_s17 + $0xb20] ss:$8 sps:$4 sm:$0xff]   ;;  %v12008_v58 = vld [vmem:[%s12594_s0 + $0x18] sm:$0xff] }
 0x1b1   : > { %v12013_v59 = vld [vmem:[%s12594_s0 + $0x98] sm:$0xff] }
 0x1b3   : > { %7971 = vmatpush1.bf16.msra.mxu1 %v9999_v60  ;;  %8395 = vmatpush1.bf16.msra.mxu0 %v10002_v61  ;;  %v9077_v60 = vcombine.low %v4432_v44, %v4448_v45  ;;  %v9093_v61 = vcombine.low %v4440_v50, %v4456_v51  ;;  %v10145_v44 = vld [vmem:[%s11701_s17 + $0x3d4] ss:$8 sps:$4 sm:$0xff]   ;;  %v10151_v50 = vld [vmem:[%s11701_s17 + $0x3e4] ss:$8 sps:$4 sm:$0xff]  }
 0x1b4   : > { %7972 = vmatprep.subr.bf16.mxu1 %v10007_v62  ;;  %8396 = vmatprep.subr.bf16.mxu0 %v10010_v63  ;;  %v12018_v62 = vld [vmem:[%s12594_s0 + $0x58] sm:$0xff]  ;;  %v10154_v51 = vld [vmem:[%s11701_s17 + $0xbe4] ss:$8 sps:$4 sm:$0xff]  }
 0x1b5   : > { %v12023_v63 = vld [vmem:[%s12594_s0 + $0xd8] sm:$0xff] }
 0x1b6   : > { %v10148_v45 = vld [vmem:[%s11701_s17 + $0xbd4] ss:$8 sps:$4 sm:$0xff]  }
 0x1b7   : > { %7973 = vmatpush1.bf16.msra.mxu1 %v10005_v4  ;;  %8397 = vmatpush1.bf16.msra.mxu0 %v10008_v7  ;;  %v10085_v4 = vld [vmem:[%s11701_s17 + $0x334] ss:$8 sps:$4 sm:$0xff]  }
 0x1b8   : > { %7974 = vmatprep.subr.bf16.mxu1 %v10013_v8  ;;  %8398 = vmatprep.subr.bf16.mxu0 %v10016_v9  ;;  %v10088_v7 = vld [vmem:[%s11701_s17 + $0xb34] ss:$8 sps:$4 sm:$0xff]   ;;  %v9048_v8 = vcombine.high %v12008_v58, %v12013_v59  ;;  %v9064_v9 = vcombine.high %v12018_v62, %v12023_v63 }
 0x1bb   : > { %7975 = vmatpush1.bf16.msra.mxu1 %v10011_v10  ;;  %8399 = vmatpush1.bf16.msra.mxu0 %v10014_v11  ;;  %v10083_v10 = vld [vmem:[%s11701_s17 + $0x330] ss:$8 sps:$4 sm:$0xff]  }
 0x1bc   : > { %7976 = vmatprep.subr.bf16.mxu1 %v10019_v12  ;;  %8400 = vmatprep.subr.bf16.mxu0 %v10022_v13  ;;  %v10086_v11 = vld [vmem:[%s11701_s17 + $0xb30] ss:$8 sps:$4 sm:$0xff]   ;;  %v10091_v12 = vld [vmem:[%s11701_s17 + $0x344] ss:$8 sps:$4 sm:$0xff]  }
 0x1bd   : > { %v10094_v13 = vld [vmem:[%s11701_s17 + $0xb44] ss:$8 sps:$4 sm:$0xff]  }
 0x1bf   : > { %7977 = vmatpush1.bf16.msra.mxu1 %v10017_v14  ;;  %8401 = vmatpush1.bf16.msra.mxu0 %v10020_v15  ;;  %v10089_v14 = vld [vmem:[%s11701_s17 + $0x340] ss:$8 sps:$4 sm:$0xff]  }
 0x1c0   : > { %7978 = vmatprep.subr.bf16.mxu1 %v10025_v16  ;;  %8402 = vmatprep.subr.bf16.mxu0 %v10028_v17  ;;  %v10092_v15 = vld [vmem:[%s11701_s17 + $0xb40] ss:$8 sps:$4 sm:$0xff]   ;;  %v10097_v16 = vld [vmem:[%s11701_s17 + $0x354] ss:$8 sps:$4 sm:$0xff]  }
 0x1c1   : > { %v10100_v17 = vld [vmem:[%s11701_s17 + $0xb54] ss:$8 sps:$4 sm:$0xff]  }
 0x1c3   : > { %7979 = vmatpush1.bf16.msra.mxu1 %v10023_v18  ;;  %8403 = vmatpush1.bf16.msra.mxu0 %v10026_v19  ;;  %v10095_v18 = vld [vmem:[%s11701_s17 + $0x350] ss:$8 sps:$4 sm:$0xff]  }
 0x1c4   : > { %7980 = vmatprep.subr.bf16.mxu1 %v10031_v20  ;;  %8404 = vmatprep.subr.bf16.mxu0 %v10034_v21  ;;  %v10098_v19 = vld [vmem:[%s11701_s17 + $0xb50] ss:$8 sps:$4 sm:$0xff]   ;;  %v10103_v20 = vld [vmem:[%s11701_s17 + $0x364] ss:$8 sps:$4 sm:$0xff]  }
 0x1c5   : > { %v10106_v21 = vld [vmem:[%s11701_s17 + $0xb64] ss:$8 sps:$4 sm:$0xff]  }
 0x1c7   : > { %7981 = vmatpush1.bf16.msra.mxu1 %v10029_v22  ;;  %8405 = vmatpush1.bf16.msra.mxu0 %v10032_v23  ;;  %v10101_v22 = vld [vmem:[%s11701_s17 + $0x360] ss:$8 sps:$4 sm:$0xff]  }
 0x1c8   : > { %7982 = vmatprep.subr.bf16.mxu1 %v10037_v24  ;;  %8406 = vmatprep.subr.bf16.mxu0 %v10040_v25  ;;  %v10104_v23 = vld [vmem:[%s11701_s17 + $0xb60] ss:$8 sps:$4 sm:$0xff]   ;;  %v10109_v24 = vld [vmem:[%s11701_s17 + $0x374] ss:$8 sps:$4 sm:$0xff]  }
 0x1c9   : > { %v10112_v25 = vld [vmem:[%s11701_s17 + $0xb74] ss:$8 sps:$4 sm:$0xff]  }
 0x1cb   : > { %7983 = vmatpush1.bf16.msra.mxu1 %v10035_v26  ;;  %8407 = vmatpush1.bf16.msra.mxu0 %v10038_v27  ;;  %v10107_v26 = vld [vmem:[%s11701_s17 + $0x370] ss:$8 sps:$4 sm:$0xff]  }
 0x1cc   : > { %7984 = vmatprep.subr.bf16.mxu1 %v10043_v28  ;;  %8408 = vmatprep.subr.bf16.mxu0 %v10046_v29  ;;  %v10110_v27 = vld [vmem:[%s11701_s17 + $0xb70] ss:$8 sps:$4 sm:$0xff]   ;;  %v10115_v28 = vld [vmem:[%s11701_s17 + $0x384] ss:$8 sps:$4 sm:$0xff]  }
 0x1cd   : > { %v10118_v29 = vld [vmem:[%s11701_s17 + $0xb84] ss:$8 sps:$4 sm:$0xff]  }
 0x1cf   : > { %7985 = vmatpush1.bf16.msra.mxu1 %v10041_v0  ;;  %8409 = vmatpush1.bf16.msra.mxu0 %v10044_v1  ;;  %v10113_v0 = vld [vmem:[%s11701_s17 + $0x380] ss:$8 sps:$4 sm:$0xff]  }
 0x1d0   : > { %7986 = vmatprep.subr.bf16.mxu1 %v10049_v3  ;;  %8410 = vmatprep.subr.bf16.mxu0 %v10052_v2  ;;  %v10116_v1 = vld [vmem:[%s11701_s17 + $0xb80] ss:$8 sps:$4 sm:$0xff]   ;;  %v10121_v3 = vld [vmem:[%s11701_s17 + $0x394] ss:$8 sps:$4 sm:$0xff]  }
 0x1d1   : > { %v10124_v2 = vld [vmem:[%s11701_s17 + $0xb94] ss:$8 sps:$4 sm:$0xff]  }
 0x1d3   : > { %7987 = vmatpush1.bf16.msra.mxu1 %v10047_v5  ;;  %8411 = vmatpush1.bf16.msra.mxu0 %v10050_v6  ;;  %v10119_v5 = vld [vmem:[%s11701_s17 + $0x390] ss:$8 sps:$4 sm:$0xff]  }
 0x1d4   : > { %7988 = vmatprep.subr.bf16.mxu1 %v10055_v30  ;;  %8412 = vmatprep.subr.bf16.mxu0 %v10058_v31  ;;  %v10122_v6 = vld [vmem:[%s11701_s17 + $0xb90] ss:$8 sps:$4 sm:$0xff]   ;;  %v10127_v30 = vld [vmem:[%s11701_s17 + $0x3a4] ss:$8 sps:$4 sm:$0xff]  }
 0x1d5   : > { %v10130_v31 = vld [vmem:[%s11701_s17 + $0xba4] ss:$8 sps:$4 sm:$0xff]  }
 0x1d7   : > { %7989 = vmatpush1.bf16.msra.mxu1 %v10053_v32  ;;  %8413 = vmatpush1.bf16.msra.mxu0 %v10056_v33  ;;  %v10125_v32 = vld [vmem:[%s11701_s17 + $0x3a0] ss:$8 sps:$4 sm:$0xff]  }
 0x1d8   : > { %7990 = vmatprep.subr.bf16.mxu1 %v10061_v34  ;;  %8414 = vmatprep.subr.bf16.mxu0 %v10064_v35  ;;  %v10128_v33 = vld [vmem:[%s11701_s17 + $0xba0] ss:$8 sps:$4 sm:$0xff]   ;;  %v10133_v34 = vld [vmem:[%s11701_s17 + $0x3b4] ss:$8 sps:$4 sm:$0xff]  }
 0x1d9   : > { %v10136_v35 = vld [vmem:[%s11701_s17 + $0xbb4] ss:$8 sps:$4 sm:$0xff]  }
 0x1db   : > { %7991 = vmatpush1.bf16.msra.mxu1 %v10059_v36  ;;  %8415 = vmatpush1.bf16.msra.mxu0 %v10062_v37  ;;  %v10131_v36 = vld [vmem:[%s11701_s17 + $0x3b0] ss:$8 sps:$4 sm:$0xff]  }
 0x1dc   : > { %8013 = vmatprep.subr.bf16.mxu1 %v10067_v38  ;;  %8437 = vmatprep.subr.bf16.mxu0 %v10070_v39  ;;  %v10134_v37 = vld [vmem:[%s11701_s17 + $0xbb0] ss:$8 sps:$4 sm:$0xff]   ;;  %v10139_v38 = vld [vmem:[%s11701_s17 + $0x3c4] ss:$8 sps:$4 sm:$0xff]  }
 0x1dd   : > { %v10142_v39 = vld [vmem:[%s11701_s17 + $0xbc4] ss:$8 sps:$4 sm:$0xff]  }
 0x1de   : > { %7993 = vmatmul.mubr.bf16.vlgmr.msra.gmra.mrb[0].mxu1 %v9045_v48  ;;  %8417 = vmatmul.mubr.bf16.vlgmr.msra.gmra.mrb[0].mxu0 %v9061_v49  ;;  %v10143_v48 = vld [vmem:[%s11701_s17 + $0x3d0] ss:$8 sps:$4 sm:$0xff]  }
 0x1df   : > { %8014 = vmatpush1.bf16.msra.mxu1 %v10065_v40  ;;  %8438 = vmatpush1.bf16.msra.mxu0 %v10068_v41  ;;  %v10137_v40 = vld [vmem:[%s11701_s17 + $0x3c0] ss:$8 sps:$4 sm:$0xff]   ;;  %v10146_v49 = vld [vmem:[%s11701_s17 + $0xbd0] ss:$8 sps:$4 sm:$0xff]  }
 0x1e0   : > { %8015 = vmatprep.subr.bf16.mxu1 %v10073_v52  ;;  %8439 = vmatprep.subr.bf16.mxu0 %v10076_v42  ;;  %v10140_v41 = vld [vmem:[%s11701_s17 + $0xbc0] ss:$8 sps:$4 sm:$0xff]  }
 0x1e1   : > { %8002 = vmatprep.mubr.bf16.mxu1 %v9078_v43  ;;  %8426 = vmatprep.mubr.bf16.mxu0 %v9094_v46  ;;  %v10149_v52 = vld [vmem:[%s11701_s17 + $0x3e0] ss:$8 sps:$4 sm:$0xff]   ;;  %v10157_v43 = vld [vmem:[%s11701_s17 + $0x3f4] ss:$8 sps:$4 sm:$0xff]  }
 0x1e2   : > { %v10152_v42 = vld [vmem:[%s11701_s17 + $0xbe0] ss:$8 sps:$4 sm:$0xff]   ;;  %v10160_v46 = vld [vmem:[%s11701_s17 + $0xbf4] ss:$8 sps:$4 sm:$0xff]  }
 0x1e3   : > { %8016 = vmatpush1.bf16.msra.mxu1 %v10071_v47  ;;  %8440 = vmatpush1.bf16.msra.mxu0 %v10074_v53  ;;  %v10155_v47 = vld [vmem:[%s11701_s17 + $0x3f0] ss:$8 sps:$4 sm:$0xff]  }
 0x1e4   : > { %8017 = vmatprep.subr.bf16.mxu1 %v10079_v54  ;;  %8441 = vmatprep.subr.bf16.mxu0 %v10082_v55  ;;  %v10158_v53 = vld [vmem:[%s11701_s17 + $0xbf0] ss:$8 sps:$4 sm:$0xff]   ;;  %v10163_v54 = vld [vmem:[%s11701_s17 + $0x404] ss:$8 sps:$4 sm:$0xff]  }
 0x1e5   : > { %v10166_v55 = vld [vmem:[%s11701_s17 + $0xc04] ss:$8 sps:$4 sm:$0xff]  }
 0x1e6   : > { %8003 = vmatmul.mubr.bf16.gmra.mrb[4].mxu1 %v9077_v60  ;;  %8427 = vmatmul.mubr.bf16.gmra.mrb[4].mxu0 %v9093_v61  ;;  %v4433_v60 = vld [vmem:[%s12594_s0 + $0x118] sm:$0xff] }
 0x1e7   : > { %8018 = vmatpush1.bf16.msra.mxu1 %v10077_v56  ;;  %8442 = vmatpush1.bf16.msra.mxu0 %v10080_v57  ;;  %v10161_v56 = vld [vmem:[%s11701_s17 + $0x400] ss:$8 sps:$4 sm:$0xff]   ;;  %v4449_v61 = vld [vmem:[%s12594_s0 + $0x198] sm:$0xff] }
 0x1e8   : > { %8019 = vmatprep.subr.bf16.mxu1 %v10085_v4  ;;  %8443 = vmatprep.subr.bf16.mxu0 %v10088_v7  ;;  %v10164_v57 = vld [vmem:[%s11701_s17 + $0xc00] ss:$8 sps:$4 sm:$0xff]   ;;  %v9047_v4 = vcombine.low %v12008_v58, %v12013_v59  ;;  %v9063_v7 = vcombine.low %v12018_v62, %v12023_v63  ;;  %v10172_v58 = vld [vmem:[%s11701_s17 + $0xc14] ss:$8 sps:$4 sm:$0xff]   ;;  %v9080_v59 = vcombine.high %v4433_v60, %v4449_v61  ;;  %v10167_v63 = vld [vmem:[%s11701_s17 + $0x410] ss:$8 sps:$4 sm:$0xff]  }
 0x1e9   : > { %8045 = vmatprep.mubr.bf16.mxu1 %v9048_v8  ;;  %8469 = vmatprep.mubr.bf16.mxu0 %v9064_v9  ;;  %v4441_v8 = vld [vmem:[%s12594_s0 + $0x158] sm:$0xff] }
 0x1ea   : > { %v4457_v9 = vld [vmem:[%s12594_s0 + $0x1d8] sm:$0xff] }
 0x1eb   : > { %8020 = vmatpush1.bf16.msra.mxu1 %v10083_v10  ;;  %8444 = vmatpush1.bf16.msra.mxu0 %v10086_v11  ;;  %v10169_v10 = vld [vmem:[%s11701_s17 + $0x414] ss:$8 sps:$4 sm:$0xff]   ;;  %v9096_v62 = vcombine.high %v4441_v8, %v4457_v9  ;;  %v10170_v11 = vld [vmem:[%s11701_s17 + $0xc10] ss:$8 sps:$4 sm:$0xff]  }
 0x1ec   : > { %8021 = vmatprep.subr.bf16.mxu1 %v10091_v12  ;;  %8445 = vmatprep.subr.bf16.mxu0 %v10094_v13  ;;  %v10175_v12 = vld [vmem:[%s11701_s17 + $0x424] ss:$8 sps:$4 sm:$0xff]  }
 0x1ed   : > { %v10178_v13 = vld [vmem:[%s11701_s17 + $0xc24] ss:$8 sps:$4 sm:$0xff]  }
 0x1ef   : > { %8022 = vmatpush1.bf16.msra.mxu1 %v10089_v14  ;;  %8446 = vmatpush1.bf16.msra.mxu0 %v10092_v15  ;;  %v10173_v14 = vld [vmem:[%s11701_s17 + $0x420] ss:$8 sps:$4 sm:$0xff]  }
 0x1f0   : > { %8023 = vmatprep.subr.bf16.mxu1 %v10097_v16  ;;  %8447 = vmatprep.subr.bf16.mxu0 %v10100_v17  ;;  %v10176_v15 = vld [vmem:[%s11701_s17 + $0xc20] ss:$8 sps:$4 sm:$0xff]  }
 0x1f1   : > { %v12112_v16 = vld [vmem:[%s12594_s0 + $0x20] sm:$0xff] }
 0x1f2   : > { %v12117_v17 = vld [vmem:[%s12594_s0 + $0xa0] sm:$0xff] }
 0x1f3   : > { %8024 = vmatpush1.bf16.msra.mxu1 %v10095_v18  ;;  %8448 = vmatpush1.bf16.msra.mxu0 %v10098_v19  ;;  %v9079_v18 = vcombine.low %v4433_v60, %v4449_v61  ;;  %v9095_v19 = vcombine.low %v4441_v8, %v4457_v9  ;;  %v10241_v60 = vld [vmem:[%s11701_s17 + $0x4d4] ss:$8 sps:$4 sm:$0xff]   ;;  %v10247_v8 = vld [vmem:[%s11701_s17 + $0x4e4] ss:$8 sps:$4 sm:$0xff]  }
 0x1f4   : > { %8025 = vmatprep.subr.bf16.mxu1 %v10103_v20  ;;  %8449 = vmatprep.subr.bf16.mxu0 %v10106_v21  ;;  %v12122_v20 = vld [vmem:[%s12594_s0 + $0x60] sm:$0xff]  ;;  %v10244_v61 = vld [vmem:[%s11701_s17 + $0xcd4] ss:$8 sps:$4 sm:$0xff]  }
 0x1f5   : > { %v12127_v21 = vld [vmem:[%s12594_s0 + $0xe0] sm:$0xff] }
 0x1f6   : > { %v10250_v9 = vld [vmem:[%s11701_s17 + $0xce4] ss:$8 sps:$4 sm:$0xff]  }
 0x1f7   : > { %8026 = vmatpush1.bf16.msra.mxu1 %v10101_v22  ;;  %8450 = vmatpush1.bf16.msra.mxu0 %v10104_v23  ;;  %v10181_v22 = vld [vmem:[%s11701_s17 + $0x434] ss:$8 sps:$4 sm:$0xff]  }
 0x1f8   : > { %8027 = vmatprep.subr.bf16.mxu1 %v10109_v24  ;;  %8451 = vmatprep.subr.bf16.mxu0 %v10112_v25  ;;  %v10184_v23 = vld [vmem:[%s11701_s17 + $0xc34] ss:$8 sps:$4 sm:$0xff]   ;;  %v9050_v24 = vcombine.high %v12112_v16, %v12117_v17  ;;  %v9066_v25 = vcombine.high %v12122_v20, %v12127_v21 }
 0x1fb   : > { %8028 = vmatpush1.bf16.msra.mxu1 %v10107_v26  ;;  %8452 = vmatpush1.bf16.msra.mxu0 %v10110_v27  ;;  %v10179_v26 = vld [vmem:[%s11701_s17 + $0x430] ss:$8 sps:$4 sm:$0xff]  }
 0x1fc   : > { %8029 = vmatprep.subr.bf16.mxu1 %v10115_v28  ;;  %8453 = vmatprep.subr.bf16.mxu0 %v10118_v29  ;;  %v10182_v27 = vld [vmem:[%s11701_s17 + $0xc30] ss:$8 sps:$4 sm:$0xff]   ;;  %v10187_v28 = vld [vmem:[%s11701_s17 + $0x444] ss:$8 sps:$4 sm:$0xff]  }
 0x1fd   : > { %v10190_v29 = vld [vmem:[%s11701_s17 + $0xc44] ss:$8 sps:$4 sm:$0xff]  }
 0x1ff   : > { %8030 = vmatpush1.bf16.msra.mxu1 %v10113_v0  ;;  %8454 = vmatpush1.bf16.msra.mxu0 %v10116_v1  ;;  %v10185_v0 = vld [vmem:[%s11701_s17 + $0x440] ss:$8 sps:$4 sm:$0xff]  }
 0x200   : > { %8031 = vmatprep.subr.bf16.mxu1 %v10121_v3  ;;  %8455 = vmatprep.subr.bf16.mxu0 %v10124_v2  ;;  %v10188_v1 = vld [vmem:[%s11701_s17 + $0xc40] ss:$8 sps:$4 sm:$0xff]   ;;  %v10193_v3 = vld [vmem:[%s11701_s17 + $0x454] ss:$8 sps:$4 sm:$0xff]  }
 0x201   : > { %v10196_v2 = vld [vmem:[%s11701_s17 + $0xc54] ss:$8 sps:$4 sm:$0xff]  }
 0x203   : > { %8032 = vmatpush1.bf16.msra.mxu1 %v10119_v5  ;;  %8456 = vmatpush1.bf16.msra.mxu0 %v10122_v6  ;;  %v10191_v5 = vld [vmem:[%s11701_s17 + $0x450] ss:$8 sps:$4 sm:$0xff]  }
 0x204   : > { %8033 = vmatprep.subr.bf16.mxu1 %v10127_v30  ;;  %8457 = vmatprep.subr.bf16.mxu0 %v10130_v31  ;;  %v10194_v6 = vld [vmem:[%s11701_s17 + $0xc50] ss:$8 sps:$4 sm:$0xff]   ;;  %v10199_v30 = vld [vmem:[%s11701_s17 + $0x464] ss:$8 sps:$4 sm:$0xff]  }
 0x205   : > { %v10202_v31 = vld [vmem:[%s11701_s17 + $0xc64] ss:$8 sps:$4 sm:$0xff]  }
 0x207   : > { %8034 = vmatpush1.bf16.msra.mxu1 %v10125_v32  ;;  %8458 = vmatpush1.bf16.msra.mxu0 %v10128_v33  ;;  %v10197_v32 = vld [vmem:[%s11701_s17 + $0x460] ss:$8 sps:$4 sm:$0xff]  }
 0x208   : > { %8035 = vmatprep.subr.bf16.mxu1 %v10133_v34  ;;  %8459 = vmatprep.subr.bf16.mxu0 %v10136_v35  ;;  %v10200_v33 = vld [vmem:[%s11701_s17 + $0xc60] ss:$8 sps:$4 sm:$0xff]   ;;  %v10205_v34 = vld [vmem:[%s11701_s17 + $0x474] ss:$8 sps:$4 sm:$0xff]  }
 0x209   : > { %v10208_v35 = vld [vmem:[%s11701_s17 + $0xc74] ss:$8 sps:$4 sm:$0xff]  }
 0x20b   : > { %8036 = vmatpush1.bf16.msra.mxu1 %v10131_v36  ;;  %8460 = vmatpush1.bf16.msra.mxu0 %v10134_v37  ;;  %v10203_v36 = vld [vmem:[%s11701_s17 + $0x470] ss:$8 sps:$4 sm:$0xff]  }
 0x20c   : > { %8037 = vmatprep.subr.bf16.mxu1 %v10139_v38  ;;  %8461 = vmatprep.subr.bf16.mxu0 %v10142_v39  ;;  %v10206_v37 = vld [vmem:[%s11701_s17 + $0xc70] ss:$8 sps:$4 sm:$0xff]   ;;  %v10211_v38 = vld [vmem:[%s11701_s17 + $0x484] ss:$8 sps:$4 sm:$0xff]  }
 0x20d   : > { %v10214_v39 = vld [vmem:[%s11701_s17 + $0xc84] ss:$8 sps:$4 sm:$0xff]  }
 0x20f   : > { %8038 = vmatpush1.bf16.msra.mxu1 %v10137_v40  ;;  %8462 = vmatpush1.bf16.msra.mxu0 %v10140_v41  ;;  %v10209_v40 = vld [vmem:[%s11701_s17 + $0x480] ss:$8 sps:$4 sm:$0xff]  }
 0x210   : > { %8039 = vmatprep.subr.bf16.mxu1 %v10145_v44  ;;  %8463 = vmatprep.subr.bf16.mxu0 %v10148_v45  ;;  %v10212_v41 = vld [vmem:[%s11701_s17 + $0xc80] ss:$8 sps:$4 sm:$0xff]   ;;  %v10217_v44 = vld [vmem:[%s11701_s17 + $0x494] ss:$8 sps:$4 sm:$0xff]  }
 0x211   : > { %v10220_v45 = vld [vmem:[%s11701_s17 + $0xc94] ss:$8 sps:$4 sm:$0xff]  }
 0x213   : > { %8040 = vmatpush1.bf16.msra.mxu1 %v10143_v48  ;;  %8464 = vmatpush1.bf16.msra.mxu0 %v10146_v49  ;;  %v10215_v48 = vld [vmem:[%s11701_s17 + $0x490] ss:$8 sps:$4 sm:$0xff]  }
 0x214   : > { %8041 = vmatprep.subr.bf16.mxu1 %v10151_v50  ;;  %8465 = vmatprep.subr.bf16.mxu0 %v10154_v51  ;;  %v10218_v49 = vld [vmem:[%s11701_s17 + $0xc90] ss:$8 sps:$4 sm:$0xff]   ;;  %v10223_v50 = vld [vmem:[%s11701_s17 + $0x4a4] ss:$8 sps:$4 sm:$0xff]  }
 0x215   : > { %v10226_v51 = vld [vmem:[%s11701_s17 + $0xca4] ss:$8 sps:$4 sm:$0xff]  }
 0x217   : > { %8042 = vmatpush1.bf16.msra.mxu1 %v10149_v52  ;;  %8466 = vmatpush1.bf16.msra.mxu0 %v10152_v42  ;;  %v10221_v52 = vld [vmem:[%s11701_s17 + $0x4a0] ss:$8 sps:$4 sm:$0xff]  }
 0x218   : > { %8043 = vmatprep.subr.bf16.mxu1 %v10157_v43  ;;  %8467 = vmatprep.subr.bf16.mxu0 %v10160_v46  ;;  %v10224_v42 = vld [vmem:[%s11701_s17 + $0xca0] ss:$8 sps:$4 sm:$0xff]   ;;  %v10229_v43 = vld [vmem:[%s11701_s17 + $0x4b4] ss:$8 sps:$4 sm:$0xff]  }
 0x219   : > { %v10232_v46 = vld [vmem:[%s11701_s17 + $0xcb4] ss:$8 sps:$4 sm:$0xff]  }
 0x21b   : > { %8044 = vmatpush1.bf16.msra.mxu1 %v10155_v47  ;;  %8468 = vmatpush1.bf16.msra.mxu0 %v10158_v53  ;;  %v10227_v47 = vld [vmem:[%s11701_s17 + $0x4b0] ss:$8 sps:$4 sm:$0xff]  }
 0x21c   : > { %8066 = vmatprep.subr.bf16.mxu1 %v10163_v54  ;;  %8490 = vmatprep.subr.bf16.mxu0 %v10166_v55  ;;  %v10230_v53 = vld [vmem:[%s11701_s17 + $0xcb0] ss:$8 sps:$4 sm:$0xff]   ;;  %v10235_v54 = vld [vmem:[%s11701_s17 + $0x4c4] ss:$8 sps:$4 sm:$0xff]  }
 0x21d   : > { %v10238_v55 = vld [vmem:[%s11701_s17 + $0xcc4] ss:$8 sps:$4 sm:$0xff]  }
 0x21e   : > { %8046 = vmatmul.mubr.bf16.vlgmr.msra.gmra.mrb[0].mxu1 %v9047_v4  ;;  %8470 = vmatmul.mubr.bf16.vlgmr.msra.gmra.mrb[0].mxu0 %v9063_v7  ;;  %v10239_v4 = vld [vmem:[%s11701_s17 + $0x4d0] ss:$8 sps:$4 sm:$0xff]  }
 0x21f   : > { %8067 = vmatpush1.bf16.msra.mxu1 %v10161_v56  ;;  %8491 = vmatpush1.bf16.msra.mxu0 %v10164_v57  ;;  %v10233_v56 = vld [vmem:[%s11701_s17 + $0x4c0] ss:$8 sps:$4 sm:$0xff]   ;;  %v10242_v7 = vld [vmem:[%s11701_s17 + $0xcd0] ss:$8 sps:$4 sm:$0xff]  }
 0x220   : > { %8068 = vmatprep.subr.bf16.mxu1 %v10169_v10  ;;  %8492 = vmatprep.subr.bf16.mxu0 %v10172_v58  ;;  %v10236_v57 = vld [vmem:[%s11701_s17 + $0xcc0] ss:$8 sps:$4 sm:$0xff]  }
 0x221   : > { %8055 = vmatprep.mubr.bf16.mxu1 %v9080_v59  ;;  %8479 = vmatprep.mubr.bf16.mxu0 %v9096_v62  ;;  %v10245_v10 = vld [vmem:[%s11701_s17 + $0x4e0] ss:$8 sps:$4 sm:$0xff]   ;;  %v10253_v59 = vld [vmem:[%s11701_s17 + $0x4f4] ss:$8 sps:$4 sm:$0xff]  }
 0x222   : > { %v10248_v58 = vld [vmem:[%s11701_s17 + $0xce0] ss:$8 sps:$4 sm:$0xff]   ;;  %v10256_v62 = vld [vmem:[%s11701_s17 + $0xcf4] ss:$8 sps:$4 sm:$0xff]  }
 0x223   : > { %8069 = vmatpush1.bf16.msra.mxu1 %v10167_v63  ;;  %8493 = vmatpush1.bf16.msra.mxu0 %v10170_v11  ;;  %v10251_v63 = vld [vmem:[%s11701_s17 + $0x4f0] ss:$8 sps:$4 sm:$0xff]  }
 0x224   : > { %8070 = vmatprep.subr.bf16.mxu1 %v10175_v12  ;;  %8494 = vmatprep.subr.bf16.mxu0 %v10178_v13  ;;  %v10254_v11 = vld [vmem:[%s11701_s17 + $0xcf0] ss:$8 sps:$4 sm:$0xff]   ;;  %v10259_v12 = vld [vmem:[%s11701_s17 + $0x504] ss:$8 sps:$4 sm:$0xff]  }
 0x225   : > { %v10262_v13 = vld [vmem:[%s11701_s17 + $0xd04] ss:$8 sps:$4 sm:$0xff]  }
 0x226   : > { %8056 = vmatmul.mubr.bf16.gmra.mrb[4].mxu1 %v9079_v18  ;;  %8480 = vmatmul.mubr.bf16.gmra.mrb[4].mxu0 %v9095_v19  ;;  %v4442_v18 = vld [vmem:[%s12594_s0 + $0x160] sm:$0xff] }
 0x227   : > { %8071 = vmatpush1.bf16.msra.mxu1 %v10173_v14  ;;  %8495 = vmatpush1.bf16.msra.mxu0 %v10176_v15  ;;  %v4434_v14 = vld [vmem:[%s12594_s0 + $0x120] sm:$0xff] }
 0x228   : > { %8072 = vmatprep.subr.bf16.mxu1 %v10181_v22  ;;  %8496 = vmatprep.subr.bf16.mxu0 %v10184_v23  ;;  %v4450_v15 = vld [vmem:[%s12594_s0 + $0x1a0] sm:$0xff]  ;;  %v9049_v22 = vcombine.low %v12112_v16, %v12117_v17  ;;  %v9065_v23 = vcombine.low %v12122_v20, %v12127_v21  ;;  %v12214_v20 = vld [vmem:[%s12594_s0 + $0x28] sm:$0xff] }
 0x229   : > { %8098 = vmatprep.mubr.bf16.mxu1 %v9050_v24  ;;  %8522 = vmatprep.mubr.bf16.mxu0 %v9066_v25  ;;  %v4458_v19 = vld [vmem:[%s12594_s0 + $0x1e0] sm:$0xff]  ;;  %v12219_v21 = vld [vmem:[%s12594_s0 + $0xa8] sm:$0xff] }
 0x22a   : > { %v10257_v24 = vld [vmem:[%s11701_s17 + $0x500] ss:$8 sps:$4 sm:$0xff]   ;;  %v10271_v16 = vld [vmem:[%s11701_s17 + $0x524] ss:$8 sps:$4 sm:$0xff]  }
 0x22b   : > { %8073 = vmatpush1.bf16.msra.mxu1 %v10179_v26  ;;  %8497 = vmatpush1.bf16.msra.mxu0 %v10182_v27  ;;  %v10260_v25 = vld [vmem:[%s11701_s17 + $0xd00] ss:$8 sps:$4 sm:$0xff]   ;;  %v10265_v26 = vld [vmem:[%s11701_s17 + $0x514] ss:$8 sps:$4 sm:$0xff]   ;;  %v10274_v17 = vld [vmem:[%s11701_s17 + $0xd24] ss:$8 sps:$4 sm:$0xff]  }
 0x22c   : > { %8074 = vmatprep.subr.bf16.mxu1 %v10187_v28  ;;  %8498 = vmatprep.subr.bf16.mxu0 %v10190_v29  ;;  %v10268_v27 = vld [vmem:[%s11701_s17 + $0xd14] ss:$8 sps:$4 sm:$0xff]   ;;  %v10263_v28 = vld [vmem:[%s11701_s17 + $0x510] ss:$8 sps:$4 sm:$0xff]  }
 0x22d   : > { %v10266_v29 = vld [vmem:[%s11701_s17 + $0xd10] ss:$8 sps:$4 sm:$0xff]  }
 0x22f   : > { %8075 = vmatpush1.bf16.msra.mxu1 %v10185_v0  ;;  %8499 = vmatpush1.bf16.msra.mxu0 %v10188_v1  ;;  %v9082_v0 = vcombine.high %v4434_v14, %v4450_v15  ;;  %v9098_v1 = vcombine.high %v4442_v18, %v4458_v19 }
 0x230   : > { %8076 = vmatprep.subr.bf16.mxu1 %v10193_v3  ;;  %8500 = vmatprep.subr.bf16.mxu0 %v10196_v2  ;;  %v12224_v3 = vld [vmem:[%s12594_s0 + $0x68] sm:$0xff] }
 0x231   : > { %v12229_v2 = vld [vmem:[%s12594_s0 + $0xe8] sm:$0xff] }
 0x233   : > { %8077 = vmatpush1.bf16.msra.mxu1 %v10191_v5  ;;  %8501 = vmatpush1.bf16.msra.mxu0 %v10194_v6  ;;  %v9081_v5 = vcombine.low %v4434_v14, %v4450_v15  ;;  %v9097_v6 = vcombine.low %v4442_v18, %v4458_v19  ;;  %v10329_v14 = vld [vmem:[%s11701_s17 + $0x5c0] ss:$8 sps:$4 sm:$0xff]   ;;  %v10337_v18 = vld [vmem:[%s11701_s17 + $0x5d4] ss:$8 sps:$4 sm:$0xff]  }
 0x234   : > { %8078 = vmatprep.subr.bf16.mxu1 %v10199_v30  ;;  %8502 = vmatprep.subr.bf16.mxu0 %v10202_v31  ;;  %v10269_v30 = vld [vmem:[%s11701_s17 + $0x520] ss:$8 sps:$4 sm:$0xff]   ;;  %v10340_v19 = vld [vmem:[%s11701_s17 + $0xdd4] ss:$8 sps:$4 sm:$0xff]  }
 0x235   : > { %v10272_v31 = vld [vmem:[%s11701_s17 + $0xd20] ss:$8 sps:$4 sm:$0xff]  }
 0x236   : > { %v10332_v15 = vld [vmem:[%s11701_s17 + $0xdc0] ss:$8 sps:$4 sm:$0xff]  }
 0x237   : > { %8079 = vmatpush1.bf16.msra.mxu1 %v10197_v32  ;;  %8503 = vmatpush1.bf16.msra.mxu0 %v10200_v33  ;;  %v10277_v32 = vld [vmem:[%s11701_s17 + $0x534] ss:$8 sps:$4 sm:$0xff]  }
 0x238   : > { %8080 = vmatprep.subr.bf16.mxu1 %v10205_v34  ;;  %8504 = vmatprep.subr.bf16.mxu0 %v10208_v35  ;;  %v10280_v33 = vld [vmem:[%s11701_s17 + $0xd34] ss:$8 sps:$4 sm:$0xff]   ;;  %v9052_v34 = vcombine.high %v12214_v20, %v12219_v21  ;;  %v9068_v35 = vcombine.high %v12224_v3, %v12229_v2 }
 0x23b   : > { %8081 = vmatpush1.bf16.msra.mxu1 %v10203_v36  ;;  %8505 = vmatpush1.bf16.msra.mxu0 %v10206_v37  ;;  %v10275_v36 = vld [vmem:[%s11701_s17 + $0x530] ss:$8 sps:$4 sm:$0xff]  }
 0x23c   : > { %8082 = vmatprep.subr.bf16.mxu1 %v10211_v38  ;;  %8506 = vmatprep.subr.bf16.mxu0 %v10214_v39  ;;  %v10278_v37 = vld [vmem:[%s11701_s17 + $0xd30] ss:$8 sps:$4 sm:$0xff]   ;;  %v10283_v38 = vld [vmem:[%s11701_s17 + $0x544] ss:$8 sps:$4 sm:$0xff]  }
 0x23d   : > { %v10286_v39 = vld [vmem:[%s11701_s17 + $0xd44] ss:$8 sps:$4 sm:$0xff]  }
 0x23f   : > { %8083 = vmatpush1.bf16.msra.mxu1 %v10209_v40  ;;  %8507 = vmatpush1.bf16.msra.mxu0 %v10212_v41  ;;  %v10281_v40 = vld [vmem:[%s11701_s17 + $0x540] ss:$8 sps:$4 sm:$0xff]  }
 0x240   : > { %8084 = vmatprep.subr.bf16.mxu1 %v10217_v44  ;;  %8508 = vmatprep.subr.bf16.mxu0 %v10220_v45  ;;  %v10284_v41 = vld [vmem:[%s11701_s17 + $0xd40] ss:$8 sps:$4 sm:$0xff]   ;;  %v10289_v44 = vld [vmem:[%s11701_s17 + $0x554] ss:$8 sps:$4 sm:$0xff]  }
 0x241   : > { %v10292_v45 = vld [vmem:[%s11701_s17 + $0xd54] ss:$8 sps:$4 sm:$0xff]  }
 0x243   : > { %8085 = vmatpush1.bf16.msra.mxu1 %v10215_v48  ;;  %8509 = vmatpush1.bf16.msra.mxu0 %v10218_v49  ;;  %v10287_v48 = vld [vmem:[%s11701_s17 + $0x550] ss:$8 sps:$4 sm:$0xff]  }
 0x244   : > { %8086 = vmatprep.subr.bf16.mxu1 %v10223_v50  ;;  %8510 = vmatprep.subr.bf16.mxu0 %v10226_v51  ;;  %v10290_v49 = vld [vmem:[%s11701_s17 + $0xd50] ss:$8 sps:$4 sm:$0xff]   ;;  %v10295_v50 = vld [vmem:[%s11701_s17 + $0x564] ss:$8 sps:$4 sm:$0xff]  }
 0x245   : > { %v10298_v51 = vld [vmem:[%s11701_s17 + $0xd64] ss:$8 sps:$4 sm:$0xff]  }
 0x247   : > { %8087 = vmatpush1.bf16.msra.mxu1 %v10221_v52  ;;  %8511 = vmatpush1.bf16.msra.mxu0 %v10224_v42  ;;  %v10293_v52 = vld [vmem:[%s11701_s17 + $0x560] ss:$8 sps:$4 sm:$0xff]  }
 0x248   : > { %8088 = vmatprep.subr.bf16.mxu1 %v10229_v43  ;;  %8512 = vmatprep.subr.bf16.mxu0 %v10232_v46  ;;  %v10296_v42 = vld [vmem:[%s11701_s17 + $0xd60] ss:$8 sps:$4 sm:$0xff]   ;;  %v10301_v43 = vld [vmem:[%s11701_s17 + $0x574] ss:$8 sps:$4 sm:$0xff]  }
 0x249   : > { %v10304_v46 = vld [vmem:[%s11701_s17 + $0xd74] ss:$8 sps:$4 sm:$0xff]  }
 0x24b   : > { %8089 = vmatpush1.bf16.msra.mxu1 %v10227_v47  ;;  %8513 = vmatpush1.bf16.msra.mxu0 %v10230_v53  ;;  %v10299_v47 = vld [vmem:[%s11701_s17 + $0x570] ss:$8 sps:$4 sm:$0xff]  }
 0x24c   : > { %8090 = vmatprep.subr.bf16.mxu1 %v10235_v54  ;;  %8514 = vmatprep.subr.bf16.mxu0 %v10238_v55  ;;  %v10302_v53 = vld [vmem:[%s11701_s17 + $0xd70] ss:$8 sps:$4 sm:$0xff]   ;;  %v10307_v54 = vld [vmem:[%s11701_s17 + $0x584] ss:$8 sps:$4 sm:$0xff]  }
 0x24d   : > { %v10310_v55 = vld [vmem:[%s11701_s17 + $0xd84] ss:$8 sps:$4 sm:$0xff]  }
 0x24f   : > { %8091 = vmatpush1.bf16.msra.mxu1 %v10233_v56  ;;  %8515 = vmatpush1.bf16.msra.mxu0 %v10236_v57  ;;  %v10305_v56 = vld [vmem:[%s11701_s17 + $0x580] ss:$8 sps:$4 sm:$0xff]  }
 0x250   : > { %8092 = vmatprep.subr.bf16.mxu1 %v10241_v60  ;;  %8516 = vmatprep.subr.bf16.mxu0 %v10244_v61  ;;  %v10308_v57 = vld [vmem:[%s11701_s17 + $0xd80] ss:$8 sps:$4 sm:$0xff]   ;;  %v10313_v60 = vld [vmem:[%s11701_s17 + $0x594] ss:$8 sps:$4 sm:$0xff]  }
 0x251   : > { %v10316_v61 = vld [vmem:[%s11701_s17 + $0xd94] ss:$8 sps:$4 sm:$0xff]  }
 0x253   : > { %8093 = vmatpush1.bf16.msra.mxu1 %v10239_v4  ;;  %8517 = vmatpush1.bf16.msra.mxu0 %v10242_v7  ;;  %v10311_v4 = vld [vmem:[%s11701_s17 + $0x590] ss:$8 sps:$4 sm:$0xff]  }
 0x254   : > { %8094 = vmatprep.subr.bf16.mxu1 %v10247_v8  ;;  %8518 = vmatprep.subr.bf16.mxu0 %v10250_v9  ;;  %v10314_v7 = vld [vmem:[%s11701_s17 + $0xd90] ss:$8 sps:$4 sm:$0xff]   ;;  %v10319_v8 = vld [vmem:[%s11701_s17 + $0x5a4] ss:$8 sps:$4 sm:$0xff]  }
 0x255   : > { %v10322_v9 = vld [vmem:[%s11701_s17 + $0xda4] ss:$8 sps:$4 sm:$0xff]  }
 0x257   : > { %8095 = vmatpush1.bf16.msra.mxu1 %v10245_v10  ;;  %8519 = vmatpush1.bf16.msra.mxu0 %v10248_v58  ;;  %v10317_v10 = vld [vmem:[%s11701_s17 + $0x5a0] ss:$8 sps:$4 sm:$0xff]  }
 0x258   : > { %8096 = vmatprep.subr.bf16.mxu1 %v10253_v59  ;;  %8520 = vmatprep.subr.bf16.mxu0 %v10256_v62  ;;  %v10320_v58 = vld [vmem:[%s11701_s17 + $0xda0] ss:$8 sps:$4 sm:$0xff]   ;;  %v10325_v59 = vld [vmem:[%s11701_s17 + $0x5b4] ss:$8 sps:$4 sm:$0xff]  }
 0x259   : > { %v10328_v62 = vld [vmem:[%s11701_s17 + $0xdb4] ss:$8 sps:$4 sm:$0xff]  }
 0x25b   : > { %8097 = vmatpush1.bf16.msra.mxu1 %v10251_v63  ;;  %8521 = vmatpush1.bf16.msra.mxu0 %v10254_v11  ;;  %v10323_v63 = vld [vmem:[%s11701_s17 + $0x5b0] ss:$8 sps:$4 sm:$0xff]  }
 0x25c   : > { %8119 = vmatprep.subr.bf16.mxu1 %v10259_v12  ;;  %8543 = vmatprep.subr.bf16.mxu0 %v10262_v13  ;;  %v10326_v11 = vld [vmem:[%s11701_s17 + $0xdb0] ss:$8 sps:$4 sm:$0xff]   ;;  %v10331_v12 = vld [vmem:[%s11701_s17 + $0x5c4] ss:$8 sps:$4 sm:$0xff]  }
 0x25d   : > { %v10334_v13 = vld [vmem:[%s11701_s17 + $0xdc4] ss:$8 sps:$4 sm:$0xff]  }
 0x25e   : > { %8099 = vmatmul.mubr.bf16.vlgmr.msra.gmra.mrb[0].mxu1 %v9049_v22  ;;  %8523 = vmatmul.mubr.bf16.vlgmr.msra.gmra.mrb[0].mxu0 %v9065_v23  ;;  %v10335_v22 = vld [vmem:[%s11701_s17 + $0x5d0] ss:$8 sps:$4 sm:$0xff]  }
 0x25f   : > { %8120 = vmatpush1.bf16.msra.mxu1 %v10257_v24  ;;  %8544 = vmatpush1.bf16.msra.mxu0 %v10260_v25  ;;  %v10338_v23 = vld [vmem:[%s11701_s17 + $0xdd0] ss:$8 sps:$4 sm:$0xff]   ;;  %v10343_v24 = vld [vmem:[%s11701_s17 + $0x5e4] ss:$8 sps:$4 sm:$0xff]  }
 0x260   : > { %8121 = vmatprep.subr.bf16.mxu1 %v10265_v26  ;;  %8545 = vmatprep.subr.bf16.mxu0 %v10268_v27  ;;  %v10346_v25 = vld [vmem:[%s11701_s17 + $0xde4] ss:$8 sps:$4 sm:$0xff]   ;;  %v10341_v26 = vld [vmem:[%s11701_s17 + $0x5e0] ss:$8 sps:$4 sm:$0xff]  }
 0x261   : > { %8108 = vmatprep.mubr.bf16.mxu1 %v9082_v0  ;;  %8532 = vmatprep.mubr.bf16.mxu0 %v9098_v1  ;;  %v10344_v27 = vld [vmem:[%s11701_s17 + $0xde0] ss:$8 sps:$4 sm:$0xff]   ;;  %v10347_v0 = vld [vmem:[%s11701_s17 + $0x5f0] ss:$8 sps:$4 sm:$0xff]  }
 0x262   : > { %v10350_v1 = vld [vmem:[%s11701_s17 + $0xdf0] ss:$8 sps:$4 sm:$0xff]  }
 0x263   : > { %8122 = vmatpush1.bf16.msra.mxu1 %v10263_v28  ;;  %8546 = vmatpush1.bf16.msra.mxu0 %v10266_v29  ;;  %v10349_v28 = vld [vmem:[%s11701_s17 + $0x5f4] ss:$8 sps:$4 sm:$0xff]  }
 0x264   : > { %8123 = vmatprep.subr.bf16.mxu1 %v10271_v16  ;;  %8547 = vmatprep.subr.bf16.mxu0 %v10274_v17  ;;  %v10352_v29 = vld [vmem:[%s11701_s17 + $0xdf4] ss:$8 sps:$4 sm:$0xff]   ;;  %v10355_v16 = vld [vmem:[%s11701_s17 + $0x604] ss:$8 sps:$4 sm:$0xff]  }
 0x265   : > { %v10358_v17 = vld [vmem:[%s11701_s17 + $0xe04] ss:$8 sps:$4 sm:$0xff]  }
 0x266   : > { %8109 = vmatmul.mubr.bf16.gmra.mrb[4].mxu1 %v9081_v5  ;;  %8533 = vmatmul.mubr.bf16.gmra.mrb[4].mxu0 %v9097_v6  ;;  %v4435_v5 = vld [vmem:[%s12594_s0 + $0x128] sm:$0xff]  ;;  %v9051_v6 = vcombine.low %v12214_v20, %v12219_v21 }
 0x267   : > { %8124 = vmatpush1.bf16.msra.mxu1 %v10269_v30  ;;  %8548 = vmatpush1.bf16.msra.mxu0 %v10272_v31  ;;  %v9067_v30 = vcombine.low %v12224_v3, %v12229_v2  ;;  %v4451_v31 = vld [vmem:[%s12594_s0 + $0x1a8] sm:$0xff]  ;;  %v10361_v3 = vld [vmem:[%s11701_s17 + $0x614] ss:$8 sps:$4 sm:$0xff]  }
 0x268   : > { %8125 = vmatprep.subr.bf16.mxu1 %v10277_v32  ;;  %8549 = vmatprep.subr.bf16.mxu0 %v10280_v33  ;;  %v4443_v32 = vld [vmem:[%s12594_s0 + $0x168] sm:$0xff]  ;;  %v10364_v2 = vld [vmem:[%s11701_s17 + $0xe14] ss:$8 sps:$4 sm:$0xff]  }
 0x269   : > { %8151 = vmatprep.mubr.bf16.mxu1 %v9052_v34  ;;  %8575 = vmatprep.mubr.bf16.mxu0 %v9068_v35  ;;  %v4459_v33 = vld [vmem:[%s12594_s0 + $0x1e8] sm:$0xff]  ;;  %v9084_v34 = vcombine.high %v4435_v5, %v4451_v31 }
 0x26a   : > { %v10353_v20 = vld [vmem:[%s11701_s17 + $0x600] ss:$8 sps:$4 sm:$0xff]   ;;  %v9100_v35 = vcombine.high %v4443_v32, %v4459_v33 }
 0x26b   : > { %8126 = vmatpush1.bf16.msra.mxu1 %v10275_v36  ;;  %8550 = vmatpush1.bf16.msra.mxu0 %v10278_v37  ;;  %v10356_v21 = vld [vmem:[%s11701_s17 + $0xe00] ss:$8 sps:$4 sm:$0xff]   ;;  %v10359_v36 = vld [vmem:[%s11701_s17 + $0x610] ss:$8 sps:$4 sm:$0xff]  }
 0x26c   : > { %8127 = vmatprep.subr.bf16.mxu1 %v10283_v38  ;;  %8551 = vmatprep.subr.bf16.mxu0 %v10286_v39  ;;  %v10362_v37 = vld [vmem:[%s11701_s17 + $0xe10] ss:$8 sps:$4 sm:$0xff]   ;;  %v10367_v38 = vld [vmem:[%s11701_s17 + $0x624] ss:$8 sps:$4 sm:$0xff]  }
 0x26d   : > { %v10370_v39 = vld [vmem:[%s11701_s17 + $0xe24] ss:$8 sps:$4 sm:$0xff]  }
 0x26f   : > { %8128 = vmatpush1.bf16.msra.mxu1 %v10281_v40  ;;  %8552 = vmatpush1.bf16.msra.mxu0 %v10284_v41  ;;  %v12318_v40 = vld [vmem:[%s12594_s0 + $0x30] sm:$0xff]  ;;  %v9083_v41 = vcombine.low %v4435_v5, %v4451_v31  ;;  %v10425_v5 = vld [vmem:[%s11701_s17 + $0x6c0] ss:$8 sps:$4 sm:$0xff]  }
 0x270   : > { %8129 = vmatprep.subr.bf16.mxu1 %v10289_v44  ;;  %8553 = vmatprep.subr.bf16.mxu0 %v10292_v45  ;;  %v9099_v44 = vcombine.low %v4443_v32, %v4459_v33  ;;  %v12323_v45 = vld [vmem:[%s12594_s0 + $0xb0] sm:$0xff] }
 0x271   : > { %v10436_v31 = vld [vmem:[%s11701_s17 + $0xed4] ss:$8 sps:$4 sm:$0xff]   ;;  %v10431_v32 = vld [vmem:[%s11701_s17 + $0x6d0] ss:$8 sps:$4 sm:$0xff]  }
 0x272   : > { %v10434_v33 = vld [vmem:[%s11701_s17 + $0xed0] ss:$8 sps:$4 sm:$0xff]  }
 0x273   : > { %8130 = vmatpush1.bf16.msra.mxu1 %v10287_v48  ;;  %8554 = vmatpush1.bf16.msra.mxu0 %v10290_v49  ;;  %v12328_v48 = vld [vmem:[%s12594_s0 + $0x70] sm:$0xff] }
 0x274   : > { %8131 = vmatprep.subr.bf16.mxu1 %v10295_v50  ;;  %8555 = vmatprep.subr.bf16.mxu0 %v10298_v51  ;;  %v12333_v49 = vld [vmem:[%s12594_s0 + $0xf0] sm:$0xff]  ;;  %v10365_v50 = vld [vmem:[%s11701_s17 + $0x620] ss:$8 sps:$4 sm:$0xff]  }
 0x275   : > { %v10368_v51 = vld [vmem:[%s11701_s17 + $0xe20] ss:$8 sps:$4 sm:$0xff]  }
 0x277   : > { %8132 = vmatpush1.bf16.msra.mxu1 %v10293_v52  ;;  %8556 = vmatpush1.bf16.msra.mxu0 %v10296_v42  ;;  %v10373_v52 = vld [vmem:[%s11701_s17 + $0x634] ss:$8 sps:$4 sm:$0xff]  }
 0x278   : > { %8133 = vmatprep.subr.bf16.mxu1 %v10301_v43  ;;  %8557 = vmatprep.subr.bf16.mxu0 %v10304_v46  ;;  %v10376_v42 = vld [vmem:[%s11701_s17 + $0xe34] ss:$8 sps:$4 sm:$0xff]   ;;  %v9054_v43 = vcombine.high %v12318_v40, %v12323_v45  ;;  %v9070_v46 = vcombine.high %v12328_v48, %v12333_v49 }
 0x27b   : > { %8134 = vmatpush1.bf16.msra.mxu1 %v10299_v47  ;;  %8558 = vmatpush1.bf16.msra.mxu0 %v10302_v53  ;;  %v10371_v47 = vld [vmem:[%s11701_s17 + $0x630] ss:$8 sps:$4 sm:$0xff]  }
 0x27c   : > { %8135 = vmatprep.subr.bf16.mxu1 %v10307_v54  ;;  %8559 = vmatprep.subr.bf16.mxu0 %v10310_v55  ;;  %v10374_v53 = vld [vmem:[%s11701_s17 + $0xe30] ss:$8 sps:$4 sm:$0xff]   ;;  %v10379_v54 = vld [vmem:[%s11701_s17 + $0x644] ss:$8 sps:$4 sm:$0xff]  }
 0x27d   : > { %v10382_v55 = vld [vmem:[%s11701_s17 + $0xe44] ss:$8 sps:$4 sm:$0xff]  }
 0x27f   : > { %8136 = vmatpush1.bf16.msra.mxu1 %v10305_v56  ;;  %8560 = vmatpush1.bf16.msra.mxu0 %v10308_v57  ;;  %v10377_v56 = vld [vmem:[%s11701_s17 + $0x640] ss:$8 sps:$4 sm:$0xff]  }
 0x280   : > { %8137 = vmatprep.subr.bf16.mxu1 %v10313_v60  ;;  %8561 = vmatprep.subr.bf16.mxu0 %v10316_v61  ;;  %v10380_v57 = vld [vmem:[%s11701_s17 + $0xe40] ss:$8 sps:$4 sm:$0xff]   ;;  %v10385_v60 = vld [vmem:[%s11701_s17 + $0x654] ss:$8 sps:$4 sm:$0xff]  }
 0x281   : > { %v10388_v61 = vld [vmem:[%s11701_s17 + $0xe54] ss:$8 sps:$4 sm:$0xff]  }
 0x283   : > { %8138 = vmatpush1.bf16.msra.mxu1 %v10311_v4  ;;  %8562 = vmatpush1.bf16.msra.mxu0 %v10314_v7  ;;  %v10383_v4 = vld [vmem:[%s11701_s17 + $0x650] ss:$8 sps:$4 sm:$0xff]  }
 0x284   : > { %8139 = vmatprep.subr.bf16.mxu1 %v10319_v8  ;;  %8563 = vmatprep.subr.bf16.mxu0 %v10322_v9  ;;  %v10386_v7 = vld [vmem:[%s11701_s17 + $0xe50] ss:$8 sps:$4 sm:$0xff]   ;;  %v10391_v8 = vld [vmem:[%s11701_s17 + $0x664] ss:$8 sps:$4 sm:$0xff]  }
 0x285   : > { %v10394_v9 = vld [vmem:[%s11701_s17 + $0xe64] ss:$8 sps:$4 sm:$0xff]  }
 0x287   : > { %8140 = vmatpush1.bf16.msra.mxu1 %v10317_v10  ;;  %8564 = vmatpush1.bf16.msra.mxu0 %v10320_v58  ;;  %v10389_v10 = vld [vmem:[%s11701_s17 + $0x660] ss:$8 sps:$4 sm:$0xff]  }
 0x288   : > { %8141 = vmatprep.subr.bf16.mxu1 %v10325_v59  ;;  %8565 = vmatprep.subr.bf16.mxu0 %v10328_v62  ;;  %v10392_v58 = vld [vmem:[%s11701_s17 + $0xe60] ss:$8 sps:$4 sm:$0xff]   ;;  %v10397_v59 = vld [vmem:[%s11701_s17 + $0x674] ss:$8 sps:$4 sm:$0xff]  }
 0x289   : > { %v10400_v62 = vld [vmem:[%s11701_s17 + $0xe74] ss:$8 sps:$4 sm:$0xff]  }
 0x28b   : > { %8142 = vmatpush1.bf16.msra.mxu1 %v10323_v63  ;;  %8566 = vmatpush1.bf16.msra.mxu0 %v10326_v11  ;;  %v10395_v63 = vld [vmem:[%s11701_s17 + $0x670] ss:$8 sps:$4 sm:$0xff]  }
 0x28c   : > { %8143 = vmatprep.subr.bf16.mxu1 %v10331_v12  ;;  %8567 = vmatprep.subr.bf16.mxu0 %v10334_v13  ;;  %v10398_v11 = vld [vmem:[%s11701_s17 + $0xe70] ss:$8 sps:$4 sm:$0xff]   ;;  %v10403_v12 = vld [vmem:[%s11701_s17 + $0x684] ss:$8 sps:$4 sm:$0xff]  }
 0x28d   : > { %v10406_v13 = vld [vmem:[%s11701_s17 + $0xe84] ss:$8 sps:$4 sm:$0xff]  }
 0x28f   : > { %8144 = vmatpush1.bf16.msra.mxu1 %v10329_v14  ;;  %8568 = vmatpush1.bf16.msra.mxu0 %v10332_v15  ;;  %v10401_v14 = vld [vmem:[%s11701_s17 + $0x680] ss:$8 sps:$4 sm:$0xff]  }
 0x290   : > { %8145 = vmatprep.subr.bf16.mxu1 %v10337_v18  ;;  %8569 = vmatprep.subr.bf16.mxu0 %v10340_v19  ;;  %v10404_v15 = vld [vmem:[%s11701_s17 + $0xe80] ss:$8 sps:$4 sm:$0xff]   ;;  %v10409_v18 = vld [vmem:[%s11701_s17 + $0x694] ss:$8 sps:$4 sm:$0xff]  }
 0x291   : > { %v10412_v19 = vld [vmem:[%s11701_s17 + $0xe94] ss:$8 sps:$4 sm:$0xff]  }
 0x293   : > { %8146 = vmatpush1.bf16.msra.mxu1 %v10335_v22  ;;  %8570 = vmatpush1.bf16.msra.mxu0 %v10338_v23  ;;  %v10407_v22 = vld [vmem:[%s11701_s17 + $0x690] ss:$8 sps:$4 sm:$0xff]  }
 0x294   : > { %8147 = vmatprep.subr.bf16.mxu1 %v10343_v24  ;;  %8571 = vmatprep.subr.bf16.mxu0 %v10346_v25  ;;  %v10410_v23 = vld [vmem:[%s11701_s17 + $0xe90] ss:$8 sps:$4 sm:$0xff]   ;;  %v10415_v24 = vld [vmem:[%s11701_s17 + $0x6a4] ss:$8 sps:$4 sm:$0xff]  }
 0x295   : > { %v10418_v25 = vld [vmem:[%s11701_s17 + $0xea4] ss:$8 sps:$4 sm:$0xff]  }
 0x297   : > { %8148 = vmatpush1.bf16.msra.mxu1 %v10341_v26  ;;  %8572 = vmatpush1.bf16.msra.mxu0 %v10344_v27  ;;  %v10413_v26 = vld [vmem:[%s11701_s17 + $0x6a0] ss:$8 sps:$4 sm:$0xff]  }
 0x298   : > { %8149 = vmatprep.subr.bf16.mxu1 %v10349_v28  ;;  %8573 = vmatprep.subr.bf16.mxu0 %v10352_v29  ;;  %v10416_v27 = vld [vmem:[%s11701_s17 + $0xea0] ss:$8 sps:$4 sm:$0xff]   ;;  %v10421_v28 = vld [vmem:[%s11701_s17 + $0x6b4] ss:$8 sps:$4 sm:$0xff]  }
 0x299   : > { %v10424_v29 = vld [vmem:[%s11701_s17 + $0xeb4] ss:$8 sps:$4 sm:$0xff]  }
 0x29b   : > { %8150 = vmatpush1.bf16.msra.mxu1 %v10347_v0  ;;  %8574 = vmatpush1.bf16.msra.mxu0 %v10350_v1  ;;  %v10419_v0 = vld [vmem:[%s11701_s17 + $0x6b0] ss:$8 sps:$4 sm:$0xff]  }
 0x29c   : > { %8172 = vmatprep.subr.bf16.mxu1 %v10355_v16  ;;  %8596 = vmatprep.subr.bf16.mxu0 %v10358_v17  ;;  %v10422_v1 = vld [vmem:[%s11701_s17 + $0xeb0] ss:$8 sps:$4 sm:$0xff]   ;;  %v10427_v16 = vld [vmem:[%s11701_s17 + $0x6c4] ss:$8 sps:$4 sm:$0xff]  }
 0x29d   : > { %v10430_v17 = vld [vmem:[%s11701_s17 + $0xec4] ss:$8 sps:$4 sm:$0xff]  }
 0x29e   : > { %8152 = vmatmul.mubr.bf16.vlgmr.msra.gmra.mrb[0].mxu1 %v9051_v6  ;;  %8576 = vmatmul.mubr.bf16.vlgmr.msra.gmra.mrb[0].mxu0 %v9067_v30  ;;  %v10428_v6 = vld [vmem:[%s11701_s17 + $0xec0] ss:$8 sps:$4 sm:$0xff]   ;;  %v10433_v30 = vld [vmem:[%s11701_s17 + $0x6d4] ss:$8 sps:$4 sm:$0xff]  }
 0x29f   : > { %8173 = vmatpush1.bf16.msra.mxu1 %v10353_v20  ;;  %8597 = vmatpush1.bf16.msra.mxu0 %v10356_v21  ;;  %v10439_v20 = vld [vmem:[%s11701_s17 + $0x6e4] ss:$8 sps:$4 sm:$0xff]  }
 0x2a0   : > { %8174 = vmatprep.subr.bf16.mxu1 %v10361_v3  ;;  %8598 = vmatprep.subr.bf16.mxu0 %v10364_v2  ;;  %v10442_v21 = vld [vmem:[%s11701_s17 + $0xee4] ss:$8 sps:$4 sm:$0xff]   ;;  %v10437_v3 = vld [vmem:[%s11701_s17 + $0x6e0] ss:$8 sps:$4 sm:$0xff]  }
 0x2a1   : > { %8161 = vmatprep.mubr.bf16.mxu1 %v9084_v34  ;;  %8585 = vmatprep.mubr.bf16.mxu0 %v9100_v35  ;;  %v10440_v2 = vld [vmem:[%s11701_s17 + $0xee0] ss:$8 sps:$4 sm:$0xff]   ;;  %v10445_v34 = vld [vmem:[%s11701_s17 + $0x6f4] ss:$8 sps:$4 sm:$0xff]  }
 0x2a2   : > { %v10448_v35 = vld [vmem:[%s11701_s17 + $0xef4] ss:$8 sps:$4 sm:$0xff]  }
 0x2a3   : > { %8175 = vmatpush1.bf16.msra.mxu1 %v10359_v36  ;;  %8599 = vmatpush1.bf16.msra.mxu0 %v10362_v37  ;;  %v10443_v36 = vld [vmem:[%s11701_s17 + $0x6f0] ss:$8 sps:$4 sm:$0xff]  }
 0x2a4   : > { %8176 = vmatprep.subr.bf16.mxu1 %v10367_v38  ;;  %8600 = vmatprep.subr.bf16.mxu0 %v10370_v39  ;;  %v10446_v37 = vld [vmem:[%s11701_s17 + $0xef0] ss:$8 sps:$4 sm:$0xff]   ;;  %v10451_v38 = vld [vmem:[%s11701_s17 + $0x704] ss:$8 sps:$4 sm:$0xff]  }
 0x2a5   : > { %v10454_v39 = vld [vmem:[%s11701_s17 + $0xf04] ss:$8 sps:$4 sm:$0xff]  }
 0x2a6   : > { %8162 = vmatmul.mubr.bf16.gmra.mrb[4].mxu1 %v9083_v41  ;;  %8586 = vmatmul.mubr.bf16.gmra.mrb[4].mxu0 %v9099_v44  ;;  %v4436_v41 = vld [vmem:[%s12594_s0 + $0x130] sm:$0xff]  ;;  %v9053_v44 = vcombine.low %v12318_v40, %v12323_v45  ;;  %v10449_v40 = vld [vmem:[%s11701_s17 + $0x700] ss:$8 sps:$4 sm:$0xff]  }
 0x2a7   : > { %8177 = vmatpush1.bf16.msra.mxu1 %v10365_v50  ;;  %8601 = vmatpush1.bf16.msra.mxu0 %v10368_v51  ;;  %v9069_v50 = vcombine.low %v12328_v48, %v12333_v49  ;;  %v4452_v51 = vld [vmem:[%s12594_s0 + $0x1b0] sm:$0xff]  ;;  %v10452_v45 = vld [vmem:[%s11701_s17 + $0xf00] ss:$8 sps:$4 sm:$0xff]  }
 0x2a8   : > { %8178 = vmatprep.subr.bf16.mxu1 %v10373_v52  ;;  %8602 = vmatprep.subr.bf16.mxu0 %v10376_v42  ;;  %v4444_v52 = vld [vmem:[%s12594_s0 + $0x170] sm:$0xff] }
 0x2a9   : > { %8204 = vmatprep.mubr.bf16.mxu1 %v9054_v43  ;;  %8628 = vmatprep.mubr.bf16.mxu0 %v9070_v46  ;;  %v4460_v42 = vld [vmem:[%s12594_s0 + $0x1f0] sm:$0xff]  ;;  %v9086_v43 = vcombine.high %v4436_v41, %v4452_v51 }
 0x2aa   : > { %v10457_v48 = vld [vmem:[%s11701_s17 + $0x714] ss:$8 sps:$4 sm:$0xff]   ;;  %v9102_v46 = vcombine.high %v4444_v52, %v4460_v42 }
 0x2ab   : > { %8179 = vmatpush1.bf16.msra.mxu1 %v10371_v47  ;;  %8603 = vmatpush1.bf16.msra.mxu0 %v10374_v53  ;;  %v10460_v49 = vld [vmem:[%s11701_s17 + $0xf14] ss:$8 sps:$4 sm:$0xff]   ;;  %v10455_v47 = vld [vmem:[%s11701_s17 + $0x710] ss:$8 sps:$4 sm:$0xff]  }
 0x2ac   : > { %8180 = vmatprep.subr.bf16.mxu1 %v10379_v54  ;;  %8604 = vmatprep.subr.bf16.mxu0 %v10382_v55  ;;  %v10458_v53 = vld [vmem:[%s11701_s17 + $0xf10] ss:$8 sps:$4 sm:$0xff]   ;;  %v10463_v54 = vld [vmem:[%s11701_s17 + $0x724] ss:$8 sps:$4 sm:$0xff]  }
 0x2ad   : > { %v10466_v55 = vld [vmem:[%s11701_s17 + $0xf24] ss:$8 sps:$4 sm:$0xff]  }
 0x2af   : > { %8181 = vmatpush1.bf16.msra.mxu1 %v10377_v56  ;;  %8605 = vmatpush1.bf16.msra.mxu0 %v10380_v57  ;;  %v12422_v56 = vld [vmem:[%s12594_s0 + $0x38] sm:$0xff]  ;;  %v9085_v57 = vcombine.low %v4436_v41, %v4452_v51  ;;  %v10521_v41 = vld [vmem:[%s11701_s17 + $0x7c0] ss:$8 sps:$4 sm:$0xff]  }
 0x2b0   : > { %8182 = vmatprep.subr.bf16.mxu1 %v10385_v60  ;;  %8606 = vmatprep.subr.bf16.mxu0 %v10388_v61  ;;  %v9101_v60 = vcombine.low %v4444_v52, %v4460_v42  ;;  %v12427_v61 = vld [vmem:[%s12594_s0 + $0xb8] sm:$0xff] }
 0x2b1   : > { %v10532_v51 = vld [vmem:[%s11701_s17 + $0xfd4] ss:$8 sps:$4 sm:$0xff]   ;;  %v10527_v52 = vld [vmem:[%s11701_s17 + $0x7d0] ss:$8 sps:$4 sm:$0xff]  }
 0x2b2   : > { %v10530_v42 = vld [vmem:[%s11701_s17 + $0xfd0] ss:$8 sps:$4 sm:$0xff]  }
 0x2b3   : > { %8183 = vmatpush1.bf16.msra.mxu1 %v10383_v4  ;;  %8607 = vmatpush1.bf16.msra.mxu0 %v10386_v7  ;;  %v12432_v4 = vld [vmem:[%s12594_s0 + $0x78] sm:$0xff] }
 0x2b4   : > { %8184 = vmatprep.subr.bf16.mxu1 %v10391_v8  ;;  %8608 = vmatprep.subr.bf16.mxu0 %v10394_v9  ;;  %v12437_v7 = vld [vmem:[%s12594_s0 + $0xf8] sm:$0xff]  ;;  %v10461_v8 = vld [vmem:[%s11701_s17 + $0x720] ss:$8 sps:$4 sm:$0xff]  }
 0x2b5   : > { %v10464_v9 = vld [vmem:[%s11701_s17 + $0xf20] ss:$8 sps:$4 sm:$0xff]  }
 0x2b7   : > { %8185 = vmatpush1.bf16.msra.mxu1 %v10389_v10  ;;  %8609 = vmatpush1.bf16.msra.mxu0 %v10392_v58  ;;  %v10469_v10 = vld [vmem:[%s11701_s17 + $0x734] ss:$8 sps:$4 sm:$0xff]  }
 0x2b8   : > { %8186 = vmatprep.subr.bf16.mxu1 %v10397_v59  ;;  %8610 = vmatprep.subr.bf16.mxu0 %v10400_v62  ;;  %v10472_v58 = vld [vmem:[%s11701_s17 + $0xf34] ss:$8 sps:$4 sm:$0xff]   ;;  %v9056_v59 = vcombine.high %v12422_v56, %v12427_v61  ;;  %v9072_v62 = vcombine.high %v12432_v4, %v12437_v7 }
 0x2bb   : > { %8187 = vmatpush1.bf16.msra.mxu1 %v10395_v63  ;;  %8611 = vmatpush1.bf16.msra.mxu0 %v10398_v11  ;;  %v10467_v63 = vld [vmem:[%s11701_s17 + $0x730] ss:$8 sps:$4 sm:$0xff]  }
 0x2bc   : > { %8188 = vmatprep.subr.bf16.mxu1 %v10403_v12  ;;  %8612 = vmatprep.subr.bf16.mxu0 %v10406_v13  ;;  %v10470_v11 = vld [vmem:[%s11701_s17 + $0xf30] ss:$8 sps:$4 sm:$0xff]   ;;  %v10475_v12 = vld [vmem:[%s11701_s17 + $0x744] ss:$8 sps:$4 sm:$0xff]  }
 0x2bd   : > { %v10478_v13 = vld [vmem:[%s11701_s17 + $0xf44] ss:$8 sps:$4 sm:$0xff]  }
 0x2bf   : > { %8189 = vmatpush1.bf16.msra.mxu1 %v10401_v14  ;;  %8613 = vmatpush1.bf16.msra.mxu0 %v10404_v15  ;;  %v10473_v14 = vld [vmem:[%s11701_s17 + $0x740] ss:$8 sps:$4 sm:$0xff]  }
 0x2c0   : > { %8190 = vmatprep.subr.bf16.mxu1 %v10409_v18  ;;  %8614 = vmatprep.subr.bf16.mxu0 %v10412_v19  ;;  %v10476_v15 = vld [vmem:[%s11701_s17 + $0xf40] ss:$8 sps:$4 sm:$0xff]   ;;  %v10481_v18 = vld [vmem:[%s11701_s17 + $0x754] ss:$8 sps:$4 sm:$0xff]  }
 0x2c1   : > { %v10484_v19 = vld [vmem:[%s11701_s17 + $0xf54] ss:$8 sps:$4 sm:$0xff]  }
 0x2c3   : > { %8191 = vmatpush1.bf16.msra.mxu1 %v10407_v22  ;;  %8615 = vmatpush1.bf16.msra.mxu0 %v10410_v23  ;;  %v10479_v22 = vld [vmem:[%s11701_s17 + $0x750] ss:$8 sps:$4 sm:$0xff]  }
 0x2c4   : > { %8192 = vmatprep.subr.bf16.mxu1 %v10415_v24  ;;  %8616 = vmatprep.subr.bf16.mxu0 %v10418_v25  ;;  %v10482_v23 = vld [vmem:[%s11701_s17 + $0xf50] ss:$8 sps:$4 sm:$0xff]   ;;  %v10487_v24 = vld [vmem:[%s11701_s17 + $0x764] ss:$8 sps:$4 sm:$0xff]  }
 0x2c5   : > { %v10490_v25 = vld [vmem:[%s11701_s17 + $0xf64] ss:$8 sps:$4 sm:$0xff]  }
 0x2c7   : > { %8193 = vmatpush1.bf16.msra.mxu1 %v10413_v26  ;;  %8617 = vmatpush1.bf16.msra.mxu0 %v10416_v27  ;;  %v10485_v26 = vld [vmem:[%s11701_s17 + $0x760] ss:$8 sps:$4 sm:$0xff]  }
 0x2c8   : > { %8194 = vmatprep.subr.bf16.mxu1 %v10421_v28  ;;  %8618 = vmatprep.subr.bf16.mxu0 %v10424_v29  ;;  %v10488_v27 = vld [vmem:[%s11701_s17 + $0xf60] ss:$8 sps:$4 sm:$0xff]   ;;  %v10493_v28 = vld [vmem:[%s11701_s17 + $0x774] ss:$8 sps:$4 sm:$0xff]  }
 0x2c9   : > { %v10496_v29 = vld [vmem:[%s11701_s17 + $0xf74] ss:$8 sps:$4 sm:$0xff]  }
 0x2cb   : > { %8195 = vmatpush1.bf16.msra.mxu1 %v10419_v0  ;;  %8619 = vmatpush1.bf16.msra.mxu0 %v10422_v1  ;;  %v10491_v0 = vld [vmem:[%s11701_s17 + $0x770] ss:$8 sps:$4 sm:$0xff]  }
 0x2cc   : > { %8196 = vmatprep.subr.bf16.mxu1 %v10427_v16  ;;  %8620 = vmatprep.subr.bf16.mxu0 %v10430_v17  ;;  %v10494_v1 = vld [vmem:[%s11701_s17 + $0xf70] ss:$8 sps:$4 sm:$0xff]   ;;  %v10499_v16 = vld [vmem:[%s11701_s17 + $0x784] ss:$8 sps:$4 sm:$0xff]  }
 0x2cd   : > { %v10502_v17 = vld [vmem:[%s11701_s17 + $0xf84] ss:$8 sps:$4 sm:$0xff]  }
 0x2cf   : > { %8197 = vmatpush1.bf16.msra.mxu1 %v10425_v5  ;;  %8621 = vmatpush1.bf16.msra.mxu0 %v10428_v6  ;;  %v10497_v5 = vld [vmem:[%s11701_s17 + $0x780] ss:$8 sps:$4 sm:$0xff]  }
 0x2d0   : > { %8198 = vmatprep.subr.bf16.mxu1 %v10433_v30  ;;  %8622 = vmatprep.subr.bf16.mxu0 %v10436_v31  ;;  %v10500_v6 = vld [vmem:[%s11701_s17 + $0xf80] ss:$8 sps:$4 sm:$0xff]   ;;  %v10505_v30 = vld [vmem:[%s11701_s17 + $0x794] ss:$8 sps:$4 sm:$0xff]  }
 0x2d1   : > { %v10508_v31 = vld [vmem:[%s11701_s17 + $0xf94] ss:$8 sps:$4 sm:$0xff]  }
 0x2d3   : > { %8199 = vmatpush1.bf16.msra.mxu1 %v10431_v32  ;;  %8623 = vmatpush1.bf16.msra.mxu0 %v10434_v33  ;;  %v10503_v32 = vld [vmem:[%s11701_s17 + $0x790] ss:$8 sps:$4 sm:$0xff]  }
 0x2d4   : > { %8200 = vmatprep.subr.bf16.mxu1 %v10439_v20  ;;  %8624 = vmatprep.subr.bf16.mxu0 %v10442_v21  ;;  %v10506_v33 = vld [vmem:[%s11701_s17 + $0xf90] ss:$8 sps:$4 sm:$0xff]   ;;  %v10511_v20 = vld [vmem:[%s11701_s17 + $0x7a4] ss:$8 sps:$4 sm:$0xff]  }
 0x2d5   : > { %v10514_v21 = vld [vmem:[%s11701_s17 + $0xfa4] ss:$8 sps:$4 sm:$0xff]  }
 0x2d7   : > { %8201 = vmatpush1.bf16.msra.mxu1 %v10437_v3  ;;  %8625 = vmatpush1.bf16.msra.mxu0 %v10440_v2  ;;  %v10509_v3 = vld [vmem:[%s11701_s17 + $0x7a0] ss:$8 sps:$4 sm:$0xff]  }
 0x2d8   : > { %8202 = vmatprep.subr.bf16.mxu1 %v10445_v34  ;;  %8626 = vmatprep.subr.bf16.mxu0 %v10448_v35  ;;  %v10512_v2 = vld [vmem:[%s11701_s17 + $0xfa0] ss:$8 sps:$4 sm:$0xff]   ;;  %v10517_v34 = vld [vmem:[%s11701_s17 + $0x7b4] ss:$8 sps:$4 sm:$0xff]  }
 0x2d9   : > { %v10520_v35 = vld [vmem:[%s11701_s17 + $0xfb4] ss:$8 sps:$4 sm:$0xff]  }
 0x2db   : > { %8203 = vmatpush1.bf16.msra.mxu1 %v10443_v36  ;;  %8627 = vmatpush1.bf16.msra.mxu0 %v10446_v37  ;;  %v10515_v36 = vld [vmem:[%s11701_s17 + $0x7b0] ss:$8 sps:$4 sm:$0xff]  }
 0x2dc   : > { %8225 = vmatprep.subr.bf16.mxu1 %v10451_v38  ;;  %8649 = vmatprep.subr.bf16.mxu0 %v10454_v39  ;;  %v10518_v37 = vld [vmem:[%s11701_s17 + $0xfb0] ss:$8 sps:$4 sm:$0xff]   ;;  %v10523_v38 = vld [vmem:[%s11701_s17 + $0x7c4] ss:$8 sps:$4 sm:$0xff]  }
 0x2dd   : > { %v10526_v39 = vld [vmem:[%s11701_s17 + $0xfc4] ss:$8 sps:$4 sm:$0xff]  }
 0x2de   : > { %8205 = vmatmul.mubr.bf16.vlgmr.msra.gmra.mrb[0].mxu1 %v9053_v44  ;;  %8629 = vmatmul.mubr.bf16.vlgmr.msra.gmra.mrb[0].mxu0 %v9069_v50  ;;  %v10524_v44 = vld [vmem:[%s11701_s17 + $0xfc0] ss:$8 sps:$4 sm:$0xff]   ;;  %v10529_v50 = vld [vmem:[%s11701_s17 + $0x7d4] ss:$8 sps:$4 sm:$0xff]  }
 0x2df   : > { %8226 = vmatpush1.bf16.msra.mxu1 %v10449_v40  ;;  %8650 = vmatpush1.bf16.msra.mxu0 %v10452_v45  ;;  %v10535_v40 = vld [vmem:[%s11701_s17 + $0x7e4] ss:$8 sps:$4 sm:$0xff]  }
 0x2e0   : > { %8227 = vmatprep.subr.bf16.mxu1 %v10457_v48  ;;  %8651 = vmatprep.subr.bf16.mxu0 %v10460_v49  ;;  %v10538_v45 = vld [vmem:[%s11701_s17 + $0xfe4] ss:$8 sps:$4 sm:$0xff]   ;;  %v10533_v48 = vld [vmem:[%s11701_s17 + $0x7e0] ss:$8 sps:$4 sm:$0xff]  }
 0x2e1   : > { %8214 = vmatprep.mubr.bf16.mxu1 %v9086_v43  ;;  %8638 = vmatprep.mubr.bf16.mxu0 %v9102_v46  ;;  %v10536_v49 = vld [vmem:[%s11701_s17 + $0xfe0] ss:$8 sps:$4 sm:$0xff]   ;;  %v10541_v43 = vld [vmem:[%s11701_s17 + $0x7f4] ss:$8 sps:$4 sm:$0xff]  }
 0x2e2   : > { %v10544_v46 = vld [vmem:[%s11701_s17 + $0xff4] ss:$8 sps:$4 sm:$0xff]  }
 0x2e3   : > { %8228 = vmatpush1.bf16.msra.mxu1 %v10455_v47  ;;  %8652 = vmatpush1.bf16.msra.mxu0 %v10458_v53  ;;  %v10539_v47 = vld [vmem:[%s11701_s17 + $0x7f0] ss:$8 sps:$4 sm:$0xff]  }
 0x2e4   : > { %8229 = vmatprep.subr.bf16.mxu1 %v10463_v54  ;;  %8653 = vmatprep.subr.bf16.mxu0 %v10466_v55  ;;  %v10542_v53 = vld [vmem:[%s11701_s17 + $0xff0] ss:$8 sps:$4 sm:$0xff]   ;;  %s9039_s17 = sshll.u32 %s10615_s18, 1 }
 0x2e5   : > { %v4437_v54 = vld [vmem:[%s12594_s0 + $0x138] sm:$0xff]  ;;  %p4388_p10 = scmp.lt.s32.totalorder %s9039_s17, 3 }
 0x2e6   : > { %8215 = vmatmul.mubr.bf16.gmra.mrb[4].mxu1 %v9085_v57  ;;  %8639 = vmatmul.mubr.bf16.gmra.mrb[4].mxu0 %v9101_v60  ;;  %v4453_v55 = vld [vmem:[%s12594_s0 + $0x1b8] sm:$0xff] }
 0x2e7   : > { %8230 = vmatpush1.bf16.msra.mxu1 %v10461_v8  ;;  %8654 = vmatpush1.bf16.msra.mxu0 %v10464_v9  ;;  %v4445_v57 = vld [vmem:[%s12594_s0 + $0x178] sm:$0xff]  ;;  %v9055_v8 = vcombine.low %v12422_v56, %v12427_v61  ;;  %v9071_v9 = vcombine.low %v12432_v4, %v12437_v7  ;;  %s12604_s17 = smov (!%p4388_p10, %s9039_s17), 3 }
 0x2e8   : > { %8231 = vmatprep.subr.bf16.mxu1 %v10469_v10  ;;  %8655 = vmatprep.subr.bf16.mxu0 %v10472_v58  ;;  %v4461_v60 = vld [vmem:[%s12594_s0 + $0x1f8] sm:$0xff]  ;;  %v9088_v10 = vcombine.high %v4437_v54, %v4453_v55  ;;  %s4390_s11 = scalar_lea.vmem %s12596_s2, %s12604_s17  ;;  %s4395_s14 = scalar_lea.vmem %s12597_s3, %s12604_s17 }
 0x2e9   : > { %8257 = vmatprep.mubr.bf16.mxu1 %v9056_v59  ;;  %8681 = vmatprep.mubr.bf16.mxu0 %v9072_v62  ;;  %v9104_v58 = vcombine.high %v4445_v57, %v4461_v60  ;;  %v9087_v59 = vcombine.low %v4437_v54, %v4453_v55  ;;  %v9103_v62 = vcombine.low %v4445_v57, %v4461_v60 }
 0x2eb   : > { %8232 = vmatpush1.bf16.msra.mxu1 %v10467_v63  ;;  %8656 = vmatpush1.bf16.msra.mxu0 %v10470_v11 }
 0x2ec   : > { %8233 = vmatprep.subr.bf16.mxu1 %v10475_v12  ;;  %8657 = vmatprep.subr.bf16.mxu0 %v10478_v13 }
 0x2ef   : > { %8234 = vmatpush1.bf16.msra.mxu1 %v10473_v14  ;;  %8658 = vmatpush1.bf16.msra.mxu0 %v10476_v15 }
 0x2f0   : > { %8235 = vmatprep.subr.bf16.mxu1 %v10481_v18  ;;  %8659 = vmatprep.subr.bf16.mxu0 %v10484_v19 }
 0x2f3   : > { %8236 = vmatpush1.bf16.msra.mxu1 %v10479_v22  ;;  %8660 = vmatpush1.bf16.msra.mxu0 %v10482_v23 }
 0x2f4   : > { %8237 = vmatprep.subr.bf16.mxu1 %v10487_v24  ;;  %8661 = vmatprep.subr.bf16.mxu0 %v10490_v25 }
 0x2f7   : > { %8238 = vmatpush1.bf16.msra.mxu1 %v10485_v26  ;;  %8662 = vmatpush1.bf16.msra.mxu0 %v10488_v27 }
 0x2f8   : > { %8239 = vmatprep.subr.bf16.mxu1 %v10493_v28  ;;  %8663 = vmatprep.subr.bf16.mxu0 %v10496_v29 }
 0x2fb   : > { %8240 = vmatpush1.bf16.msra.mxu1 %v10491_v0  ;;  %8664 = vmatpush1.bf16.msra.mxu0 %v10494_v1 }
 0x2fc   : > { %8241 = vmatprep.subr.bf16.mxu1 %v10499_v16  ;;  %8665 = vmatprep.subr.bf16.mxu0 %v10502_v17 }
 0x2ff   : > { %8242 = vmatpush1.bf16.msra.mxu1 %v10497_v5  ;;  %8666 = vmatpush1.bf16.msra.mxu0 %v10500_v6 }
 0x300   : > { %8243 = vmatprep.subr.bf16.mxu1 %v10505_v30  ;;  %8667 = vmatprep.subr.bf16.mxu0 %v10508_v31 }
 0x303   : > { %8244 = vmatpush1.bf16.msra.mxu1 %v10503_v32  ;;  %8668 = vmatpush1.bf16.msra.mxu0 %v10506_v33 }
 0x304   : > { %8245 = vmatprep.subr.bf16.mxu1 %v10511_v20  ;;  %8669 = vmatprep.subr.bf16.mxu0 %v10514_v21 }
 0x307   : > { %8246 = vmatpush1.bf16.msra.mxu1 %v10509_v3  ;;  %8670 = vmatpush1.bf16.msra.mxu0 %v10512_v2 }
 0x308   : > { %8247 = vmatprep.subr.bf16.mxu1 %v10517_v34  ;;  %8671 = vmatprep.subr.bf16.mxu0 %v10520_v35 }
 0x30b   : > { %8248 = vmatpush1.bf16.msra.mxu1 %v10515_v36  ;;  %8672 = vmatpush1.bf16.msra.mxu0 %v10518_v37 }
 0x30c   : > { %8249 = vmatprep.subr.bf16.mxu1 %v10523_v38  ;;  %8673 = vmatprep.subr.bf16.mxu0 %v10526_v39 }
 0x30f   : > { %8250 = vmatpush1.bf16.msra.mxu1 %v10521_v41  ;;  %8674 = vmatpush1.bf16.msra.mxu0 %v10524_v44 }
 0x310   : > { %8251 = vmatprep.subr.bf16.mxu1 %v10529_v50  ;;  %8675 = vmatprep.subr.bf16.mxu0 %v10532_v51 }
 0x313   : > { %8252 = vmatpush1.bf16.msra.mxu1 %v10527_v52  ;;  %8676 = vmatpush1.bf16.msra.mxu0 %v10530_v42 }
 0x314   : > { %8253 = vmatprep.subr.bf16.mxu1 %v10535_v40  ;;  %8677 = vmatprep.subr.bf16.mxu0 %v10538_v45 }
 0x317   : > { %8254 = vmatpush1.bf16.msra.mxu1 %v10533_v48  ;;  %8678 = vmatpush1.bf16.msra.mxu0 %v10536_v49 }
 0x318   : > { %8255 = vmatprep.subr.bf16.mxu1 %v10541_v43  ;;  %8679 = vmatprep.subr.bf16.mxu0 %v10544_v46 }
 0x31b   : > { %8256 = vmatpush1.bf16.msra.mxu1 %v10539_v47  ;;  %8680 = vmatpush1.bf16.msra.mxu0 %v10542_v53 }
 0x31e   : > { %8258 = vmatmul.mubr.bf16.vlgmr.msra.gmra.mrb[0].mxu1 %v9055_v8  ;;  %8682 = vmatmul.mubr.bf16.vlgmr.msra.gmra.mrb[0].mxu0 %v9071_v9 }
 0x31f   : > { %8267 = vmatprep.mubr.bf16.mxu1 %v9088_v10  ;;  %8691 = vmatprep.mubr.bf16.mxu0 %v9104_v58 }
 0x326   : > { %8268 = vmatmul.mubr.bf16.gmra.mrb[4].mxu1 %v9087_v59  ;;  %8692 = vmatmul.mubr.bf16.gmra.mrb[4].mxu0 %v9103_v62 }
 0x3f1   : > { %v8259_v63 = vpop.f32.mrb[0].mxu1  ;;  %v8683_v11 = vpop.f32.mrb[0].mxu0 }
 0x3f2   : > { %v12513_v12 = vadd.f32 %v8683_v11, %v8259_v63  ;;  %v8261_v56 = vpop.f32.mrb[1].mxu1  ;;  %v8685_v61 = vpop.f32.mrb[1].mxu0 }
 0x3f3   : > { %v12515_v13 = vadd.f32 %v8685_v61, %v8261_v56  ;;  %v8263_v4 = vpop.f32.mrb[2].mxu1  ;;  %v8687_v7 = vpop.f32.mrb[2].mxu0 }
 0x3f4   : > { %v12517_v14 = vadd.f32 %v8687_v7, %v8263_v4  ;;  %v8265_v15 = vpop.f32.mrb[3].mxu1  ;;  %v8689_v18 = vpop.f32.mrb[3].mxu0  ;;  %v8722_v22 = vmul.f32 %v12513_v12, %v12513_v12 }
 0x3f5   : > { %v12519_v19 = vadd.f32 %v8689_v18, %v8265_v15  ;;  %v8723_v25 = vmul.f32 %v12515_v13, %v12515_v13 }
 0x3f6   : > { %v8702_v23 = vadd.f32 %v12517_v14, %v12513_v12  ;;  %v8724_v24 = vmul.f32 %v12517_v14, %v12517_v14 }
 0x3f7   : > { %v8711_v26 = vadd.f32 %v12519_v19, %v12515_v13  ;;  %v8725_v27 = vmul.f32 %v12519_v19, %v12519_v19 }
 0x3f8   : > { %v8730_v28 = vadd.f32 %v8724_v24, %v8722_v22 }
 0x3f9   : > { %v8739_v29 = vadd.f32 %v8725_v27, %v8723_v25  ;;  %v8269_v0 = vpop.f32.mrb[4].mxu1  ;;  %v8693_v1 = vpop.f32.mrb[4].mxu0 }
 0x3fa   : > { %v12533_v16 = vadd.f32 %v8693_v1, %v8269_v0  ;;  %v8271_v17 = vpop.f32.mrb[5].mxu1  ;;  %v8695_v5 = vpop.f32.mrb[5].mxu0  ;;  %v10573_v0 = vmov 1966171168  }
 0x3fb   : > { %v12535_v6 = vadd.f32 %v8695_v5, %v8271_v17  ;;  %v8273_v30 = vpop.f32.mrb[6].mxu1  ;;  %v8697_v31 = vpop.f32.mrb[6].mxu0  ;;  %v8765_v1 = vunpack.c.l.s4 %v10573_v0  ;;  %v8767_v17 = vlaneseq }
 0x3fc   : > { %v8703_v32 = vadd.f32 %v12533_v16, %v8702_v23  ;;  %v8726_v33 = vmul.f32 %v12533_v16, %v12533_v16  ;;  %v12540_v20 = vadd.f32 %v8697_v31, %v8273_v30  ;;  %v8275_v21 = vpop.f32.mrb[7].mxu1  ;;  %v8699_v3 = vpop.f32.mrb[7].mxu0 }
 0x3fd   : > { %v8712_v2 = vadd.f32 %v12535_v6, %v8711_v26  ;;  %v8727_v34 = vmul.f32 %v12535_v6, %v12535_v6  ;;  %v12545_v35 = vadd.f32 %v8699_v3, %v8275_v21  ;;  %v8766_v5 = vunpack.c.0.s8 %v8765_v1 }
 0x3fe   : > { %v8731_v36 = vadd.f32 %v8730_v28, %v8726_v33  ;;  %v8704_v37 = vadd.f32 %v12540_v20, %v8703_v32  ;;  %v8728_v38 = vmul.f32 %v12540_v20, %v12540_v20  ;;  %v8768_v30 = vshrl.u32 %v8767_v17, 7 }
 0x3ff   : > { %v8740_v39 = vadd.f32 %v8739_v29, %v8727_v34  ;;  %v8713_v41 = vadd.f32 %v12545_v35, %v8712_v2  ;;  %v8729_v44 = vmul.f32 %v12545_v35, %v12545_v35  ;;  %v8756_v2 = vld [vmem:[%s4390_s11] sm:$0x3] }
 0x400   : > { %v8705_v50 = vrot.slane %v8704_v37, 4  ;;  %v8732_v51 = vadd.f32 %v8731_v36, %v8728_v38  ;;  %v8769_v32 = vsub.s32 %v8766_v5, %v8768_v30  ;;  %v8784_v36 = vsub.s32 0, %v8768_v30 }
 0x401   : > { %v8714_v52 = vrot.slane %v8713_v41, 4  ;;  %v8741_v42 = vadd.f32 %v8740_v39, %v8729_v44 }
 0x402   : > { %v8706_v40 = vadd.f32 %v8705_v50, %v8704_v37  ;;  %v8733_v45 = vrot.slane %v8732_v51, 4  ;;  %v8788_v37 = vsub.s32 1, %v8768_v30 }
 0x403   : > { %v8715_v48 = vadd.f32 %v8714_v52, %v8713_v41  ;;  %v8742_v49 = vrot.slane %v8741_v42, 4 }
 0x404   : > { %v8707_v43 = vrot.slane %v8706_v40, 2  ;;  %v8734_v46 = vadd.f32 %v8733_v45, %v8732_v51 }
 0x405   : > { %v8716_v47 = vrot.slane %v8715_v48, 2  ;;  %v8743_v53 = vadd.f32 %v8742_v49, %v8741_v42 }
 0x406   : > { %v8708_v54 = vadd.f32 %v8707_v43, %v8706_v40  ;;  %v8735_v55 = vrot.slane %v8734_v46, 2 }
 0x407   : > { %v8717_v57 = vadd.f32 %v8716_v47, %v8715_v48  ;;  %v8744_v60 = vrot.slane %v8743_v53, 2  ;;  %v8780_v47 = vld [vmem:[%s4395_s14] sm:$0x3] }
 0x408   : > { %v8709_v8 = vrot.slane %v8708_v54, 1  ;;  %v8736_v9 = vadd.f32 %v8735_v55, %v8734_v46 }
 0x409   : > { %v8718_v10 = vrot.slane %v8717_v57, 1  ;;  %v8745_v58 = vadd.f32 %v8744_v60, %v8743_v53 }
 0x40a   : > { %v8710_v59 = vadd.f32 %v8709_v8, %v8708_v54  ;;  %v8737_v62 = vrot.slane %v8736_v9, 1 }
 0x40b   : > { %v8719_v63 = vadd.f32 %v8718_v10, %v8717_v57  ;;  %v8746_v11 = vrot.slane %v8745_v58, 1 }
 0x40c   : > { %v8720_v56 = vmul.f32 0.03125, %v8710_v59  ;;  %v8738_v61 = vadd.f32 %v8737_v62, %v8736_v9 }
 0x40d   : > { %v8721_v4 = vmul.f32 0.03125, %v8719_v63  ;;  %v8747_v7 = vadd.f32 %v8746_v11, %v8745_v58 }
 0x40e   : > { %v8748_v15 = vmul.f32 0.03125, %v8738_v61  ;;  %v8750_v18 = vmul.f32 %v8720_v56, %v8720_v56 }
 0x40f   : > { %v8749_v22 = vmul.f32 0.03125, %v8747_v7  ;;  %v8751_v23 = vmul.f32 %v8721_v4, %v8721_v4 }
 0x410   : > { %v8752_v24 = vsub.f32 %v8748_v15, %v8750_v18 }
 0x411   : > { %v8753_v25 = vsub.f32 %v8749_v22, %v8751_v23 }
 0x412   : > { %v8754_v26 = vmax.f32 %v8752_v24, 0.0 }
 0x413   : > { %v8755_v27 = vmax.f32 %v8753_v25, 0.0 }
 0x414   : > { %v8757_v28 = vadd.f32 1e-05, %v8754_v26 }
 0x415   : > { %v8758_v29 = vadd.f32 1e-05, %v8755_v27 }
 0x416   : > { %10545 = vrsqrt.f32 %v8757_v28 }
 0x417   : > { %10547 = vrsqrt.f32 %v8758_v29 }
 0x420   : > { %v10546_v31 = vpop.eup %10545 }
 0x421   : > { %v10548_v33 = vpop.eup %10547 }
 0x422   : > { %v8763_v21 = vcombine.low %v10546_v31, %v10548_v33 }
 0x424   : > { %v8770_v3 = vrot.slane %v8763_v21, %v8769_v32 }
 0x426   : > { %v8777_v34 = vrot.slane %v8770_v3, %v8769_v32 }
 0x428   : > { %v8779_v38 = vmul.f32 %v8777_v34, %v8756_v2 }
 0x42a   : > { %v8785_v39 = vrot.slane %v8779_v38, %v8784_v36  ;;  %v8789_v41 = vrot.slane %v8779_v38, %v8788_v37 }
 0x42c   : > { %v8792_v44 = vmul.f32 %v8785_v39, %v8720_v56  ;;  %v8793_v50 = vmul.f32 %v8789_v41, %v8721_v4  ;;  %v8813_v51 = vmul.f32 %v12513_v12, %v8785_v39  ;;  %v8814_v52 = vmul.f32 %v12515_v13, %v8789_v41 }
 0x42d   : > { %v8815_v42 = vmul.f32 %v12517_v14, %v8785_v39  ;;  %v8816_v40 = vmul.f32 %v12519_v19, %v8789_v41  ;;  %v8817_v45 = vmul.f32 %v12533_v16, %v8785_v39  ;;  %v8818_v48 = vmul.f32 %v12535_v6, %v8789_v41 }
 0x42e   : > { %v8796_v49 = vcombine.low %v8792_v44, %v8793_v50  ;;  %v8819_v43 = vmul.f32 %v12540_v20, %v8785_v39  ;;  %v8820_v46 = vmul.f32 %v12545_v35, %v8789_v41 }
 0x430   : > { %v8803_v12 = vrot.slane %v8796_v49, %v8769_v32 }
 0x432   : > { %v8810_v13 = vrot.slane %v8803_v12, %v8769_v32 }
 0x434   : > { %v8812_v14 = vsub.f32 %v8780_v47, %v8810_v13 }
 0x436   : > { %v8825_v53 = vrot.slane %v8812_v14, %v8784_v36  ;;  %v8829_v19 = vrot.slane %v8812_v14, %v8788_v37 }
 0x438   : > { %v8832_v54 = vadd.f32 %v8825_v53, %v8813_v51  ;;  %v8833_v16 = vadd.f32 %v8829_v19, %v8814_v52  ;;  %v8834_v55 = vadd.f32 %v8825_v53, %v8815_v42  ;;  %v8835_v6 = vadd.f32 %v8829_v19, %v8816_v40 }
 0x439   : > { %v8836_v57 = vadd.f32 %v8825_v53, %v8817_v45  ;;  %v8837_v60 = vadd.f32 %v8829_v19, %v8818_v48  ;;  %v8838_v8 = vadd.f32 %v8825_v53, %v8819_v43  ;;  %v8839_v9 = vadd.f32 %v8829_v19, %v8820_v46 }
 0x43a   : > { %vm8840_vm0 = vcmp.ge.f32.partialorder %v8832_v54, 0.0  ;;  %vm8841_vm1 = vcmp.ge.f32.partialorder %v8833_v16, 0.0  ;;  %vm8842_vm2 = vcmp.ge.f32.partialorder %v8834_v55, 0.0  ;;  %vm8843_vm3 = vcmp.ge.f32.partialorder %v8835_v6, 0.0 }
 0x43b   : > { %vm8844_vm4 = vcmp.ge.f32.partialorder %v8836_v57, 0.0  ;;  %vm8845_vm5 = vcmp.ge.f32.partialorder %v8837_v60, 0.0  ;;  %vm8846_vm6 = vcmp.ge.f32.partialorder %v8838_v8, 0.0  ;;  %vm8847_vm7 = vcmp.ge.f32.partialorder %v8839_v9, 0.0 }
 0x43c   : > { %v8848_v20 = vmul.f32 0.2, %v8832_v54  ;;  %v8849_v35 = vmul.f32 0.2, %v8833_v16  ;;  %v8850_v10 = vmul.f32 0.2, %v8834_v55 }
 0x43d   : > { %v8851_v58 = vmul.f32 0.2, %v8835_v6  ;;  %v8852_v59 = vmul.f32 0.2, %v8836_v57  ;;  %v8853_v62 = vmul.f32 0.2, %v8837_v60 }
 0x43e   : > { %v8854_v63 = vmul.f32 0.2, %v8838_v8  ;;  %v8855_v11 = vmul.f32 0.2, %v8839_v9  ;;  %v8856_v56 = vsel %vm8840_vm0, %v8832_v54, %v8848_v20  ;;  %v8857_v61 = vsel %vm8841_vm1, %v8833_v16, %v8849_v35  ;;  %8898 = sbr.rel (!%p10630_p5) target bundleno = 1100 (0x44c), region = 92 }
 0x43f   : > { %v8858_v4 = vsel %vm8842_vm2, %v8834_v55, %v8850_v10  ;;  %v8859_v7 = vsel %vm8843_vm3, %v8835_v6, %v8851_v58  ;;  %v8860_v15 = vsel %vm8844_vm4, %v8836_v57, %v8852_v59  ;;  %v8861_v18 = vsel %vm8845_vm5, %v8837_v60, %v8853_v62 }
 0x440   : > { %v8862_v22 = vsel %vm8846_vm6, %v8838_v8, %v8854_v63  ;;  %v8863_v23 = vsel %vm8847_vm7, %v8839_v9, %v8855_v11  ;;  %v9627_v24 = vpack.c.bf16 %v8857_v61, %v8856_v56  ;;  %v9628_v25 = vpack.c.bf16 %v8859_v7, %v8858_v4 }
 0x441   : > { %v9629_v26 = vpack.c.bf16 %v8861_v18, %v8860_v15  ;;  %v9630_v27 = vpack.c.bf16 %v8863_v23, %v8862_v22 }
 0x442   : > { %8888 = vst [vmem:[%s4385_s15] sm:$0xff] %v9627_v24  ;;  %8889 = vst [vmem:[%s4385_s15 + $0x8] sm:$0xff] %v9628_v25 }
 0x443   : > { %8890 = vst [vmem:[%s4385_s15 + $0x10] sm:$0xff] %v9629_v26  ;;  %8891 = vst [vmem:[%s4385_s15 + $0x18] sm:$0xff] %v9630_v27 }
 0x449   : > { %v8935_v28 = vld [vmem:[%s4385_s15] sm:$0xff]  ;;  %v8937_v29 = vld [vmem:[%s4385_s15 + $0x8] sm:$0xff] }
 0x44a   : > { %v8939_v0 = vld [vmem:[%s4385_s15 + $0x10] sm:$0xff]  ;;  %v8941_v1 = vld [vmem:[%s4385_s15 + $0x18] sm:$0xff]  ;;  %8936 = vst [vmem:[%s8901_s25] sm:$0xff] %v8935_v28  ;;  %8938 = vst [vmem:[%s8901_s25 + $0x10] sm:$0xff] %v8937_v29 }
 0x44b   : > { %8940 = vst [vmem:[%s8901_s25 + $0x20] sm:$0xff] %v8939_v0  ;;  %8942 = vst [vmem:[%s8901_s25 + $0x30] sm:$0xff] %v8941_v1 }
 0x44c PF: > { %p11_p11 = scmp.ge.s32.totalorder %s10618_s19, 4   ;;  %s12600_s15 = smov %s10567_s16 }
 0x44d   : > { %s12601_s16 = smov %s10628_s22  ;;  %s12602_s17 = smov %s10618_s19 }
 0x44e   :  { %13 = sbr.rel (!%p11_p11) target bundleno = 2 (0x2), region = 173 }

</bundles_post_ra>
